<compile_context>
chip_gen: v6e
topology: v6e:2x2x1
jax: 0.10.0
libtpu: 0.0.40
codegen_flags: <defaults>
</compile_context>

<pallas_src>
import functools

import jax
import jax.numpy as jnp
from jax.experimental import pallas as pl
from jax.experimental.pallas import tpu as pltpu

EPS = 1e-5                        # nn.BatchNorm2d default eps
CONV_DTYPE = jnp.bfloat16         # MXU operand dtype (f32 accumulation)
ACT_DTYPE = jnp.bfloat16          # inter-pass activation storage dtype
                                  # (set both to jnp.float32 for closer-to-f32)
_VMEM_LIMIT = 48 * 1024 * 1024    # safe on v7x's 64 MiB physical VMEM
_TILE_BUDGET = 24 * 1024 * 1024   # per-grid-step working-set target


# --------------------------------------------------------------------------
# kernels
# --------------------------------------------------------------------------
def _conv3x3_stats_kernel(*refs, fuse_bn_relu):
    """One batch tile of: [bn+relu] -> 3x3 'same' conv -> BN partial stats.

    refs (fuse_bn_relu=True):  x, scale, shift, w, y_out, stats_out, pad_scratch
    refs (fuse_bn_relu=False): x, w, y_out, stats_out, pad_scratch

    x:       (TB, H, W, Cin)       input tile (f32 in pass 1, bf16 in pass 2)
    scale/shift: (1, Cin)          BN affine applied BEFORE the conv (pass 2)
    w:       (3, 3*Cin, Cout)      conv weights, kh-major chunks (CONV_DTYPE)
    y_out:   (TB, H, W, Cout)      conv output, stored as ACT_DTYPE
    stats:   (1, 2, Cout)          this tile's [sum, sum_of_squares] (f32)
    pad:     VMEM scratch (TB, H+2, W+2, Cin) in CONV_DTYPE
    """
    if fuse_bn_relu:
        x_ref, scale_ref, shift_ref, w_ref, y_ref, stats_ref, pad_ref = refs
    else:
        x_ref, w_ref, y_ref, stats_ref, pad_ref = refs

    TB, H, W, Cin = x_ref.shape
    Cout = w_ref.shape[-1]

    # Zero only the 1-pixel halo; the interior is fully overwritten every step.
    # Unconditional per step (each TensorCore owns a private scratch and a
    # disjoint slice of the grid under "parallel" semantics).
    zrow = jnp.zeros((TB, 1, W + 2, Cin), pad_ref.dtype)
    pad_ref[:, 0:1, :, :] = zrow
    pad_ref[:, H + 1:H + 2, :, :] = zrow
    zcol = jnp.zeros((TB, H, 1, Cin), pad_ref.dtype)
    pad_ref[:, 1:H + 1, 0:1, :] = zcol
    pad_ref[:, 1:H + 1, W + 1:W + 2, :] = zcol

    # Interior: optional fused per-channel affine + ReLU (f32 VPU math), then a
    # single cast to the bf16 conv operand dtype.
    if fuse_bn_relu:
        xin = (x_ref[...].astype(jnp.float32)
               * scale_ref[...].reshape(1, 1, 1, Cin)
               + shift_ref[...].reshape(1, 1, 1, Cin))
        xin = jnp.maximum(xin, 0.0)
        pad_ref[:, 1:H + 1, 1:W + 1, :] = xin.astype(pad_ref.dtype)
    else:
        pad_ref[:, 1:H + 1, 1:W + 1, :] = x_ref[...].astype(pad_ref.dtype)

    # Conv as 3 accumulating MXU matmuls (K = 3*Cin per kh-chunk) instead of a
    # single 9x-expanded im2col buffer; f32 accumulation throughout.
    acc = jnp.zeros((TB * H * W, Cout), jnp.float32)
    for kh in range(3):
        taps = [pad_ref[:, kh:kh + H, kw:kw + W, :] for kw in range(3)]
        patches = jnp.concatenate(taps, axis=-1).reshape(TB * H * W, 3 * Cin)
        acc = acc + jnp.dot(patches, w_ref[kh],
                            preferred_element_type=jnp.float32)

    y_ref[...] = acc.reshape(TB, H, W, Cout).astype(y_ref.dtype)

    # Single-pass partial statistics for the BatchNorm that follows this conv,
    # taken from the f32 accumulator (not the bf16-stored activation).
    s = jnp.sum(acc, axis=0, keepdims=True)            # (1, Cout)
    ss = jnp.sum(acc * acc, axis=0, keepdims=True)     # (1, Cout)
    stats_ref[...] = jnp.concatenate([s, ss], axis=0).reshape(1, 2, Cout)


def _bn_add_relu_kernel(y_ref, scale_ref, shift_ref, id_ref, out_ref):
    """out = relu(bn2(y) + identity) for one batch tile (f32 VPU math)."""
    C = y_ref.shape[-1]
    y = (y_ref[...].astype(jnp.float32) * scale_ref[...].reshape(1, 1, 1, C)
         + shift_ref[...].reshape(1, 1, 1, C))
    out_ref[...] = jnp.maximum(y + id_ref[...], 0.0)


# --------------------------------------------------------------------------
# pallas_call wrappers
# --------------------------------------------------------------------------
def _conv3x3_with_stats(x, w3d, *, scale=None, shift=None, batch_tile):
    N, H, W, Cin = x.shape
    Cout = w3d.shape[-1]
    nt = N // batch_tile
    fuse = scale is not None

    flops = 2 * N * H * W * 9 * Cin * Cout + (3 * N * H * W * Cin if fuse else 0)
    bytes_accessed = (x.size * x.dtype.itemsize
                      + int(w3d.size) * w3d.dtype.itemsize
                      + N * H * W * Cout * jnp.dtype(ACT_DTYPE).itemsize
                      + nt * 2 * Cout * 4
                      + (2 * Cin * 4 if fuse else 0))

    in_specs = [pl.BlockSpec((batch_tile, H, W, Cin), lambda i: (i, 0, 0, 0))]
    args = [x]
    if fuse:
        in_specs += [pl.BlockSpec((1, Cin), lambda i: (0, 0)),
                     pl.BlockSpec((1, Cin), lambda i: (0, 0))]
        args += [scale, shift]
    in_specs += [pl.BlockSpec((3, 3 * Cin, Cout), lambda i: (0, 0, 0))]
    args += [w3d]

    kernel = functools.partial(_conv3x3_stats_kernel, fuse_bn_relu=fuse)
    y, stats = pl.pallas_call(
        kernel,
        out_shape=(jax.ShapeDtypeStruct((N, H, W, Cout), ACT_DTYPE),
                   jax.ShapeDtypeStruct((nt, 2, Cout), jnp.float32)),
        grid=(nt,),
        in_specs=in_specs,
        out_specs=(
            pl.BlockSpec((batch_tile, H, W, Cout), lambda i: (i, 0, 0, 0)),
            pl.BlockSpec((1, 2, Cout), lambda i: (i, 0, 0)),
        ),
        scratch_shapes=[
            pltpu.VMEM((batch_tile, H + 2, W + 2, Cin), CONV_DTYPE),
        ],
        compiler_params=pltpu.CompilerParams(
            dimension_semantics=("parallel",),
            vmem_limit_bytes=_VMEM_LIMIT),
        cost_estimate=pl.CostEstimate(flops=flops, transcendentals=0,
                                      bytes_accessed=bytes_accessed),
    )(*args)
    return y, stats


def _bn_add_relu(y, scale, shift, identity, *, batch_tile):
    N, H, W, C = y.shape
    nt = N // batch_tile
    return pl.pallas_call(
        _bn_add_relu_kernel,
        out_shape=jax.ShapeDtypeStruct((N, H, W, C), jnp.float32),
        grid=(nt,),
        in_specs=[
            pl.BlockSpec((batch_tile, H, W, C), lambda i: (i, 0, 0, 0)),
            pl.BlockSpec((1, C), lambda i: (0, 0)),
            pl.BlockSpec((1, C), lambda i: (0, 0)),
            pl.BlockSpec((batch_tile, H, W, C), lambda i: (i, 0, 0, 0)),
        ],
        out_specs=pl.BlockSpec((batch_tile, H, W, C), lambda i: (i, 0, 0, 0)),
        # Output reuses the f32 identity buffer (same shape/dtype): no third
        # full-size activation allocation in HBM.
        input_output_aliases={3: 0},
        compiler_params=pltpu.CompilerParams(
            dimension_semantics=("parallel",),
            vmem_limit_bytes=_VMEM_LIMIT),
        cost_estimate=pl.CostEstimate(
            flops=4 * N * H * W * C, transcendentals=0,
            bytes_accessed=N * H * W * C * (jnp.dtype(ACT_DTYPE).itemsize + 8)),
    )(y, scale, shift, identity)


# --------------------------------------------------------------------------
# host-side helpers
# --------------------------------------------------------------------------
def _fold_bn(partial_stats, gamma, beta, count):
    """Collapse per-tile [sum, sumsq] into per-channel BN scale/shift.

    Training-mode BatchNorm2d forward: biased variance over (N, H, W).
    var = E[y^2] - E[y]^2 (single-pass), clamped at 0 against fp drift.
    """
    totals = jnp.sum(partial_stats, axis=0)                   # (2, C)
    mean = totals[0] / count
    var = jnp.maximum(totals[1] / count - mean * mean, 0.0)
    inv = jax.lax.rsqrt(var + EPS)
    scale = gamma.reshape(-1) * inv
    shift = beta.reshape(-1) - mean * scale
    return scale.reshape(1, -1), shift.reshape(1, -1)


def _pick_batch_tile(N, H, W, Cin, Cout):
    """Largest batch tile whose conv-pass working set fits the VMEM budget,
    preferring nt = N // tile >= 2 so both v7x TensorCores get grid work."""
    per = (H * W * Cin * 4                       # input tile (f32 worst case)
           + H * W * Cout * 2                    # bf16 conv-output tile
           + (H + 2) * (W + 2) * Cin * 2         # bf16 padded scratch
           + H * W * 3 * Cin * 2                 # bf16 kh-chunk patches
           + H * W * Cout * 4)                   # f32 accumulator
    per += H * W * (Cin * 4 + Cout * 2)          # double-buffered in/out tiles
    tb = max(1, min(N, _TILE_BUDGET // max(per, 1)))
    while tb > 1 and (N % tb != 0 or N // tb < 2):
        tb -= 1
    return tb


def basic_block_forward(x_nchw, params, *, batch_tile=None):
    """BasicBlock forward (stride=1, no downsample). x_nchw: (N, C, H, W) f32."""
    w1, g1, b1, w2, g2, b2 = params

    # NCHW -> NHWC at the PyTorch boundary (channels on the 128-lane axis).
    x = jnp.transpose(x_nchw, (0, 2, 3, 1)).astype(jnp.float32)
    N, H, W, Cin = x.shape
    Cout = w1.shape[-1]
    if batch_tile is None:
        batch_tile = _pick_batch_tile(N, H, W, max(Cin, Cout), Cout)
    assert N % batch_tile == 0, "batch_tile must divide N"
    count = N * H * W

    # Conv weights: HWIO -> (3, 3*Cin, Cout) kh-major chunks, MXU operand dtype.
    w1_3d = w1.reshape(3, 3 * Cin, Cout).astype(CONV_DTYPE)
    w2_3d = w2.reshape(3, 3 * Cout, Cout).astype(CONV_DTYPE)

    # pass 1: conv1 + BN1 partial stats (no input affine)
    y1, stats1 = _conv3x3_with_stats(x, w1_3d, batch_tile=batch_tile)
    scale1, shift1 = _fold_bn(stats1, g1, b1, count)

    # pass 2: (bn1 + relu fused at the input) -> conv2 + BN2 partial stats
    y2, stats2 = _conv3x3_with_stats(y1, w2_3d, scale=scale1, shift=shift1,
                                     batch_tile=batch_tile)
    scale2, shift2 = _fold_bn(stats2, g2, b2, count)

    # pass 3: bn2 + residual add + relu
    out = _bn_add_relu(y2, scale2, shift2, x, batch_tile=batch_tile)

    return jnp.transpose(out, (0, 3, 1, 2))                   # NHWC -> NCHW


# --------------------------------------------------------------------------
# pure-JAX reference (same numerical recipe: bf16 MXU operands + bf16 storage
# of the inter-pass activations, BN stats from the f32 conv result)
# --------------------------------------------------------------------------
def reference_forward(x_nchw, params):
    w1, g1, b1, w2, g2, b2 = params
    x = jnp.transpose(x_nchw, (0, 2, 3, 1)).astype(jnp.float32)

    def conv(h, w):
        return jax.lax.conv_general_dilated(
            h.astype(CONV_DTYPE), w.astype(CONV_DTYPE),
            window_strides=(1, 1), padding="SAME",
            dimension_numbers=("NHWC", "HWIO", "NHWC"),
            preferred_element_type=jnp.float32)

    def fold(y, g, b):
        m = jnp.mean(y, axis=(0, 1, 2))
        v = jnp.maximum(jnp.mean(y * y, axis=(0, 1, 2)) - m * m, 0.0)
        inv = jax.lax.rsqrt(v + EPS)
        scale = g.reshape(-1) * inv
        shift = b.reshape(-1) - m * scale
        return scale, shift

    y1 = conv(x, w1)
    s1, t1 = fold(y1, g1, b1)
    y1q = y1.astype(ACT_DTYPE).astype(jnp.float32)          # bf16 storage
    h = jnp.maximum(y1q * s1 + t1, 0.0)

    y2 = conv(h, w2)
    s2, t2 = fold(y2, g2, b2)
    y2q = y2.astype(ACT_DTYPE).astype(jnp.float32)          # bf16 storage
    out = jnp.maximum(y2q * s2 + t2 + x, 0.0)
    return jnp.transpose(out, (0, 3, 1, 2))


def make_params(key, inplanes, planes):
    """Deterministic synthetic parameters (shapes from BasicBlock.__init__)."""
    k1, k2, k3, k4, k5, k6 = jax.random.split(key, 6)
    w1 = 0.1 * jax.random.normal(k1, (3, 3, inplanes, planes), jnp.float32)  # HWIO
    w2 = 0.1 * jax.random.normal(k2, (3, 3, planes, planes), jnp.float32)
    g1 = 1.0 + 0.05 * jax.random.normal(k3, (1, planes), jnp.float32)
    b1 = 0.05 * jax.random.normal(k4, (1, planes), jnp.float32)
    g2 = 1.0 + 0.05 * jax.random.normal(k5, (1, planes), jnp.float32)
    b2 = 0.05 * jax.random.normal(k6, (1, planes), jnp.float32)
    return (w1, g1, b1, w2, g2, b2)


if __name__ == "__main__":
    key = jax.random.PRNGKey(0)
    kx, kp = jax.random.split(key)

    N, C, H, W = 2, 4, 16, 16          # inplanes = planes = 4, stride = 1
    x = jax.random.normal(kx, (N, C, H, W), jnp.float32)
    params = make_params(kp, C, C)

    fwd = jax.jit(basic_block_forward)
    out = jax.block_until_ready(fwd(x, params))

    ref = jax.block_until_ready(reference_forward(x, params))
    assert out.shape == (N, C, H, W)
    err = float(jnp.max(jnp.abs(out - ref)))
    # bf16 activation storage + bf16 MXU operands -> 1e-2 tolerance
    assert jnp.allclose(out, ref, atol=1e-2, rtol=1e-2), f"max abs err = {err}"

    print("KERNEL_OK")
</pallas_src>

<mosaic_0001>
module attributes {stable_mosaic.version = 11 : i64} {
  func.func @_conv3x3_stats_kernel(%arg0: i32, %arg1: memref<1x16x16x4xf32, #tpu.memory_space<vmem>>, %arg2: memref<3x12x4xbf16, #tpu.memory_space<vmem>>, %arg3: memref<1x16x16x4xbf16, #tpu.memory_space<vmem>>, %arg4: memref<1x2x4xf32, #tpu.memory_space<vmem>>, %arg5: memref<1x18x18x4xbf16, #tpu.memory_space<vmem>>) attributes {dimension_semantics = [#tpu.dimension_semantics<parallel>], iteration_bounds = array<i64: 2>, scalar_prefetch = 0 : i64, scratch_operands = 1 : i64, tpu.core_type = #tpu.core_type<tc>, window_params = [{transform_indices = @transform_0, window_bounds = array<i64: 1, 16, 16, 4>}, {pipeline_mode = #tpu.pipeline_mode<synchronous>, transform_indices = @transform_1, window_bounds = array<i64: 3, 12, 4>}, {transform_indices = @transform_2, window_bounds = array<i64: 1, 16, 16, 4>}, {transform_indices = @transform_3, window_bounds = array<i64: 1, 2, 4>}]} {
    %cst = arith.constant 0.000000e+00 : bf16
    %0 = vector.broadcast %cst : bf16 to vector<1x1x18x4xbf16>
    %c0 = arith.constant 0 : index
    %c0_0 = arith.constant 0 : index
    %c0_1 = arith.constant 0 : index
    %c0_2 = arith.constant 0 : index
    %1 = vector.load %arg5[%c0, %c0_0, %c0_1, %c0_2] : memref<1x18x18x4xbf16, #tpu.memory_space<vmem>>, vector<1x1x18x4xbf16>
    tpu.vector_store %arg5[%c0, %c0_0, %c0_1, %c0_2], %0 {strides = array<i32>} : memref<1x18x18x4xbf16, #tpu.memory_space<vmem>>, vector<1x1x18x4xbf16>,
    %c0_3 = arith.constant 0 : index
    %c17 = arith.constant 17 : index
    %c0_4 = arith.constant 0 : index
    %c0_5 = arith.constant 0 : index
    %2 = vector.load %arg5[%c0_3, %c17, %c0_4, %c0_5] : memref<1x18x18x4xbf16, #tpu.memory_space<vmem>>, vector<1x1x18x4xbf16>
    tpu.vector_store %arg5[%c0_3, %c17, %c0_4, %c0_5], %0 {strides = array<i32>} : memref<1x18x18x4xbf16, #tpu.memory_space<vmem>>, vector<1x1x18x4xbf16>,
    %cst_6 = arith.constant 0.000000e+00 : bf16
    %3 = vector.broadcast %cst_6 : bf16 to vector<1x16x1x4xbf16>
    %c0_7 = arith.constant 0 : index
    %c1 = arith.constant 1 : index
    %c0_8 = arith.constant 0 : index
    %c0_9 = arith.constant 0 : index
    %4 = vector.load %arg5[%c0_7, %c1, %c0_8, %c0_9] : memref<1x18x18x4xbf16, #tpu.memory_space<vmem>>, vector<1x16x1x4xbf16>
    tpu.vector_store %arg5[%c0_7, %c1, %c0_8, %c0_9], %3 {strides = array<i32>} : memref<1x18x18x4xbf16, #tpu.memory_space<vmem>>, vector<1x16x1x4xbf16>,
    %c0_10 = arith.constant 0 : index
    %c1_11 = arith.constant 1 : index
    %c17_12 = arith.constant 17 : index
    %c0_13 = arith.constant 0 : index
    %5 = vector.load %arg5[%c0_10, %c1_11, %c17_12, %c0_13] : memref<1x18x18x4xbf16, #tpu.memory_space<vmem>>, vector<1x16x1x4xbf16>
    tpu.vector_store %arg5[%c0_10, %c1_11, %c17_12, %c0_13], %3 {strides = array<i32>} : memref<1x18x18x4xbf16, #tpu.memory_space<vmem>>, vector<1x16x1x4xbf16>,
    %c0_14 = arith.constant 0 : index
    %c0_15 = arith.constant 0 : index
    %c0_16 = arith.constant 0 : index
    %c0_17 = arith.constant 0 : index
    %6 = vector.load %arg1[%c0_14, %c0_15, %c0_16, %c0_17] : memref<1x16x16x4xf32, #tpu.memory_space<vmem>>, vector<1x16x16x4xf32>
    %7 = arith.truncf %6 : vector<1x16x16x4xf32> to vector<1x16x16x4xbf16>
    %c0_18 = arith.constant 0 : index
    %c1_19 = arith.constant 1 : index
    %c1_20 = arith.constant 1 : index
    %c0_21 = arith.constant 0 : index
    %8 = vector.load %arg5[%c0_18, %c1_19, %c1_20, %c0_21] : memref<1x18x18x4xbf16, #tpu.memory_space<vmem>>, vector<1x16x16x4xbf16>
    tpu.vector_store %arg5[%c0_18, %c1_19, %c1_20, %c0_21], %7 {strides = array<i32>} : memref<1x18x18x4xbf16, #tpu.memory_space<vmem>>, vector<1x16x16x4xbf16>,
    %cst_22 = arith.constant 0.000000e+00 : f32
    %9 = vector.broadcast %cst_22 : f32 to vector<256x4xf32>
    %c0_23 = arith.constant 0 : index
    %c0_24 = arith.constant 0 : index
    %c0_25 = arith.constant 0 : index
    %c0_26 = arith.constant 0 : index
    %10 = vector.load %arg5[%c0_23, %c0_24, %c0_25, %c0_26] : memref<1x18x18x4xbf16, #tpu.memory_space<vmem>>, vector<1x16x16x4xbf16>
    %c0_27 = arith.constant 0 : index
    %c0_28 = arith.constant 0 : index
    %c1_29 = arith.constant 1 : index
    %c0_30 = arith.constant 0 : index
    %11 = vector.load %arg5[%c0_27, %c0_28, %c1_29, %c0_30] : memref<1x18x18x4xbf16, #tpu.memory_space<vmem>>, vector<1x16x16x4xbf16>
    %c0_31 = arith.constant 0 : index
    %c0_32 = arith.constant 0 : index
    %c2 = arith.constant 2 : index
    %c0_33 = arith.constant 0 : index
    %12 = vector.load %arg5[%c0_31, %c0_32, %c2, %c0_33] : memref<1x18x18x4xbf16, #tpu.memory_space<vmem>>, vector<1x16x16x4xbf16>
    %13 = tpu.concatenate %10, %11, %12 in 3 : vector<1x16x16x4xbf16>, vector<1x16x16x4xbf16>, vector<1x16x16x4xbf16> -> vector<1x16x16x12xbf16>
    %14 = vector.shape_cast %13 : vector<1x16x16x12xbf16> to vector<256x12xbf16>
    %c0_34 = arith.constant 0 : index
    %c0_35 = arith.constant 0 : index
    %c0_36 = arith.constant 0 : index
    %15 = vector.load %arg2[%c0_34, %c0_35, %c0_36] : memref<3x12x4xbf16, #tpu.memory_space<vmem>>, vector<1x12x4xbf16>
    %16 = vector.shape_cast %15 : vector<1x12x4xbf16> to vector<12x4xbf16>
    %cst_37 = arith.constant dense<0.000000e+00> : vector<256x4xf32>
    %17 = tpu.matmul %14, %16, %cst_37 {dimension_numbers = #tpu.dot_dimension_numbers<[1], [0], [0], [1], [0, 0, 1, 1], [], []>} : vector<256x12xbf16>, vector<12x4xbf16>, vector<256x4xf32> -> vector<256x4xf32>
    %18 = arith.addf %9, %17 : vector<256x4xf32>
    %c0_38 = arith.constant 0 : index
    %c1_39 = arith.constant 1 : index
    %c0_40 = arith.constant 0 : index
    %c0_41 = arith.constant 0 : index
    %19 = vector.load %arg5[%c0_38, %c1_39, %c0_40, %c0_41] : memref<1x18x18x4xbf16, #tpu.memory_space<vmem>>, vector<1x16x16x4xbf16>
    %c0_42 = arith.constant 0 : index
    %c1_43 = arith.constant 1 : index
    %c1_44 = arith.constant 1 : index
    %c0_45 = arith.constant 0 : index
    %20 = vector.load %arg5[%c0_42, %c1_43, %c1_44, %c0_45] : memref<1x18x18x4xbf16, #tpu.memory_space<vmem>>, vector<1x16x16x4xbf16>
    %c0_46 = arith.constant 0 : index
    %c1_47 = arith.constant 1 : index
    %c2_48 = arith.constant 2 : index
    %c0_49 = arith.constant 0 : index
    %21 = vector.load %arg5[%c0_46, %c1_47, %c2_48, %c0_49] : memref<1x18x18x4xbf16, #tpu.memory_space<vmem>>, vector<1x16x16x4xbf16>
    %22 = tpu.concatenate %19, %20, %21 in 3 : vector<1x16x16x4xbf16>, vector<1x16x16x4xbf16>, vector<1x16x16x4xbf16> -> vector<1x16x16x12xbf16>
    %23 = vector.shape_cast %22 : vector<1x16x16x12xbf16> to vector<256x12xbf16>
    %c1_50 = arith.constant 1 : index
    %c0_51 = arith.constant 0 : index
    %c0_52 = arith.constant 0 : index
    %24 = vector.load %arg2[%c1_50, %c0_51, %c0_52] : memref<3x12x4xbf16, #tpu.memory_space<vmem>>, vector<1x12x4xbf16>
    %25 = vector.shape_cast %24 : vector<1x12x4xbf16> to vector<12x4xbf16>
    %cst_53 = arith.constant dense<0.000000e+00> : vector<256x4xf32>
    %26 = tpu.matmul %23, %25, %cst_53 {dimension_numbers = #tpu.dot_dimension_numbers<[1], [0], [0], [1], [0, 0, 1, 1], [], []>} : vector<256x12xbf16>, vector<12x4xbf16>, vector<256x4xf32> -> vector<256x4xf32>
    %27 = arith.addf %18, %26 : vector<256x4xf32>
    %c0_54 = arith.constant 0 : index
    %c2_55 = arith.constant 2 : index
    %c0_56 = arith.constant 0 : index
    %c0_57 = arith.constant 0 : index
    %28 = vector.load %arg5[%c0_54, %c2_55, %c0_56, %c0_57] : memref<1x18x18x4xbf16, #tpu.memory_space<vmem>>, vector<1x16x16x4xbf16>
    %c0_58 = arith.constant 0 : index
    %c2_59 = arith.constant 2 : index
    %c1_60 = arith.constant 1 : index
    %c0_61 = arith.constant 0 : index
    %29 = vector.load %arg5[%c0_58, %c2_59, %c1_60, %c0_61] : memref<1x18x18x4xbf16, #tpu.memory_space<vmem>>, vector<1x16x16x4xbf16>
    %c0_62 = arith.constant 0 : index
    %c2_63 = arith.constant 2 : index
    %c2_64 = arith.constant 2 : index
    %c0_65 = arith.constant 0 : index
    %30 = vector.load %arg5[%c0_62, %c2_63, %c2_64, %c0_65] : memref<1x18x18x4xbf16, #tpu.memory_space<vmem>>, vector<1x16x16x4xbf16>
    %31 = tpu.concatenate %28, %29, %30 in 3 : vector<1x16x16x4xbf16>, vector<1x16x16x4xbf16>, vector<1x16x16x4xbf16> -> vector<1x16x16x12xbf16>
    %32 = vector.shape_cast %31 : vector<1x16x16x12xbf16> to vector<256x12xbf16>
    %c2_66 = arith.constant 2 : index
    %c0_67 = arith.constant 0 : index
    %c0_68 = arith.constant 0 : index
    %33 = vector.load %arg2[%c2_66, %c0_67, %c0_68] : memref<3x12x4xbf16, #tpu.memory_space<vmem>>, vector<1x12x4xbf16>
    %34 = vector.shape_cast %33 : vector<1x12x4xbf16> to vector<12x4xbf16>
    %cst_69 = arith.constant dense<0.000000e+00> : vector<256x4xf32>
    %35 = tpu.matmul %32, %34, %cst_69 {dimension_numbers = #tpu.dot_dimension_numbers<[1], [0], [0], [1], [0, 0, 1, 1], [], []>} : vector<256x12xbf16>, vector<12x4xbf16>, vector<256x4xf32> -> vector<256x4xf32>
    %36 = arith.addf %27, %35 : vector<256x4xf32>
    %37 = vector.shape_cast %36 : vector<256x4xf32> to vector<1x16x16x4xf32>
    %38 = arith.truncf %37 : vector<1x16x16x4xf32> to vector<1x16x16x4xbf16>
    %c0_70 = arith.constant 0 : index
    %c0_71 = arith.constant 0 : index
    %c0_72 = arith.constant 0 : index
    %c0_73 = arith.constant 0 : index
    %39 = vector.load %arg3[%c0_70, %c0_71, %c0_72, %c0_73] : memref<1x16x16x4xbf16, #tpu.memory_space<vmem>>, vector<1x16x16x4xbf16>
    tpu.vector_store %arg3[%c0_70, %c0_71, %c0_72, %c0_73], %38 {strides = array<i32>} : memref<1x16x16x4xbf16, #tpu.memory_space<vmem>>, vector<1x16x16x4xbf16>,
    %cst_74 = arith.constant dense<0.000000e+00> : vector<4xf32>
    %40 = vector.multi_reduction <add>, %36, %cst_74 [0] : vector<256x4xf32> to vector<4xf32>
    %41 = vector.shape_cast %40 : vector<4xf32> to vector<1x4xf32>
    %42 = arith.mulf %36, %36 : vector<256x4xf32>
    %cst_75 = arith.constant dense<0.000000e+00> : vector<4xf32>
    %43 = vector.multi_reduction <add>, %42, %cst_75 [0] : vector<256x4xf32> to vector<4xf32>
    %44 = vector.shape_cast %43 : vector<4xf32> to vector<1x4xf32>
    %45 = tpu.concatenate %41, %44 in 0 : vector<1x4xf32>, vector<1x4xf32> -> vector<2x4xf32>
    %46 = vector.shape_cast %45 : vector<2x4xf32> to vector<1x2x4xf32>
    %c0_76 = arith.constant 0 : index
    %c0_77 = arith.constant 0 : index
    %c0_78 = arith.constant 0 : index
    %47 = vector.load %arg4[%c0_76, %c0_77, %c0_78] : memref<1x2x4xf32, #tpu.memory_space<vmem>>, vector<1x2x4xf32>
    tpu.vector_store %arg4[%c0_76, %c0_77, %c0_78], %46 {strides = array<i32>} : memref<1x2x4xf32, #tpu.memory_space<vmem>>, vector<1x2x4xf32>,
    return
  }
  func.func @transform_0(%arg0: i32) -> (i32, i32, i32, i32) {
    %c0_i32 = arith.constant 0 : i32
    %c0_i32_0 = arith.constant 0 : i32
    %c0_i32_1 = arith.constant 0 : i32
    %c0_i32_2 = arith.constant 0 : i32
    return %arg0, %c0_i32, %c0_i32_0, %c0_i32_1 : i32, i32, i32, i32
  }
  func.func @transform_1(%arg0: i32) -> (i32, i32, i32) {
    %c0_i32 = arith.constant 0 : i32
    %c0_i32_0 = arith.constant 0 : i32
    %c0_i32_1 = arith.constant 0 : i32
    %c0_i32_2 = arith.constant 0 : i32
    return %c0_i32, %c0_i32_0, %c0_i32_1 : i32, i32, i32
  }
  func.func @transform_2(%arg0: i32) -> (i32, i32, i32, i32) {
    %c0_i32 = arith.constant 0 : i32
    %c0_i32_0 = arith.constant 0 : i32
    %c0_i32_1 = arith.constant 0 : i32
    %c0_i32_2 = arith.constant 0 : i32
    return %arg0, %c0_i32, %c0_i32_0, %c0_i32_1 : i32, i32, i32, i32
  }
  func.func @transform_3(%arg0: i32) -> (i32, i32, i32) {
    %c0_i32 = arith.constant 0 : i32
    %c0_i32_0 = arith.constant 0 : i32
    %c0_i32_1 = arith.constant 0 : i32
    return %arg0, %c0_i32, %c0_i32_0 : i32, i32, i32
  }
}

module attributes {stable_mosaic.version = 11 : i64} {
  func.func @_bn_add_relu_kernel(%arg0: i32, %arg1: memref<1x16x16x4xbf16, #tpu.memory_space<vmem>>, %arg2: memref<1x4xf32, #tpu.memory_space<vmem>>, %arg3: memref<1x4xf32, #tpu.memory_space<vmem>>, %arg4: memref<1x16x16x4xf32, #tpu.memory_space<vmem>>, %arg5: memref<1x16x16x4xf32, #tpu.memory_space<vmem>>) attributes {dimension_semantics = [#tpu.dimension_semantics<parallel>], iteration_bounds = array<i64: 2>, scalar_prefetch = 0 : i64, scratch_operands = 0 : i64, tpu.core_type = #tpu.core_type<tc>, window_params = [{transform_indices = @transform_0, window_bounds = array<i64: 1, 16, 16, 4>}, {pipeline_mode = #tpu.pipeline_mode<synchronous>, transform_indices = @transform_1, window_bounds = array<i64: 1, 4>}, {pipeline_mode = #tpu.pipeline_mode<synchronous>, transform_indices = @transform_2, window_bounds = array<i64: 1, 4>}, {transform_indices = @transform_3, window_bounds = array<i64: 1, 16, 16, 4>}, {transform_indices = @transform_4, window_bounds = array<i64: 1, 16, 16, 4>}]} {
    %c0 = arith.constant 0 : index
    %c0_0 = arith.constant 0 : index
    %c0_1 = arith.constant 0 : index
    %c0_2 = arith.constant 0 : index
    %0 = vector.load %arg1[%c0, %c0_0, %c0_1, %c0_2] : memref<1x16x16x4xbf16, #tpu.memory_space<vmem>>, vector<1x16x16x4xbf16>
    %1 = arith.extf %0 : vector<1x16x16x4xbf16> to vector<1x16x16x4xf32>
    %c0_3 = arith.constant 0 : index
    %c0_4 = arith.constant 0 : index
    %2 = vector.load %arg2[%c0_3, %c0_4] : memref<1x4xf32, #tpu.memory_space<vmem>>, vector<1x4xf32>
    %3 = vector.shape_cast %2 : vector<1x4xf32> to vector<1x1x1x4xf32>
    %4 = vector.broadcast %3 : vector<1x1x1x4xf32> to vector<1x16x16x4xf32>
    %5 = arith.mulf %1, %4 : vector<1x16x16x4xf32>
    %c0_5 = arith.constant 0 : index
    %c0_6 = arith.constant 0 : index
    %6 = vector.load %arg3[%c0_5, %c0_6] : memref<1x4xf32, #tpu.memory_space<vmem>>, vector<1x4xf32>
    %7 = vector.shape_cast %6 : vector<1x4xf32> to vector<1x1x1x4xf32>
    %8 = vector.broadcast %7 : vector<1x1x1x4xf32> to vector<1x16x16x4xf32>
    %9 = arith.addf %5, %8 : vector<1x16x16x4xf32>
    %c0_7 = arith.constant 0 : index
    %c0_8 = arith.constant 0 : index
    %c0_9 = arith.constant 0 : index
    %c0_10 = arith.constant 0 : index
    %10 = vector.load %arg4[%c0_7, %c0_8, %c0_9, %c0_10] : memref<1x16x16x4xf32, #tpu.memory_space<vmem>>, vector<1x16x16x4xf32>
    %11 = arith.addf %9, %10 : vector<1x16x16x4xf32>
    %cst = arith.constant 0.000000e+00 : f32
    %12 = vector.broadcast %cst : f32 to vector<1x16x16x4xf32>
    %13 = arith.maximumf %11, %12 : vector<1x16x16x4xf32>
    %c0_11 = arith.constant 0 : index
    %c0_12 = arith.constant 0 : index
    %c0_13 = arith.constant 0 : index
    %c0_14 = arith.constant 0 : index
    %14 = vector.load %arg5[%c0_11, %c0_12, %c0_13, %c0_14] : memref<1x16x16x4xf32, #tpu.memory_space<vmem>>, vector<1x16x16x4xf32>
    tpu.vector_store %arg5[%c0_11, %c0_12, %c0_13, %c0_14], %13 {strides = array<i32>} : memref<1x16x16x4xf32, #tpu.memory_space<vmem>>, vector<1x16x16x4xf32>,
    return
  }
  func.func @transform_0(%arg0: i32) -> (i32, i32, i32, i32) {
    %c0_i32 = arith.constant 0 : i32
    %c0_i32_0 = arith.constant 0 : i32
    %c0_i32_1 = arith.constant 0 : i32
    %c0_i32_2 = arith.constant 0 : i32
    return %arg0, %c0_i32, %c0_i32_0, %c0_i32_1 : i32, i32, i32, i32
  }
  func.func @transform_1(%arg0: i32) -> (i32, i32) {
    %c0_i32 = arith.constant 0 : i32
    %c0_i32_0 = arith.constant 0 : i32
    %c0_i32_1 = arith.constant 0 : i32
    return %c0_i32, %c0_i32_0 : i32, i32
  }
  func.func @transform_2(%arg0: i32) -> (i32, i32) {
    %c0_i32 = arith.constant 0 : i32
    %c0_i32_0 = arith.constant 0 : i32
    %c0_i32_1 = arith.constant 0 : i32
    return %c0_i32, %c0_i32_0 : i32, i32
  }
  func.func @transform_3(%arg0: i32) -> (i32, i32, i32, i32) {
    %c0_i32 = arith.constant 0 : i32
    %c0_i32_0 = arith.constant 0 : i32
    %c0_i32_1 = arith.constant 0 : i32
    %c0_i32_2 = arith.constant 0 : i32
    return %arg0, %c0_i32, %c0_i32_0, %c0_i32_1 : i32, i32, i32, i32
  }
  func.func @transform_4(%arg0: i32) -> (i32, i32, i32, i32) {
    %c0_i32 = arith.constant 0 : i32
    %c0_i32_0 = arith.constant 0 : i32
    %c0_i32_1 = arith.constant 0 : i32
    %c0_i32_2 = arith.constant 0 : i32
    return %arg0, %c0_i32, %c0_i32_0, %c0_i32_1 : i32, i32, i32, i32
  }
}

module attributes {stable_mosaic.version = 11 : i64} {
  func.func @_conv3x3_stats_kernel(%arg0: i32, %arg1: memref<1x16x16x4xbf16, #tpu.memory_space<vmem>>, %arg2: memref<1x4xf32, #tpu.memory_space<vmem>>, %arg3: memref<1x4xf32, #tpu.memory_space<vmem>>, %arg4: memref<3x12x4xbf16, #tpu.memory_space<vmem>>, %arg5: memref<1x16x16x4xbf16, #tpu.memory_space<vmem>>, %arg6: memref<1x2x4xf32, #tpu.memory_space<vmem>>, %arg7: memref<1x18x18x4xbf16, #tpu.memory_space<vmem>>) attributes {dimension_semantics = [#tpu.dimension_semantics<parallel>], iteration_bounds = array<i64: 2>, scalar_prefetch = 0 : i64, scratch_operands = 1 : i64, tpu.core_type = #tpu.core_type<tc>, window_params = [{transform_indices = @transform_0, window_bounds = array<i64: 1, 16, 16, 4>}, {pipeline_mode = #tpu.pipeline_mode<synchronous>, transform_indices = @transform_1, window_bounds = array<i64: 1, 4>}, {pipeline_mode = #tpu.pipeline_mode<synchronous>, transform_indices = @transform_2, window_bounds = array<i64: 1, 4>}, {pipeline_mode = #tpu.pipeline_mode<synchronous>, transform_indices = @transform_3, window_bounds = array<i64: 3, 12, 4>}, {transform_indices = @transform_4, window_bounds = array<i64: 1, 16, 16, 4>}, {transform_indices = @transform_5, window_bounds = array<i64: 1, 2, 4>}]} {
    %cst = arith.constant 0.000000e+00 : bf16
    %0 = vector.broadcast %cst : bf16 to vector<1x1x18x4xbf16>
    %c0 = arith.constant 0 : index
    %c0_0 = arith.constant 0 : index
    %c0_1 = arith.constant 0 : index
    %c0_2 = arith.constant 0 : index
    %1 = vector.load %arg7[%c0, %c0_0, %c0_1, %c0_2] : memref<1x18x18x4xbf16, #tpu.memory_space<vmem>>, vector<1x1x18x4xbf16>
    tpu.vector_store %arg7[%c0, %c0_0, %c0_1, %c0_2], %0 {strides = array<i32>} : memref<1x18x18x4xbf16, #tpu.memory_space<vmem>>, vector<1x1x18x4xbf16>,
    %c0_3 = arith.constant 0 : index
    %c17 = arith.constant 17 : index
    %c0_4 = arith.constant 0 : index
    %c0_5 = arith.constant 0 : index
    %2 = vector.load %arg7[%c0_3, %c17, %c0_4, %c0_5] : memref<1x18x18x4xbf16, #tpu.memory_space<vmem>>, vector<1x1x18x4xbf16>
    tpu.vector_store %arg7[%c0_3, %c17, %c0_4, %c0_5], %0 {strides = array<i32>} : memref<1x18x18x4xbf16, #tpu.memory_space<vmem>>, vector<1x1x18x4xbf16>,
    %cst_6 = arith.constant 0.000000e+00 : bf16
    %3 = vector.broadcast %cst_6 : bf16 to vector<1x16x1x4xbf16>
    %c0_7 = arith.constant 0 : index
    %c1 = arith.constant 1 : index
    %c0_8 = arith.constant 0 : index
    %c0_9 = arith.constant 0 : index
    %4 = vector.load %arg7[%c0_7, %c1, %c0_8, %c0_9] : memref<1x18x18x4xbf16, #tpu.memory_space<vmem>>, vector<1x16x1x4xbf16>
    tpu.vector_store %arg7[%c0_7, %c1, %c0_8, %c0_9], %3 {strides = array<i32>} : memref<1x18x18x4xbf16, #tpu.memory_space<vmem>>, vector<1x16x1x4xbf16>,
    %c0_10 = arith.constant 0 : index
    %c1_11 = arith.constant 1 : index
    %c17_12 = arith.constant 17 : index
    %c0_13 = arith.constant 0 : index
    %5 = vector.load %arg7[%c0_10, %c1_11, %c17_12, %c0_13] : memref<1x18x18x4xbf16, #tpu.memory_space<vmem>>, vector<1x16x1x4xbf16>
    tpu.vector_store %arg7[%c0_10, %c1_11, %c17_12, %c0_13], %3 {strides = array<i32>} : memref<1x18x18x4xbf16, #tpu.memory_space<vmem>>, vector<1x16x1x4xbf16>,
    %c0_14 = arith.constant 0 : index
    %c0_15 = arith.constant 0 : index
    %c0_16 = arith.constant 0 : index
    %c0_17 = arith.constant 0 : index
    %6 = vector.load %arg1[%c0_14, %c0_15, %c0_16, %c0_17] : memref<1x16x16x4xbf16, #tpu.memory_space<vmem>>, vector<1x16x16x4xbf16>
    %7 = arith.extf %6 : vector<1x16x16x4xbf16> to vector<1x16x16x4xf32>
    %c0_18 = arith.constant 0 : index
    %c0_19 = arith.constant 0 : index
    %8 = vector.load %arg2[%c0_18, %c0_19] : memref<1x4xf32, #tpu.memory_space<vmem>>, vector<1x4xf32>
    %9 = vector.shape_cast %8 : vector<1x4xf32> to vector<1x1x1x4xf32>
    %10 = vector.broadcast %9 : vector<1x1x1x4xf32> to vector<1x16x16x4xf32>
    %11 = arith.mulf %7, %10 : vector<1x16x16x4xf32>
    %c0_20 = arith.constant 0 : index
    %c0_21 = arith.constant 0 : index
    %12 = vector.load %arg3[%c0_20, %c0_21] : memref<1x4xf32, #tpu.memory_space<vmem>>, vector<1x4xf32>
    %13 = vector.shape_cast %12 : vector<1x4xf32> to vector<1x1x1x4xf32>
    %14 = vector.broadcast %13 : vector<1x1x1x4xf32> to vector<1x16x16x4xf32>
    %15 = arith.addf %11, %14 : vector<1x16x16x4xf32>
    %cst_22 = arith.constant 0.000000e+00 : f32
    %16 = vector.broadcast %cst_22 : f32 to vector<1x16x16x4xf32>
    %17 = arith.maximumf %15, %16 : vector<1x16x16x4xf32>
    %18 = arith.truncf %17 : vector<1x16x16x4xf32> to vector<1x16x16x4xbf16>
    %c0_23 = arith.constant 0 : index
    %c1_24 = arith.constant 1 : index
    %c1_25 = arith.constant 1 : index
    %c0_26 = arith.constant 0 : index
    %19 = vector.load %arg7[%c0_23, %c1_24, %c1_25, %c0_26] : memref<1x18x18x4xbf16, #tpu.memory_space<vmem>>, vector<1x16x16x4xbf16>
    tpu.vector_store %arg7[%c0_23, %c1_24, %c1_25, %c0_26], %18 {strides = array<i32>} : memref<1x18x18x4xbf16, #tpu.memory_space<vmem>>, vector<1x16x16x4xbf16>,
    %cst_27 = arith.constant 0.000000e+00 : f32
    %20 = vector.broadcast %cst_27 : f32 to vector<256x4xf32>
    %c0_28 = arith.constant 0 : index
    %c0_29 = arith.constant 0 : index
    %c0_30 = arith.constant 0 : index
    %c0_31 = arith.constant 0 : index
    %21 = vector.load %arg7[%c0_28, %c0_29, %c0_30, %c0_31] : memref<1x18x18x4xbf16, #tpu.memory_space<vmem>>, vector<1x16x16x4xbf16>
    %c0_32 = arith.constant 0 : index
    %c0_33 = arith.constant 0 : index
    %c1_34 = arith.constant 1 : index
    %c0_35 = arith.constant 0 : index
    %22 = vector.load %arg7[%c0_32, %c0_33, %c1_34, %c0_35] : memref<1x18x18x4xbf16, #tpu.memory_space<vmem>>, vector<1x16x16x4xbf16>
    %c0_36 = arith.constant 0 : index
    %c0_37 = arith.constant 0 : index
    %c2 = arith.constant 2 : index
    %c0_38 = arith.constant 0 : index
    %23 = vector.load %arg7[%c0_36, %c0_37, %c2, %c0_38] : memref<1x18x18x4xbf16, #tpu.memory_space<vmem>>, vector<1x16x16x4xbf16>
    %24 = tpu.concatenate %21, %22, %23 in 3 : vector<1x16x16x4xbf16>, vector<1x16x16x4xbf16>, vector<1x16x16x4xbf16> -> vector<1x16x16x12xbf16>
    %25 = vector.shape_cast %24 : vector<1x16x16x12xbf16> to vector<256x12xbf16>
    %c0_39 = arith.constant 0 : index
    %c0_40 = arith.constant 0 : index
    %c0_41 = arith.constant 0 : index
    %26 = vector.load %arg4[%c0_39, %c0_40, %c0_41] : memref<3x12x4xbf16, #tpu.memory_space<vmem>>, vector<1x12x4xbf16>
    %27 = vector.shape_cast %26 : vector<1x12x4xbf16> to vector<12x4xbf16>
    %cst_42 = arith.constant dense<0.000000e+00> : vector<256x4xf32>
    %28 = tpu.matmul %25, %27, %cst_42 {dimension_numbers = #tpu.dot_dimension_numbers<[1], [0], [0], [1], [0, 0, 1, 1], [], []>} : vector<256x12xbf16>, vector<12x4xbf16>, vector<256x4xf32> -> vector<256x4xf32>
    %29 = arith.addf %20, %28 : vector<256x4xf32>
    %c0_43 = arith.constant 0 : index
    %c1_44 = arith.constant 1 : index
    %c0_45 = arith.constant 0 : index
    %c0_46 = arith.constant 0 : index
    %30 = vector.load %arg7[%c0_43, %c1_44, %c0_45, %c0_46] : memref<1x18x18x4xbf16, #tpu.memory_space<vmem>>, vector<1x16x16x4xbf16>
    %c0_47 = arith.constant 0 : index
    %c1_48 = arith.constant 1 : index
    %c1_49 = arith.constant 1 : index
    %c0_50 = arith.constant 0 : index
    %31 = vector.load %arg7[%c0_47, %c1_48, %c1_49, %c0_50] : memref<1x18x18x4xbf16, #tpu.memory_space<vmem>>, vector<1x16x16x4xbf16>
    %c0_51 = arith.constant 0 : index
    %c1_52 = arith.constant 1 : index
    %c2_53 = arith.constant 2 : index
    %c0_54 = arith.constant 0 : index
    %32 = vector.load %arg7[%c0_51, %c1_52, %c2_53, %c0_54] : memref<1x18x18x4xbf16, #tpu.memory_space<vmem>>, vector<1x16x16x4xbf16>
    %33 = tpu.concatenate %30, %31, %32 in 3 : vector<1x16x16x4xbf16>, vector<1x16x16x4xbf16>, vector<1x16x16x4xbf16> -> vector<1x16x16x12xbf16>
    %34 = vector.shape_cast %33 : vector<1x16x16x12xbf16> to vector<256x12xbf16>
    %c1_55 = arith.constant 1 : index
    %c0_56 = arith.constant 0 : index
    %c0_57 = arith.constant 0 : index
    %35 = vector.load %arg4[%c1_55, %c0_56, %c0_57] : memref<3x12x4xbf16, #tpu.memory_space<vmem>>, vector<1x12x4xbf16>
    %36 = vector.shape_cast %35 : vector<1x12x4xbf16> to vector<12x4xbf16>
    %cst_58 = arith.constant dense<0.000000e+00> : vector<256x4xf32>
    %37 = tpu.matmul %34, %36, %cst_58 {dimension_numbers = #tpu.dot_dimension_numbers<[1], [0], [0], [1], [0, 0, 1, 1], [], []>} : vector<256x12xbf16>, vector<12x4xbf16>, vector<256x4xf32> -> vector<256x4xf32>
    %38 = arith.addf %29, %37 : vector<256x4xf32>
    %c0_59 = arith.constant 0 : index
    %c2_60 = arith.constant 2 : index
    %c0_61 = arith.constant 0 : index
    %c0_62 = arith.constant 0 : index
    %39 = vector.load %arg7[%c0_59, %c2_60, %c0_61, %c0_62] : memref<1x18x18x4xbf16, #tpu.memory_space<vmem>>, vector<1x16x16x4xbf16>
    %c0_63 = arith.constant 0 : index
    %c2_64 = arith.constant 2 : index
    %c1_65 = arith.constant 1 : index
    %c0_66 = arith.constant 0 : index
    %40 = vector.load %arg7[%c0_63, %c2_64, %c1_65, %c0_66] : memref<1x18x18x4xbf16, #tpu.memory_space<vmem>>, vector<1x16x16x4xbf16>
    %c0_67 = arith.constant 0 : index
    %c2_68 = arith.constant 2 : index
    %c2_69 = arith.constant 2 : index
    %c0_70 = arith.constant 0 : index
    %41 = vector.load %arg7[%c0_67, %c2_68, %c2_69, %c0_70] : memref<1x18x18x4xbf16, #tpu.memory_space<vmem>>, vector<1x16x16x4xbf16>
    %42 = tpu.concatenate %39, %40, %41 in 3 : vector<1x16x16x4xbf16>, vector<1x16x16x4xbf16>, vector<1x16x16x4xbf16> -> vector<1x16x16x12xbf16>
    %43 = vector.shape_cast %42 : vector<1x16x16x12xbf16> to vector<256x12xbf16>
    %c2_71 = arith.constant 2 : index
    %c0_72 = arith.constant 0 : index
    %c0_73 = arith.constant 0 : index
    %44 = vector.load %arg4[%c2_71, %c0_72, %c0_73] : memref<3x12x4xbf16, #tpu.memory_space<vmem>>, vector<1x12x4xbf16>
    %45 = vector.shape_cast %44 : vector<1x12x4xbf16> to vector<12x4xbf16>
    %cst_74 = arith.constant dense<0.000000e+00> : vector<256x4xf32>
    %46 = tpu.matmul %43, %45, %cst_74 {dimension_numbers = #tpu.dot_dimension_numbers<[1], [0], [0], [1], [0, 0, 1, 1], [], []>} : vector<256x12xbf16>, vector<12x4xbf16>, vector<256x4xf32> -> vector<256x4xf32>
    %47 = arith.addf %38, %46 : vector<256x4xf32>
    %48 = vector.shape_cast %47 : vector<256x4xf32> to vector<1x16x16x4xf32>
    %49 = arith.truncf %48 : vector<1x16x16x4xf32> to vector<1x16x16x4xbf16>
    %c0_75 = arith.constant 0 : index
    %c0_76 = arith.constant 0 : index
    %c0_77 = arith.constant 0 : index
    %c0_78 = arith.constant 0 : index
    %50 = vector.load %arg5[%c0_75, %c0_76, %c0_77, %c0_78] : memref<1x16x16x4xbf16, #tpu.memory_space<vmem>>, vector<1x16x16x4xbf16>
    tpu.vector_store %arg5[%c0_75, %c0_76, %c0_77, %c0_78], %49 {strides = array<i32>} : memref<1x16x16x4xbf16, #tpu.memory_space<vmem>>, vector<1x16x16x4xbf16>,
    %cst_79 = arith.constant dense<0.000000e+00> : vector<4xf32>
    %51 = vector.multi_reduction <add>, %47, %cst_79 [0] : vector<256x4xf32> to vector<4xf32>
    %52 = vector.shape_cast %51 : vector<4xf32> to vector<1x4xf32>
    %53 = arith.mulf %47, %47 : vector<256x4xf32>
    %cst_80 = arith.constant dense<0.000000e+00> : vector<4xf32>
    %54 = vector.multi_reduction <add>, %53, %cst_80 [0] : vector<256x4xf32> to vector<4xf32>
    %55 = vector.shape_cast %54 : vector<4xf32> to vector<1x4xf32>
    %56 = tpu.concatenate %52, %55 in 0 : vector<1x4xf32>, vector<1x4xf32> -> vector<2x4xf32>
    %57 = vector.shape_cast %56 : vector<2x4xf32> to vector<1x2x4xf32>
    %c0_81 = arith.constant 0 : index
    %c0_82 = arith.constant 0 : index
    %c0_83 = arith.constant 0 : index
    %58 = vector.load %arg6[%c0_81, %c0_82, %c0_83] : memref<1x2x4xf32, #tpu.memory_space<vmem>>, vector<1x2x4xf32>
    tpu.vector_store %arg6[%c0_81, %c0_82, %c0_83], %57 {strides = array<i32>} : memref<1x2x4xf32, #tpu.memory_space<vmem>>, vector<1x2x4xf32>,
    return
  }
  func.func @transform_0(%arg0: i32) -> (i32, i32, i32, i32) {
    %c0_i32 = arith.constant 0 : i32
    %c0_i32_0 = arith.constant 0 : i32
    %c0_i32_1 = arith.constant 0 : i32
    %c0_i32_2 = arith.constant 0 : i32
    return %arg0, %c0_i32, %c0_i32_0, %c0_i32_1 : i32, i32, i32, i32
  }
  func.func @transform_1(%arg0: i32) -> (i32, i32) {
    %c0_i32 = arith.constant 0 : i32
    %c0_i32_0 = arith.constant 0 : i32
    %c0_i32_1 = arith.constant 0 : i32
    return %c0_i32, %c0_i32_0 : i32, i32
  }
  func.func @transform_2(%arg0: i32) -> (i32, i32) {
    %c0_i32 = arith.constant 0 : i32
    %c0_i32_0 = arith.constant 0 : i32
    %c0_i32_1 = arith.constant 0 : i32
    return %c0_i32, %c0_i32_0 : i32, i32
  }
  func.func @transform_3(%arg0: i32) -> (i32, i32, i32) {
    %c0_i32 = arith.constant 0 : i32
    %c0_i32_0 = arith.constant 0 : i32
    %c0_i32_1 = arith.constant 0 : i32
    %c0_i32_2 = arith.constant 0 : i32
    return %c0_i32, %c0_i32_0, %c0_i32_1 : i32, i32, i32
  }
  func.func @transform_4(%arg0: i32) -> (i32, i32, i32, i32) {
    %c0_i32 = arith.constant 0 : i32
    %c0_i32_0 = arith.constant 0 : i32
    %c0_i32_1 = arith.constant 0 : i32
    %c0_i32_2 = arith.constant 0 : i32
    return %arg0, %c0_i32, %c0_i32_0, %c0_i32_1 : i32, i32, i32, i32
  }
  func.func @transform_5(%arg0: i32) -> (i32, i32, i32) {
    %c0_i32 = arith.constant 0 : i32
    %c0_i32_0 = arith.constant 0 : i32
    %c0_i32_1 = arith.constant 0 : i32
    return %arg0, %c0_i32, %c0_i32_0 : i32, i32, i32
  }
}

</mosaic_0001>

<bundles_post_ra>
// kernel: basic_block_forward.5
= control target key start
LH: loop header
LB: loop body
LE: loop exit
PB: predicated region body
PF: predicated region fallthrough
CT: control target
= control target key end

     0   :  { %s694_s15 = smov 0   ;;  %s882_s0 = inlined_call_operand.vmem [shape: bf16[2,16,16,4], index: 0, kind: input, shape index: {}]   ;;  %s883_s1 = inlined_call_operand.vmem [shape: f32[1,4], index: 1, kind: input, shape index: {}]   ;;  %s884_s2 = inlined_call_operand.vmem [shape: f32[1,4], index: 2, kind: input, shape index: {}]   ;;  %s885_s3 = inlined_call_operand.vmem [shape: f32[2,16,16,4], index: 3, kind: input, shape index: {}, may-alias: {3,4}]   ;;  %s886_s4 = inlined_call_operand.vmem [shape: f32[2,16,16,4], index: 4, kind: output, shape index: {}, may-alias: {3,4}]  }
   0x1 LB: > { %s556_s16 = sadd.s32 4294967295, %s667_s15   ;;  %p560_p0 = scmp.ge.s32.totalorder %s667_s15, 1  ;;  %s667_s15 = sphi %s694_s15, %s14_s15  }
   0x2   : > { %p172_p1 = scmp.lt.s32.totalorder %s667_s15, 3 }
   0x4   : > { %p173_p2 = pnand %p560_p0, %p172_p1 }
   0x5   : > { %p203_p3 = scmp.lt.s32.totalorder (!%p173_p2), %s556_s16, 1 }
   0x6   : > { %176 = sbr.rel (%p173_p2) target bundleno = 65 (0x41), region = 36 }
   0xb   : > { %s888_s16 = smov (!%p203_p3, %s556_s16), 1  ;;  %v567_v40 = vld [vmem:[%s883_s1] ss:$0 sm:$0xff]  ;;  %vm456_vm0 = vcmask 31744  }
   0xc   : > { %s571_s17 = sshll.u32 %s888_s16, 7  ;;  %s572_s23 = sshll.u32 %s888_s16, 8 }
   0xd   : > { %s708_s20 = scalar_lea.vmem %s882_s0, %s571_s17  ;;  %s738_s28 = scalar_lea.vmem %s885_s3, %s572_s23 }
   0xe   : > { %v575_v0 = vld [vmem:[%s708_s20] sm:$0xff]   ;;  %v638_v1 = vld [vmem:[%s708_s20 + $0x8] sm:$0xff]   ;;  %v639_v2 = vld [vmem:[%s708_s20 + $0x10] sm:$0xff]   ;;  %s793_s5 = scalar_lea.vmem %s886_s4, %s572_s23 }
   0xf   : > { %v576_v3 = vunpack.c.l.bf16 %v575_v0  ;;  %v577_v4 = vunpack.c.h.bf16 %v575_v0  ;;  %v580_v5 = vunpack.c.l.bf16 %v638_v1  ;;  %v581_v6 = vunpack.c.h.bf16 %v638_v1  ;;  %v640_v7 = vld [vmem:[%s708_s20 + $0x18] sm:$0xff]   ;;  %v641_v8 = vld [vmem:[%s708_s20 + $0x20] sm:$0xff]   ;;  %v642_v9 = vld [vmem:[%s708_s20 + $0x28] sm:$0xff]  }
  0x10   : > { %v584_v10 = vunpack.c.l.bf16 %v639_v2  ;;  %v585_v11 = vunpack.c.h.bf16 %v639_v2  ;;  %v588_v12 = vunpack.c.l.bf16 %v640_v7  ;;  %v589_v13 = vunpack.c.h.bf16 %v640_v7  ;;  %v643_v14 = vld [vmem:[%s708_s20 + $0x30] sm:$0xff]   ;;  %v644_v15 = vld [vmem:[%s708_s20 + $0x38] sm:$0xff]   ;;  %v645_v16 = vld [vmem:[%s708_s20 + $0x40] sm:$0xff]  }
  0x11   : > { %v592_v17 = vunpack.c.l.bf16 %v641_v8  ;;  %v593_v18 = vunpack.c.h.bf16 %v641_v8  ;;  %v596_v19 = vunpack.c.l.bf16 %v642_v9  ;;  %v597_v20 = vunpack.c.h.bf16 %v642_v9  ;;  %v646_v21 = vld [vmem:[%s708_s20 + $0x48] sm:$0xff]   ;;  %v647_v22 = vld [vmem:[%s708_s20 + $0x50] sm:$0xff]   ;;  %v648_v23 = vld [vmem:[%s708_s20 + $0x58] sm:$0xff]  }
  0x12   : > { %v600_v24 = vunpack.c.l.bf16 %v643_v14  ;;  %v601_v25 = vunpack.c.h.bf16 %v643_v14  ;;  %v604_v26 = vunpack.c.l.bf16 %v644_v15  ;;  %v605_v27 = vunpack.c.h.bf16 %v644_v15  ;;  %v649_v28 = vld [vmem:[%s708_s20 + $0x60] sm:$0xff]   ;;  %v650_v29 = vld [vmem:[%s708_s20 + $0x68] sm:$0xff]   ;;  %v651_v34 = vld [vmem:[%s708_s20 + $0x70] sm:$0xff]  }
  0x13   : > { %v608_v30 = vunpack.c.l.bf16 %v645_v16  ;;  %v609_v31 = vunpack.c.h.bf16 %v645_v16  ;;  %v612_v32 = vunpack.c.l.bf16 %v646_v21  ;;  %v613_v33 = vunpack.c.h.bf16 %v646_v21  ;;  %v652_v35 = vld [vmem:[%s708_s20 + $0x78] sm:$0xff]   ;;  %v568_v9 = vld [vmem:[%s884_s2] ss:$0 sm:$0xff] }
  0x14   : > { %v616_v36 = vunpack.c.l.bf16 %v647_v22  ;;  %v617_v37 = vunpack.c.h.bf16 %v647_v22  ;;  %v620_v38 = vunpack.c.l.bf16 %v648_v23  ;;  %v621_v39 = vunpack.c.h.bf16 %v648_v23 }
  0x15   : > { %v624_v41 = vunpack.c.l.bf16 %v649_v28  ;;  %v625_v42 = vunpack.c.h.bf16 %v649_v28  ;;  %v628_v43 = vunpack.c.l.bf16 %v650_v29  ;;  %v629_v44 = vunpack.c.h.bf16 %v650_v29 }
  0x16   : > { %v632_v45 = vunpack.c.l.bf16 %v651_v34  ;;  %v633_v46 = vunpack.c.h.bf16 %v651_v34  ;;  %v636_v47 = vunpack.c.l.bf16 %v652_v35  ;;  %v637_v48 = vunpack.c.h.bf16 %v652_v35  ;;  %v360_v34 = vld [vmem:[%s738_s28] sm:$0xff]  ;;  %v361_v35 = vld [vmem:[%s738_s28 + $0x8] sm:$0xff] }
  0x17   : > { %v289_v49 = vmul.f32 %v576_v3, %v567_v40  ;;  %v290_v50 = vmul.f32 %v577_v4, %v567_v40  ;;  %v291_v51 = vmul.f32 %v580_v5, %v567_v40  ;;  %v292_v52 = vmul.f32 %v581_v6, %v567_v40 }
  0x18   : > { %v293_v53 = vmul.f32 %v584_v10, %v567_v40  ;;  %v294_v54 = vmul.f32 %v585_v11, %v567_v40  ;;  %v295_v55 = vmul.f32 %v588_v12, %v567_v40  ;;  %v296_v56 = vmul.f32 %v589_v13, %v567_v40 }
  0x19   : > { %v297_v57 = vmul.f32 %v592_v17, %v567_v40  ;;  %v298_v58 = vmul.f32 %v593_v18, %v567_v40  ;;  %v299_v59 = vmul.f32 %v596_v19, %v567_v40  ;;  %v300_v60 = vmul.f32 %v597_v20, %v567_v40 }
  0x1a   : > { %v301_v61 = vmul.f32 %v600_v24, %v567_v40  ;;  %v302_v62 = vmul.f32 %v601_v25, %v567_v40  ;;  %v303_v63 = vmul.f32 %v604_v26, %v567_v40  ;;  %v304_v0 = vmul.f32 %v605_v27, %v567_v40 }
  0x1b   : > { %v305_v1 = vmul.f32 %v608_v30, %v567_v40  ;;  %v306_v2 = vmul.f32 %v609_v31, %v567_v40  ;;  %v307_v7 = vmul.f32 %v612_v32, %v567_v40  ;;  %v308_v3 = vmul.f32 %v613_v33, %v567_v40 }
  0x1c   : > { %v309_v4 = vmul.f32 %v616_v36, %v567_v40  ;;  %v310_v5 = vmul.f32 %v617_v37, %v567_v40  ;;  %v311_v6 = vmul.f32 %v620_v38, %v567_v40  ;;  %v312_v8 = vmul.f32 %v621_v39, %v567_v40  ;;  %v362_v36 = vld [vmem:[%s738_s28 + $0x10] sm:$0xff]  ;;  %v363_v37 = vld [vmem:[%s738_s28 + $0x18] sm:$0xff] }
  0x1d   : > { %v313_v10 = vmul.f32 %v624_v41, %v567_v40  ;;  %v314_v11 = vmul.f32 %v625_v42, %v567_v40  ;;  %v315_v12 = vmul.f32 %v628_v43, %v567_v40  ;;  %v316_v13 = vmul.f32 %v629_v44, %v567_v40  ;;  %v364_v42 = vld [vmem:[%s738_s28 + $0x20] sm:$0xff]  ;;  %v365_v43 = vld [vmem:[%s738_s28 + $0x28] sm:$0xff]  ;;  %v366_v44 = vld [vmem:[%s738_s28 + $0x30] sm:$0xff] }
  0x1e   : > { %v317_v14 = vmul.f32 %v632_v45, %v567_v40  ;;  %v318_v15 = vmul.f32 %v633_v46, %v567_v40  ;;  %v319_v16 = vmul.f32 %v636_v47, %v567_v40  ;;  %v320_v17 = vmul.f32 %v637_v48, %v567_v40  ;;  %v367_v45 = vld [vmem:[%s738_s28 + $0x38] sm:$0xff] }
  0x1f   : > { %v328_v18 = vadd.f32 %v568_v9, %v289_v49  ;;  %v329_v19 = vadd.f32 %v568_v9, %v290_v50  ;;  %v330_v20 = vadd.f32 %v568_v9, %v291_v51  ;;  %v331_v21 = vadd.f32 %v568_v9, %v292_v52  ;;  %v368_v50 = vld [vmem:[%s738_s28 + $0x40] sm:$0xff]  ;;  %v369_v51 = vld [vmem:[%s738_s28 + $0x48] sm:$0xff]  ;;  %v370_v52 = vld [vmem:[%s738_s28 + $0x50] sm:$0xff] }
  0x20   : > { %v332_v22 = vadd.f32 %v568_v9, %v293_v53  ;;  %v333_v23 = vadd.f32 %v568_v9, %v294_v54  ;;  %v334_v24 = vadd.f32 %v568_v9, %v295_v55  ;;  %v335_v25 = vadd.f32 %v568_v9, %v296_v56 }
  0x21   : > { %v336_v26 = vadd.f32 %v568_v9, %v297_v57  ;;  %v337_v27 = vadd.f32 %v568_v9, %v298_v58  ;;  %v338_v28 = vadd.f32 %v568_v9, %v299_v59  ;;  %v339_v29 = vadd.f32 %v568_v9, %v300_v60  ;;  %v371_v57 = vld [vmem:[%s738_s28 + $0x58] sm:$0xff]  ;;  %v372_v58 = vld [vmem:[%s738_s28 + $0x60] sm:$0xff]  ;;  %v373_v59 = vld [vmem:[%s738_s28 + $0x68] sm:$0xff] }
  0x22   : > { %v340_v30 = vadd.f32 %v568_v9, %v301_v61  ;;  %v341_v31 = vadd.f32 %v568_v9, %v302_v62  ;;  %v342_v32 = vadd.f32 %v568_v9, %v303_v63  ;;  %v343_v33 = vadd.f32 %v568_v9, %v304_v0  ;;  %v374_v0 = vld [vmem:[%s738_s28 + $0x70] sm:$0xff] }
  0x23   : > { %v344_v38 = vadd.f32 %v568_v9, %v305_v1  ;;  %v345_v39 = vadd.f32 %v568_v9, %v306_v2  ;;  %v346_v40 = vadd.f32 %v568_v9, %v307_v7  ;;  %v347_v41 = vadd.f32 %v568_v9, %v308_v3  ;;  %v375_v1 = vld [vmem:[%s738_s28 + $0x78] sm:$0xff]  ;;  %v376_v2 = vld [vmem:[%s738_s28 + $0x80] sm:$0xff]  ;;  %v377_v7 = vld [vmem:[%s738_s28 + $0x88] sm:$0xff] }
  0x24   : > { %v348_v46 = vadd.f32 %v568_v9, %v309_v4  ;;  %v349_v47 = vadd.f32 %v568_v9, %v310_v5  ;;  %v350_v48 = vadd.f32 %v568_v9, %v311_v6  ;;  %v351_v49 = vadd.f32 %v568_v9, %v312_v8  ;;  %v378_v3 = vld [vmem:[%s738_s28 + $0x90] sm:$0xff]  ;;  %v379_v4 = vld [vmem:[%s738_s28 + $0x98] sm:$0xff] }
  0x25   : > { %v352_v53 = vadd.f32 %v568_v9, %v313_v10  ;;  %v353_v54 = vadd.f32 %v568_v9, %v314_v11  ;;  %v354_v55 = vadd.f32 %v568_v9, %v315_v12  ;;  %v355_v56 = vadd.f32 %v568_v9, %v316_v13  ;;  %v380_v11 = vld [vmem:[%s738_s28 + $0xa0] sm:$0xff]  ;;  %v381_v12 = vld [vmem:[%s738_s28 + $0xa8] sm:$0xff] }
  0x26   : > { %v356_v60 = vadd.f32 %v568_v9, %v317_v14  ;;  %v357_v61 = vadd.f32 %v568_v9, %v318_v15  ;;  %v358_v62 = vadd.f32 %v568_v9, %v319_v16  ;;  %v359_v63 = vadd.f32 %v568_v9, %v320_v17  ;;  %v382_v9 = vld [vmem:[%s738_s28 + $0xb0] sm:$0xff]  ;;  %v383_v17 = vld [vmem:[%s738_s28 + $0xb8] sm:$0xff] }
  0x27   : > { %v392_v5 = vadd.f32 %v360_v34, %v328_v18  ;;  %v393_v6 = vadd.f32 %v361_v35, %v329_v19  ;;  %v394_v8 = vadd.f32 %v362_v36, %v330_v20  ;;  %v395_v10 = vadd.f32 %v363_v37, %v331_v21  ;;  %v384_v18 = vld [vmem:[%s738_s28 + $0xc0] sm:$0xff]  ;;  %v385_v34 = vld [vmem:[%s738_s28 + $0xc8] sm:$0xff]  ;;  %v386_v21 = vld [vmem:[%s738_s28 + $0xd0] sm:$0xff] }
  0x28   : > { %v396_v13 = vadd.f32 %v364_v42, %v332_v22  ;;  %v397_v14 = vadd.f32 %v365_v43, %v333_v23  ;;  %v398_v15 = vadd.f32 %v366_v44, %v334_v24  ;;  %v399_v16 = vadd.f32 %v367_v45, %v335_v25  ;;  %v387_v37 = vld [vmem:[%s738_s28 + $0xd8] sm:$0xff]  ;;  %v388_v22 = vld [vmem:[%s738_s28 + $0xe0] sm:$0xff]  ;;  %v389_v44 = vld [vmem:[%s738_s28 + $0xe8] sm:$0xff] }
  0x29   : > { %v400_v19 = vadd.f32 %v368_v50, %v336_v26  ;;  %v401_v35 = vadd.f32 %v369_v51, %v337_v27  ;;  %v402_v20 = vadd.f32 %v370_v52, %v338_v28  ;;  %v403_v36 = vadd.f32 %v371_v57, %v339_v29  ;;  %v390_v25 = vld [vmem:[%s738_s28 + $0xf0] sm:$0xff]  ;;  %v391_v45 = vld [vmem:[%s738_s28 + $0xf8] sm:$0xff] }
  0x2a   : > { %v404_v42 = vadd.f32 %v372_v58, %v340_v30  ;;  %v405_v23 = vadd.f32 %v373_v59, %v341_v31  ;;  %v406_v43 = vadd.f32 %v374_v0, %v342_v32  ;;  %v407_v24 = vadd.f32 %v375_v1, %v343_v33 }
  0x2b   : > { %v408_v26 = vadd.f32 %v376_v2, %v344_v38  ;;  %v409_v50 = vadd.f32 %v377_v7, %v345_v39  ;;  %v410_v27 = vadd.f32 %v378_v3, %v346_v40  ;;  %v411_v51 = vadd.f32 %v379_v4, %v347_v41 }
  0x2c   : > { %v772_v28 = vadd.f32 %v380_v11, %v348_v46  ;;  %v774_v52 = vadd.f32 %v381_v12, %v349_v47  ;;  %v776_v29 = vadd.f32 %v382_v9, %v350_v48  ;;  %v778_v57 = vadd.f32 %v383_v17, %v351_v49 }
  0x2d   : > { %v780_v30 = vadd.f32 %v384_v18, %v352_v53  ;;  %v782_v31 = vadd.f32 %v385_v34, %v353_v54  ;;  %v784_v32 = vadd.f32 %v386_v21, %v354_v55  ;;  %v786_v33 = vadd.f32 %v387_v37, %v355_v56 }
  0x2e   : > { %v795_v38 = vadd.f32 %v388_v22, %v356_v60  ;;  %v797_v39 = vadd.f32 %v389_v44, %v357_v61  ;;  %v799_v40 = vadd.f32 %v390_v25, %v358_v62  ;;  %v801_v41 = vadd.f32 %v391_v45, %v359_v63 }
  0x2f   : > { %v424_v46 = vmax.f32 %v392_v5, 0.0  ;;  %v425_v47 = vmax.f32 %v393_v6, 0.0  ;;  %v426_v48 = vmax.f32 %v394_v8, 0.0  ;;  %v427_v49 = vmax.f32 %v395_v10, 0.0 }
  0x30   : > { %v428_v53 = vmax.f32 %v396_v13, 0.0  ;;  %v429_v54 = vmax.f32 %v397_v14, 0.0  ;;  %v430_v55 = vmax.f32 %v398_v15, 0.0  ;;  %v431_v56 = vmax.f32 %v399_v16, 0.0 }
  0x31   : > { %v432_v58 = vmax.f32 %v400_v19, 0.0  ;;  %v433_v59 = vmax.f32 %v401_v35, 0.0  ;;  %v434_v60 = vmax.f32 %v402_v20, 0.0  ;;  %v435_v61 = vmax.f32 %v403_v36, 0.0  ;;  %457 = vst.msk [vmem:[%s793_s5] sm:$0xff] %vm456_vm0, %v424_v46  ;;  %458 = vst.msk [vmem:[%s793_s5 + $0x8] sm:$0xff] %vm456_vm0, %v425_v47 }
  0x32   : > { %459 = vst.msk [vmem:[%s793_s5 + $0x10] sm:$0xff] %vm456_vm0, %v426_v48  ;;  %460 = vst.msk [vmem:[%s793_s5 + $0x18] sm:$0xff] %vm456_vm0, %v427_v49  ;;  %v436_v62 = vmax.f32 %v404_v42, 0.0  ;;  %v437_v63 = vmax.f32 %v405_v23, 0.0  ;;  %v438_v0 = vmax.f32 %v406_v43, 0.0  ;;  %v439_v1 = vmax.f32 %v407_v24, 0.0 }
  0x33   : > { %461 = vst.msk [vmem:[%s793_s5 + $0x20] sm:$0xff] %vm456_vm0, %v428_v53  ;;  %462 = vst.msk [vmem:[%s793_s5 + $0x28] sm:$0xff] %vm456_vm0, %v429_v54  ;;  %v440_v2 = vmax.f32 %v408_v26, 0.0  ;;  %v441_v7 = vmax.f32 %v409_v50, 0.0  ;;  %v442_v3 = vmax.f32 %v410_v27, 0.0  ;;  %v443_v4 = vmax.f32 %v411_v51, 0.0 }
  0x34   : > { %463 = vst.msk [vmem:[%s793_s5 + $0x30] sm:$0xff] %vm456_vm0, %v430_v55  ;;  %464 = vst.msk [vmem:[%s793_s5 + $0x38] sm:$0xff] %vm456_vm0, %v431_v56  ;;  %v444_v5 = vmax.f32 %v772_v28, 0.0  ;;  %v445_v6 = vmax.f32 %v774_v52, 0.0  ;;  %v446_v8 = vmax.f32 %v776_v29, 0.0  ;;  %v447_v10 = vmax.f32 %v778_v57, 0.0 }
  0x35   : > { %465 = vst.msk [vmem:[%s793_s5 + $0x40] sm:$0xff] %vm456_vm0, %v432_v58  ;;  %466 = vst.msk [vmem:[%s793_s5 + $0x48] sm:$0xff] %vm456_vm0, %v433_v59  ;;  %v448_v11 = vmax.f32 %v780_v30, 0.0  ;;  %v449_v12 = vmax.f32 %v782_v31, 0.0  ;;  %v450_v9 = vmax.f32 %v784_v32, 0.0  ;;  %v451_v13 = vmax.f32 %v786_v33, 0.0 }
  0x36   : > { %467 = vst.msk [vmem:[%s793_s5 + $0x50] sm:$0xff] %vm456_vm0, %v434_v60  ;;  %468 = vst.msk [vmem:[%s793_s5 + $0x58] sm:$0xff] %vm456_vm0, %v435_v61  ;;  %v452_v14 = vmax.f32 %v795_v38, 0.0  ;;  %v453_v15 = vmax.f32 %v797_v39, 0.0  ;;  %v454_v16 = vmax.f32 %v799_v40, 0.0  ;;  %v455_v17 = vmax.f32 %v801_v41, 0.0 }
  0x37   : > { %469 = vst.msk [vmem:[%s793_s5 + $0x60] sm:$0xff] %vm456_vm0, %v436_v62  ;;  %470 = vst.msk [vmem:[%s793_s5 + $0x68] sm:$0xff] %vm456_vm0, %v437_v63 }
  0x38   : > { %471 = vst.msk [vmem:[%s793_s5 + $0x70] sm:$0xff] %vm456_vm0, %v438_v0  ;;  %472 = vst.msk [vmem:[%s793_s5 + $0x78] sm:$0xff] %vm456_vm0, %v439_v1 }
  0x39   : > { %473 = vst.msk [vmem:[%s793_s5 + $0x80] sm:$0xff] %vm456_vm0, %v440_v2  ;;  %474 = vst.msk [vmem:[%s793_s5 + $0x88] sm:$0xff] %vm456_vm0, %v441_v7 }
  0x3a   : > { %475 = vst.msk [vmem:[%s793_s5 + $0x90] sm:$0xff] %vm456_vm0, %v442_v3  ;;  %476 = vst.msk [vmem:[%s793_s5 + $0x98] sm:$0xff] %vm456_vm0, %v443_v4 }
  0x3b   : > { %477 = vst.msk [vmem:[%s793_s5 + $0xa0] sm:$0xff] %vm456_vm0, %v444_v5  ;;  %478 = vst.msk [vmem:[%s793_s5 + $0xa8] sm:$0xff] %vm456_vm0, %v445_v6 }
  0x3c   : > { %479 = vst.msk [vmem:[%s793_s5 + $0xb0] sm:$0xff] %vm456_vm0, %v446_v8  ;;  %480 = vst.msk [vmem:[%s793_s5 + $0xb8] sm:$0xff] %vm456_vm0, %v447_v10 }
  0x3d   : > { %481 = vst.msk [vmem:[%s793_s5 + $0xc0] sm:$0xff] %vm456_vm0, %v448_v11  ;;  %482 = vst.msk [vmem:[%s793_s5 + $0xc8] sm:$0xff] %vm456_vm0, %v449_v12 }
  0x3e   : > { %483 = vst.msk [vmem:[%s793_s5 + $0xd0] sm:$0xff] %vm456_vm0, %v450_v9  ;;  %484 = vst.msk [vmem:[%s793_s5 + $0xd8] sm:$0xff] %vm456_vm0, %v451_v13 }
  0x3f   : > { %485 = vst.msk [vmem:[%s793_s5 + $0xe0] sm:$0xff] %vm456_vm0, %v452_v14  ;;  %486 = vst.msk [vmem:[%s793_s5 + $0xe8] sm:$0xff] %vm456_vm0, %v453_v15 }
  0x40   : > { %487 = vst.msk [vmem:[%s793_s5 + $0xf0] sm:$0xff] %vm456_vm0, %v454_v16  ;;  %488 = vst.msk [vmem:[%s793_s5 + $0xf8] sm:$0xff] %vm456_vm0, %v455_v17 }
  0x41 PF: > { %s14_s15 = sadd.s32 1, %s667_s15  }
  0x42   : > { %p11_p4 = scmp.ge.s32.totalorder %s14_s15, 4  }
  0x44   :  { %13 = sbr.rel (!%p11_p4) target bundleno = 1 (0x1), region = 69 }

// kernel: basic_block_forward.3
= control target key start
LH: loop header
LB: loop body
LE: loop exit
PB: predicated region body
PF: predicated region fallthrough
CT: control target
= control target key end

     0   :  { %s4434_s12 = smov 0   ;;  %s5974_s0 = inlined_call_operand.vmem [shape: f32[2,16,16,4], index: 0, kind: input, shape index: {}]   ;;  %s5975_s1 = inlined_call_operand.vmem [shape: bf16[3,12,4], index: 1, kind: input, shape index: {}]   ;;  %s5976_s2 = inlined_call_operand.vmem [shape: bf16[2,16,16,4], index: 2, kind: output, shape index: {0}]   ;;  %s5977_s3 = inlined_call_operand.vmem [shape: f32[2,2,4], index: 3, kind: output, shape index: {1}]  }
   0x1 LB: > { %s3752_s13 = sadd.s32 4294967295, %s4409_s12   ;;  %p3756_p0 = scmp.ge.s32.totalorder %s4409_s12, 1  ;;  %s4409_s12 = sphi %s4434_s12, %s14_s12  }
   0x2   : > { %p140_p1 = scmp.lt.s32.totalorder %s4409_s12, 3 }
   0x4   : > { %p141_p2 = pnand %p3756_p0, %p140_p1 }
   0x6   : > { %144 = sbr.rel (%p141_p2) target bundleno = 628 (0x274), region = 28 }
   0xb   : > { %p168_p3 = scmp.lt.s32.totalorder %s3752_s13, 1  ;;  %vm186_vm0 = vcmask 24576   ;;  %vm194_vm1 = vsmask.f32 256  ;;  %v223_v1 = vld [vmem:[#allocation2 + $0x78] sm:$0x1] }
   0xc   : > { %vm4444_vm2 = vmand %vm186_vm0, %vm194_vm1  ;;  %vm244_vm3 = vsmask.f32 7938  ;;  %v273_v2 = vld [vmem:[#allocation2 + $0x80] sm:$0x1]  ;;  %v220_v5 = vld [vmem:[#allocation2 + $0x6c] sm:$0x1] }
   0xd   : > { %s6008_s13 = smov (!%p168_p3, %s3752_s13), 1  ;;  %v224_v3 = vsel %vm4444_vm2, 0, %v223_v1  ;;  %vm4454_vm4 = vmand %vm186_vm0, %vm244_vm3  ;;  %vm183_vm5 = vcmask 27648   ;;  %v221_v7 = vsel %vm4444_vm2, 0, %v220_v5  ;;  %v270_v8 = vld [vmem:[#allocation2 + $0x74] sm:$0x1] }
   0xe   : > { %225 = vst [vmem:[#allocation2 + $0x78] sm:$0x1] %v224_v3  ;;  %v274_v6 = vsel %vm4454_vm4, 0, %v273_v2  ;;  %s4027_s14 = sshll.u32 %s6008_s13, 8  ;;  %222 = vst [vmem:[#allocation2 + $0x6c] sm:$0x1] %v221_v7 }
   0xf   : > { %275 = vst [vmem:[#allocation2 + $0x80] sm:$0x1] %v274_v6  ;;  %v271_v9 = vsel %vm4454_vm4, 0, %v270_v8  ;;  %v199_v10 = vld [vmem:[#allocation2 + $0x18] sm:$0x1]  ;;  %s4468_s17 = scalar_lea.vmem %s5974_s0, %s4027_s14  ;;  %v4411_v27 = vmov 0   ;;  %vm4503_vm8 = vmand %vm183_vm5, %vm244_vm3 }
  0x10   : > { %v249_v11 = vld [vmem:[#allocation2 + $0x20] sm:$0x1]  ;;  %272 = vst [vmem:[#allocation2 + $0x74] sm:$0x1] %v271_v9  ;;  %v200_v12 = vsel %vm4444_vm2, 0, %v199_v10  ;;  %v312_v16 = vld [vmem:[%s4468_s17 + $0x90] sm:$0xff] }
  0x11   : > { %v250_v13 = vsel %vm4454_vm4, 0, %v249_v11  ;;  %v196_v14 = vld [vmem:[#allocation2 + $0xc] sm:$0x1]  ;;  %v246_v15 = vld [vmem:[#allocation2 + $0x14] sm:$0x1]  ;;  %v313_v17 = vld [vmem:[%s4468_s17 + $0x98] sm:$0xff]  ;;  %v4047_v21 = vpack.c.bf16 %v312_v16, %v312_v16 }
  0x12   : > { %v310_v18 = vld [vmem:[%s4468_s17 + $0x80] sm:$0xff]  ;;  %201 = vst [vmem:[#allocation2 + $0x18] sm:$0x1] %v200_v12  ;;  %251 = vst [vmem:[#allocation2 + $0x20] sm:$0x1] %v250_v13  ;;  %v197_v19 = vsel %vm4444_vm2, 0, %v196_v14  ;;  %v4048_v22 = vpack.c.bf16 %v313_v17, %v313_v17 }
  0x13   : > { %v247_v20 = vsel %vm4454_vm4, 0, %v246_v15  ;;  %v311_v23 = vld [vmem:[%s4468_s17 + $0x88] sm:$0xff]  ;;  %v4045_v24 = vpack.c.bf16 %v310_v18, %v310_v18  ;;  %v296_v25 = vld [vmem:[%s4468_s17 + $0x10] sm:$0xff]  ;;  %v297_v26 = vld [vmem:[%s4468_s17 + $0x18] sm:$0xff]  ;;  %198 = vst [vmem:[#allocation2 + $0xc] sm:$0x1] %v197_v19 }
  0x14   : > { %248 = vst [vmem:[#allocation2 + $0x14] sm:$0x1] %v247_v20  ;;  %184 = vst.msk [vmem:[#allocation2] sm:$0xf] %vm183_vm5, %v4411_v27  ;;  %vm422_vm6 = vsmask.f32 4368  ;;  %v4046_v28 = vpack.c.bf16 %v311_v23, %v311_v23  ;;  %v4031_v29 = vpack.c.bf16 %v296_v25, %v296_v25  ;;  %v4490_v30 = vpack.c.bf16 %v297_v26, %v297_v26 }
  0x15   : > { %185 = vst.msk [vmem:[#allocation2 + $0x4] sm:$0xf] %vm183_vm5, %v4411_v27  ;;  %189 = vst.msk [vmem:[#allocation2 + $0xcc] sm:$0xf] %vm183_vm5, %v4411_v27  ;;  %v294_v31 = vld [vmem:[%s4468_s17] sm:$0xff]  ;;  %v295_v32 = vld [vmem:[%s4468_s17 + $0x8] sm:$0xff] }
  0x16   : > { %187 = vst.msk [vmem:[#allocation2 + $0x8] sm:$0x1] %vm186_vm0, %v4411_v27  ;;  %191 = vst.msk [vmem:[#allocation2 + $0xd4] sm:$0x1] %vm186_vm0, %v4411_v27  ;;  %v578_v33 = vshrl.u32 %v4047_v21, 16  ;;  %v581_v34 = vshll.u32 %v4047_v21, 16  ;;  %v4029_v45 = vpack.c.bf16 %v294_v31, %v294_v31  ;;  %v4499_v46 = vpack.c.bf16 %v295_v32, %v295_v32 }
  0x17   : > { %190 = vst.msk [vmem:[#allocation2 + $0xd0] sm:$0xf] %vm183_vm5, %v4411_v27  ;;  %v586_v35 = vshrl.u32 %v4048_v22, 16  ;;  %v589_v36 = vshll.u32 %v4048_v22, 16  ;;  %v561_v37 = vshrl.u32 %v4045_v24, 16  ;;  %v564_v38 = vshll.u32 %v4045_v24, 16  ;;  %vm4495_vm7 = vmor %vm194_vm1, %vm422_vm6 }
  0x18   : > { %v569_v39 = vshrl.u32 %v4046_v28, 16  ;;  %v572_v40 = vshll.u32 %v4046_v28, 16  ;;  %v580_v42 = vrot.slane %v578_v33, 7  ;;  %v809_v44 = vld [vmem:[#allocation2 + $0x78] sm:$0xf]  ;;  %v442_v51 = vshrl.u32 %v4031_v29, 16 }
  0x19   : > { %v588_v43 = vrot.slane %v586_v35, 7  ;;  %v813_v48 = vld [vmem:[#allocation2 + $0x80] sm:$0x1]  ;;  %v563_v49 = vrot.slane %v561_v37, 7  ;;  %v445_v52 = vshll.u32 %v4031_v29, 16  ;;  %v450_v9 = vshrl.u32 %v4490_v30, 16 }
  0x1a   : > { %v571_v50 = vrot.slane %v569_v39, 7  ;;  %v583_v53 = vor.u32 %v581_v34, %v580_v42  ;;  %v584_v54 = vrot.slane %v580_v42, 4  ;;  %v802_v57 = vld [vmem:[#allocation2 + $0x6c] sm:$0xf]  ;;  %v806_v58 = vld [vmem:[#allocation2 + $0x74] sm:$0x1] }
  0x1b   : > { %v591_v55 = vor.u32 %v589_v36, %v588_v43  ;;  %v593_v56 = vrot.slane %v588_v43, 4  ;;  %v566_v59 = vor.u32 %v564_v38, %v563_v49  ;;  %v567_v60 = vrot.slane %v563_v49, 4  ;;  %v205_v5 = vld [vmem:[#allocation2 + $0x30] sm:$0x1]  ;;  %v753_v10 = vld [vmem:[#allocation2 + $0x18] sm:$0xf] }
  0x1c   : > { %v574_v61 = vor.u32 %v572_v40, %v571_v50  ;;  %v576_v62 = vrot.slane %v571_v50, 4  ;;  %v810_v1 = vsel %vm4503_vm8, %v583_v53, %v809_v44  ;;  %v444_v3 = vrot.slane %v442_v51, 7  ;;  %v255_v11 = vld [vmem:[#allocation2 + $0x38] sm:$0x1]  ;;  %v300_v16 = vld [vmem:[%s4468_s17 + $0x30] sm:$0xff]  ;;  %v314_v42 = vld [vmem:[%s4468_s17 + $0xa0] sm:$0xff] }
  0x1d   : > { %v592_v63 = vsel %vm4495_vm7, %v584_v54, %v591_v55  ;;  %v814_v2 = vsel %vm4444_vm2, %v593_v56, %v813_v48  ;;  %811 = vst [vmem:[#allocation2 + $0x78] sm:$0xf] %v810_v1  ;;  %v803_v7 = vsel %vm4503_vm8, %v566_v59, %v802_v57  ;;  %v453_v14 = vshll.u32 %v4490_v30, 16  ;;  %v226_v21 = vld [vmem:[#allocation2 + $0x84] sm:$0x1]  ;;  %v301_v40 = vld [vmem:[%s4468_s17 + $0x38] sm:$0xff] }
  0x1e   : > { %812 = vst.msk [vmem:[#allocation2 + $0x7c] sm:$0xf] %vm183_vm5, %v592_v63  ;;  %815 = vst [vmem:[#allocation2 + $0x80] sm:$0x1] %v814_v2  ;;  %v575_v6 = vsel %vm4495_vm7, %v567_v60, %v574_v61  ;;  %v807_v8 = vsel %vm4444_vm2, %v576_v62, %v806_v58  ;;  %v447_v12 = vor.u32 %v445_v52, %v444_v3  ;;  %v448_v13 = vrot.slane %v444_v3, 4  ;;  %v315_v52 = vld [vmem:[%s4468_s17 + $0xa8] sm:$0xff] }
  0x1f   : > { %804 = vst [vmem:[#allocation2 + $0x6c] sm:$0xf] %v803_v7  ;;  %805 = vst.msk [vmem:[#allocation2 + $0x70] sm:$0xf] %vm183_vm5, %v575_v6  ;;  %v425_v15 = vshrl.u32 %v4029_v45, 16  ;;  %v452_v17 = vrot.slane %v450_v9, 7  ;;  %v4532_v31 = vpack.c.bf16 %v300_v16, %v300_v16  ;;  %v4036_v56 = vpack.c.bf16 %v301_v40, %v301_v40 }
  0x20   : > { %808 = vst [vmem:[#allocation2 + $0x74] sm:$0x1] %v807_v8  ;;  %v428_v18 = vshll.u32 %v4029_v45, 16  ;;  %v433_v19 = vshrl.u32 %v4499_v46, 16  ;;  %v436_v20 = vshll.u32 %v4499_v46, 16  ;;  %v754_v22 = vsel %vm4503_vm8, %v447_v12, %v753_v10  ;;  %v316_v53 = vld [vmem:[%s4468_s17 + $0xb0] sm:$0xff] }
  0x21   : > { %v757_v23 = vld [vmem:[#allocation2 + $0x20] sm:$0x1]  ;;  %v427_v24 = vrot.slane %v425_v15, 7  ;;  %v206_v25 = vsel %vm4444_vm2, 0, %v205_v5  ;;  %v256_v26 = vsel %vm4454_vm4, 0, %v255_v11  ;;  %v455_v27 = vor.u32 %v453_v14, %v452_v17  ;;  %v317_v1 = vld [vmem:[%s4468_s17 + $0xb8] sm:$0xff] }
  0x22   : > { %v457_v28 = vrot.slane %v452_v17, 4  ;;  %755 = vst [vmem:[#allocation2 + $0x18] sm:$0xf] %v754_v22  ;;  %v435_v29 = vrot.slane %v433_v19, 7  ;;  %v746_v30 = vld [vmem:[#allocation2 + $0xc] sm:$0xf]  ;;  %v4557_v58 = vpack.c.bf16 %v314_v42, %v314_v42  ;;  %v4564_v3 = vpack.c.bf16 %v315_v52, %v315_v52 }
  0x23   : > { %207 = vst [vmem:[#allocation2 + $0x30] sm:$0x1] %v206_v25  ;;  %257 = vst [vmem:[#allocation2 + $0x38] sm:$0x1] %v256_v26  ;;  %vm1323_vm9 = vcmask 1046528   ;;  %v430_v32 = vor.u32 %v428_v18, %v427_v24  ;;  %v431_v33 = vrot.slane %v427_v24, 4  ;;  %v456_v36 = vsel %vm4495_vm7, %v448_v13, %v455_v27 }
  0x24   : > { %v750_v34 = vld [vmem:[#allocation2 + $0x14] sm:$0x1]  ;;  %v227_v35 = vsel %vm4444_vm2, 0, %v226_v21  ;;  %v758_v37 = vsel %vm4444_vm2, %v457_v28, %v757_v23  ;;  %v438_v38 = vor.u32 %v436_v20, %v435_v29  ;;  %v440_v39 = vrot.slane %v435_v29, 4  ;;  %v1529_v44 = vld [vmem:[#allocation2 + $0x78] sm:$0xe] }
  0x25   : > { %228 = vst [vmem:[#allocation2 + $0x84] sm:$0x1] %v227_v35  ;;  %v1491_v43 = vld [vmem:[#allocation2 + $0x7c] sm:$0xf]  ;;  %756 = vst.msk [vmem:[#allocation2 + $0x1c] sm:$0xf] %vm183_vm5, %v456_v36  ;;  %v747_v45 = vsel %vm4503_vm8, %v430_v32, %v746_v30  ;;  %v4570_v11 = vpack.c.bf16 %v316_v53, %v316_v53  ;;  %v4588_v30 = vpack.c.bf16 %v317_v1, %v317_v1 }
  0x26   : > { %759 = vst [vmem:[#allocation2 + $0x20] sm:$0x1] %v758_v37  ;;  %v4545_v46 = vld [vmem:[#allocation2 + $0x80] ss:$0 sps:$4 sm:$0x11]   ;;  %v3883_v48 = vcombine.low %v1529_v44, %v1491_v43  ;;  %v439_v49 = vsel %vm4495_vm7, %v431_v33, %v438_v38  ;;  %v751_v50 = vsel %vm4444_vm2, %v440_v39, %v750_v34  ;;  %v476_v51 = vshrl.u32 %v4532_v31, 16 }
  0x27   : > { %748 = vst [vmem:[#allocation2 + $0xc] sm:$0xf] %v747_v45  ;;  %v4554_v54 = vld [vmem:[#allocation2 + $0x70] sm:$0xf]  ;;  %v1528_v55 = vld [vmem:[#allocation2 + $0x6c] sm:$0xe] }
  0x28   : > { %749 = vst.msk [vmem:[#allocation2 + $0x10] sm:$0xf] %vm183_vm5, %v439_v49  ;;  %752 = vst [vmem:[#allocation2 + $0x14] sm:$0x1] %v751_v50  ;;  %v276_v57 = vld [vmem:[#allocation2 + $0x8c] sm:$0x1]  ;;  %v3882_v62 = vcombine.low %v1528_v55, %v4554_v54 }
  0x29   : > { %v1963_v59 = vrot.slane %v3883_v48, 1  ;;  %v1964_v60 = vrot.slane %v4545_v46, 1  ;;  %v4560_v61 = vld [vmem:[#allocation2 + $0x74] ss:$0 sps:$4 sm:$0x11]   ;;  %v478_v63 = vrot.slane %v476_v51, 7 }
  0x2a   : > { %v1490_v2 = vld [vmem:[#allocation2 + $0x78] sm:$0xf]  ;;  %v298_v5 = vld [vmem:[%s4468_s17 + $0x20] sm:$0xff]  ;;  %v299_v6 = vld [vmem:[%s4468_s17 + $0x28] sm:$0xff]  ;;  %v1960_v8 = vrot.slane %v3882_v62, 1  ;;  %v1961_v9 = vrot.slane %v4560_v61, 1 }
  0x2b   : > { %v1965_v7 = vsel %vm1323_vm9, %v1963_v59, %v1964_v60  ;;  %v1521_v10 = vld [vmem:[#allocation2 + $0x18] sm:$0xe]  ;;  %v318_v12 = vld [vmem:[%s4468_s17 + $0xc0] sm:$0xff]  ;;  %v319_v13 = vld [vmem:[%s4468_s17 + $0xc8] sm:$0xff]  ;;  %s4412_s18 = smov 8   ;;  %v479_v14 = vshll.u32 %v4532_v31, 16  ;;  %v4576_v19 = vcombine.low %v1490_v2, %v1491_v43  ;;  %v4590_v33 = vpack.c.bf16 %v298_v5, %v298_v5 }
  0x2c   : > { %2002 = vrot.lane.b32.xlu0 %v1965_v7, %s4412_s18  ;;  %v482_v15 = vrot.slane %v478_v63, 4  ;;  %v484_v16 = vshrl.u32 %v4036_v56, 16  ;;  %v487_v17 = vshll.u32 %v4036_v56, 16  ;;  %v767_v18 = vld [vmem:[#allocation2 + $0x30] sm:$0xf]  ;;  %v1962_v20 = vsel %vm1323_vm9, %v1960_v8, %v1961_v9  ;;  %s4413_s19 = smov 4  }
  0x2d   : > { %v4579_v21 = vld [vmem:[#allocation2 + $0x1c] sm:$0xf]  ;;  %v277_v22 = vsel %vm4454_vm4, 0, %v276_v57  ;;  %v595_v23 = vshrl.u32 %v4557_v58, 16  ;;  %2000 = vrot.lane.b32.xlu1 %v1962_v20, %s4412_s18  ;;  %v481_v27 = vor.u32 %v479_v14, %v478_v63  ;;  %v771_v29 = vld [vmem:[#allocation2 + $0x38] sm:$0x1]  ;;  %v4592_v34 = vpack.c.bf16 %v299_v6, %v299_v6 }
  0x2e   : > { %v4585_v24 = vld [vmem:[#allocation2 + $0x20] ss:$0 sps:$4 sm:$0x11]   ;;  %v3875_v25 = vcombine.low %v1521_v10, %v4579_v21  ;;  %v1520_v26 = vld [vmem:[#allocation2 + $0xc] sm:$0xe]  ;;  %v486_v28 = vrot.slane %v484_v16, 7  ;;  %v4594_v35 = vpack.c.bf16 %v318_v12, %v318_v12  ;;  %v4596_v36 = vpack.c.bf16 %v319_v13, %v319_v13 }
  0x2f   : > { %278 = vst [vmem:[#allocation2 + $0x8c] sm:$0x1] %v277_v22  ;;  %v1473_v31 = vld [vmem:[#allocation2 + $0x10] sm:$0xf]  ;;  %v1472_v32 = vld [vmem:[#allocation2 + $0xc] sm:$0xf]  ;;  %v768_v45 = vsel %vm4503_vm8, %v481_v27, %v767_v18 }
  0x30   : > { %v1939_v37 = vrot.slane %v3875_v25, 1  ;;  %v1940_v38 = vrot.slane %v4585_v24, 1  ;;  %v4599_v39 = vld [vmem:[#allocation2 + $0x14] ss:$0 sps:$4 sm:$0x11]   ;;  %v3874_v40 = vcombine.low %v1520_v26, %v1473_v31  ;;  %v4601_v42 = vcombine.low %v1472_v32, %v1473_v31  ;;  %s4028_s26 = sshll.u32 %s6008_s13, 7 }
  0x31   : > { %v489_v43 = vor.u32 %v487_v17, %v486_v28  ;;  %v491_v44 = vrot.slane %v486_v28, 4  ;;  %v597_v48 = vrot.slane %v595_v23, 7  ;;  %v229_v49 = vld [vmem:[#allocation2 + $0x90] sm:$0x1]  ;;  %v1937_v52 = vrot.slane %v4599_v39, 1  ;;  %s5735_s29 = scalar_lea.vmem %s5976_s2, %s4028_s26  ;;  %s3761_s30 = sshll.u32 %s6008_s13, 1 }
  0x32   : > { %v1941_v50 = vsel %vm1323_vm9, %v1939_v37, %v1940_v38  ;;  %v1936_v51 = vrot.slane %v3874_v40, 1  ;;  %769 = vst [vmem:[#allocation2 + $0x30] sm:$0xf] %v768_v45  ;;  %v598_v53 = vshll.u32 %v4557_v58, 16  ;;  %v279_v55 = vld [vmem:[#allocation2 + $0x98] sm:$0x1]  ;;  %s181_s6 = scalar_lea.vmem %s5977_s3, %s3761_s30 }
  0x33   : > { %1986 = vrot.lane.b32.xlu1 %v1941_v50, %s4412_s18  ;;  %v490_v56 = vsel %vm4495_vm7, %v482_v15, %v489_v43  ;;  %v772_v57 = vsel %vm4444_vm2, %v491_v44, %v771_v29  ;;  %v601_v59 = vrot.slane %v597_v48, 4  ;;  %v603_v60 = vshrl.u32 %v4564_v3, 16  ;;  %v816_v62 = vld [vmem:[#allocation2 + $0x84] sm:$0xf]  ;;  %v252_v10 = vld [vmem:[#allocation2 + $0x2c] sm:$0x1] }
  0x34   : > { %v1938_v63 = vsel %vm1323_vm9, %v1936_v51, %v1937_v52  ;;  %770 = vst.msk [vmem:[#allocation2 + $0x34] sm:$0xf] %vm183_vm5, %v490_v56  ;;  %773 = vst [vmem:[#allocation2 + $0x38] sm:$0x1] %v772_v57  ;;  %v600_v1 = vor.u32 %v598_v53, %v597_v48  ;;  %v606_v58 = vshll.u32 %v4564_v3, 16  ;;  %v230_v2 = vsel %vm4444_vm2, 0, %v229_v49 }
  0x35   : > { %v202_v5 = vld [vmem:[#allocation2 + $0x24] sm:$0x1]  ;;  %1984 = vrot.lane.b32.xlu0 %v1938_v63, %s4412_s18  ;;  %v605_v6 = vrot.slane %v603_v60, 7  ;;  %231 = vst [vmem:[#allocation2 + $0x90] sm:$0x1] %v230_v2  ;;  %v280_v7 = vsel %vm4454_vm4, 0, %v279_v55 }
  0x36   : > { %v612_v8 = vshrl.u32 %v4570_v11, 16  ;;  %v615_v9 = vshll.u32 %v4570_v11, 16  ;;  %v817_v12 = vsel %vm4503_vm8, %v600_v1, %v816_v62  ;;  %v820_v3 = vld [vmem:[#allocation2 + $0x8c] sm:$0x1]  ;;  %281 = vst [vmem:[#allocation2 + $0x98] sm:$0x1] %v280_v7 }
  0x37   : > { %v620_v13 = vshrl.u32 %v4588_v30, 16  ;;  %v623_v14 = vshll.u32 %v4588_v30, 16  ;;  %vm1050_vm10 = vsmask.f32 7424  ;;  %v1665_v15 = vshrl.u32 %v4601_v42, 16  ;;  %v320_v37 = vld [vmem:[%s4468_s17 + $0xd0] sm:$0xff] }
  0x38   : > { %v1488_v16 = vld [vmem:[#allocation2 + $0x6c] sm:$0xf]  ;;  %v608_v17 = vor.u32 %v606_v58, %v605_v6  ;;  %v610_v18 = vrot.slane %v605_v6, 4  ;;  %818 = vst [vmem:[#allocation2 + $0x84] sm:$0xf] %v817_v12  ;;  %v614_v20 = vrot.slane %v612_v8, 7  ;;  %v4654_v60 = vpack.c.bf16 %v320_v37, %v320_v37 }
  0x39   : > { %v1667_v11 = vshll.u32 %v4601_v42, 16  ;;  %v1474_v22 = vld [vmem:[#allocation2 + $0x18] sm:$0xf]  ;;  %v622_v23 = vrot.slane %v620_v13, 7  ;;  %v1672_v25 = vshll.u32 %v4599_v39, 16  ;;  %v203_v26 = vsel %vm4444_vm2, 0, %v202_v5 }
  0x3a   : > { %v253_v27 = vsel %vm4454_vm4, 0, %v252_v10  ;;  %v1523_v28 = vld [vmem:[#allocation2 + $0x30] sm:$0xe]  ;;  %v609_v29 = vsel %vm4495_vm7, %v601_v59, %v608_v17  ;;  %v821_v30 = vsel %vm4444_vm2, %v610_v18, %v820_v3  ;;  %v617_v31 = vor.u32 %v615_v9, %v614_v20  ;;  %204 = vst [vmem:[#allocation2 + $0x24] sm:$0x1] %v203_v26  ;;  %v321_v44 = vld [vmem:[%s4468_s17 + $0xd8] sm:$0xff] }
  0x3b   : > { %v618_v32 = vrot.slane %v614_v20, 4  ;;  %254 = vst [vmem:[#allocation2 + $0x2c] sm:$0x1] %v253_v27  ;;  %819 = vst.msk [vmem:[#allocation2 + $0x88] sm:$0xf] %vm183_vm5, %v609_v29  ;;  %v625_v38 = vor.u32 %v623_v14, %v622_v23  ;;  %v627_v39 = vrot.slane %v622_v23, 4  ;;  %v4643_v45 = vcombine.low %v1488_v16, %v4554_v54 }
  0x3c   : > { %822 = vst [vmem:[#allocation2 + $0x8c] sm:$0x1] %v821_v30  ;;  %v1669_v40 = vrot.slane %v1667_v11, 1  ;;  %v1674_v43 = vrot.slane %v1672_v25, 1  ;;  %v4646_v48 = vcombine.low %v1474_v22, %v4579_v21  ;;  %v1478_v49 = vld [vmem:[#allocation2 + $0x30] sm:$0xf]  ;;  %v4664_v5 = vpack.c.bf16 %v321_v44, %v321_v44 }
  0x3d   : > { %v1479_v50 = vld [vmem:[#allocation2 + $0x34] sm:$0xf]  ;;  %v459_v51 = vshrl.u32 %v4590_v33, 16  ;;  %v462_v52 = vshll.u32 %v4590_v33, 16  ;;  %v626_v56 = vsel %vm4495_vm7, %v618_v32, %v625_v38  ;;  %v823_v57 = vld [vmem:[#allocation2 + $0x90] sm:$0xf] }
  0x3e   : > { %v4650_v53 = vld [vmem:[#allocation2 + $0x38] ss:$0 sps:$4 sm:$0x11]   ;;  %v3877_v55 = vcombine.low %v1523_v28, %v1479_v50  ;;  %v1670_v59 = vor.u32 %v1669_v40, %v1665_v15  ;;  %v824_v54 = vsel %vm4503_vm8, %v617_v31, %v823_v57  ;;  %826 = vst.msk [vmem:[#allocation2 + $0x94] sm:$0xf] %vm183_vm5, %v626_v56  ;;  %v467_v63 = vshrl.u32 %v4592_v34, 16 }
  0x3f   : > { %v827_v21 = vld [vmem:[#allocation2 + $0x98] sm:$0x1]  ;;  %v461_v62 = vrot.slane %v459_v51, 7  ;;  %v470_v33 = vshll.u32 %v4592_v34, 16  ;;  %v1946_v58 = vrot.slane %v4650_v53, 1  ;;  %v1677_v10 = vshrl.u32 %v4646_v48, 16 }
  0x40   : > { %v1945_v1 = vrot.slane %v3877_v55, 1  ;;  %825 = vst [vmem:[#allocation2 + $0x90] sm:$0xf] %v824_v54  ;;  %v828_v2 = vsel %vm4444_vm2, %v627_v39, %v827_v21  ;;  %v1530_v6 = vld [vmem:[#allocation2 + $0x84] sm:$0xe]  ;;  %v469_v9 = vrot.slane %v467_v63, 7  ;;  %v4667_v12 = vcombine.low %v1478_v49, %v1479_v50 }
  0x41   : > { %829 = vst [vmem:[#allocation2 + $0x98] sm:$0x1] %v828_v2  ;;  %v464_v7 = vor.u32 %v462_v52, %v461_v62  ;;  %v465_v8 = vrot.slane %v461_v62, 4  ;;  %v1492_v3 = vld [vmem:[#allocation2 + $0x84] sm:$0xf]  ;;  %v1679_v15 = vshll.u32 %v4646_v48, 16  ;;  %v1675_v18 = vsel %vm1050_vm10, %v1670_v59, %v1674_v43 }
  0x42   : > { %v1947_v34 = vsel %vm1323_vm9, %v1945_v1, %v1946_v58  ;;  %v760_v13 = vld [vmem:[#allocation2 + $0x24] sm:$0xf]  ;;  %v764_v14 = vld [vmem:[#allocation2 + $0x2c] sm:$0x1]  ;;  %v1684_v16 = vshll.u32 %v4585_v24, 16  ;;  %v472_v20 = vor.u32 %v470_v33, %v469_v9  ;;  %v474_v11 = vrot.slane %v469_v9, 4 }
  0x43   : > { %1990 = vrot.lane.b32.xlu1 %v1947_v34, %s4412_s18  ;;  %v1493_v17 = vld [vmem:[#allocation2 + $0x88] sm:$0xf]  ;;  %v761_v22 = vsel %vm4503_vm8, %v464_v7, %v760_v13  ;;  %v302_v23 = vld [vmem:[%s4468_s17 + $0x40] sm:$0xff]  ;;  %v4677_v25 = vld [vmem:[#allocation2 + $0x8c] ss:$0 sps:$4 sm:$0x11]  }
  0x44   : > { %v3884_v26 = vcombine.low %v1530_v6, %v1493_v17  ;;  %762 = vst [vmem:[#allocation2 + $0x24] sm:$0xf] %v761_v22  ;;  %v1681_v27 = vrot.slane %v1679_v15, 1  ;;  %v1686_v28 = vrot.slane %v1684_v16, 1  ;;  %v1761_v24 = vshrl.u32 %v4643_v45, 16  ;;  %v303_v44 = vld [vmem:[%s4468_s17 + $0x48] sm:$0xff] }
  0x45   : > { %v473_v29 = vsel %vm4495_vm7, %v465_v8, %v472_v20  ;;  %v765_v30 = vsel %vm4444_vm2, %v474_v11, %v764_v14  ;;  %v1763_v31 = vshll.u32 %v4643_v45, 16  ;;  %v1768_v32 = vshll.u32 %v4560_v61, 16  ;;  %v1495_v39 = vld [vmem:[#allocation2 + $0x94] sm:$0xf]  ;;  %v305_v9 = vld [vmem:[%s4468_s17 + $0x58] sm:$0xff] }
  0x46   : > { %v1966_v37 = vrot.slane %v3884_v26, 1  ;;  %v1967_v38 = vrot.slane %v4677_v25, 1  ;;  %763 = vst.msk [vmem:[#allocation2 + $0x28] sm:$0xf] %vm183_vm5, %v473_v29  ;;  %766 = vst [vmem:[#allocation2 + $0x2c] sm:$0x1] %v765_v30  ;;  %v1682_v40 = vor.u32 %v1681_v27, %v1677_v10  ;;  %v4690_v49 = vcombine.low %v1492_v3, %v1493_v17 }
  0x47   : > { %v1773_v43 = vshrl.u32 %v4576_v19, 16  ;;  %v1494_v50 = vld [vmem:[#allocation2 + $0x90] sm:$0xf]  ;;  %1856 = vrot.lane.b32.xlu1 %v1675_v18, %s4413_s19  ;;  %v1765_v61 = vrot.slane %v1763_v31, 1  ;;  %v1770_v52 = vrot.slane %v1768_v32, 1  ;;  %v4693_v55 = vpack.c.bf16 %v302_v23, %v302_v23 }
  0x48   : > { %v1531_v51 = vld [vmem:[#allocation2 + $0x90] sm:$0xe]  ;;  %v1968_v56 = vsel %vm1323_vm9, %v1966_v37, %v1967_v38  ;;  %v4696_v57 = vcombine.low %v1494_v50, %v1495_v39  ;;  %v4282_v59 = vld [vmem:[#allocation2 + $0x98] ss:$0 sps:$4 sm:$0x11]   ;;  %v1687_v21 = vsel %vm1050_vm10, %v1682_v40, %v1686_v28  ;;  %v1775_v33 = vshll.u32 %v4576_v19, 16 }
  0x49   : > { %v3885_v54 = vcombine.low %v1531_v51, %v1495_v39  ;;  %v304_v62 = vld [vmem:[%s4468_s17 + $0x50] sm:$0xff]  ;;  %2004 = vrot.lane.b32.xlu0 %v1968_v56, %s4412_s18  ;;  %v1766_v63 = vor.u32 %v1765_v61, %v1761_v24  ;;  %v1780_v1 = vshll.u32 %v4545_v46, 16  ;;  %v1785_v58 = vshrl.u32 %v4690_v49, 16  ;;  %v232_v27 = vld [vmem:[#allocation2 + $0x9c] sm:$0x1] }
  0x4a   : > { %v1970_v6 = vrot.slane %v4282_v59, 1  ;;  %v1797_v7 = vshrl.u32 %v4696_v57, 16  ;;  %v1799_v8 = vshll.u32 %v4696_v57, 16  ;;  %v1804_v3 = vshll.u32 %v4282_v59, 16  ;;  %v282_v40 = vld [vmem:[#allocation2 + $0xa4] sm:$0x1] }
  0x4b   : > { %v1969_v2 = vrot.slane %v3885_v54, 1  ;;  %v1476_v10 = vld [vmem:[#allocation2 + $0x24] sm:$0xf]  ;;  %1858 = vrot.lane.b32.xlu1 %v1687_v21, %s4413_s19  ;;  %v1777_v13 = vrot.slane %v1775_v33, 1  ;;  %v4708_v14 = vpack.c.bf16 %v303_v44, %v303_v44  ;;  %v4710_v15 = vpack.c.bf16 %v304_v62, %v304_v62  ;;  %v235_v51 = vld [vmem:[#allocation2 + $0xa8] sm:$0x1] }
  0x4c   : > { %v1522_v34 = vld [vmem:[#allocation2 + $0x24] sm:$0xe]  ;;  %v1801_v16 = vrot.slane %v1799_v8, 1  ;;  %v1782_v17 = vrot.slane %v1780_v1, 1  ;;  %v1787_v18 = vshll.u32 %v4690_v49, 16  ;;  %v1771_v11 = vsel %vm1050_vm10, %v1766_v63, %v1770_v52 }
  0x4d   : > { %v1971_v46 = vsel %vm1323_vm9, %v1969_v2, %v1970_v6  ;;  %v1477_v20 = vld [vmem:[#allocation2 + $0x28] sm:$0xf]  ;;  %v1806_v22 = vrot.slane %v1804_v3, 1  ;;  %v1778_v23 = vor.u32 %v1777_v13, %v1773_v43  ;;  %v1792_v26 = vshll.u32 %v4677_v25, 16  ;;  %v285_v54 = vld [vmem:[#allocation2 + $0xb0] sm:$0x1] }
  0x4e   : > { %2006 = vrot.lane.b32.xlu0 %v1971_v46, %s4412_s18  ;;  %v4717_v28 = vcombine.low %v1476_v10, %v1477_v20  ;;  %v4285_v24 = vld [vmem:[#allocation2 + $0x2c] ss:$0 sps:$4 sm:$0x11]   ;;  %v3876_v29 = vcombine.low %v1522_v34, %v1477_v20  ;;  %v1802_v30 = vor.u32 %v1801_v16, %v1797_v7  ;;  %v4719_v31 = vpack.c.bf16 %v305_v9, %v305_v9  ;;  %v258_v20 = vld [vmem:[#allocation2 + $0x44] sm:$0x1] }
  0x4f   : > { %v4722_v32 = vsel %vm1050_vm10, %v1778_v23, %v1782_v17  ;;  %v1789_v37 = vrot.slane %v1787_v18, 1  ;;  %v1701_v38 = vshrl.u32 %v4667_v12, 16  ;;  %v1703_v39 = vshll.u32 %v4667_v12, 16  ;;  %v4928_v0 = vld [vmem:[#allocation2 + $0x28] sm:$0xf] }
  0x50   : > { %v1942_v43 = vrot.slane %v3876_v29, 1  ;;  %v1943_v44 = vrot.slane %v4285_v24, 1  ;;  %v1807_v25 = vsel %vm1050_vm10, %v1802_v30, %v1806_v22  ;;  %v1794_v50 = vrot.slane %v1792_v26, 1 }
  0x51   : > { %1878 = vrot.lane.b32.xlu1 %v1807_v25, %s4413_s19  ;;  %v1689_v61 = vshrl.u32 %v4717_v28, 16  ;;  %v1691_v52 = vshll.u32 %v4717_v28, 16  ;;  %v1696_v56 = vshll.u32 %v4285_v24, 16  ;;  %v1705_v59 = vrot.slane %v1703_v39, 1 }
  0x52   : > { %v1944_v21 = vsel %vm1323_vm9, %v1942_v43, %v1943_v44  ;;  %v1708_v62 = vshll.u32 %v4650_v53, 16  ;;  %v233_v63 = vsel %vm4444_vm2, 0, %v232_v27  ;;  %v283_v33 = vsel %vm4454_vm4, 0, %v282_v40 }
  0x53   : > { %1988 = vrot.lane.b32.xlu0 %v1944_v21, %s4412_s18  ;;  %v1693_v1 = vrot.slane %v1691_v52, 1  ;;  %v1698_v2 = vrot.slane %v1696_v56, 1  ;;  %v1790_v6 = vor.u32 %v1789_v37, %v1785_v58  ;;  %v1706_v7 = vor.u32 %v1705_v59, %v1701_v38  ;;  %234 = vst [vmem:[#allocation2 + $0x9c] sm:$0x1] %v233_v63  ;;  %284 = vst [vmem:[#allocation2 + $0xa4] sm:$0x1] %v283_v33 }
  0x54   : > { %v1710_v8 = vrot.slane %v1708_v62, 1  ;;  %v629_v9 = vshrl.u32 %v4594_v35, 16  ;;  %v632_v10 = vshll.u32 %v4594_v35, 16  ;;  %v637_v53 = vshrl.u32 %v4596_v36, 16  ;;  %v208_v58 = vld [vmem:[#allocation2 + $0x3c] sm:$0x1] }
  0x55   : > { %v1694_v34 = vor.u32 %v1693_v1, %v1689_v61  ;;  %v640_v3 = vshll.u32 %v4596_v36, 16  ;;  %v236_v13 = vsel %vm4444_vm2, 0, %v235_v51  ;;  %v286_v46 = vsel %vm4454_vm4, 0, %v285_v54  ;;  %v211_v37 = vld [vmem:[#allocation2 + $0x48] sm:$0x1] }
  0x56   : > { %v1711_v16 = vsel %vm1050_vm10, %v1706_v7, %v1710_v8  ;;  %v631_v17 = vrot.slane %v629_v9, 7  ;;  %v639_v18 = vrot.slane %v637_v53, 7  ;;  %237 = vst [vmem:[#allocation2 + $0xa8] sm:$0x1] %v236_v13  ;;  %287 = vst [vmem:[#allocation2 + $0xb0] sm:$0x1] %v286_v46  ;;  %v1795_v43 = vsel %vm1050_vm10, %v1790_v6, %v1794_v50 }
  0x57   : > { %v646_v35 = vshrl.u32 %v4654_v60, 16  ;;  %1872 = vrot.lane.b32.xlu0 %v1771_v11, %s4413_s19  ;;  %v1699_v36 = vsel %vm1050_vm10, %v1694_v34, %v1698_v2  ;;  %v649_v22 = vshll.u32 %v4654_v60, 16  ;;  %v654_v23 = vshrl.u32 %v4664_v5, 16  ;;  %v322_v60 = vld [vmem:[%s4468_s17 + $0xe0] sm:$0xff]  ;;  %v261_v54 = vld [vmem:[#allocation2 + $0x50] sm:$0x1] }
  0x58   : > { %v657_v26 = vshll.u32 %v4664_v5, 16  ;;  %1860 = vrot.lane.b32.xlu1 %v1699_v36, %s4413_s19  ;;  %v634_v27 = vor.u32 %v632_v10, %v631_v17  ;;  %v635_v24 = vrot.slane %v631_v17, 4  ;;  %v642_v29 = vor.u32 %v640_v3, %v639_v18  ;;  %v238_v63 = vld [vmem:[#allocation2 + $0xb4] sm:$0x1]  ;;  %v323_v34 = vld [vmem:[%s4468_s17 + $0xe8] sm:$0xff] }
  0x59   : > { %v644_v30 = vrot.slane %v639_v18, 4  ;;  %v648_v38 = vrot.slane %v646_v35, 7  ;;  %v656_v39 = vrot.slane %v654_v23, 7  ;;  %v209_v11 = vsel %vm4444_vm2, 0, %v208_v58  ;;  %v288_v58 = vld [vmem:[#allocation2 + $0xbc] sm:$0x1] }
  0x5a   : > { %v259_v40 = vsel %vm4454_vm4, 0, %v258_v20  ;;  %v643_v5 = vsel %vm4495_vm7, %v635_v24, %v642_v29  ;;  %v830_v44 = vld [vmem:[#allocation2 + $0x9c] sm:$0xf]  ;;  %v834_v25 = vld [vmem:[#allocation2 + $0xa4] sm:$0x1]  ;;  %v493_v51 = vshrl.u32 %v4693_v55, 16  ;;  %v4775_v7 = vpack.c.bf16 %v322_v60, %v322_v60 }
  0x5b   : > { %210 = vst [vmem:[#allocation2 + $0x3c] sm:$0x1] %v209_v11  ;;  %260 = vst [vmem:[#allocation2 + $0x44] sm:$0x1] %v259_v40  ;;  %v496_v61 = vshll.u32 %v4693_v55, 16  ;;  %1874 = vrot.lane.b32.xlu0 %v4722_v32, %s4413_s19  ;;  %v831_v52 = vsel %vm4503_vm8, %v634_v27, %v830_v44  ;;  %v835_v50 = vsel %vm4444_vm2, %v644_v30, %v834_v25  ;;  %v652_v59 = vrot.slane %v648_v38, 4 }
  0x5c   : > { %833 = vst.msk [vmem:[#allocation2 + $0xa0] sm:$0xf] %vm183_vm5, %v643_v5  ;;  %v651_v56 = vor.u32 %v649_v22, %v648_v38  ;;  %1862 = vrot.lane.b32.xlu1 %v1711_v16, %s4413_s19  ;;  %832 = vst [vmem:[#allocation2 + $0x9c] sm:$0xf] %v831_v52  ;;  %v659_v55 = vor.u32 %v657_v26, %v656_v39  ;;  %v661_v21 = vrot.slane %v656_v39, 4  ;;  %v495_v62 = vrot.slane %v493_v51, 7 }
  0x5d   : > { %836 = vst [vmem:[#allocation2 + $0xa4] sm:$0x1] %v835_v50  ;;  %v501_v32 = vshrl.u32 %v4708_v14, 16  ;;  %v837_v33 = vld [vmem:[#allocation2 + $0xa8] sm:$0xf]  ;;  %v504_v2 = vshll.u32 %v4708_v14, 16  ;;  %v4058_v27 = vpack.c.bf16 %v323_v34, %v323_v34 }
  0x5e   : > { %v841_v1 = vld [vmem:[#allocation2 + $0xb0] sm:$0x1]  ;;  %v212_v6 = vsel %vm4444_vm2, 0, %v211_v37  ;;  %v660_v8 = vsel %vm4495_vm7, %v652_v59, %v659_v55  ;;  %v838_v9 = vsel %vm4503_vm8, %v651_v56, %v837_v33  ;;  %v498_v53 = vor.u32 %v496_v61, %v495_v62  ;;  %v325_v59 = vld [vmem:[%s4468_s17 + $0xf8] sm:$0xff] }
  0x5f   : > { %v842_v10 = vsel %vm4444_vm2, %v661_v21, %v841_v1  ;;  %213 = vst [vmem:[#allocation2 + $0x48] sm:$0x1] %v212_v6  ;;  %1876 = vrot.lane.b32.xlu0 %v1795_v43, %s4413_s19  ;;  %839 = vst [vmem:[#allocation2 + $0xa8] sm:$0xf] %v838_v9  ;;  %v499_v14 = vrot.slane %v495_v62, 4  ;;  %v503_v3 = vrot.slane %v501_v32, 7 }
  0x60   : > { %840 = vst.msk [vmem:[#allocation2 + $0xac] sm:$0xf] %vm183_vm5, %v660_v8  ;;  %843 = vst [vmem:[#allocation2 + $0xb0] sm:$0x1] %v842_v10  ;;  %v262_v13 = vsel %vm4454_vm4, 0, %v261_v54  ;;  %v510_v46 = vshrl.u32 %v4710_v15, 16 }
  0x61   : > { %263 = vst [vmem:[#allocation2 + $0x50] sm:$0x1] %v262_v13  ;;  %v513_v16 = vshll.u32 %v4710_v15, 16  ;;  %v518_v17 = vshrl.u32 %v4719_v31, 16  ;;  %v521_v18 = vshll.u32 %v4719_v31, 16  ;;  %v239_v35 = vsel %vm4444_vm2, 0, %v238_v63 }
  0x62   : > { %v506_v20 = vor.u32 %v504_v2, %v503_v3  ;;  %v508_v36 = vrot.slane %v503_v3, 4  ;;  %v774_v22 = vld [vmem:[#allocation2 + $0x3c] sm:$0xf]  ;;  %v778_v23 = vld [vmem:[#allocation2 + $0x44] sm:$0x1]  ;;  %v512_v26 = vrot.slane %v510_v46, 7 }
  0x63   : > { %240 = vst [vmem:[#allocation2 + $0xb4] sm:$0x1] %v239_v35  ;;  %v1497_v24 = vld [vmem:[#allocation2 + $0xa0] sm:$0xf]  ;;  %v775_v29 = vsel %vm4503_vm8, %v498_v53, %v774_v22  ;;  %v520_v15 = vrot.slane %v518_v17, 7  ;;  %v289_v30 = vsel %vm4454_vm4, 0, %v288_v58 }
  0x64   : > { %v663_v31 = vshrl.u32 %v4775_v7, 16  ;;  %v324_v37 = vld [vmem:[%s4468_s17 + $0xf0] sm:$0xff]  ;;  %v1496_v38 = vld [vmem:[#allocation2 + $0x9c] sm:$0xf]  ;;  %v507_v11 = vsel %vm4495_vm7, %v499_v14, %v506_v20  ;;  %776 = vst [vmem:[#allocation2 + $0x3c] sm:$0xf] %v775_v29  ;;  %v779_v40 = vsel %vm4444_vm2, %v508_v36, %v778_v23  ;;  %v515_v60 = vor.u32 %v513_v16, %v512_v26 }
  0x65   : > { %v1532_v39 = vld [vmem:[#allocation2 + $0x9c] sm:$0xe]  ;;  %290 = vst [vmem:[#allocation2 + $0xbc] sm:$0x1] %v289_v30  ;;  %v4804_v43 = vcombine.low %v1496_v38, %v1497_v24  ;;  %777 = vst.msk [vmem:[#allocation2 + $0x40] sm:$0xf] %vm183_vm5, %v507_v11  ;;  %v523_v51 = vor.u32 %v521_v18, %v520_v15  ;;  %v4809_v54 = vpack.c.bf16 %v324_v37, %v324_v37 }
  0x66   : > { %v4288_v5 = vld [vmem:[#allocation2 + $0xa4] ss:$0 sps:$4 sm:$0x11]   ;;  %v3886_v44 = vcombine.low %v1532_v39, %v1497_v24  ;;  %780 = vst [vmem:[#allocation2 + $0x44] sm:$0x1] %v779_v40  ;;  %v516_v25 = vrot.slane %v512_v26, 4  ;;  %v4820_v16 = vpack.c.bf16 %v325_v59, %v325_v59 }
  0x67   : > { %v781_v61 = vld [vmem:[#allocation2 + $0x48] sm:$0xf]  ;;  %v665_v52 = vrot.slane %v663_v31, 7  ;;  %v666_v50 = vshll.u32 %v4775_v7, 16  ;;  %v671_v56 = vshrl.u32 %v4058_v27, 16  ;;  %v1809_v55 = vshrl.u32 %v4804_v43, 16 }
  0x68   : > { %v1811_v21 = vshll.u32 %v4804_v43, 16  ;;  %v1816_v62 = vshll.u32 %v4288_v5, 16  ;;  %v1498_v32 = vld [vmem:[#allocation2 + $0xa8] sm:$0xf]  ;;  %v525_v63 = vrot.slane %v520_v15, 4  ;;  %v1972_v1 = vrot.slane %v3886_v44, 1 }
  0x69   : > { %v1499_v33 = vld [vmem:[#allocation2 + $0xac] sm:$0xf]  ;;  %v1973_v2 = vrot.slane %v4288_v5, 1  ;;  %v524_v6 = vsel %vm4495_vm7, %v516_v25, %v523_v51  ;;  %v782_v7 = vsel %vm4503_vm8, %v515_v60, %v781_v61  ;;  %v4290_v53 = vld [vmem:[#allocation2 + $0xb0] ss:$0 sps:$4 sm:$0x11]   ;;  %v668_v13 = vor.u32 %v666_v50, %v665_v52 }
  0x6a   : > { %v1813_v8 = vrot.slane %v1811_v21, 1  ;;  %v1818_v9 = vrot.slane %v1816_v62, 1  ;;  %v4817_v10 = vcombine.low %v1498_v32, %v1499_v33  ;;  %783 = vst [vmem:[#allocation2 + $0x48] sm:$0xf] %v782_v7  ;;  %784 = vst.msk [vmem:[#allocation2 + $0x4c] sm:$0xf] %vm183_vm5, %v524_v6 }
  0x6b   : > { %v669_v34 = vrot.slane %v665_v52, 4  ;;  %v1533_v14 = vld [vmem:[#allocation2 + $0xa8] sm:$0xe]  ;;  %v785_v3 = vld [vmem:[#allocation2 + $0x50] sm:$0x1]  ;;  %v673_v46 = vrot.slane %v671_v56, 7  ;;  %v1974_v39 = vsel %vm1323_vm9, %v1972_v1, %v1973_v2 }
  0x6c   : > { %v674_v58 = vshll.u32 %v4058_v27, 16  ;;  %v1814_v17 = vor.u32 %v1813_v8, %v1809_v55  ;;  %v1821_v18 = vshrl.u32 %v4817_v10, 16  ;;  %v1823_v35 = vshll.u32 %v4817_v10, 16  ;;  %v1480_v36 = vld [vmem:[#allocation2 + $0x3c] sm:$0xf] }
  0x6d   : > { %v1828_v20 = vshll.u32 %v4290_v53, 16  ;;  %v1481_v22 = vld [vmem:[#allocation2 + $0x40] sm:$0xf]  ;;  %v3887_v23 = vcombine.low %v1533_v14, %v1499_v33  ;;  %v1976_v26 = vrot.slane %v4290_v53, 1  ;;  %v786_v24 = vsel %vm4444_vm2, %v525_v63, %v785_v3  ;;  %v1524_v40 = vld [vmem:[#allocation2 + $0x3c] sm:$0xe] }
  0x6e   : > { %v676_v29 = vor.u32 %v674_v58, %v673_v46  ;;  %v1819_v15 = vsel %vm1050_vm10, %v1814_v17, %v1818_v9  ;;  %v1825_v30 = vrot.slane %v1823_v35, 1  ;;  %v4827_v31 = vcombine.low %v1480_v36, %v1481_v22  ;;  %v4292_v37 = vld [vmem:[#allocation2 + $0x44] ss:$0 sps:$4 sm:$0x11]   ;;  %787 = vst [vmem:[#allocation2 + $0x50] sm:$0x1] %v786_v24 }
  0x6f   : > { %v1830_v27 = vrot.slane %v1828_v20, 1  ;;  %v241_v38 = vld [vmem:[#allocation2 + $0xc0] sm:$0x1]  ;;  %1880 = vrot.lane.b32.xlu0 %v1819_v15, %s4413_s19  ;;  %v1975_v11 = vrot.slane %v3887_v23, 1  ;;  %v678_v5 = vrot.slane %v673_v46, 4  ;;  %v1720_v50 = vshll.u32 %v4292_v37, 16 }
  0x70   : > { %v677_v60 = vsel %vm4495_vm7, %v669_v34, %v676_v29  ;;  %v844_v44 = vld [vmem:[#allocation2 + $0xb4] sm:$0xf]  ;;  %v291_v25 = vld [vmem:[#allocation2 + $0xc8] sm:$0x1]  ;;  %v1826_v51 = vor.u32 %v1825_v30, %v1821_v18  ;;  %v1713_v61 = vshrl.u32 %v4827_v31, 16  ;;  %v1715_v52 = vshll.u32 %v4827_v31, 16 }
  0x71   : > { %847 = vst.msk [vmem:[#allocation2 + $0xb8] sm:$0xf] %vm183_vm5, %v677_v60  ;;  %v848_v56 = vld [vmem:[#allocation2 + $0xbc] sm:$0x1]  ;;  %v1977_v59 = vsel %vm1323_vm9, %v1975_v11, %v1976_v26  ;;  %v1482_v55 = vld [vmem:[#allocation2 + $0x48] sm:$0xf]  ;;  %v3878_v62 = vcombine.low %v1524_v40, %v1481_v22  ;;  %v845_v63 = vsel %vm4503_vm8, %v668_v13, %v844_v44 }
  0x72   : > { %v1483_v21 = vld [vmem:[#allocation2 + $0x4c] sm:$0xf]  ;;  %v1949_v32 = vrot.slane %v4292_v37, 1  ;;  %v1831_v33 = vsel %vm1050_vm10, %v1826_v51, %v1830_v27  ;;  %v1717_v1 = vrot.slane %v1715_v52, 1  ;;  %v1722_v2 = vrot.slane %v1720_v50, 1  ;;  %v306_v24 = vld [vmem:[%s4468_s17 + $0x60] sm:$0xff] }
  0x73   : > { %v4840_v6 = vcombine.low %v1482_v55, %v1483_v21  ;;  %v1525_v7 = vld [vmem:[#allocation2 + $0x48] sm:$0xe]  ;;  %846 = vst [vmem:[#allocation2 + $0xb4] sm:$0xf] %v845_v63  ;;  %1882 = vrot.lane.b32.xlu1 %v1831_v33, %s4413_s19  ;;  %2008 = vrot.lane.b32.xlu0 %v1974_v39, %s4412_s18  ;;  %v1948_v8 = vrot.slane %v3878_v62, 1  ;;  %v849_v53 = vsel %vm4444_vm2, %v678_v5, %v848_v56  ;;  %v242_v34 = vsel %vm4444_vm2, 0, %v241_v38 }
  0x74   : > { %v3879_v9 = vcombine.low %v1525_v7, %v1483_v21  ;;  %v214_v14 = vld [vmem:[#allocation2 + $0x54] sm:$0x1]  ;;  %v264_v3 = vld [vmem:[#allocation2 + $0x5c] sm:$0x1]  ;;  %v1718_v13 = vor.u32 %v1717_v1, %v1713_v61  ;;  %850 = vst [vmem:[#allocation2 + $0xbc] sm:$0x1] %v849_v53  ;;  %v4041_v61 = vpack.c.bf16 %v306_v24, %v306_v24 }
  0x75   : > { %v1725_v46 = vshrl.u32 %v4840_v6, 16  ;;  %v1727_v58 = vshll.u32 %v4840_v6, 16  ;;  %243 = vst [vmem:[#allocation2 + $0xc0] sm:$0x1] %v242_v34  ;;  %v292_v17 = vsel %vm4454_vm4, 0, %v291_v25  ;;  %v1950_v35 = vsel %vm1323_vm9, %v1948_v8, %v1949_v32  ;;  %v307_v40 = vld [vmem:[%s4468_s17 + $0x68] sm:$0xff] }
  0x76   : > { %v4294_v18 = vld [vmem:[#allocation2 + $0x50] ss:$0 sps:$4 sm:$0x11]   ;;  %v1951_v20 = vrot.slane %v3879_v9, 1  ;;  %293 = vst [vmem:[#allocation2 + $0xc8] sm:$0x1] %v292_v17  ;;  %v1723_v36 = vsel %vm1050_vm10, %v1718_v13, %v1722_v2  ;;  %v4042_v63 = vpack.c.bf16 %v307_v40, %v307_v40 }
  0x77   : > { %v1729_v22 = vrot.slane %v1727_v58, 1  ;;  %v680_v23 = vshrl.u32 %v4809_v54, 16  ;;  %v683_v26 = vshll.u32 %v4809_v54, 16  ;;  %1864 = vrot.lane.b32.xlu1 %v1723_v36, %s4413_s19  ;;  %2010 = vrot.lane.b32.xlu0 %v1977_v59, %s4412_s18  ;;  %v1732_v29 = vshll.u32 %v4294_v18, 16  ;;  %v308_v60 = vld [vmem:[%s4468_s17 + $0x70] sm:$0xff]  ;;  %v309_v59 = vld [vmem:[%s4468_s17 + $0x78] sm:$0xff] }
  0x78   : > { %v1952_v15 = vrot.slane %v4294_v18, 1  ;;  %v1501_v30 = vld [vmem:[#allocation2 + $0xb8] sm:$0xf]  ;;  %v688_v27 = vshrl.u32 %v4820_v16, 16  ;;  %v691_v37 = vshll.u32 %v4820_v16, 16  ;;  %v215_v11 = vsel %vm4444_vm2, 0, %v214_v14 }
  0x79   : > { %v1730_v38 = vor.u32 %v1729_v22, %v1725_v46  ;;  %v682_v39 = vrot.slane %v680_v23, 7  ;;  %v265_v54 = vsel %vm4454_vm4, 0, %v264_v3  ;;  %v1734_v5 = vrot.slane %v1732_v29, 1  ;;  %216 = vst [vmem:[#allocation2 + $0x54] sm:$0x1] %v215_v11 }
  0x7a   : > { %v1500_v44 = vld [vmem:[#allocation2 + $0xb4] sm:$0xf]  ;;  %v690_v25 = vrot.slane %v688_v27, 7  ;;  %266 = vst [vmem:[#allocation2 + $0x5c] sm:$0x1] %v265_v54  ;;  %v1953_v33 = vsel %vm1323_vm9, %v1951_v20, %v1952_v15  ;;  %v4043_v9 = vpack.c.bf16 %v308_v60, %v308_v60  ;;  %v527_v17 = vshrl.u32 %v4041_v61, 16 }
  0x7b   : > { %v1534_v51 = vld [vmem:[#allocation2 + $0xb4] sm:$0xe]  ;;  %v4867_v52 = vcombine.low %v1500_v44, %v1501_v30  ;;  %v685_v16 = vor.u32 %v683_v26, %v682_v39  ;;  %v686_v50 = vrot.slane %v682_v39, 4  ;;  %v1735_v55 = vsel %vm1050_vm10, %v1730_v38, %v1734_v5  ;;  %1992 = vrot.lane.b32.xlu0 %v1950_v35, %s4412_s18  ;;  %v4297_v21 = vld [vmem:[#allocation2 + $0xbc] ss:$0 sps:$4 sm:$0x11]  }
  0x7c   : > { %v3888_v56 = vcombine.low %v1534_v51, %v1501_v30  ;;  %v693_v62 = vor.u32 %v691_v37, %v690_v25  ;;  %v695_v32 = vrot.slane %v690_v25, 4  ;;  %1866 = vrot.lane.b32.xlu1 %v1735_v55, %s4413_s19  ;;  %v851_v7 = vld [vmem:[#allocation2 + $0xc0] sm:$0xf]  ;;  %v1840_v53 = vshll.u32 %v4297_v21, 16  ;;  %v267_v18 = vld [vmem:[#allocation2 + $0x68] sm:$0x1] }
  0x7d   : > { %v1833_v1 = vshrl.u32 %v4867_v52, 16  ;;  %v1835_v2 = vshll.u32 %v4867_v52, 16  ;;  %v855_v8 = vld [vmem:[#allocation2 + $0xc8] sm:$0x1]  ;;  %v852_v14 = vsel %vm4503_vm8, %v685_v16, %v851_v7  ;;  %v217_v13 = vld [vmem:[#allocation2 + $0x60] sm:$0x1]  ;;  %v4044_v35 = vpack.c.bf16 %v309_v59, %v309_v59 }
  0x7e   : > { %v694_v34 = vsel %vm4495_vm7, %v686_v50, %v693_v62  ;;  %v856_v3 = vsel %vm4444_vm2, %v695_v32, %v855_v8  ;;  %853 = vst [vmem:[#allocation2 + $0xc0] sm:$0xf] %v852_v14  ;;  %v1978_v58 = vrot.slane %v3888_v56, 1  ;;  %v1842_v20 = vrot.slane %v1840_v53, 1  ;;  %v858_v27 = vld [vmem:[#allocation2] sm:$0xf] }
  0x7f   : > { %v1837_v46 = vrot.slane %v1835_v2, 1  ;;  %854 = vst.msk [vmem:[#allocation2 + $0xc4] sm:$0xf] %vm183_vm5, %v694_v34  ;;  %857 = vst [vmem:[#allocation2 + $0xc8] sm:$0x1] %v856_v3  ;;  %v530_v36 = vshll.u32 %v4041_v61, 16 }
  0x80   : > { %v535_v22 = vshrl.u32 %v4042_v63, 16  ;;  %v538_v23 = vshll.u32 %v4042_v63, 16  ;;  %1994 = vrot.lane.b32.xlu1 %v1953_v33, %s4412_s18  ;;  %v1979_v24 = vrot.slane %v4297_v21, 1  ;;  %v529_v29 = vrot.slane %v527_v17, 7  ;;  %v788_v15 = vld [vmem:[#allocation2 + $0x54] sm:$0xf] }
  0x81   : > { %v1838_v26 = vor.u32 %v1837_v46, %v1833_v1  ;;  %v218_v30 = vsel %vm4444_vm2, 0, %v217_v13  ;;  %v268_v38 = vsel %vm4454_vm4, 0, %v267_v18  ;;  %v544_v39 = vshrl.u32 %v4043_v9, 16  ;;  %v792_v5 = vld [vmem:[#allocation2 + $0x5c] sm:$0x1] }
  0x82   : > { %v537_v37 = vrot.slane %v535_v22, 7  ;;  %219 = vst [vmem:[#allocation2 + $0x60] sm:$0x1] %v218_v30  ;;  %v547_v11 = vshll.u32 %v4043_v9, 16  ;;  %v532_v40 = vor.u32 %v530_v36, %v529_v29  ;;  %v533_v60 = vrot.slane %v529_v29, 4 }
  0x83   : > { %v1843_v54 = vsel %vm1050_vm10, %v1838_v26, %v1842_v20  ;;  %269 = vst [vmem:[#allocation2 + $0x68] sm:$0x1] %v268_v38  ;;  %v552_v44 = vshrl.u32 %v4044_v35, 16  ;;  %v4889_v25 = vld [vmem:[#allocation2 + $0x4] sm:$0xf]  ;;  %v546_v16 = vrot.slane %v544_v39, 7  ;;  %v1980_v4 = vsel %vm1323_vm9, %v1978_v58, %v1979_v24 }
  0x84   : > { %1884 = vrot.lane.b32.xlu0 %v1843_v54, %s4413_s19  ;;  %v540_v51 = vor.u32 %v538_v23, %v537_v37  ;;  %v542_v61 = vrot.slane %v537_v37, 4  ;;  %v555_v50 = vshll.u32 %v4044_v35, 16  ;;  %v789_v56 = vsel %vm4503_vm8, %v532_v40, %v788_v15  ;;  %v4902_v1 = vld [vmem:[#allocation2 + $0x8] ss:$0 sps:$4 sm:$0x11]  }
  0x85   : > { %v554_v59 = vrot.slane %v552_v44, 7  ;;  %v1502_v55 = vld [vmem:[#allocation2 + $0xc0] sm:$0xf]  ;;  %790 = vst [vmem:[#allocation2 + $0x54] sm:$0xf] %v789_v56  ;;  %v549_v63 = vor.u32 %v547_v11, %v546_v16  ;;  %v4900_v33 = vcombine.low %v858_v27, %v4889_v25  ;;  %v550_v9 = vrot.slane %v546_v16, 4 }
  0x86   : > { %v1503_v21 = vld [vmem:[#allocation2 + $0xc4] sm:$0xf]  ;;  %v541_v62 = vsel %vm4495_vm7, %v533_v60, %v540_v51  ;;  %v793_v32 = vsel %vm4444_vm2, %v542_v61, %v792_v5  ;;  %v4299_v7 = vld [vmem:[#allocation2 + $0xc8] ss:$0 sps:$4 sm:$0x11]   ;;  %v1059_v47 = vshll.u32 %v4902_v1, 16 }
  0x87   : > { %v4904_v2 = vcombine.low %v1502_v55, %v1503_v21  ;;  %791 = vst.msk [vmem:[#allocation2 + $0x58] sm:$0xf] %vm183_vm5, %v541_v62  ;;  %794 = vst [vmem:[#allocation2 + $0x5c] sm:$0x1] %v793_v32  ;;  %v1535_v8 = vld [vmem:[#allocation2 + $0xc0] sm:$0xe]  ;;  %v557_v53 = vor.u32 %v555_v50, %v554_v59 }
  0x88   : > { %2012 = vrot.lane.b32.xlu0 %v1980_v4, %s4412_s18  ;;  %v3889_v34 = vcombine.low %v1535_v8, %v1503_v21  ;;  %v559_v14 = vrot.slane %v554_v59, 4  ;;  %v860_v3 = vld [vmem:[#allocation2 + $0xc] sm:$0xf]  ;;  %v4908_v13 = vld [vmem:[#allocation2 + $0x10] sm:$0xf]  ;;  %v1852_v17 = vshll.u32 %v4299_v7, 16 }
  0x89   : > { %v1845_v46 = vshrl.u32 %v4904_v2, 16  ;;  %v1847_v58 = vshll.u32 %v4904_v2, 16  ;;  %v1982_v18 = vrot.slane %v4299_v7, 1  ;;  %v795_v35 = vld [vmem:[#allocation2 + $0x60] sm:$0xf]  ;;  %v558_v36 = vsel %vm4495_vm7, %v550_v9, %v557_v53 }
  0x8a   : > { %v1981_v20 = vrot.slane %v3889_v34, 1  ;;  %v796_v22 = vsel %vm4503_vm8, %v549_v63, %v795_v35  ;;  %v799_v23 = vld [vmem:[#allocation2 + $0x68] sm:$0x1]  ;;  %v1054_v26 = vshll.u32 %v4900_v33, 16  ;;  %v1854_v29 = vrot.slane %v1852_v17, 1 }
  0x8b   : > { %v1849_v24 = vrot.slane %v1847_v58, 1  ;;  %797 = vst [vmem:[#allocation2 + $0x60] sm:$0xf] %v796_v22  ;;  %798 = vst.msk [vmem:[#allocation2 + $0x64] sm:$0xf] %vm183_vm5, %v558_v36  ;;  %v800_v15 = vsel %vm4444_vm2, %v559_v14, %v799_v23  ;;  %v4925_v37 = vcombine.low %v860_v3, %v4908_v13  ;;  %v1052_v5 = vshrl.u32 %v4900_v33, 16 }
  0x8c   : > { %v2488_v30 = vld [vmem:[#allocation2 + $0x18] sm:$0xf]  ;;  %v4920_v27 = vld [vmem:[#allocation2 + $0x1c] sm:$0xf]  ;;  %v1983_v41 = vsel %vm1323_vm9, %v1981_v20, %v1982_v18  ;;  %801 = vst [vmem:[#allocation2 + $0x68] sm:$0x1] %v800_v15 }
  0x8d   : > { %v906_v38 = vld [vmem:[#allocation2] sm:$0xe]  ;;  %v1850_v39 = vor.u32 %v1849_v24, %v1845_v46  ;;  %v1484_v11 = vld [vmem:[#allocation2 + $0x54] sm:$0xf]  ;;  %2014 = vrot.lane.b32.xlu0 %v1983_v41, %s4412_s18  ;;  %v2490_v40 = vld [vmem:[#allocation2 + $0x24] sm:$0xf]  ;;  %v4932_v51 = vcombine.low %v2488_v30, %v4920_v27 }
  0x8e   : > { %v1526_v54 = vld [vmem:[#allocation2 + $0x54] sm:$0xe]  ;;  %v1485_v60 = vld [vmem:[#allocation2 + $0x58] sm:$0xf]  ;;  %v1056_v44 = vrot.slane %v1054_v26, 1  ;;  %v1061_v59 = vrot.slane %v1059_v47, 1  ;;  %v3826_v21 = vcombine.low %v906_v38, %v4889_v25  ;;  %v4950_v58 = vcombine.low %v2490_v40, %v4928_v0 }
  0x8f   : > { %v1855_v61 = vsel %vm1050_vm10, %v1850_v39, %v1854_v29  ;;  %v4935_v16 = vcombine.low %v1484_v11, %v1485_v60  ;;  %v4301_v50 = vld [vmem:[#allocation2 + $0x5c] ss:$0 sps:$4 sm:$0x11]   ;;  %v3880_v4 = vcombine.low %v1526_v54, %v1485_v60  ;;  %v4937_v56 = vld [vmem:[#allocation2 + $0x20] ss:$0 sps:$4 sm:$0x11]  }
  0x90   : > { %1886 = vrot.lane.b32.xlu1 %v1855_v61, %s4413_s19  ;;  %v1066_v55 = vshll.u32 %v4925_v37, 16  ;;  %v4942_v62 = vld [vmem:[#allocation2 + $0x18] sm:$0xe]  ;;  %v1744_v7 = vshll.u32 %v4301_v50, 16  ;;  %v1955_v34 = vrot.slane %v4301_v50, 1  ;;  %v1057_v14 = vor.u32 %v1056_v44, %v1052_v5 }
  0x91   : > { %v1737_v32 = vshrl.u32 %v4935_v16, 16  ;;  %v1739_v63 = vshll.u32 %v4935_v16, 16  ;;  %v1954_v8 = vrot.slane %v3880_v4, 1  ;;  %v4946_v3 = vld [vmem:[#allocation2 + $0x14] ss:$0 sps:$4 sm:$0x11]   ;;  %v3958_v22 = vcombine.low %v4942_v62, %v4920_v27 }
  0x92   : > { %v1486_v9 = vld [vmem:[#allocation2 + $0x60] sm:$0xf]  ;;  %v1487_v53 = vld [vmem:[#allocation2 + $0x64] sm:$0xf]  ;;  %v2683_v46 = vshll.u32 %v4932_v51, 16  ;;  %v1746_v35 = vrot.slane %v1744_v7, 1  ;;  %v1062_v11 = vsel %vm1050_vm10, %v1057_v14, %v1061_v59 }
  0x93   : > { %v862_v25 = vld [vmem:[#allocation2 + $0x18] sm:$0xf]  ;;  %v4952_v17 = vld [vmem:[#allocation2 + $0x1c] sm:$0xf]  ;;  %v1741_v18 = vrot.slane %v1739_v63, 1  ;;  %v4954_v20 = vcombine.low %v1486_v9, %v1487_v53  ;;  %v1956_v26 = vsel %vm1323_vm9, %v1954_v8, %v1955_v34  ;;  %v2681_v29 = vshrl.u32 %v4932_v51, 16 }
  0x94   : > { %v1527_v36 = vld [vmem:[#allocation2 + $0x60] sm:$0xe]  ;;  %v4303_v23 = vld [vmem:[#allocation2 + $0x68] ss:$0 sps:$4 sm:$0x11]   ;;  %v2685_v15 = vrot.slane %v2683_v46, 1  ;;  %1996 = vrot.lane.b32.xlu0 %v1956_v26, %s4412_s18  ;;  %v4969_v44 = vcombine.low %v862_v25, %v4952_v17 }
  0x95   : > { %v3881_v24 = vcombine.low %v1527_v36, %v1487_v53  ;;  %v1742_v30 = vor.u32 %v1741_v18, %v1737_v32  ;;  %v1749_v41 = vshrl.u32 %v4954_v20, 16  ;;  %v1751_v47 = vshll.u32 %v4954_v20, 16  ;;  %v4975_v8 = vld [vmem:[#allocation2 + $0x20] ss:$0 sps:$4 sm:$0x11]  }
  0x96   : > { %v2688_v38 = vshll.u32 %v4937_v56, 16  ;;  %v1756_v39 = vshll.u32 %v4303_v23, 16  ;;  %v1324_v27 = vrot.slane %v3826_v21, 1  ;;  %v1325_v54 = vrot.slane %v4902_v1, 1  ;;  %v907_v1 = vld [vmem:[#allocation2 + $0xc] sm:$0xe] }
  0x97   : > { %v1747_v40 = vsel %vm1050_vm10, %v1742_v30, %v1746_v35  ;;  %v1753_v60 = vrot.slane %v1751_v47, 1  ;;  %v1064_v5 = vshrl.u32 %v4925_v37, 16  ;;  %v1957_v50 = vrot.slane %v3881_v24, 1  ;;  %v4978_v53 = vld [vmem:[#allocation2 + $0x2c] ss:$0 sps:$4 sm:$0x11]  }
  0x98   : > { %1868 = vrot.lane.b32.xlu1 %v1747_v40, %s4413_s19  ;;  %v1758_v61 = vrot.slane %v1756_v39, 1  ;;  %v1068_v4 = vrot.slane %v1066_v55, 1  ;;  %v1071_v62 = vshll.u32 %v4946_v3, 16  ;;  %v1958_v59 = vrot.slane %v4303_v23, 1  ;;  %1243 = vrot.lane.b32.xlu0 %v1062_v11, %s4413_s19  ;;  %v864_v55 = vld [vmem:[#allocation2 + $0x24] sm:$0xf] }
  0x99   : > { %v1754_v32 = vor.u32 %v1753_v60, %v1749_v41  ;;  %v2686_v21 = vor.u32 %v2685_v15, %v2681_v29  ;;  %v2690_v63 = vrot.slane %v2688_v38, 1  ;;  %v1326_v7 = vsel %vm1323_vm9, %v1324_v27, %v1325_v54  ;;  %v2492_v18 = vld [vmem:[#allocation2 + $0x30] sm:$0xf]  ;;  %v4983_v35 = vld [vmem:[#allocation2 + $0x34] sm:$0xf] }
  0x9a   : > { %v1078_v34 = vshll.u32 %v4969_v44, 16  ;;  %v1069_v14 = vor.u32 %v1068_v4, %v1064_v5  ;;  %v1073_v46 = vrot.slane %v1071_v62, 1  ;;  %v3827_v25 = vcombine.low %v907_v1, %v4908_v13  ;;  %v4989_v29 = vld [vmem:[#allocation2 + $0x28] sm:$0xf]  ;;  %v908_v47 = vld [vmem:[#allocation2 + $0x18] sm:$0xe] }
  0x9b   : > { %v1759_v9 = vsel %vm1050_vm10, %v1754_v32, %v1758_v61  ;;  %v1959_v36 = vsel %vm1323_vm9, %v1957_v50, %v1958_v59  ;;  %v2691_v23 = vsel %vm1050_vm10, %v2686_v21, %v2690_v63  ;;  %v2695_v26 = vshll.u32 %v4950_v58, 16  ;;  %v2537_v38 = vld [vmem:[#allocation2 + $0x24] sm:$0xe]  ;;  %v5010_v62 = vld [vmem:[#allocation2 + $0x2c] ss:$0 sps:$4 sm:$0x11]  }
  0x9c   : > { %1870 = vrot.lane.b32.xlu1 %v1759_v9, %s4413_s19  ;;  %1372 = vrot.lane.b32.xlu0 %v1326_v7, %s4412_s18  ;;  %v2952_v24 = vrot.slane %v3958_v22, 1  ;;  %v2953_v15 = vrot.slane %v4937_v56, 1  ;;  %v1076_v30 = vshrl.u32 %v4969_v44, 16  ;;  %v1080_v41 = vrot.slane %v1078_v34, 1  ;;  %v866_v1 = vld [vmem:[#allocation2 + $0x30] sm:$0xf] }
  0x9d   : > { %v1083_v13 = vshll.u32 %v4975_v8, 16  ;;  %v4995_v39 = vcombine.low %v2492_v18, %v4983_v35  ;;  %v1327_v11 = vrot.slane %v3827_v25, 1  ;;  %v1328_v27 = vrot.slane %v4946_v3, 1  ;;  %v5003_v56 = vld [vmem:[#allocation2 + $0x38] ss:$0 sps:$4 sm:$0x11]  }
  0x9e   : > { %v2700_v22 = vshll.u32 %v4978_v53, 16  ;;  %v5001_v54 = vcombine.low %v864_v55, %v4989_v29  ;;  %v1074_v40 = vsel %vm1050_vm10, %v1069_v14, %v1073_v46  ;;  %v2693_v60 = vshrl.u32 %v4950_v58, 16  ;;  %v5014_v21 = vld [vmem:[#allocation2 + $0x34] sm:$0xf]  ;;  %v2494_v46 = vld [vmem:[#allocation2 + $0x3c] sm:$0xf] }
  0x9f   : > { %v2697_v5 = vrot.slane %v2695_v26, 1  ;;  %v3828_v61 = vcombine.low %v908_v47, %v4952_v17  ;;  %v2954_v50 = vsel %vm1323_vm9, %v2952_v24, %v2953_v15  ;;  %v1081_v4 = vor.u32 %v1080_v41, %v1076_v30 }
  0xa0   : > { %1998 = vrot.lane.b32.xlu1 %v1959_v36, %s4412_s18  ;;  %2872 = vrot.lane.b32.xlu0 %v2691_v23, %s4413_s19  ;;  %v1085_v3 = vrot.slane %v1083_v13, 1  ;;  %v2707_v32 = vshll.u32 %v4995_v39, 16  ;;  %v3959_v59 = vcombine.low %v2537_v38, %v4928_v0  ;;  %v1329_v63 = vsel %vm1323_vm9, %v1327_v11, %v1328_v27  ;;  %v5024_v36 = vld [vmem:[#allocation2 + $0x40] sm:$0xf]  ;;  %v2538_v23 = vld [vmem:[#allocation2 + $0x30] sm:$0xe] }
  0xa1   : > { %v2702_v7 = vrot.slane %v2700_v22, 1  ;;  %v1090_v17 = vshll.u32 %v5001_v54, 16  ;;  %v2698_v9 = vor.u32 %v2697_v5, %v2693_v60  ;;  %v1330_v34 = vrot.slane %v3828_v61, 1  ;;  %v909_v13 = vld [vmem:[#allocation2 + $0x24] sm:$0xe] }
  0xa2   : > { %v1331_v55 = vrot.slane %v4975_v8, 1  ;;  %v2712_v14 = vshll.u32 %v5003_v56, 16  ;;  %v1086_v0 = vsel %vm1050_vm10, %v1081_v4, %v1085_v3  ;;  %v2705_v25 = vshrl.u32 %v4995_v39, 16  ;;  %v5039_v27 = vld [vmem:[#allocation2 + $0x38] ss:$0 sps:$4 sm:$0x11]  }
  0xa3   : > { %v2709_v18 = vrot.slane %v2707_v32, 1  ;;  %v5027_v26 = vcombine.low %v866_v1, %v5014_v21  ;;  %v2955_v24 = vrot.slane %v3959_v59, 1  ;;  %v2956_v15 = vrot.slane %v4978_v53, 1  ;;  %v5042_v60 = vld [vmem:[#allocation2 + $0x44] ss:$0 sps:$4 sm:$0x11]   ;;  %v5050_v1 = vpop.permute.xlu1 %2000 }
  0xa4   : > { %1245 = vrot.lane.b32.xlu1 %v1074_v40, %s4413_s19  ;;  %3000 = vrot.lane.b32.xlu0 %v2954_v50, %s4412_s18  ;;  %v1088_v8 = vshrl.u32 %v5001_v54, 16  ;;  %v1092_v30 = vrot.slane %v1090_v17, 1  ;;  %v1095_v41 = vshll.u32 %v5010_v62, 16  ;;  %v2703_v47 = vsel %vm1050_vm10, %v2698_v9, %v2702_v7  ;;  %v2496_v61 = vld [vmem:[#allocation2 + $0x48] sm:$0xf] }
  0xa5   : > { %5993 = vst [vmem:[#allocation3_spill] sm:$0xff] %v5027_v26  ;;  %v5036_v38 = vcombine.low %v2494_v46, %v5024_v36  ;;  %v3960_v11 = vcombine.low %v2538_v23, %v4983_v35  ;;  %v1332_v22 = vsel %vm1323_vm9, %v1330_v34, %v1331_v55  ;;  %v2710_v53 = vor.u32 %v2709_v18, %v2705_v25  ;;  %v5045_v50 = vld [vmem:[#allocation2 + $0x4c] sm:$0xf]  ;;  %v868_v59 = vld [vmem:[#allocation2 + $0x3c] sm:$0xf] }
  0xa6   : > { %v2714_v40 = vrot.slane %v2712_v14, 1  ;;  %v1102_v5 = vshll.u32 %v5027_v26, 16  ;;  %v2957_v4 = vsel %vm1323_vm9, %v2955_v24, %v2956_v15  ;;  %v1093_v3 = vor.u32 %v1092_v30, %v1088_v8  ;;  %v5056_v34 = vld [vmem:[#allocation2 + $0x40] sm:$0xf]  ;;  %v2539_v25 = vld [vmem:[#allocation2 + $0x3c] sm:$0xe] }
  0xa7   : > { %5994 = vst [vmem:[#allocation4_spill] sm:$0xff] %v5036_v38  ;;  %v1097_v32 = vrot.slane %v1095_v41, 1  ;;  %v3829_v35 = vcombine.low %v909_v13, %v4989_v29  ;;  %v2958_v7 = vrot.slane %v3960_v11, 1  ;;  %v2959_v17 = vrot.slane %v5003_v56, 1  ;;  %v910_v29 = vld [vmem:[#allocation2 + $0x30] sm:$0xe] }
  0xa8   : > { %1374 = vrot.lane.b32.xlu1 %v1329_v63, %s4412_s18  ;;  %1247 = vrot.lane.b32.xlu0 %v1086_v0, %s4413_s19  ;;  %v2719_v63 = vshll.u32 %v5036_v38, 16  ;;  %v1107_v9 = vshll.u32 %v5039_v27, 16  ;;  %v2715_v55 = vsel %vm1050_vm10, %v2710_v53, %v2714_v40  ;;  %v1100_v14 = vshrl.u32 %v5027_v26, 16  ;;  %v5073_v13 = vld [vmem:[#allocation2 + $0x50] ss:$0 sps:$4 sm:$0x11]  }
  0xa9   : > { %v1104_v46 = vrot.slane %v1102_v5, 1  ;;  %v5061_v0 = vcombine.low %v2496_v61, %v5045_v50  ;;  %v1333_v18 = vrot.slane %v3829_v35, 1  ;;  %v1334_v23 = vrot.slane %v5010_v62, 1  ;;  %v870_v40 = vld [vmem:[#allocation2 + $0x48] sm:$0xf]  ;;  %v5079_v5 = vpop.permute.xlu0 %2002  ;;  %v5081_v61 = vpop.permute.xlu1 %1986 }
  0xaa   : > { %v2724_v56 = vshll.u32 %v5042_v60, 16  ;;  %v5067_v24 = vcombine.low %v868_v59, %v5056_v34  ;;  %v1098_v15 = vsel %vm1050_vm10, %v1093_v3, %v1097_v32  ;;  %v2717_v8 = vshrl.u32 %v5036_v38, 16  ;;  %v5084_v3 = vld [vmem:[#allocation2 + $0x4c] sm:$0xf]  ;;  %v2498_v59 = vld [vmem:[#allocation2 + $0x54] sm:$0xf] }
  0xab   : > { %5995 = vst [vmem:[#allocation5_spill] sm:$0xff] %v5061_v0  ;;  %v2721_v30 = vrot.slane %v2719_v63, 1  ;;  %v3830_v41 = vcombine.low %v910_v29, %v5014_v21  ;;  %v1105_v11 = vor.u32 %v1104_v46, %v1100_v14  ;;  %v1109_v62 = vrot.slane %v1107_v9, 1  ;;  %v5089_v63 = vld [vmem:[#allocation2 + $0x58] sm:$0xf] }
  0xac   : > { %2874 = vrot.lane.b32.xlu1 %v2703_v47, %s4413_s19  ;;  %1376 = vrot.lane.b32.xlu0 %v1332_v22, %s4412_s18  ;;  %5996 = vst [vmem:[#allocation6_spill] sm:$0xff] %v5067_v24  ;;  %v2960_v47 = vsel %vm1323_vm9, %v2958_v7, %v2959_v17  ;;  %v5076_v22 = vld [vmem:[#allocation2 + $0x44] ss:$0 sps:$4 sm:$0x11]   ;;  %v2731_v53 = vshll.u32 %v5061_v0, 16  ;;  %v1335_v21 = vsel %vm1323_vm9, %v1333_v18, %v1334_v23  ;;  %v2726_v32 = vrot.slane %v2724_v56, 1 }
  0xad   : > { %v1114_v35 = vshll.u32 %v5067_v24, 16  ;;  %v2722_v7 = vor.u32 %v2721_v30, %v2717_v8  ;;  %v1336_v17 = vrot.slane %v3830_v41, 1  ;;  %v1337_v9 = vrot.slane %v5039_v27, 1  ;;  %v2540_v29 = vld [vmem:[#allocation2 + $0x48] sm:$0xe]  ;;  %v5106_v41 = vpop.permute.xlu0 %1984 }
  0xae   : > { %v2729_v14 = vshrl.u32 %v5061_v0, 16  ;;  %v2733_v46 = vrot.slane %v2731_v53, 1  ;;  %v2962_v23 = vrot.slane %v5042_v60, 1  ;;  %v1112_v56 = vshrl.u32 %v5067_v24, 16  ;;  %v911_v8 = vld [vmem:[#allocation2 + $0x3c] sm:$0xe] }
  0xaf   : > { %v1119_v27 = vshll.u32 %v5076_v22, 16  ;;  %v5104_v30 = vcombine.low %v2498_v59, %v5089_v63  ;;  %v3962_v60 = vcombine.low %v2540_v29, %v5045_v50  ;;  %v1338_v53 = vsel %vm1323_vm9, %v1336_v17, %v1337_v9  ;;  %v2500_v24 = vld [vmem:[#allocation2 + $0x60] sm:$0xf]  ;;  %v5120_v0 = vld [vmem:[#allocation2 + $0x64] sm:$0xf] }
  0xb0   : > { %3002 = vrot.lane.b32.xlu1 %v2957_v4, %s4412_s18  ;;  %2876 = vrot.lane.b32.xlu0 %v2715_v55, %s4413_s19  ;;  %v3961_v4 = vcombine.low %v2539_v25, %v5024_v36  ;;  %v2736_v36 = vshll.u32 %v5073_v13, 16  ;;  %v1110_v55 = vsel %vm1050_vm10, %v1105_v11, %v1109_v62  ;;  %v5097_v25 = vcombine.low %v870_v40, %v5084_v3  ;;  %v5113_v62 = vld [vmem:[#allocation2 + $0x50] ss:$0 sps:$4 sm:$0x11]   ;;  %v872_v17 = vld [vmem:[#allocation2 + $0x54] sm:$0xf] }
  0xb1   : > { %5998 = vst [vmem:[#allocation8_spill] sm:$0xff] %v5104_v30  ;;  %v2727_v11 = vsel %vm1050_vm10, %v2722_v7, %v2726_v32  ;;  %v2734_v40 = vor.u32 %v2733_v46, %v2729_v14  ;;  %v3831_v59 = vcombine.low %v911_v8, %v5056_v34  ;;  %v1121_v7 = vrot.slane %v1119_v27, 1  ;;  %v5128_v46 = vld [vmem:[#allocation2 + $0x58] sm:$0xf]  ;;  %v874_v26 = vld [vmem:[#allocation2 + $0x60] sm:$0xf] }
  0xb2   : > { %5997 = vst [vmem:[#allocation7_spill] sm:$0xff] %v5097_v25  ;;  %v2961_v18 = vrot.slane %v3961_v4, 1  ;;  %v2738_v4 = vrot.slane %v2736_v36, 1  ;;  %v2964_v36 = vrot.slane %v3962_v60, 1  ;;  %v2965_v14 = vrot.slane %v5073_v13, 1 }
  0xb3   : > { %v1131_v34 = vshll.u32 %v5113_v62, 16  ;;  %vm1404_vm11 = vcmask 31744   ;;  %v4356_v13 = vld [vmem:[%s5975_s1 + $0x8] sm:$0x3f]   ;;  %v1339_v8 = vrot.slane %v3831_v59, 1  ;;  %v2741_v60 = vshrl.u32 %v5104_v30, 16 }
  0xb4   : > { %1249 = vrot.lane.b32.xlu1 %v1098_v15, %s4413_s19  ;;  %3004 = vrot.lane.b32.xlu0 %v2960_v47, %s4412_s18  ;;  %v1116_v15 = vrot.slane %v1114_v35, 1  ;;  %v1126_v35 = vshll.u32 %v5097_v25, 16  ;;  %v2963_v32 = vsel %vm1323_vm9, %v2961_v18, %v2962_v23  ;;  %v2739_v29 = vsel %vm1050_vm10, %v2734_v40, %v2738_v4  ;;  %v2541_v40 = vld [vmem:[#allocation2 + $0x54] sm:$0xe] }
  0xb5   : > { %v5108_v47 = vpop.permute.xlu1 %1990  ;;  %v1124_v18 = vshrl.u32 %v5097_v25, 16  ;;  %v5148_v25 = vld [vmem:[#allocation2 + $0x68] ss:$0 sps:$4 sm:$0x11]   ;;  %vm2121_vm12 = vcmask 1045504   ;;  %vm1437_vm13 = vcmask 64512  }
  0xb6   : > { %v1117_v50 = vor.u32 %v1116_v15, %v1112_v56  ;;  %v1128_v23 = vrot.slane %v1126_v35, 1  ;;  %v912_v56 = vld [vmem:[#allocation2 + $0x48] sm:$0xe]  ;;  %v5133_v15 = vcombine.low %v2500_v24, %v5120_v0  ;;  %v5146_v35 = vcombine.low %v872_v17, %v5128_v46  ;;  %v5158_v17 = vld [vmem:[#allocation2 + $0x64] sm:$0xf]  ;;  %4248 = vmatprep.subr.msk.bf16.mxu0 %vm2121_vm12, %v4356_v13  ;;  %4249 = vmatprep.subr.msk.bf16.mxu1 %vm2121_vm12, %v4356_v13 }
  0xb7   : > { %v3832_v38 = vcombine.low %v912_v56, %v5084_v3  ;;  %vm2088_vm14 = vcmask 97280   ;;  %v3963_v3 = vcombine.low %v2541_v40, %v5089_v63  ;;  %v1343_v63 = vrot.slane %v5113_v62, 1 }
  0xb8   : > { %1378 = vrot.lane.b32.xlu1 %v1335_v21, %s4412_s18  ;;  %1251 = vrot.lane.b32.xlu0 %v1110_v55, %s4413_s19  ;;  %v5116_v21 = vld [vmem:[#allocation2 + $0x5c] ss:$0 sps:$4 sm:$0x11]   ;;  %v2743_v55 = vshll.u32 %v5104_v30, 16  ;;  %v1122_v4 = vsel %vm1050_vm10, %v1117_v50, %v1121_v7  ;;  %5999 = vst [vmem:[#allocation9_spill] sm:$0xff] %v5146_v35  ;;  %v1133_v30 = vrot.slane %v1131_v34, 1  ;;  %v1129_v50 = vor.u32 %v1128_v23, %v1124_v18 }
  0xb9   : > { %v1857_v9 = vpop.permute.xlu1 %1856  ;;  %v2755_v7 = vshll.u32 %v5133_v15, 16  ;;  %v1138_v18 = vshll.u32 %v5146_v35, 16  ;;  %v2502_v23 = vld [vmem:[#allocation2 + $0x6c] sm:$0xf]  ;;  %v1342_v40 = vrot.slane %v3832_v38, 1  ;;  %v2967_v62 = vrot.slane %v3963_v3, 1 }
  0xba   : > { %v2745_v24 = vrot.slane %v2743_v55, 1  ;;  %v2017_v59 = vsel %vm1404_vm11, %v4601_v42, %v1857_v9  ;;  %v5164_v9 = vld [vmem:[#allocation2 + $0x5c] ss:$0 sps:$4 sm:$0x11]   ;;  %vm3662_vm15 = vcmask 1040384   ;;  %vm3664_vm0 = vcmask 25600  }
  0xbb   : > { %v5135_v27 = vpop.permute.xlu0 %2004  ;;  %v1344_v3 = vsel %vm1323_vm9, %v1342_v40, %v1343_v63  ;;  %v2971_v63 = vrot.slane %v5148_v25, 1 }
  0xbc   : > { %2878 = vrot.lane.b32.xlu1 %v2727_v11, %s4413_s19  ;;  %1380 = vrot.lane.b32.xlu0 %v1338_v53, %s4412_s18  ;;  %v1340_v11 = vrot.slane %v5076_v22, 1  ;;  %v2748_v53 = vshll.u32 %v5116_v21, 16  ;;  %v2966_v22 = vsel %vm1323_vm9, %v2964_v36, %v2965_v14  ;;  %v2049_v36 = vsel %vm1437_vm13, %v2017_v59, %v5106_v41 }
  0xbd   : > { %v2123_v14 = vsel %vm2121_vm12, %v4356_v13, 0  ;;  %v2746_v34 = vor.u32 %v2745_v24, %v2741_v60  ;;  %4146 = vmatprep.mubr.msk.bf16.mxu0 %vm2088_vm14, %v2049_v36  ;;  %v2760_v41 = vshll.u32 %v5148_v25, 16  ;;  %v2542_v13 = vld [vmem:[#allocation2 + $0x60] sm:$0xe]  ;;  %v2968_v24 = vrot.slane %v5116_v21, 1 }
  0xbe   : > { %v1341_v42 = vsel %vm1323_vm9, %v1339_v8, %v1340_v11  ;;  %v5177_v8 = vld [vmem:[#allocation2 + $0x70] sm:$0xf]  ;;  %v5180_v11 = vcombine.low %v874_v26, %v5158_v17  ;;  %4145 = vmatpush3.bf16.msra.mxu0 %v2123_v14  ;;  %4247 = vmatpush3.bf16.msra.mxu1 %v2123_v14  ;;  %v1143_v59 = vshll.u32 %v5164_v9, 16  ;;  %v1136_v26 = vshrl.u32 %v5146_v35, 16 }
  0xbf   : > { %v3964_v38 = vcombine.low %v2542_v13, %v5120_v0  ;;  %v2762_v14 = vrot.slane %v2760_v41, 1  ;;  %v876_v13 = vld [vmem:[#allocation2 + $0x6c] sm:$0xf]  ;;  %v5212_v41 = vld [vmem:[#allocation2 + $0x70] sm:$0xf] }
  0xc0   : > { %3006 = vrot.lane.b32.xlu1 %v2963_v32, %s4412_s18  ;;  %2880 = vrot.lane.b32.xlu0 %v2739_v29, %s4413_s19  ;;  %v1859_v32 = vpop.permute.xlu1 %1858  ;;  %v5156_v55 = vpop.permute.xlu0 %2006  ;;  %v2750_v29 = vrot.slane %v2748_v53, 1  ;;  %v1134_v53 = vsel %vm1050_vm10, %v1129_v50, %v1133_v30  ;;  %v5193_v30 = vcombine.low %v2502_v23, %v5177_v8  ;;  %v2969_v23 = vsel %vm1323_vm9, %v2967_v62, %v2968_v24 }
  0xc1   : > { %v2019_v56 = vsel %vm1404_vm11, %v4646_v48, %v1859_v32  ;;  %v2753_v48 = vshrl.u32 %v5133_v15, 16  ;;  %v1140_v32 = vrot.slane %v1138_v18, 1  ;;  %v5203_v18 = vld [vmem:[#allocation2 + $0x74] ss:$0 sps:$4 sm:$0x11]   ;;  %v1145_v0 = vrot.slane %v1143_v59, 1 }
  0xc2   : > { %v2051_v60 = vsel %vm1437_vm13, %v2019_v56, %v5081_v61  ;;  %v913_v61 = vld [vmem:[#allocation2 + $0x54] sm:$0xe]  ;;  %v2751_v21 = vsel %vm1050_vm10, %v2746_v34, %v2750_v29  ;;  %v5207_v34 = vld [vmem:[#allocation2 + $0x7c] sm:$0xf]  ;;  %v2970_v35 = vrot.slane %v3964_v38, 1 }
  0xc3   : > { %4147 = vmatmul.mubr.msk.bf16.vlgmr.msra.gmra.mxu0 %vm2088_vm14, %v2051_v60  ;;  %v3833_v56 = vcombine.low %v913_v61, %v5128_v46  ;;  %v2504_v60 = vld [vmem:[#allocation2 + $0x78] sm:$0xf]  ;;  %v1141_v29 = vor.u32 %v1140_v32, %v1136_v26  ;;  %v914_v26 = vld [vmem:[#allocation2 + $0x60] sm:$0xe] }
  0xc4   : > { %1253 = vrot.lane.b32.xlu1 %v1122_v4, %s4413_s19  ;;  %3008 = vrot.lane.b32.xlu0 %v2966_v22, %s4412_s18  ;;  %v2757_v4 = vrot.slane %v2755_v7, 1  ;;  %v5188_v22 = vpop.permute.xlu1 %1878  ;;  %v5199_v7 = vld [vmem:[#allocation2 + $0x68] ss:$0 sps:$4 sm:$0x11]   ;;  %v5221_v32 = vcombine.low %v2504_v60, %v5207_v34 }
  0xc5   : > { %v1989_v50 = vpop.permute.xlu0 %1988  ;;  %v1345_v38 = vrot.slane %v3833_v56, 1 }
  0xc6   : > { %v2758_v36 = vor.u32 %v2757_v4, %v2753_v48  ;;  %v1148_v48 = vshrl.u32 %v5180_v11, 16  ;;  %v1155_v4 = vshll.u32 %v5199_v7, 16 }
  0xc8   : > { %1382 = vrot.lane.b32.xlu1 %v1341_v42, %s4412_s18  ;;  %1255 = vrot.lane.b32.xlu0 %v1134_v53, %s4413_s19  ;;  %v1150_v42 = vshll.u32 %v5180_v11, 16  ;;  %v2767_v53 = vshll.u32 %v5193_v30, 16  ;;  %v2763_v59 = vsel %vm1050_vm10, %v2758_v36, %v2762_v14  ;;  %v2765_v36 = vshrl.u32 %v5193_v30, 16 }
  0xc9   : > { %v1873_v40 = vpop.permute.xlu0 %1872  ;;  %v1157_v60 = vrot.slane %v1155_v4, 1  ;;  %v878_v4 = vld [vmem:[#allocation2 + $0x78] sm:$0xf] }
  0xca   : > { %v1152_v46 = vrot.slane %v1150_v42, 1  ;;  %v2033_v62 = vsel %vm1404_vm11, %v4643_v45, %v1873_v40  ;;  %v1861_v24 = vpop.permute.xlu1 %1860  ;;  %v2772_v42 = vshll.u32 %v5203_v18, 16  ;;  %v2769_v14 = vrot.slane %v2767_v53, 1  ;;  %v5240_v40 = vld [vmem:[#allocation2 + $0x80] ss:$0 sps:$4 sm:$0x11]  }
  0xcb   : > { %v2065_v25 = vsel %vm1437_vm13, %v2033_v62, %v5050_v1  ;;  %v2021_v61 = vsel %vm1404_vm11, %v4717_v28, %v1861_v24  ;;  %v5235_v1 = vcombine.low %v876_v13, %v5212_v41  ;;  %v5245_v13 = vld [vmem:[#allocation2 + $0x74] ss:$0 sps:$4 sm:$0x11]   ;;  %v2779_v53 = vshll.u32 %v5221_v32, 16 }
  0xcc   : > { %2882 = vrot.lane.b32.xlu1 %v2751_v21, %s4413_s19  ;;  %1384 = vrot.lane.b32.xlu0 %v1344_v3, %s4412_s18  ;;  %v1346_v21 = vrot.slane %v5164_v9, 1  ;;  %v2053_v45 = vsel %vm1437_vm13, %v2021_v61, %v1989_v50  ;;  %v1146_v3 = vsel %vm1050_vm10, %v1141_v29, %v1145_v0  ;;  %v2543_v9 = vld [vmem:[#allocation2 + $0x6c] sm:$0xe]  ;;  %v1153_v56 = vor.u32 %v1152_v46, %v1148_v48 }
  0xcd   : > { %4162 = vmatprep.mubr.msk.bf16.mxu1 %vm2088_vm14, %v2065_v25  ;;  %v1875_v28 = vpop.permute.xlu0 %1874  ;;  %4150 = vmatprep.mubr.msk.bf16.mxu0 %vm2088_vm14, %v2053_v45  ;;  %v3834_v50 = vcombine.low %v914_v26, %v5158_v17  ;;  %v2972_v29 = vsel %vm1323_vm9, %v2970_v35, %v2971_v63  ;;  %v2774_v46 = vrot.slane %v2772_v42, 1  ;;  %v2770_v63 = vor.u32 %v2769_v14, %v2765_v36 }
  0xce   : > { %v1863_v0 = vpop.permute.xlu1 %1862  ;;  %v1347_v17 = vsel %vm1323_vm9, %v1345_v38, %v1346_v21  ;;  %v3965_v24 = vcombine.low %v2543_v9, %v5177_v8  ;;  %v1158_v26 = vsel %vm1050_vm10, %v1153_v56, %v1157_v60  ;;  %v2784_v61 = vshll.u32 %v5240_v40, 16  ;;  %v5266_v38 = vld [vmem:[#allocation2 + $0x88] sm:$0xf]  ;;  %v915_v56 = vld [vmem:[#allocation2 + $0x6c] sm:$0xe] }
  0xcf   : > { %v2023_v48 = vsel %vm1404_vm11, %v4667_v12, %v1863_v0  ;;  %v1349_v12 = vrot.slane %v5199_v7, 1  ;;  %v1348_v25 = vrot.slane %v3834_v50, 1  ;;  %v2777_v21 = vshrl.u32 %v5221_v32, 16  ;;  %v2544_v7 = vld [vmem:[#allocation2 + $0x78] sm:$0xe] }
  0xd0   : > { %3010 = vrot.lane.b32.xlu1 %v2969_v23, %s4412_s18  ;;  %2884 = vrot.lane.b32.xlu0 %v2763_v59, %s4413_s19  ;;  %v2035_v23 = vsel %vm1404_vm11, %v4576_v19, %v1875_v28  ;;  %v5254_v19 = vld [vmem:[#allocation2 + $0x7c] sm:$0xf]  ;;  %v2055_v35 = vsel %vm1437_vm13, %v2023_v48, %v5108_v47  ;;  %v2506_v47 = vld [vmem:[#allocation2 + $0x84] sm:$0xf]  ;;  %v2781_v42 = vrot.slane %v2779_v53, 1  ;;  %v2974_v36 = vrot.slane %v5203_v18, 1 }
  0xd1   : > { %v2067_v62 = vsel %vm1437_vm13, %v2035_v23, %v5079_v5  ;;  %v1162_v5 = vshll.u32 %v5235_v1, 16  ;;  %v1877_v59 = vpop.permute.xlu0 %1876  ;;  %4151 = vmatmul.mubr.msk.bf16.gmra.mxu0 %vm2088_vm14, %v2055_v35  ;;  %v5272_v45 = vcombine.low %v878_v4, %v5254_v19  ;;  %v2039_v14 = vsel %vm1404_vm11, %v4696_v57, %v5188_v22  ;;  %v5291_v50 = vld [vmem:[#allocation2 + $0x80] ss:$0 sps:$4 sm:$0x11]   ;;  %v5296_v48 = vld [vmem:[#allocation2 + $0x94] sm:$0xf] }
  0xd2   : > { %4163 = vmatmul.mubr.msk.bf16.vlgmr.msra.gmra.mxu1 %vm2088_vm14, %v2067_v62  ;;  %v2037_v8 = vsel %vm1404_vm11, %v4690_v49, %v1877_v59  ;;  %v2775_v49 = vsel %vm1050_vm10, %v2770_v63, %v2774_v46  ;;  %v2973_v28 = vrot.slane %v3965_v24, 1  ;;  %v1167_v9 = vshll.u32 %v5245_v13, 16  ;;  %v2508_v62 = vld [vmem:[#allocation2 + $0x90] sm:$0xf]  ;;  %v880_v63 = vld [vmem:[#allocation2 + $0x84] sm:$0xf] }
  0xd3   : > { %v5285_v60 = vcombine.low %v2506_v47, %v5266_v38  ;;  %v1164_v18 = vrot.slane %v1162_v5, 1  ;;  %v1350_v57 = vsel %vm1323_vm9, %v1348_v25, %v1349_v12  ;;  %v3966_v22 = vcombine.low %v2544_v7, %v5207_v34  ;;  %v5299_v46 = vld [vmem:[#allocation2 + $0x8c] ss:$0 sps:$4 sm:$0x11]   ;;  %v5307_v12 = vld [vmem:[#allocation2 + $0x88] sm:$0xf] }
  0xd4   : > { %1257 = vrot.lane.b32.xlu1 %v1146_v3, %s4413_s19  ;;  %3012 = vrot.lane.b32.xlu0 %v2972_v29, %s4412_s18  ;;  %v2069_v3 = vsel %vm1437_vm13, %v2037_v8, %v5135_v27  ;;  %v1160_v27 = vshrl.u32 %v5235_v1, 16  ;;  %v2782_v23 = vor.u32 %v2781_v42, %v2777_v21  ;;  %v2786_v0 = vrot.slane %v2784_v61, 1  ;;  %v916_v21 = vld [vmem:[#allocation2 + $0x78] sm:$0xe] }
  0xd5   : > { %4166 = vmatprep.mubr.msk.bf16.mxu1 %vm2088_vm14, %v2069_v3  ;;  %v1174_v29 = vshll.u32 %v5272_v45, 16  ;;  %v2071_v53 = vsel %vm1437_vm13, %v2039_v14, %v5156_v55  ;;  %v2975_v34 = vsel %vm1323_vm9, %v2973_v28, %v2974_v36  ;;  %v1169_v4 = vrot.slane %v1167_v9, 1  ;;  %v2545_v36 = vld [vmem:[#allocation2 + $0x84] sm:$0xe] }
  0xd6   : > { %v2791_v35 = vshll.u32 %v5285_v60, 16  ;;  %v1165_v24 = vor.u32 %v1164_v18, %v1160_v27  ;;  %v2976_v55 = vrot.slane %v3966_v22, 1  ;;  %v2977_v5 = vrot.slane %v5240_v40, 1  ;;  %v5319_v40 = vld [vmem:[%s5975_s1] sm:$0x3f]  }
  0xd7   : > { %v2787_v59 = vsel %vm1050_vm10, %v2782_v23, %v2786_v0  ;;  %v1176_v25 = vrot.slane %v1174_v29, 1  ;;  %v1179_v61 = vshll.u32 %v5291_v50, 16  ;;  %v1352_v8 = vrot.slane %v5245_v13, 1  ;;  %v5329_v13 = vld [vmem:[#allocation2 + $0x98] ss:$0 sps:$4 sm:$0x11]   ;;  %4250 = vmatprep.subr.msk.bf16.mxu1 %vm2121_vm12, %v5319_v40 }
  0xd8   : > { %1386 = vrot.lane.b32.xlu1 %v1347_v17, %s4412_s18  ;;  %1259 = vrot.lane.b32.xlu0 %v1158_v26, %s4413_s19  ;;  %v3835_v17 = vcombine.low %v915_v56, %v5212_v41  ;;  %v5310_v41 = vcombine.low %v2508_v62, %v5296_v48  ;;  %v1172_v26 = vshrl.u32 %v5272_v45, 16  ;;  %v2789_v42 = vshrl.u32 %v5285_v60, 16  ;;  %v5335_v18 = vld [vmem:[#allocation2 + $0x8c] ss:$0 sps:$4 sm:$0x11]  }
  0xd9   : > { %v2793_v7 = vrot.slane %v2791_v35, 1  ;;  %v2796_v3 = vshll.u32 %v5299_v46, 16  ;;  %v5325_v14 = vcombine.low %v880_v63, %v5307_v12  ;;  %v2978_v9 = vsel %vm1323_vm9, %v2976_v55, %v2977_v5  ;;  %v882_v0 = vld [vmem:[#allocation2 + $0x90] sm:$0xf]  ;;  %v5339_v29 = vld [vmem:[#allocation2 + $0x94] sm:$0xf] }
  0xda   : > { %4167 = vmatmul.mubr.msk.bf16.gmra.mxu1 %vm2088_vm14, %v2071_v53  ;;  %v1351_v47 = vrot.slane %v3835_v17, 1  ;;  %v2803_v28 = vshll.u32 %v5310_v41, 16  ;;  %v1177_v56 = vor.u32 %v1176_v25, %v1172_v26  ;;  %v1181_v27 = vrot.slane %v1179_v61, 1  ;;  %v5344_v35 = vld [vmem:[#allocation2 + $0xa0] sm:$0xf] }
  0xdb   : > { %v3836_v22 = vcombine.low %v916_v21, %v5254_v19  ;;  %v3967_v23 = vcombine.low %v2545_v36, %v5266_v38  ;;  %v2794_v62 = vor.u32 %v2793_v7, %v2789_v42  ;;  %v2798_v17 = vrot.slane %v2796_v3, 1  ;;  %v2546_v55 = vld [vmem:[#allocation2 + $0x90] sm:$0xe]  ;;  %v917_v36 = vld [vmem:[#allocation2 + $0x84] sm:$0xe] }
  0xdc   : > { %2886 = vrot.lane.b32.xlu1 %v2775_v49, %s4413_s19  ;;  %1388 = vrot.lane.b32.xlu0 %v1350_v57, %s4412_s18  ;;  %v1170_v49 = vsel %vm1050_vm10, %v1165_v24, %v1169_v4  ;;  %v1353_v53 = vsel %vm1323_vm9, %v1351_v47, %v1352_v8  ;;  %v2510_v4 = vld [vmem:[#allocation2 + $0x9c] sm:$0xf]  ;;  %v1355_v19 = vrot.slane %v5291_v50, 1  ;;  %v2801_v38 = vshrl.u32 %v5310_v41, 16  ;;  %v5361_v42 = vld [vmem:[%s5975_s1 + $0x10] sm:$0x3f]  }
  0xdd   : > { %v2805_v63 = vrot.slane %v2803_v28, 1  ;;  %v2808_v24 = vshll.u32 %v5329_v13, 16  ;;  %v1182_v5 = vsel %vm1050_vm10, %v1177_v56, %v1181_v27  ;;  %v1354_v25 = vrot.slane %v3836_v22, 1  ;;  %v5373_v27 = vld [vmem:[#allocation2 + $0x98] ss:$0 sps:$4 sm:$0x11]   ;;  %4251 = vmatprep.subr.msk.bf16.mxu0 %vm2121_vm12, %v5361_v42 }
  0xde   : > { %v5354_v47 = vcombine.low %v882_v0, %v5339_v29  ;;  %v2979_v8 = vrot.slane %v3967_v23, 1  ;;  %v2980_v50 = vrot.slane %v5299_v46, 1  ;;  %v1191_v3 = vshll.u32 %v5335_v18, 16 }
  0xdf   : > { %v2799_v46 = vsel %vm1050_vm10, %v2794_v62, %v2798_v17  ;;  %v2806_v28 = vor.u32 %v2805_v63, %v2801_v38  ;;  %v3968_v56 = vcombine.low %v2546_v55, %v5296_v48  ;;  %v1356_v22 = vsel %vm1323_vm9, %v1354_v25, %v1355_v19  ;;  %v2512_v62 = vld [vmem:[#allocation2 + $0xa8] sm:$0xf]  ;;  %v5381_v17 = vld [vmem:[#allocation2 + $0xac] sm:$0xf] }
  0xe0   : > { %3014 = vrot.lane.b32.xlu1 %v2975_v34, %s4412_s18  ;;  %2888 = vrot.lane.b32.xlu0 %v2787_v59, %s4413_s19  ;;  %v1186_v34 = vshll.u32 %v5325_v14, 16  ;;  %v3837_v48 = vcombine.low %v917_v36, %v5307_v12  ;;  %v1193_v63 = vrot.slane %v1191_v3, 1  ;;  %v1203_v12 = vshll.u32 %v5373_v27, 16 }
  0xe1   : > { %v1881_v57 = vpop.permute.xlu0 %1880  ;;  %v5398_v25 = vcombine.low %v2512_v62, %v5381_v17  ;;  %v5420_v62 = vld [vmem:[#allocation2 + $0xa4] ss:$0 sps:$4 sm:$0x11]  }
  0xe2   : > { %v2041_v59 = vsel %vm1404_vm11, %v4804_v43, %v1881_v57  ;;  %v1184_v43 = vshrl.u32 %v5325_v14, 16  ;;  %v1188_v7 = vrot.slane %v1186_v34, 1  ;;  %v2981_v34 = vsel %vm1323_vm9, %v2979_v8, %v2980_v50 }
  0xe4   : > { %1261 = vrot.lane.b32.xlu1 %v1170_v49, %s4413_s19  ;;  %3016 = vrot.lane.b32.xlu0 %v2978_v9, %s4412_s18  ;;  %v5368_v49 = vcombine.low %v2510_v4, %v5344_v35  ;;  %v2810_v9 = vrot.slane %v2808_v24, 1  ;;  %v1189_v38 = vor.u32 %v1188_v7, %v1184_v43  ;;  %v2983_v24 = vrot.slane %v5329_v13, 1 }
  0xe5   : > { %v1883_v26 = vpop.permute.xlu1 %1882  ;;  %v2009_v61 = vpop.permute.xlu0 %2008  ;;  %v1196_v13 = vshrl.u32 %v5354_v47, 16  ;;  %v1357_v43 = vrot.slane %v3837_v48, 1  ;;  %v1358_v7 = vrot.slane %v5335_v18, 1 }
  0xe6   : > { %v2073_v21 = vsel %vm1437_vm13, %v2041_v59, %v2009_v61  ;;  %v2043_v57 = vsel %vm1404_vm11, %v4817_v10, %v1883_v26  ;;  %v5387_v10 = vld [vmem:[#allocation2 + $0xa4] ss:$0 sps:$4 sm:$0x11]   ;;  %v2815_v19 = vshll.u32 %v5368_v49, 16  ;;  %v2811_v55 = vsel %vm1050_vm10, %v2806_v28, %v2810_v9  ;;  %v884_v59 = vld [vmem:[#allocation2 + $0x9c] sm:$0xf] }
  0xe7   : > { %4170 = vmatprep.mubr.msk.bf16.mxu1 %vm2088_vm14, %v2073_v21  ;;  %v5395_v26 = vld [vmem:[#allocation2 + $0xa0] sm:$0xf]  ;;  %v2324_v21 = vsel %vm2121_vm12, %v5319_v40, 0  ;;  %v2813_v28 = vshrl.u32 %v5368_v49, 16  ;;  %v2820_v9 = vshll.u32 %v5387_v10, 16  ;;  %v1194_v18 = vsel %vm1050_vm10, %v1189_v38, %v1193_v63 }
  0xe8   : > { %1390 = vrot.lane.b32.xlu1 %v1353_v53, %s4412_s18  ;;  %1263 = vrot.lane.b32.xlu0 %v1182_v5, %s4413_s19  ;;  %v1198_v53 = vshll.u32 %v5354_v47, 16  ;;  %v2982_v5 = vrot.slane %v3968_v56, 1  ;;  %v2547_v56 = vld [vmem:[#allocation2 + $0x9c] sm:$0xe]  ;;  %v5412_v40 = vcombine.low %v884_v59, %v5395_v26  ;;  %v1359_v48 = vsel %vm1323_vm9, %v1357_v43, %v1358_v7 }
  0xe9   : > { %v1865_v23 = vpop.permute.xlu1 %1864  ;;  %v2011_v0 = vpop.permute.xlu0 %2010  ;;  %4179 = vmatpush3.bf16.msra.mxu1 %v2324_v21  ;;  %v3969_v38 = vcombine.low %v2547_v56, %v5344_v35  ;;  %v1361_v7 = vrot.slane %v5373_v27, 1 }
  0xea   : > { %v2075_v4 = vsel %vm1437_vm13, %v2043_v57, %v2011_v0  ;;  %v2025_v61 = vsel %vm1404_vm11, %v4827_v31, %v1865_v23  ;;  %v1200_v50 = vrot.slane %v1198_v53, 1  ;;  %v2817_v31 = vrot.slane %v2815_v19, 1  ;;  %v5416_v57 = vld [vmem:[#allocation2 + $0xb0] ss:$0 sps:$4 sm:$0x11]  }
  0xeb   : > { %4171 = vmatmul.mubr.msk.bf16.gmra.mxu1 %vm2088_vm14, %v2075_v4  ;;  %v2984_v23 = vsel %vm1323_vm9, %v2982_v5, %v2983_v24  ;;  %v1205_v53 = vrot.slane %v1203_v12, 1  ;;  %v886_v19 = vld [vmem:[#allocation2 + $0xa8] sm:$0xf]  ;;  %v2822_v5 = vrot.slane %v2820_v9, 1  ;;  %v1210_v59 = vshll.u32 %v5412_v40, 16 }
  0xec   : > { %2890 = vrot.lane.b32.xlu1 %v2799_v46, %s4413_s19  ;;  %1392 = vrot.lane.b32.xlu0 %v1356_v22, %s4412_s18  ;;  %v918_v46 = vld [vmem:[#allocation2 + $0x90] sm:$0xe]  ;;  %v2827_v22 = vshll.u32 %v5398_v25, 16  ;;  %v1201_v0 = vor.u32 %v1200_v50, %v1196_v13  ;;  %v2818_v24 = vor.u32 %v2817_v31, %v2813_v28  ;;  %v3137_v13 = vsel %vm2121_vm12, %v5361_v42, 0 }
  0xed   : > { %v1993_v8 = vpop.permute.xlu0 %1992  ;;  %4213 = vmatpush3.bf16.msra.mxu0 %v3137_v13  ;;  %v2986_v28 = vrot.slane %v5387_v10, 1  ;;  %v1208_v42 = vshrl.u32 %v5412_v40, 16  ;;  %v1215_v9 = vshll.u32 %v5420_v62, 16  ;;  %v1212_v27 = vrot.slane %v1210_v59, 1  ;;  %v5474_v13 = vld [vmem:[#allocation2 + $0xb8] sm:$0xf] }
  0xee   : > { %v1867_v3 = vpop.permute.xlu1 %1866  ;;  %v2057_v36 = vsel %vm1437_vm13, %v2025_v61, %v1993_v8  ;;  %v2829_v35 = vrot.slane %v2827_v22, 1  ;;  %v2832_v61 = vshll.u32 %v5416_v57, 16  ;;  %v5436_v8 = vld [vmem:[#allocation2 + $0xb8] sm:$0xf]  ;;  %v1206_v50 = vsel %vm1050_vm10, %v1201_v0, %v1205_v53 }
  0xef   : > { %4154 = vmatprep.mubr.msk.bf16.mxu0 %vm2088_vm14, %v2057_v36  ;;  %v2027_v4 = vsel %vm1404_vm11, %v4840_v6, %v1867_v3  ;;  %v2825_v6 = vshrl.u32 %v5398_v25, 16  ;;  %v2548_v3 = vld [vmem:[#allocation2 + $0xa8] sm:$0xe]  ;;  %v2823_v31 = vsel %vm1050_vm10, %v2818_v24, %v2822_v5  ;;  %v1213_v59 = vor.u32 %v1212_v27, %v1208_v42  ;;  %v2549_v27 = vld [vmem:[#allocation2 + $0xb4] sm:$0xe] }
  0xf0   : > { %3018 = vrot.lane.b32.xlu1 %v2981_v34, %s4412_s18  ;;  %2892 = vrot.lane.b32.xlu0 %v2811_v55, %s4413_s19  ;;  %v3838_v34 = vcombine.low %v918_v46, %v5339_v29  ;;  %v5427_v55 = vld [vmem:[#allocation2 + $0xac] sm:$0xf]  ;;  %v2514_v29 = vld [vmem:[#allocation2 + $0xb4] sm:$0xf]  ;;  %v2985_v46 = vrot.slane %v3969_v38, 1  ;;  %v3970_v0 = vcombine.low %v2548_v3, %v5381_v17  ;;  %v1217_v17 = vrot.slane %v1215_v9, 1 }
  0xf1   : > { %v5443_v36 = vcombine.low %v886_v19, %v5427_v55  ;;  %v5451_v56 = vcombine.low %v2514_v29, %v5436_v8  ;;  %v2830_v22 = vor.u32 %v2829_v35, %v2825_v6  ;;  %v5462_v19 = vld [vmem:[#allocation2 + $0xc4] sm:$0xf]  ;;  %v2989_v35 = vrot.slane %v5416_v57, 1 }
  0xf2   : > { %v1995_v63 = vpop.permute.xlu1 %1994  ;;  %v1360_v43 = vrot.slane %v3838_v34, 1  ;;  %v2987_v24 = vsel %vm1323_vm9, %v2985_v46, %v2986_v28  ;;  %v2988_v6 = vrot.slane %v3970_v0, 1  ;;  %v1364_v3 = vrot.slane %v5420_v62, 1 }
  0xf3   : > { %v2059_v12 = vsel %vm1437_vm13, %v2027_v4, %v1995_v63  ;;  %v1222_v4 = vshll.u32 %v5443_v36, 16  ;;  %v2516_v63 = vld [vmem:[#allocation2 + $0xc0] sm:$0xf]  ;;  %v2837_v46 = vshrl.u32 %v5451_v56, 16 }
  0xf4   : > { %1265 = vrot.lane.b32.xlu1 %v1194_v18, %s4413_s19  ;;  %3020 = vrot.lane.b32.xlu0 %v2984_v23, %s4412_s18  ;;  %v919_v18 = vld [vmem:[#allocation2 + $0x9c] sm:$0xe]  ;;  %v2834_v23 = vrot.slane %v2832_v61, 1  ;;  %v1362_v53 = vsel %vm1323_vm9, %v1360_v43, %v1361_v7  ;;  %v888_v61 = vld [vmem:[#allocation2 + $0xb4] sm:$0xf]  ;;  %v5479_v7 = vcombine.low %v2516_v63, %v5462_v19  ;;  %v2990_v62 = vsel %vm1323_vm9, %v2988_v6, %v2989_v35 }
  0xf5   : > { %4155 = vmatmul.mubr.msk.bf16.gmra.mxu0 %vm2088_vm14, %v2059_v12  ;;  %v3839_v5 = vcombine.low %v919_v18, %v5395_v26  ;;  %v2839_v12 = vshll.u32 %v5451_v56, 16  ;;  %v1224_v26 = vrot.slane %v1222_v4, 1  ;;  %v920_v43 = vld [vmem:[#allocation2 + $0xa8] sm:$0xe]  ;;  %v5488_v18 = vcombine.low %v888_v61, %v5474_v13 }
  0xf6   : > { %v1885_v21 = vpop.permute.xlu0 %1884  ;;  %v2835_v29 = vsel %vm1050_vm10, %v2830_v22, %v2834_v23  ;;  %v3840_v22 = vcombine.low %v920_v43, %v5427_v55  ;;  %v3971_v55 = vcombine.low %v2549_v27, %v5436_v8  ;;  %v2849_v35 = vshrl.u32 %v5479_v7, 16 }
  0xf7   : > { %v2045_v10 = vsel %vm1404_vm11, %v4867_v52, %v1885_v21  ;;  %v5468_v52 = vld [vmem:[#allocation2 + $0xbc] ss:$0 sps:$4 sm:$0x11]   ;;  %v2841_v28 = vrot.slane %v2839_v12, 1  ;;  %v1363_v42 = vrot.slane %v3839_v5, 1  ;;  %v1234_v12 = vshll.u32 %v5488_v18, 16 }
  0xf8   : > { %1394 = vrot.lane.b32.xlu1 %v1359_v48, %s4412_s18  ;;  %1267 = vrot.lane.b32.xlu0 %v1206_v50, %s4413_s19  ;;  %v5458_v48 = vld [vmem:[#allocation2 + $0xb0] ss:$0 sps:$4 sm:$0x11]   ;;  %v1220_v50 = vshrl.u32 %v5443_v36, 16  ;;  %v2844_v57 = vshll.u32 %v5468_v52, 16 }
  0xf9   : > { %v1227_v21 = vshll.u32 %v5458_v48, 16  ;;  %v1365_v5 = vsel %vm1323_vm9, %v1363_v42, %v1364_v3  ;;  %v2991_v3 = vrot.slane %v3971_v55, 1 }
  0xfa   : > { %v2013_v34 = vpop.permute.xlu0 %2012  ;;  %v1225_v0 = vor.u32 %v1224_v26, %v1220_v50  ;;  %v2846_v63 = vrot.slane %v2844_v57, 1  ;;  %v5510_v50 = vld [vmem:[#allocation2 + $0xd0] sm:$0xf] }
  0xfb   : > { %v2077_v38 = vsel %vm1437_vm13, %v2045_v10, %v2013_v34  ;;  %v1229_v10 = vrot.slane %v1227_v21, 1  ;;  %v2851_v34 = vshll.u32 %v5479_v7, 16  ;;  %v2550_v21 = vld [vmem:[#allocation2 + $0xc0] sm:$0xe] }
  0xfc   : > { %2894 = vrot.lane.b32.xlu1 %v2823_v31, %s4413_s19  ;;  %4174 = vmatprep.mubr.msk.bf16.mxu1 %vm2088_vm14, %v2077_v38  ;;  %v1218_v31 = vsel %vm1050_vm10, %v1213_v59, %v1217_v17  ;;  %v2842_v38 = vor.u32 %v2841_v28, %v2837_v46  ;;  %v5500_v17 = vld [vmem:[#allocation2 + $0xbc] ss:$0 sps:$4 sm:$0x11]   ;;  %v1366_v59 = vrot.slane %v3840_v22, 1  ;;  %v2992_v46 = vrot.slane %v5468_v52, 1 }
  0xfd   : > { %1396 = vrot.lane.b32.xlu0 %v1362_v53, %s4412_s18  ;;  %v5492_v53 = vld [vmem:[#allocation2 + $0xc8] ss:$0 sps:$4 sm:$0x11]   ;;  %v1230_v6 = vsel %vm1050_vm10, %v1225_v0, %v1229_v10  ;;  %v2853_v61 = vrot.slane %v2851_v34, 1  ;;  %v1236_v28 = vrot.slane %v1234_v12, 1  ;;  %v1239_v57 = vshll.u32 %v5500_v17, 16 }
  0xfe   : > { %v2856_v8 = vshll.u32 %v5492_v53, 16  ;;  %v2847_v43 = vsel %vm1050_vm10, %v2842_v38, %v2846_v63  ;;  %v2995_v12 = vrot.slane %v5492_v53, 1 }
  0xff   : > { %v2015_v9 = vpop.permute.xlu0 %2014  ;;  %v2854_v22 = vor.u32 %v2853_v61, %v2849_v35  ;;  %v1241_v63 = vrot.slane %v1239_v57, 1 }
 0x100   : > { %3022 = vrot.lane.b32.xlu1 %v2987_v24, %s4412_s18 }
 0x101   : > { %2896 = vrot.lane.b32.xlu0 %v2835_v29, %s4413_s19  ;;  %v2518_v29 = vld [vmem:[#allocation2 + $0xcc] sm:$0xf] }
 0x102   : > { %v1887_v23 = vpop.permute.xlu1 %1886  ;;  %v5519_v42 = vcombine.low %v2518_v29, %v5510_v50  ;;  %v1370_v29 = vrot.slane %v5500_v17, 1 }
 0x103   : > { %v2047_v4 = vsel %vm1404_vm11, %v4904_v2, %v1887_v23  ;;  %v1367_v2 = vrot.slane %v5458_v48, 1  ;;  %v1232_v48 = vshrl.u32 %v5488_v18, 16  ;;  %v2858_v23 = vrot.slane %v2856_v8, 1 }
 0x104   : > { %1269 = vrot.lane.b32.xlu1 %v1218_v31, %s4413_s19  ;;  %v2079_v24 = vsel %vm1437_vm13, %v2047_v4, %v2015_v9  ;;  %v921_v31 = vld [vmem:[#allocation2 + $0xb4] sm:$0xe]  ;;  %v2993_v4 = vsel %vm1323_vm9, %v2991_v3, %v2992_v46  ;;  %v2861_v61 = vshrl.u32 %v5519_v42, 16 }
 0x105   : > { %3024 = vrot.lane.b32.xlu0 %v2990_v62, %s4412_s18  ;;  %4175 = vmatmul.mubr.msk.bf16.gmra.mxu1 %vm2088_vm14, %v2079_v24  ;;  %v1368_v27 = vsel %vm1323_vm9, %v1366_v59, %v1367_v2  ;;  %v3972_v62 = vcombine.low %v2550_v21, %v5462_v19  ;;  %v3841_v34 = vcombine.low %v921_v31, %v5474_v13  ;;  %v4399_v24 = vld [vmem:[#allocation2 + $0xd4] ss:$0 sps:$4 sm:$0x11]   ;;  %v2863_v19 = vshll.u32 %v5519_v42, 16 }
 0x106   : > { %v1997_v26 = vpop.permute.xlu0 %1996  ;;  %v1237_v38 = vor.u32 %v1236_v28, %v1232_v48  ;;  %v2868_v8 = vshll.u32 %v4399_v24, 16 }
 0x107   : > { %v1369_v2 = vrot.slane %v3841_v34, 1  ;;  %v2865_v53 = vrot.slane %v2863_v19, 1 }
 0x108   : > { %1398 = vrot.lane.b32.xlu1 %v1365_v5, %s4412_s18  ;;  %v2994_v5 = vrot.slane %v3972_v62, 1  ;;  %v1242_v35 = vsel %vm1050_vm10, %v1237_v38, %v1241_v63  ;;  %v2870_v28 = vrot.slane %v2868_v8, 1  ;;  %v2998_v62 = vrot.slane %v4399_v24, 1 }
 0x109   : > { %1271 = vrot.lane.b32.xlu0 %v1230_v6, %s4413_s19  ;;  %v1371_v46 = vsel %vm1323_vm9, %v1369_v2, %v1370_v29  ;;  %v2866_v48 = vor.u32 %v2865_v53, %v2861_v61  ;;  %v6001_v53 = vld [vmem:[#allocation4_spill] sm:$0xff] }
 0x10a   : > { %v1869_v9 = vpop.permute.xlu1 %1868  ;;  %v1244_v0 = vpop.permute.xlu0 %1243  ;;  %v2996_v21 = vsel %vm1323_vm9, %v2994_v5, %v2995_v12 }
 0x10b   : > { %v2029_v52 = vsel %vm1404_vm11, %v4935_v16, %v1869_v9  ;;  %v2859_v16 = vsel %vm1050_vm10, %v2854_v22, %v2858_v23  ;;  %v1406_v13 = vsel %vm1404_vm11, %v4900_v33, %v1244_v0  ;;  %v2871_v22 = vsel %vm1050_vm10, %v2866_v48, %v2870_v28  ;;  %v6003_v48 = vld [vmem:[#allocation6_spill] sm:$0xff] }
 0x10c   : > { %2898 = vrot.lane.b32.xlu1 %v2847_v43, %s4413_s19  ;;  %v2061_v10 = vsel %vm1437_vm13, %v2029_v52, %v1997_v26  ;;  %v2551_v43 = vld [vmem:[#allocation2 + $0xcc] sm:$0xe] }
 0x10d   : > { %4158 = vmatprep.mubr.msk.bf16.mxu0 %vm2088_vm14, %v2061_v10  ;;  %1400 = vrot.lane.b32.xlu0 %v1368_v27, %s4412_s18  ;;  %v3973_v57 = vcombine.low %v2551_v43, %v5510_v50  ;;  %v6002_v43 = vld [vmem:[#allocation5_spill] sm:$0xff] }
 0x10e   : > { %v1871_v55 = vpop.permute.xlu1 %1870  ;;  %v1373_v59 = vpop.permute.xlu0 %1372 }
 0x10f   : > { %v1439_v6 = vsel %vm1437_vm13, %v1406_v13, %v1373_v59  ;;  %v2031_v33 = vsel %vm1404_vm11, %v4954_v20, %v1871_v55  ;;  %v2997_v23 = vrot.slane %v3973_v57, 1 }
 0x110   : > { %3026 = vrot.lane.b32.xlu1 %v2993_v4, %s4412_s18  ;;  %4180 = vmatprep.mubr.msk.bf16.mxu1 %vm2088_vm14, %v1439_v6  ;;  %v6000_v6 = vld [vmem:[#allocation3_spill] sm:$0xff] }
 0x111   : > { %2900 = vrot.lane.b32.xlu0 %v2859_v16, %s4413_s19 }
 0x112   : > { %v1999_v26 = vpop.permute.xlu1 %1998  ;;  %v2873_v3 = vpop.permute.xlu0 %2872 }
 0x113   : > { %v2063_v17 = vsel %vm1437_vm13, %v2031_v33, %v1999_v26  ;;  %v3033_v31 = vsel %vm1404_vm11, %v4932_v51, %v2873_v3  ;;  %v2999_v51 = vsel %vm1323_vm9, %v2997_v23, %v2998_v62 }
 0x114   : > { %1273 = vrot.lane.b32.xlu1 %v1242_v35, %s4413_s19  ;;  %4159 = vmatmul.mubr.msk.bf16.gmra.mxu0 %vm2088_vm14, %v2063_v17 }
 0x115   : > { %3028 = vrot.lane.b32.xlu0 %v2996_v21, %s4412_s18 }
 0x116   : > { %v1246_v20 = vpop.permute.xlu1 %1245  ;;  %v3001_v9 = vpop.permute.xlu0 %3000 }
 0x117   : > { %v3065_v27 = vsel %vm1437_vm13, %v3033_v31, %v3001_v9  ;;  %v1408_v52 = vsel %vm1404_vm11, %v4925_v37, %v1246_v20 }
 0x118   : > { %1402 = vrot.lane.b32.xlu1 %v1371_v46, %s4412_s18  ;;  %4214 = vmatprep.mubr.msk.bf16.mxu0 %vm2088_vm14, %v3065_v27  ;;  %v6004_v27 = vld [vmem:[#allocation7_spill] sm:$0xff] }
 0x11a   : > { %v1375_v0 = vpop.permute.xlu1 %1374  ;;  %v1248_v10 = vpop.permute.xlu0 %1247 }
 0x11b   : > { %v1441_v50 = vsel %vm1437_vm13, %v1408_v52, %v1375_v0  ;;  %v1410_v4 = vsel %vm1404_vm11, %v4969_v44, %v1248_v10  ;;  %v6005_v52 = vld [vmem:[#allocation8_spill] sm:$0xff] }
 0x11c   : > { %2902 = vrot.lane.b32.xlu1 %v2871_v22, %s4413_s19  ;;  %4181 = vmatmul.mubr.msk.bf16.vlgmr.msra.gmra.mxu1 %vm2088_vm14, %v1441_v50 }
 0x11e   : > { %v2875_v34 = vpop.permute.xlu1 %2874  ;;  %v1377_v38 = vpop.permute.xlu0 %1376 }
 0x11f   : > { %v1443_v63 = vsel %vm1437_vm13, %v1410_v4, %v1377_v38  ;;  %v3035_v37 = vsel %vm1404_vm11, %v4950_v58, %v2875_v34 }
 0x120   : > { %3030 = vrot.lane.b32.xlu1 %v2999_v51, %s4412_s18  ;;  %4184 = vmatprep.mubr.msk.bf16.mxu1 %vm2088_vm14, %v1443_v63 }
 0x122   : > { %v3003_v24 = vpop.permute.xlu1 %3002  ;;  %v2877_v55 = vpop.permute.xlu0 %2876 }
 0x123   : > { %v3067_v19 = vsel %vm1437_vm13, %v3035_v37, %v3003_v24  ;;  %v3037_v44 = vsel %vm1404_vm11, %v4995_v39, %v2877_v55  ;;  %v6006_v37 = vld [vmem:[#allocation9_spill] sm:$0xff] }
 0x124   : > { %4215 = vmatmul.mubr.msk.bf16.vlgmr.msra.gmra.mxu0 %vm2088_vm14, %v3067_v19 }
 0x126   : > { %v1250_v16 = vpop.permute.xlu1 %1249  ;;  %v3005_v5 = vpop.permute.xlu0 %3004 }
 0x127   : > { %v3069_v12 = vsel %vm1437_vm13, %v3037_v44, %v3005_v5  ;;  %v1412_v13 = vsel %vm1404_vm11, %v5001_v54, %v1250_v16 }
 0x128   : > { %4218 = vmatprep.mubr.msk.bf16.mxu0 %vm2088_vm14, %v3069_v12 }
 0x12a   : > { %v1379_v59 = vpop.permute.xlu1 %1378  ;;  %v1252_v2 = vpop.permute.xlu0 %1251 }
 0x12b   : > { %v1445_v58 = vsel %vm1437_vm13, %v1412_v13, %v1379_v59  ;;  %v1414_v35 = vsel %vm1404_vm11, %v6000_v6, %v1252_v2 }
 0x12c   : > { %4185 = vmatmul.mubr.msk.bf16.gmra.mxu1 %vm2088_vm14, %v1445_v58 }
 0x12e   : > { %v2879_v29 = vpop.permute.xlu1 %2878  ;;  %v1381_v61 = vpop.permute.xlu0 %1380 }
 0x12f   : > { %v1447_v39 = vsel %vm1437_vm13, %v1414_v35, %v1381_v61  ;;  %v3039_v8 = vsel %vm1404_vm11, %v6001_v53, %v2879_v29 }
 0x130   : > { %4188 = vmatprep.mubr.msk.bf16.mxu1 %vm2088_vm14, %v1447_v39 }
 0x132   : > { %v3007_v33 = vpop.permute.xlu1 %3006  ;;  %v2881_v26 = vpop.permute.xlu0 %2880 }
 0x133   : > { %v3071_v54 = vsel %vm1437_vm13, %v3039_v8, %v3007_v33  ;;  %v3041_v17 = vsel %vm1404_vm11, %v6002_v43, %v2881_v26 }
 0x134   : > { %4219 = vmatmul.mubr.msk.bf16.gmra.mxu0 %vm2088_vm14, %v3071_v54 }
 0x136   : > { %v1254_v21 = vpop.permute.xlu1 %1253  ;;  %v3009_v3 = vpop.permute.xlu0 %3008 }
 0x137   : > { %v3073_v46 = vsel %vm1437_vm13, %v3041_v17, %v3009_v3  ;;  %v1416_v28 = vsel %vm1404_vm11, %v6003_v48, %v1254_v21 }
 0x138   : > { %4222 = vmatprep.mubr.msk.bf16.mxu0 %vm2088_vm14, %v3073_v46 }
 0x13a   : > { %v1383_v57 = vpop.permute.xlu1 %1382  ;;  %v1256_v31 = vpop.permute.xlu0 %1255 }
 0x13b   : > { %v1449_v20 = vsel %vm1437_vm13, %v1416_v28, %v1383_v57  ;;  %v1418_v22 = vsel %vm1404_vm11, %v6004_v27, %v1256_v31 }
 0x13c   : > { %4189 = vmatmul.mubr.msk.bf16.gmra.mxu1 %vm2088_vm14, %v1449_v20 }
 0x13e   : > { %v2883_v9 = vpop.permute.xlu1 %2882  ;;  %v1385_v23 = vpop.permute.xlu0 %1384 }
 0x13f   : > { %v1451_v62 = vsel %vm1437_vm13, %v1418_v22, %v1385_v23  ;;  %v3043_v0 = vsel %vm1404_vm11, %v6005_v52, %v2883_v9 }
 0x140   : > { %4192 = vmatprep.mubr.msk.bf16.mxu1 %vm2088_vm14, %v1451_v62 }
 0x142   : > { %v3011_v50 = vpop.permute.xlu1 %3010  ;;  %v2885_v51 = vpop.permute.xlu0 %2884 }
 0x143   : > { %v3075_v10 = vsel %vm1437_vm13, %v3043_v0, %v3011_v50  ;;  %v3045_v4 = vsel %vm1404_vm11, %v5133_v15, %v2885_v51 }
 0x144   : > { %4223 = vmatmul.mubr.msk.bf16.gmra.mxu0 %vm2088_vm14, %v3075_v10 }
 0x146   : > { %v1258_v34 = vpop.permute.xlu1 %1257  ;;  %v3013_v38 = vpop.permute.xlu0 %3012 }
 0x147   : > { %v3077_v63 = vsel %vm1437_vm13, %v3045_v4, %v3013_v38  ;;  %v1420_v24 = vsel %vm1404_vm11, %v6006_v37, %v1258_v34 }
 0x148   : > { %4226 = vmatprep.mubr.msk.bf16.mxu0 %vm2088_vm14, %v3077_v63 }
 0x14a   : > { %v1387_v19 = vpop.permute.xlu1 %1386  ;;  %v1260_v16 = vpop.permute.xlu0 %1259 }
 0x14b   : > { %v1453_v55 = vsel %vm1437_vm13, %v1420_v24, %v1387_v19  ;;  %v1422_v5 = vsel %vm1404_vm11, %v5180_v11, %v1260_v16 }
 0x14c   : > { %4193 = vmatmul.mubr.msk.bf16.gmra.mxu1 %vm2088_vm14, %v1453_v55 }
 0x14e   : > { %v2887_v44 = vpop.permute.xlu1 %2886  ;;  %v1389_v12 = vpop.permute.xlu0 %1388 }
 0x14f   : > { %v1455_v15 = vsel %vm1437_vm13, %v1422_v5, %v1389_v12  ;;  %v3047_v13 = vsel %vm1404_vm11, %v5193_v30, %v2887_v44 }
 0x150   : > { %4196 = vmatprep.mubr.msk.bf16.mxu1 %vm2088_vm14, %v1455_v15 }
 0x152   : > { %v3015_v59 = vpop.permute.xlu1 %3014  ;;  %v2889_v2 = vpop.permute.xlu0 %2888 }
 0x153   : > { %v3079_v58 = vsel %vm1437_vm13, %v3047_v13, %v3015_v59  ;;  %v3049_v6 = vsel %vm1404_vm11, %v5221_v32, %v2889_v2 }
 0x154   : > { %4227 = vmatmul.mubr.msk.bf16.gmra.mxu0 %vm2088_vm14, %v3079_v58 }
 0x156   : > { %v1262_v29 = vpop.permute.xlu1 %1261  ;;  %v3017_v35 = vpop.permute.xlu0 %3016 }
 0x157   : > { %v3081_v11 = vsel %vm1437_vm13, %v3049_v6, %v3017_v35  ;;  %v1424_v61 = vsel %vm1404_vm11, %v5235_v1, %v1262_v29 }
 0x158   : > { %4230 = vmatprep.mubr.msk.bf16.mxu0 %vm2088_vm14, %v3081_v11 }
 0x15a   : > { %v1391_v39 = vpop.permute.xlu1 %1390  ;;  %v1264_v53 = vpop.permute.xlu0 %1263 }
 0x15b   : > { %v1457_v30 = vsel %vm1437_vm13, %v1424_v61, %v1391_v39  ;;  %v1426_v33 = vsel %vm1404_vm11, %v5272_v45, %v1264_v53 }
 0x15c   : > { %4197 = vmatmul.mubr.msk.bf16.gmra.mxu1 %vm2088_vm14, %v1457_v30 }
 0x15e   : > { %v2891_v8 = vpop.permute.xlu1 %2890  ;;  %v1393_v54 = vpop.permute.xlu0 %1392 }
 0x15f   : > { %v1459_v32 = vsel %vm1437_vm13, %v1426_v33, %v1393_v54  ;;  %v3051_v26 = vsel %vm1404_vm11, %v5285_v60, %v2891_v8 }
 0x160   : > { %4200 = vmatprep.mubr.msk.bf16.mxu1 %vm2088_vm14, %v1459_v32 }
 0x162   : > { %v3019_v21 = vpop.permute.xlu1 %3018  ;;  %v2893_v43 = vpop.permute.xlu0 %2892 }
 0x163   : > { %v3083_v1 = vsel %vm1437_vm13, %v3051_v26, %v3019_v21  ;;  %v3053_v3 = vsel %vm1404_vm11, %v5310_v41, %v2893_v43 }
 0x164   : > { %4231 = vmatmul.mubr.msk.bf16.gmra.mxu0 %vm2088_vm14, %v3083_v1 }
 0x166   : > { %v1266_v17 = vpop.permute.xlu1 %1265  ;;  %v3021_v46 = vpop.permute.xlu0 %3020 }
 0x167   : > { %v3085_v45 = vsel %vm1437_vm13, %v3053_v3, %v3021_v46  ;;  %v1428_v48 = vsel %vm1404_vm11, %v5325_v14, %v1266_v17 }
 0x168   : > { %4234 = vmatprep.mubr.msk.bf16.mxu0 %vm2088_vm14, %v3085_v45 }
 0x16a   : > { %v1395_v28 = vpop.permute.xlu1 %1394  ;;  %v1268_v57 = vpop.permute.xlu0 %1267 }
 0x16b   : > { %v1461_v60 = vsel %vm1437_vm13, %v1428_v48, %v1395_v28  ;;  %v1430_v31 = vsel %vm1404_vm11, %v5354_v47, %v1268_v57 }
 0x16c   : > { %4201 = vmatmul.mubr.msk.bf16.gmra.mxu1 %vm2088_vm14, %v1461_v60 }
 0x16e   : > { %v2895_v20 = vpop.permute.xlu1 %2894 }
 0x16f   : > { %v1397_v9 = vpop.permute.xlu0 %1396  ;;  %v3055_v27 = vsel %vm1404_vm11, %v5368_v49, %v2895_v20 }
 0x170   : > { %v1463_v41 = vsel %vm1437_vm13, %v1430_v31, %v1397_v9 }
 0x171   : > { %4204 = vmatprep.mubr.msk.bf16.mxu1 %vm2088_vm14, %v1463_v41 }
 0x172   : > { %v3023_v22 = vpop.permute.xlu1 %3022 }
 0x173   : > { %v3087_v14 = vsel %vm1437_vm13, %v3055_v27, %v3023_v22  ;;  %v2897_v23 = vpop.permute.xlu0 %2896 }
 0x174   : > { %4235 = vmatmul.mubr.msk.bf16.gmra.mxu0 %vm2088_vm14, %v3087_v14  ;;  %v3057_v52 = vsel %vm1404_vm11, %v5398_v25, %v2897_v23 }
 0x176   : > { %v1270_v62 = vpop.permute.xlu1 %1269 }
 0x177   : > { %v3025_v0 = vpop.permute.xlu0 %3024  ;;  %v1432_v50 = vsel %vm1404_vm11, %v5412_v40, %v1270_v62 }
 0x178   : > { %v3089_v47 = vsel %vm1437_vm13, %v3057_v52, %v3025_v0 }
 0x179   : > { %4238 = vmatprep.mubr.msk.bf16.mxu0 %vm2088_vm14, %v3089_v47 }
 0x17a   : > { %v1399_v10 = vpop.permute.xlu1 %1398 }
 0x17b   : > { %v1465_v49 = vsel %vm1437_vm13, %v1432_v50, %v1399_v10  ;;  %v1272_v51 = vpop.permute.xlu0 %1271 }
 0x17c   : > { %4205 = vmatmul.mubr.msk.bf16.gmra.mxu1 %vm2088_vm14, %v1465_v49  ;;  %v1434_v4 = vsel %vm1404_vm11, %v5443_v36, %v1272_v51 }
 0x17e   : > { %v2899_v34 = vpop.permute.xlu1 %2898 }
 0x17f   : > { %v1401_v38 = vpop.permute.xlu0 %1400  ;;  %v3059_v63 = vsel %vm1404_vm11, %v5451_v56, %v2899_v34 }
 0x180   : > { %v1467_v25 = vsel %vm1437_vm13, %v1434_v4, %v1401_v38 }
 0x181   : > { %4208 = vmatprep.mubr.msk.bf16.mxu1 %vm2088_vm14, %v1467_v25 }
 0x182   : > { %v3027_v37 = vpop.permute.xlu1 %3026 }
 0x183   : > { %v3091_v40 = vsel %vm1437_vm13, %v3059_v63, %v3027_v37  ;;  %v2901_v24 = vpop.permute.xlu0 %2900 }
 0x184   : > { %4239 = vmatmul.mubr.msk.bf16.gmra.mxu0 %vm2088_vm14, %v3091_v40  ;;  %v3061_v55 = vsel %vm1404_vm11, %v5479_v7, %v2901_v24 }
 0x186   : > { %v1274_v19 = vpop.permute.xlu1 %1273 }
 0x187   : > { %v3029_v16 = vpop.permute.xlu0 %3028  ;;  %v1436_v44 = vsel %vm1404_vm11, %v5488_v18, %v1274_v19  ;;  %v4148_v18 = vpop.f32.mrf.mxu0 }
 0x188   : > { %v3093_v36 = vsel %vm1437_vm13, %v3061_v55, %v3029_v16 }
 0x189   : > { %4242 = vmatprep.mubr.msk.bf16.mxu0 %vm2088_vm14, %v3093_v36  ;;  %v2159_v6 = vpop.f32.mrf.mxu0 }
 0x18a   : > { %v1403_v5 = vpop.permute.xlu1 %1402 }
 0x18b   : > { %v1469_v56 = vsel %vm1437_vm13, %v1436_v44, %v1403_v5  ;;  %v4149_v11 = vpop.f32.mrf.mxu0 }
 0x18c   : > { %4209 = vmatmul.mubr.msk.bf16.gmra.mxu1 %vm2088_vm14, %v1469_v56 }
 0x18e   : > { %v2903_v12 = vpop.permute.xlu1 %2902 }
 0x18f   : > { %v3063_v15 = vsel %vm1404_vm11, %v5519_v42, %v2903_v12  ;;  %v2162_v42 = vpop.f32.mrf.mxu0 }
 0x191   : > { %v4152_v30 = vpop.f32.mrf.mxu0 }
 0x192   : > { %v3031_v13 = vpop.permute.xlu1 %3030  ;;  %v5681_v59 = vpop.f32.mrf.mxu1 }
 0x193   : > { %v3095_v7 = vsel %vm1437_vm13, %v3063_v15, %v3031_v13  ;;  %v2175_v8 = vpop.f32.mrf.mxu0 }
 0x194   : > { %4243 = vmatmul.mubr.msk.bf16.gmra.mxu0 %vm2088_vm14, %v3095_v7  ;;  %v5683_v58 = vpop.f32.mrf.mxu1 }
 0x195   : > { %v4153_v54 = vpop.f32.mrf.mxu0 }
 0x196   : > { %v5685_v2 = vpop.f32.mrf.mxu1 }
 0x197   : > { %v2178_v26 = vpop.f32.mrf.mxu0 }
 0x198   : > { %v5687_v29 = vpop.f32.mrf.mxu1 }
 0x19a   : > { %v5689_v35 = vpop.f32.mrf.mxu1 }
 0x19c   : > { %v5691_v61 = vpop.f32.mrf.mxu1 }
 0x19e   : > { %v5693_v39 = vpop.f32.mrf.mxu1 }
 0x1a0   : > { %v5695_v53 = vpop.f32.mrf.mxu1 }
 0x1ab   : > { %v5697_v33 = vpop.f32.mrf.mxu1 }
 0x1ad   : > { %v5699_v32 = vpop.f32.mrf.mxu1 }
 0x1af   : > { %v5703_v1 = vpop.f32.mrf.mxu1 }
 0x1b1   : > { %v5707_v17 = vpop.f32.mrf.mxu1 }
 0x1b5   : > { %v5701_v21 = vpop.f32.mrf.mxu0 }
 0x1b7   : > { %v5705_v43 = vpop.f32.mrf.mxu0 }
 0x1b9   : > { %v5711_v46 = vpop.f32.mrf.mxu0 }
 0x1bb   : > { %v5715_v48 = vpop.f32.mrf.mxu0 }
 0x1c5   : > { %v5709_v3 = vpop.f32.mrf.mxu1 }
 0x1c7   : > { %v5713_v45 = vpop.f32.mrf.mxu1 }
 0x1c9   : > { %v5717_v28 = vpop.f32.mrf.mxu1 }
 0x1cb   : > { %v5721_v57 = vpop.f32.mrf.mxu1 }
 0x1d4   : > { %v5719_v60 = vpop.f32.mrf.mxu0 }
 0x1d6   : > { %v5723_v20 = vpop.f32.mrf.mxu0 }
 0x1d8   : > { %v5725_v9 = vpop.f32.mrf.mxu0 }
 0x1da   : > { %v5727_v27 = vpop.f32.mrf.mxu0 }
 0x1dc   : > { %v4182_v31 = vpop.f32.mrf.mxu1 }
 0x1dd   : > { %v2369_v14 = vadd.f32 %v4182_v31, %v4148_v18 }
 0x1de   : > { %v2360_v41 = vpop.f32.mrf.mxu1 }
 0x1df   : > { %v2361_v62 = vadd.f32 %v2360_v41, %v2159_v6 }
 0x1e0   : > { %v4183_v22 = vpop.f32.mrf.mxu1 }
 0x1e1   : > { %v2372_v49 = vadd.f32 %v4183_v22, %v4149_v11 }
 0x1e2   : > { %v2363_v0 = vpop.f32.mrf.mxu1 }
 0x1e3   : > { %v2364_v34 = vadd.f32 %v2363_v0, %v2162_v42 }
 0x1e4   : > { %v4216_v23 = vpop.f32.mrf.mxu0 }
 0x1e5   : > { %v5730_v52 = vadd.f32 %v4216_v23, %v2369_v14 }
 0x1e6   : > { %v3173_v47 = vpop.f32.mrf.mxu0 }
 0x1e7   : > { %v4063_v50 = vpack.c.bf16 %v5730_v52, %v5730_v52  ;;  %v3300_v10 = vadd.f32 %v3173_v47, %v2361_v62  ;;  %v3495_v44 = vsel %vm1404_vm11, %v5730_v52, 0.0 }
 0x1e8   : > { %v4217_v51 = vpop.f32.mrf.mxu0 }
 0x1e9   : > { %3462 = vst.msk [vmem:[%s5735_s29 + $0x8] sm:$0xf] %vm183_vm5, %v4063_v50  ;;  %v4061_v4 = vpack.c.bf16 %v3300_v10, %v3300_v10  ;;  %v5741_v38 = vadd.f32 %v4217_v51, %v2372_v49  ;;  %v3492_v24 = vsel %vm1404_vm11, %v3300_v10, 0.0 }
 0x1ea   : > { %v3176_v25 = vpop.f32.mrf.mxu0 }
 0x1eb   : > { %3460 = vst.msk [vmem:[%s5735_s29] sm:$0xf] %vm183_vm5, %v4061_v4  ;;  %v3301_v63 = vadd.f32 %v3176_v25, %v2364_v34  ;;  %v4064_v37 = vpack.c.bf16 %v5741_v38, %v5741_v38  ;;  %v3497_v56 = vsel %vm1404_vm11, %v5741_v38, 0.0 }
 0x1ec   : > { %v4186_v40 = vpop.f32.mrf.mxu1 }
 0x1ed   : > { %v4062_v19 = vpack.c.bf16 %v3301_v63, %v3301_v63  ;;  %v3493_v55 = vsel %vm1404_vm11, %v3301_v63, 0.0  ;;  %3463 = vst.msk [vmem:[%s5735_s29 + $0xc] sm:$0xf] %vm183_vm5, %v4064_v37  ;;  %v2385_v13 = vadd.f32 %v4186_v40, %v4152_v30  ;;  %v3562_v4 = vmul.f32 %v3301_v63, %v3301_v63 }
 0x1ee   : > { %v3494_v16 = vadd.f32 %v3493_v55, %v3492_v24  ;;  %v2376_v36 = vpop.f32.mrf.mxu1 }
 0x1ef   : > { %3461 = vst.msk [vmem:[%s5735_s29 + $0x4] sm:$0xf] %vm183_vm5, %v4062_v19  ;;  %v2377_v18 = vadd.f32 %v2376_v36, %v2175_v8  ;;  %v3561_v19 = vmul.f32 %v3300_v10, %v3300_v10 }
 0x1f0   : > { %v3496_v5 = vadd.f32 %v3495_v44, %v3494_v16  ;;  %v4187_v12 = vpop.f32.mrf.mxu1 }
 0x1f1   : > { %v2388_v22 = vadd.f32 %v4187_v12, %v4153_v54 }
 0x1f2   : > { %v5757_v15 = vadd.f32 %v3497_v56, %v3496_v5  ;;  %v2379_v11 = vpop.f32.mrf.mxu1  ;;  %v3563_v56 = vmul.f32 %v5730_v52, %v5730_v52 }
 0x1f3   : > { %v2380_v23 = vadd.f32 %v2379_v11, %v2178_v26 }
 0x1f4   : > { %v4220_v7 = vpop.f32.mrf.mxu0 }
 0x1f5   : > { %v5759_v6 = vadd.f32 %v4220_v7, %v2385_v13 }
 0x1f6   : > { %v3189_v42 = vpop.f32.mrf.mxu0 }
 0x1f7   : > { %v4067_v31 = vpack.c.bf16 %v5759_v6, %v5759_v6  ;;  %v3304_v41 = vadd.f32 %v3189_v42, %v2377_v18  ;;  %v3596_v42 = vsel %vm1404_vm11, %v3563_v56, 0.0 }
 0x1f8   : > { %v4221_v14 = vpop.f32.mrf.mxu0 }
 0x1f9   : > { %3466 = vst.msk [vmem:[%s5735_s29 + $0x18] sm:$0xf] %vm183_vm5, %v4067_v31  ;;  %v4065_v62 = vpack.c.bf16 %v3304_v41, %v3304_v41  ;;  %v5765_v0 = vadd.f32 %v4221_v14, %v2388_v22  ;;  %v3564_v31 = vmul.f32 %v5741_v38, %v5741_v38  ;;  %v3565_v52 = vmul.f32 %v3304_v41, %v3304_v41 }
 0x1fa   : > { %v3192_v30 = vpop.f32.mrf.mxu0  ;;  %v3499_v14 = vsel %vm1404_vm11, %v3304_v41, 0.0 }
 0x1fb   : > { %3464 = vst.msk [vmem:[%s5735_s29 + $0x10] sm:$0xf] %vm183_vm5, %v4065_v62  ;;  %v3305_v8 = vadd.f32 %v3192_v30, %v2380_v23  ;;  %v4068_v47 = vpack.c.bf16 %v5765_v0, %v5765_v0  ;;  %v3598_v30 = vsel %vm1404_vm11, %v3564_v31, 0.0 }
 0x1fc   : > { %v4190_v50 = vpop.f32.mrf.mxu1 }
 0x1fd   : > { %v4066_v49 = vpack.c.bf16 %v3305_v8, %v3305_v8  ;;  %3467 = vst.msk [vmem:[%s5735_s29 + $0x1c] sm:$0xf] %vm183_vm5, %v4068_v47  ;;  %v2401_v26 = vadd.f32 %v4190_v50, %v5701_v21  ;;  %v3594_v21 = vsel %vm1404_vm11, %v3562_v4, 0.0  ;;  %v3566_v23 = vmul.f32 %v3305_v8, %v3305_v8 }
 0x1fe   : > { %v2392_v51 = vpop.f32.mrf.mxu1  ;;  %v3600_v47 = vsel %vm1404_vm11, %v3565_v52, 0.0  ;;  %v3501_v50 = vsel %vm1404_vm11, %v3305_v8, 0.0  ;;  %v3567_v8 = vmul.f32 %v5759_v6, %v5759_v6 }
 0x1ff   : > { %3465 = vst.msk [vmem:[%s5735_s29 + $0x14] sm:$0xf] %vm183_vm5, %v4066_v49  ;;  %v2393_v25 = vadd.f32 %v2392_v51, %v5705_v43  ;;  %v3500_v51 = vadd.f32 %v3499_v14, %v5757_v15 }
 0x200   : > { %v4191_v54 = vpop.f32.mrf.mxu1  ;;  %v3604_v56 = vsel %vm1404_vm11, %v3567_v8, 0.0 }
 0x201   : > { %v2404_v36 = vadd.f32 %v4191_v54, %v5711_v46  ;;  %v3593_v46 = vsel %vm1404_vm11, %v3561_v19, 0.0 }
 0x202   : > { %v2395_v40 = vpop.f32.mrf.mxu1  ;;  %v3595_v13 = vadd.f32 %v3594_v21, %v3593_v46  ;;  %v3568_v46 = vmul.f32 %v5765_v0, %v5765_v0 }
 0x203   : > { %v2396_v63 = vadd.f32 %v2395_v40, %v5715_v48 }
 0x204   : > { %v4224_v34 = vpop.f32.mrf.mxu0  ;;  %v3597_v22 = vadd.f32 %v3596_v42, %v3595_v13 }
 0x205   : > { %v5777_v37 = vadd.f32 %v4224_v34, %v2401_v26  ;;  %v3602_v26 = vsel %vm1404_vm11, %v3566_v23, 0.0 }
 0x206   : > { %v3205_v24 = vpop.f32.mrf.mxu0  ;;  %v3599_v54 = vadd.f32 %v3598_v30, %v3597_v22  ;;  %v3606_v22 = vsel %vm1404_vm11, %v3568_v46, 0.0 }
 0x207   : > { %v4071_v55 = vpack.c.bf16 %v5777_v37, %v5777_v37  ;;  %v5781_v16 = vadd.f32 %v3205_v24, %v2393_v25  ;;  %v3502_v25 = vadd.f32 %v3501_v50, %v3500_v51 }
 0x208   : > { %v4225_v44 = vpop.f32.mrf.mxu0  ;;  %v3601_v4 = vadd.f32 %v3600_v47, %v3599_v54 }
 0x209   : > { %3470 = vst.msk [vmem:[%s5735_s29 + $0x28] sm:$0xf] %vm183_vm5, %v4071_v55  ;;  %v4069_v43 = vpack.c.bf16 %v5781_v16, %v5781_v16  ;;  %v5790_v10 = vadd.f32 %v4225_v44, %v2404_v36 }
 0x20a   : > { %v3208_v5 = vpop.f32.mrf.mxu0  ;;  %v3603_v19 = vadd.f32 %v3602_v26, %v3601_v4  ;;  %v3511_v26 = vsel %vm1404_vm11, %v5777_v37, 0.0 }
 0x20b   : > { %3468 = vst.msk [vmem:[%s5735_s29 + $0x20] sm:$0xf] %vm183_vm5, %v4069_v43  ;;  %v3309_v12 = vadd.f32 %v3208_v5, %v2396_v63  ;;  %v4072_v48 = vpack.c.bf16 %v5790_v10, %v5790_v10  ;;  %v3572_v8 = vmul.f32 %v5790_v10, %v5790_v10 }
 0x20c   : > { %v4194_v7 = vpop.f32.mrf.mxu1 }
 0x20d   : > { %v4070_v18 = vpack.c.bf16 %v3309_v12, %v3309_v12  ;;  %3471 = vst.msk [vmem:[%s5735_s29 + $0x2c] sm:$0xf] %vm183_vm5, %v4072_v48  ;;  %v2417_v49 = vadd.f32 %v4194_v7, %v5719_v60  ;;  %v3505_v7 = vsel %vm1404_vm11, %v5765_v0, 0.0  ;;  %v3509_v23 = vsel %vm1404_vm11, %v3309_v12, 0.0 }
 0x20e   : > { %v2408_v11 = vpop.f32.mrf.mxu1 }
 0x20f   : > { %3469 = vst.msk [vmem:[%s5735_s29 + $0x24] sm:$0xf] %vm183_vm5, %v4070_v18  ;;  %v2409_v34 = vadd.f32 %v2408_v11, %v5723_v20  ;;  %v3503_v20 = vsel %vm1404_vm11, %v5759_v6, 0.0  ;;  %v3605_v6 = vadd.f32 %v3604_v56, %v3603_v19  ;;  %v3507_v18 = vsel %vm1404_vm11, %v5781_v16, 0.0 }
 0x210   : > { %v4195_v62 = vpop.f32.mrf.mxu1  ;;  %v3504_v63 = vadd.f32 %v3503_v20, %v3502_v25  ;;  %v3570_v11 = vmul.f32 %v3309_v12, %v3309_v12 }
 0x211   : > { %v2420_v55 = vadd.f32 %v4195_v62, %v5725_v9  ;;  %v3569_v9 = vmul.f32 %v5781_v16, %v5781_v16  ;;  %v3607_v30 = vadd.f32 %v3606_v22, %v3605_v6  ;;  %v3571_v16 = vmul.f32 %v5777_v37, %v5777_v37 }
 0x212   : > { %v2411_v40 = vpop.f32.mrf.mxu1  ;;  %v3506_v31 = vadd.f32 %v3505_v7, %v3504_v63  ;;  %v3610_v0 = vsel %vm1404_vm11, %v3570_v11, 0.0 }
 0x213   : > { %v2412_v44 = vadd.f32 %v2411_v40, %v5727_v27  ;;  %v3608_v14 = vsel %vm1404_vm11, %v3569_v9, 0.0  ;;  %v3612_v4 = vsel %vm1404_vm11, %v3571_v16, 0.0  ;;  %v3614_v9 = vsel %vm1404_vm11, %v3572_v8, 0.0 }
 0x214   : > { %v4228_v38 = vpop.f32.mrf.mxu0  ;;  %v3508_v62 = vadd.f32 %v3507_v18, %v3506_v31  ;;  %v3609_v47 = vadd.f32 %v3608_v14, %v3607_v30 }
 0x215   : > { %v5814_v41 = vadd.f32 %v4228_v38, %v2417_v49 }
 0x216   : > { %v3221_v24 = vpop.f32.mrf.mxu0  ;;  %v3510_v50 = vadd.f32 %v3509_v23, %v3508_v62  ;;  %v3611_v54 = vadd.f32 %v3610_v0, %v3609_v47 }
 0x217   : > { %v4075_v60 = vpack.c.bf16 %v5814_v41, %v5814_v41  ;;  %v3312_v15 = vadd.f32 %v3221_v24, %v2409_v34  ;;  %v3519_v22 = vsel %vm1404_vm11, %v5814_v41, 0.0 }
 0x218   : > { %v4229_v36 = vpop.f32.mrf.mxu0  ;;  %v3512_v25 = vadd.f32 %v3511_v26, %v3510_v50  ;;  %v3613_v37 = vadd.f32 %v3612_v4, %v3611_v54 }
 0x219   : > { %3474 = vst.msk [vmem:[%s5735_s29 + $0x38] sm:$0xf] %vm183_vm5, %v4075_v60  ;;  %v4073_v21 = vpack.c.bf16 %v3312_v15, %v3312_v15  ;;  %v5826_v43 = vadd.f32 %v4229_v36, %v2420_v55  ;;  %v3573_v60 = vmul.f32 %v3312_v15, %v3312_v15  ;;  %v3515_v20 = vsel %vm1404_vm11, %v3312_v15, 0.0 }
 0x21a   : > { %v3224_v5 = vpop.f32.mrf.mxu0 }
 0x21b   : > { %3472 = vst.msk [vmem:[%s5735_s29 + $0x30] sm:$0xf] %vm183_vm5, %v4073_v21  ;;  %v3313_v27 = vadd.f32 %v3224_v5, %v2412_v44  ;;  %v4076_v13 = vpack.c.bf16 %v5826_v43, %v5826_v43  ;;  %v3576_v14 = vmul.f32 %v5826_v43, %v5826_v43  ;;  %v3521_v47 = vsel %vm1404_vm11, %v5826_v43, 0.0 }
 0x21c   : > { %v4198_v48 = vpop.f32.mrf.mxu1 }
 0x21d   : > { %v4074_v42 = vpack.c.bf16 %v3313_v27, %v3313_v27  ;;  %3475 = vst.msk [vmem:[%s5735_s29 + $0x3c] sm:$0xf] %vm183_vm5, %v4076_v13  ;;  %v2433_v51 = vadd.f32 %v4198_v48, %v5681_v59  ;;  %v3574_v44 = vmul.f32 %v3313_v27, %v3313_v27  ;;  %v3622_v26 = vsel %vm1404_vm11, %v3576_v14, 0.0 }
 0x21e   : > { %v2424_v52 = vpop.f32.mrf.mxu1 }
 0x21f   : > { %3473 = vst.msk [vmem:[%s5735_s29 + $0x34] sm:$0xf] %vm183_vm5, %v4074_v42  ;;  %v2425_v12 = vadd.f32 %v2424_v52, %v5683_v58  ;;  %v3513_v58 = vsel %vm1404_vm11, %v5790_v10, 0.0  ;;  %v3616_v10 = vsel %vm1404_vm11, %v3573_v60, 0.0  ;;  %v3618_v7 = vsel %vm1404_vm11, %v3574_v44, 0.0 }
 0x220   : > { %v4199_v49 = vpop.f32.mrf.mxu1  ;;  %v3514_v5 = vadd.f32 %v3513_v58, %v3512_v25 }
 0x221   : > { %v2436_v55 = vadd.f32 %v4199_v49, %v5685_v2  ;;  %v3517_v2 = vsel %vm1404_vm11, %v3313_v27, 0.0  ;;  %v3575_v27 = vmul.f32 %v5814_v41, %v5814_v41 }
 0x222   : > { %v2427_v40 = vpop.f32.mrf.mxu1  ;;  %v3516_v6 = vadd.f32 %v3515_v20, %v3514_v5 }
 0x223   : > { %v2428_v21 = vadd.f32 %v2427_v40, %v5687_v29  ;;  %v3615_v29 = vadd.f32 %v3614_v9, %v3613_v37  ;;  %v3620_v30 = vsel %vm1404_vm11, %v3575_v27, 0.0 }
 0x224   : > { %v4232_v38 = vpop.f32.mrf.mxu0  ;;  %v3518_v42 = vadd.f32 %v3517_v2, %v3516_v6 }
 0x225   : > { %v5855_v34 = vadd.f32 %v4232_v38, %v2433_v51  ;;  %v3617_v11 = vadd.f32 %v3616_v10, %v3615_v29 }
 0x226   : > { %v3237_v24 = vpop.f32.mrf.mxu0  ;;  %v3520_v23 = vadd.f32 %v3519_v22, %v3518_v42 }
 0x227   : > { %v4079_v59 = vpack.c.bf16 %v5855_v34, %v5855_v34  ;;  %v3316_v19 = vadd.f32 %v3237_v24, %v2425_v12  ;;  %v3619_v52 = vadd.f32 %v3618_v7, %v3617_v11 }
 0x228   : > { %v4233_v36 = vpop.f32.mrf.mxu0  ;;  %v3522_v12 = vadd.f32 %v3521_v47, %v3520_v23 }
 0x229   : > { %3478 = vst.msk [vmem:[%s5735_s29 + $0x48] sm:$0xf] %vm183_vm5, %v4079_v59  ;;  %v4077_v63 = vpack.c.bf16 %v3316_v19, %v3316_v19  ;;  %v5869_v56 = vadd.f32 %v4233_v36, %v2436_v55  ;;  %v3577_v0 = vmul.f32 %v3316_v19, %v3316_v19  ;;  %v3621_v50 = vadd.f32 %v3620_v30, %v3619_v52 }
 0x22a   : > { %v3240_v46 = vpop.f32.mrf.mxu0  ;;  %v3523_v51 = vsel %vm1404_vm11, %v3316_v19, 0.0 }
 0x22b   : > { %3476 = vst.msk [vmem:[%s5735_s29 + $0x40] sm:$0xf] %vm183_vm5, %v4077_v63  ;;  %v3317_v15 = vadd.f32 %v3240_v46, %v2428_v21  ;;  %v4080_v13 = vpack.c.bf16 %v5869_v56, %v5869_v56  ;;  %v3624_v40 = vsel %vm1404_vm11, %v3577_v0, 0.0  ;;  %v3524_v8 = vadd.f32 %v3523_v51, %v3522_v12 }
 0x22c   : > { %v4202_v48 = vpop.f32.mrf.mxu1  ;;  %v3623_v60 = vadd.f32 %v3622_v26, %v3621_v50  ;;  %v3579_v21 = vmul.f32 %v5855_v34, %v5855_v34  ;;  %v3580_v6 = vmul.f32 %v5869_v56, %v5869_v56 }
 0x22d   : > { %v4078_v18 = vpack.c.bf16 %v3317_v15, %v3317_v15  ;;  %3479 = vst.msk [vmem:[%s5735_s29 + $0x4c] sm:$0xf] %vm183_vm5, %v4080_v13  ;;  %v2449_v16 = vadd.f32 %v4202_v48, %v5689_v35  ;;  %v3578_v54 = vmul.f32 %v3317_v15, %v3317_v15  ;;  %v3525_v35 = vsel %vm1404_vm11, %v3317_v15, 0.0 }
 0x22e   : > { %v2440_v31 = vpop.f32.mrf.mxu1  ;;  %v3625_v55 = vadd.f32 %v3624_v40, %v3623_v60  ;;  %v3526_v36 = vadd.f32 %v3525_v35, %v3524_v8  ;;  %v3628_v15 = vsel %vm1404_vm11, %v3579_v21, 0.0  ;;  %v3529_v48 = vsel %vm1404_vm11, %v5869_v56, 0.0 }
 0x22f   : > { %3477 = vst.msk [vmem:[%s5735_s29 + $0x44] sm:$0xf] %vm183_vm5, %v4078_v18  ;;  %v2441_v41 = vadd.f32 %v2440_v31, %v5691_v61  ;;  %v3626_v61 = vsel %vm1404_vm11, %v3578_v54, 0.0  ;;  %v3630_v42 = vsel %vm1404_vm11, %v3580_v6, 0.0 }
 0x230   : > { %v4203_v62 = vpop.f32.mrf.mxu1  ;;  %v3627_v63 = vadd.f32 %v3626_v61, %v3625_v55 }
 0x231   : > { %v2452_v59 = vadd.f32 %v4203_v62, %v5693_v39 }
 0x232   : > { %v2443_v4 = vpop.f32.mrf.mxu1  ;;  %v3629_v13 = vadd.f32 %v3628_v15, %v3627_v63 }
 0x233   : > { %v2444_v58 = vadd.f32 %v2443_v4, %v5695_v53  ;;  %v3527_v53 = vsel %vm1404_vm11, %v5855_v34, 0.0 }
 0x234   : > { %v4236_v49 = vpop.f32.mrf.mxu0  ;;  %v3528_v10 = vadd.f32 %v3527_v53, %v3526_v36  ;;  %v3631_v14 = vadd.f32 %v3630_v42, %v3629_v13 }
 0x235   : > { %v3322_v38 = vadd.f32 %v4236_v49, %v2449_v16 }
 0x236   : > { %v3253_v25 = vpop.f32.mrf.mxu0  ;;  %v3530_v18 = vadd.f32 %v3529_v48, %v3528_v10 }
 0x237   : > { %v4083_v43 = vpack.c.bf16 %v3322_v38, %v3322_v38  ;;  %v3320_v24 = vadd.f32 %v3253_v25, %v2441_v41  ;;  %v3583_v49 = vmul.f32 %v3322_v38, %v3322_v38  ;;  %v3535_v12 = vsel %vm1404_vm11, %v3322_v38, 0.0 }
 0x238   : > { %v4237_v19 = vpop.f32.mrf.mxu0 }
 0x239   : > { %3482 = vst.msk [vmem:[%s5735_s29 + $0x58] sm:$0xf] %vm183_vm5, %v4083_v43  ;;  %v4081_v37 = vpack.c.bf16 %v3320_v24, %v3320_v24  ;;  %v3323_v20 = vadd.f32 %v4237_v19, %v2452_v59  ;;  %v3581_v29 = vmul.f32 %v3320_v24, %v3320_v24  ;;  %v3531_v7 = vsel %vm1404_vm11, %v3320_v24, 0.0 }
 0x23a   : > { %v3256_v44 = vpop.f32.mrf.mxu0  ;;  %v3532_v22 = vadd.f32 %v3531_v7, %v3530_v18  ;;  %v3636_v43 = vsel %vm1404_vm11, %v3583_v49, 0.0 }
 0x23b   : > { %3480 = vst.msk [vmem:[%s5735_s29 + $0x50] sm:$0xf] %vm183_vm5, %v4081_v37  ;;  %v3321_v39 = vadd.f32 %v3256_v44, %v2444_v58  ;;  %v4084_v5 = vpack.c.bf16 %v3323_v20, %v3323_v20  ;;  %v3632_v31 = vsel %vm1404_vm11, %v3581_v29, 0.0  ;;  %v3584_v24 = vmul.f32 %v3323_v20, %v3323_v20 }
 0x23c   : > { %v4206_v46 = vpop.f32.mrf.mxu1  ;;  %v3633_v0 = vadd.f32 %v3632_v31, %v3631_v14 }
 0x23d   : > { %v4082_v9 = vpack.c.bf16 %v3321_v39, %v3321_v39  ;;  %3483 = vst.msk [vmem:[%s5735_s29 + $0x5c] sm:$0xf] %vm183_vm5, %v4084_v5  ;;  %v3582_v34 = vmul.f32 %v3321_v39, %v3321_v39  ;;  %v3533_v27 = vsel %vm1404_vm11, %v3321_v39, 0.0  ;;  %v2465_v52 = vadd.f32 %v4206_v46, %v5697_v33 }
 0x23e   : > { %v2456_v2 = vpop.f32.mrf.mxu1  ;;  %v3534_v16 = vadd.f32 %v3533_v27, %v3532_v22  ;;  %v3638_v36 = vsel %vm1404_vm11, %v3584_v24, 0.0 }
 0x23f   : > { %3481 = vst.msk [vmem:[%s5735_s29 + $0x54] sm:$0xf] %vm183_vm5, %v4082_v9  ;;  %v3634_v62 = vsel %vm1404_vm11, %v3582_v34, 0.0  ;;  %v2457_v56 = vadd.f32 %v2456_v2, %v5699_v32 }
 0x240   : > { %v4207_v11 = vpop.f32.mrf.mxu1  ;;  %v3635_v41 = vadd.f32 %v3634_v62, %v3633_v0  ;;  %v3536_v25 = vadd.f32 %v3535_v12, %v3534_v16 }
 0x241   : > { %v2468_v33 = vadd.f32 %v4207_v11, %v5703_v1 }
 0x242   : > { %v2459_v47 = vpop.f32.mrf.mxu1  ;;  %v3637_v60 = vadd.f32 %v3636_v43, %v3635_v41 }
 0x243   : > { %v2460_v4 = vadd.f32 %v2459_v47, %v5707_v17  ;;  %v3537_v17 = vsel %vm1404_vm11, %v3323_v20, 0.0 }
 0x244   : > { %v4240_v23 = vpop.f32.mrf.mxu0  ;;  %v3538_v37 = vadd.f32 %v3537_v17, %v3536_v25  ;;  %v3639_v63 = vadd.f32 %v3638_v36, %v3637_v60 }
 0x245   : > { %v3326_v30 = vadd.f32 %v4240_v23, %v2465_v52 }
 0x246   : > { %v3269_v50 = vpop.f32.mrf.mxu0 }
 0x247   : > { %v4087_v51 = vpack.c.bf16 %v3326_v30, %v3326_v30  ;;  %v3324_v54 = vadd.f32 %v3269_v50, %v2457_v56  ;;  %v3587_v9 = vmul.f32 %v3326_v30, %v3326_v30  ;;  %v3543_v6 = vsel %vm1404_vm11, %v3326_v30, 0.0 }
 0x248   : > { %v4241_v26 = vpop.f32.mrf.mxu0 }
 0x249   : > { %3486 = vst.msk [vmem:[%s5735_s29 + $0x68] sm:$0xf] %vm183_vm5, %v4087_v51  ;;  %v4085_v32 = vpack.c.bf16 %v3324_v54, %v3324_v54  ;;  %v3327_v40 = vadd.f32 %v4241_v26, %v2468_v33  ;;  %v3585_v8 = vmul.f32 %v3324_v54, %v3324_v54  ;;  %v3539_v19 = vsel %vm1404_vm11, %v3324_v54, 0.0 }
 0x24a   : > { %v3272_v35 = vpop.f32.mrf.mxu0  ;;  %v3540_v39 = vadd.f32 %v3539_v19, %v3538_v37  ;;  %v3644_v18 = vsel %vm1404_vm11, %v3587_v9, 0.0 }
 0x24b   : > { %3484 = vst.msk [vmem:[%s5735_s29 + $0x60] sm:$0xf] %vm183_vm5, %v4085_v32  ;;  %v3325_v1 = vadd.f32 %v3272_v35, %v2460_v4  ;;  %v4088_v59 = vpack.c.bf16 %v3327_v40, %v3327_v40  ;;  %v3640_v44 = vsel %vm1404_vm11, %v3585_v8, 0.0  ;;  %v3588_v11 = vmul.f32 %v3327_v40, %v3327_v40 }
 0x24c   : > { %v4210_v38 = vpop.f32.mrf.mxu1  ;;  %v3641_v5 = vadd.f32 %v3640_v44, %v3639_v63  ;;  %v3545_v27 = vsel %vm1404_vm11, %v3327_v40, 0.0 }
 0x24d   : > { %v4086_v61 = vpack.c.bf16 %v3325_v1, %v3325_v1  ;;  %v3586_v58 = vmul.f32 %v3325_v1, %v3325_v1  ;;  %3487 = vst.msk [vmem:[%s5735_s29 + $0x6c] sm:$0xf] %vm183_vm5, %v4088_v59  ;;  %v3541_v21 = vsel %vm1404_vm11, %v3325_v1, 0.0  ;;  %v2481_v10 = vadd.f32 %v4210_v38, %v5709_v3 }
 0x24e   : > { %v2472_v55 = vpop.f32.mrf.mxu1  ;;  %v3542_v46 = vadd.f32 %v3541_v21, %v3540_v39  ;;  %v3646_v16 = vsel %vm1404_vm11, %v3588_v11, 0.0 }
 0x24f   : > { %3485 = vst.msk [vmem:[%s5735_s29 + $0x64] sm:$0xf] %vm183_vm5, %v4086_v61  ;;  %v3642_v20 = vsel %vm1404_vm11, %v3586_v58, 0.0  ;;  %v2473_v29 = vadd.f32 %v2472_v55, %v5713_v45 }
 0x250   : > { %v4211_v53 = vpop.f32.mrf.mxu1  ;;  %v3643_v2 = vadd.f32 %v3642_v20, %v3641_v5  ;;  %v3544_v48 = vadd.f32 %v3543_v6, %v3542_v46 }
 0x251   : > { %v2484_v52 = vadd.f32 %v4211_v53, %v5717_v28 }
 0x252   : > { %v2475_v7 = vpop.f32.mrf.mxu1  ;;  %v3645_v3 = vadd.f32 %v3644_v18, %v3643_v2  ;;  %v3546_v56 = vadd.f32 %v3545_v27, %v3544_v48 }
 0x253   : > { %v2476_v14 = vadd.f32 %v2475_v7, %v5721_v57 }
 0x254   : > { %v4244_v15 = vpop.f32.mrf.mxu0  ;;  %v3647_v57 = vadd.f32 %v3646_v16, %v3645_v3 }
 0x255   : > { %v3330_v13 = vadd.f32 %v4244_v15, %v2481_v10 }
 0x256   : > { %v3285_v34 = vpop.f32.mrf.mxu0 }
 0x257   : > { %v4091_v42 = vpack.c.bf16 %v3330_v13, %v3330_v13  ;;  %v3328_v31 = vadd.f32 %v3285_v34, %v2473_v29  ;;  %v3591_v51 = vmul.f32 %v3330_v13, %v3330_v13  ;;  %v3551_v4 = vsel %vm1404_vm11, %v3330_v13, 0.0 }
 0x258   : > { %v4245_v22 = vpop.f32.mrf.mxu0 }
 0x259   : > { %3490 = vst.msk [vmem:[%s5735_s29 + $0x78] sm:$0xf] %vm183_vm5, %v4091_v42  ;;  %v4089_v45 = vpack.c.bf16 %v3328_v31, %v3328_v31  ;;  %v3547_v23 = vsel %vm1404_vm11, %v3328_v31, 0.0  ;;  %v3589_v62 = vmul.f32 %v3328_v31, %v3328_v31  ;;  %v3331_v30 = vadd.f32 %v4245_v22, %v2484_v52 }
 0x25a   : > { %v3288_v0 = vpop.f32.mrf.mxu0  ;;  %v3548_v50 = vadd.f32 %v3547_v23, %v3546_v56  ;;  %v3652_v43 = vsel %vm1404_vm11, %v3591_v51, 0.0 }
 0x25b   : > { %3488 = vst.msk [vmem:[%s5735_s29 + $0x70] sm:$0xf] %vm183_vm5, %v4089_v45  ;;  %v3648_v28 = vsel %vm1404_vm11, %v3589_v62, 0.0  ;;  %v3329_v47 = vadd.f32 %v3288_v0, %v2476_v14  ;;  %v4092_v49 = vpack.c.bf16 %v3331_v30, %v3331_v30  ;;  %v3592_v32 = vmul.f32 %v3331_v30, %v3331_v30 }
 0x25c   : > { %v3649_v26 = vadd.f32 %v3648_v28, %v3647_v57  ;;  %v3553_v24 = vsel %vm1404_vm11, %v3331_v30, 0.0 }
 0x25d   : > { %v4090_v54 = vpack.c.bf16 %v3329_v47, %v3329_v47  ;;  %v3549_v41 = vsel %vm1404_vm11, %v3329_v47, 0.0  ;;  %v3590_v33 = vmul.f32 %v3329_v47, %v3329_v47  ;;  %3491 = vst.msk [vmem:[%s5735_s29 + $0x7c] sm:$0xf] %vm183_vm5, %v4092_v49  ;;  %v3654_v60 = vsel %vm1404_vm11, %v3592_v32, 0.0 }
 0x25e   : > { %v3550_v12 = vadd.f32 %v3549_v41, %v3548_v50 }
 0x25f   : > { %3489 = vst.msk [vmem:[%s5735_s29 + $0x74] sm:$0xf] %vm183_vm5, %v4090_v54  ;;  %v3650_v25 = vsel %vm1404_vm11, %v3590_v33, 0.0 }
 0x260   : > { %v3552_v40 = vadd.f32 %v3551_v4, %v3550_v12  ;;  %v3651_v35 = vadd.f32 %v3650_v25, %v3649_v26 }
 0x262   : > { %v3554_v8 = vadd.f32 %v3553_v24, %v3552_v40  ;;  %v3653_v1 = vadd.f32 %v3652_v43, %v3651_v35 }
 0x264   : > { %v3555_v59 = vrot.slane %v3554_v8, 4  ;;  %v3655_v38 = vadd.f32 %v3654_v60, %v3653_v1 }
 0x266   : > { %v3556_v17 = vadd.f32 %v3555_v59, %v3554_v8  ;;  %v3656_v19 = vrot.slane %v3655_v38, 4 }
 0x268   : > { %v3557_v61 = vrot.slane %v3556_v17, 2  ;;  %v3657_v58 = vadd.f32 %v3656_v19, %v3655_v38 }
 0x26a   : > { %v3558_v37 = vadd.f32 %v3557_v61, %v3556_v17  ;;  %v3658_v55 = vrot.slane %v3657_v58, 2 }
 0x26c   : > { %v3559_v36 = vrot.slane %v3558_v37, 1  ;;  %v3659_v44 = vadd.f32 %v3658_v55, %v3657_v58 }
 0x26e   : > { %v3660_v21 = vrot.slane %v3659_v44, 1  ;;  %v3560_v39 = vadd.f32 %v3559_v36, %v3558_v37 }
 0x270   : > { %v3661_v63 = vadd.f32 %v3660_v21, %v3659_v44 }
 0x272   : > { %v3663_v20 = vsel %vm3662_vm15, %v3560_v39, %v3661_v63 }
 0x273   : > { %3665 = vst.msk [vmem:[%s181_s6] sm:$0x3] %vm3664_vm0, %v3663_v20 }
 0x274 PF: > { %s14_s12 = sadd.s32 1, %s4409_s12  }
 0x275   : > { %p11_p4 = scmp.ge.s32.totalorder %s14_s12, 4  }
 0x277   :  { %13 = sbr.rel (!%p11_p4) target bundleno = 1 (0x1), region = 75 }

// kernel: basic_block_forward.4
= control target key start
LH: loop header
LB: loop body
LE: loop exit
PB: predicated region body
PF: predicated region fallthrough
CT: control target
= control target key end

     0   :  { %s4725_s18 = smov 0   ;;  %s6298_s0 = inlined_call_operand.vmem [shape: bf16[2,16,16,4], index: 0, kind: input, shape index: {}]   ;;  %s6299_s1 = inlined_call_operand.vmem [shape: f32[1,4], index: 1, kind: input, shape index: {}]   ;;  %s6300_s2 = inlined_call_operand.vmem [shape: f32[1,4], index: 2, kind: input, shape index: {}]   ;;  %s6301_s3 = inlined_call_operand.vmem [shape: bf16[3,12,4], index: 3, kind: input, shape index: {}]   ;;  %s6302_s4 = inlined_call_operand.vmem [shape: bf16[2,16,16,4], index: 4, kind: output, shape index: {0}]   ;;  %s6303_s5 = inlined_call_operand.vmem [shape: f32[2,2,4], index: 5, kind: output, shape index: {1}]  }
   0x1 LB: > { %s3948_s19 = sadd.s32 4294967295, %s4690_s18   ;;  %p3952_p0 = scmp.ge.s32.totalorder %s4690_s18, 1  ;;  %s4690_s18 = sphi %s4725_s18, %s16_s18  }
   0x2   : > { %p190_p1 = scmp.lt.s32.totalorder %s4690_s18, 3 }
   0x4   : > { %p191_p2 = pnand %p3952_p0, %p190_p1 }
   0x6   : > { %194 = sbr.rel (%p191_p2) target bundleno = 656 (0x290), region = 36 }
   0xb   : > { %p222_p3 = scmp.lt.s32.totalorder %s3948_s19, 1  ;;  %vm240_vm0 = vcmask 24576   ;;  %vm248_vm1 = vsmask.f32 256  ;;  %v277_v1 = vld [vmem:[#allocation2 + $0x78] sm:$0x1] }
   0xc   : > { %vm4735_vm2 = vmand %vm240_vm0, %vm248_vm1  ;;  %vm298_vm3 = vsmask.f32 7938  ;;  %v327_v2 = vld [vmem:[#allocation2 + $0x80] sm:$0x1]  ;;  %v274_v6 = vld [vmem:[#allocation2 + $0x6c] sm:$0x1] }
   0xd   : > { %s6346_s19 = smov (!%p222_p3, %s3948_s19), 1  ;;  %v278_v3 = vsel %vm4735_vm2, 0, %v277_v1  ;;  %vm4745_vm4 = vmand %vm240_vm0, %vm298_vm3  ;;  %v4755_v7 = vld [vmem:[%s6299_s1] ss:$0 sm:$0xff]  ;;  %v275_v8 = vsel %vm4735_vm2, 0, %v274_v6  ;;  %vm237_vm5 = vcmask 27648  }
   0xe   : > { %279 = vst [vmem:[#allocation2 + $0x78] sm:$0x1] %v278_v3  ;;  %v328_v5 = vsel %vm4745_vm4, 0, %v327_v2  ;;  %s4225_s20 = sshll.u32 %s6346_s19, 7  ;;  %v324_v9 = vld [vmem:[#allocation2 + $0x74] sm:$0x1]  ;;  %vm4813_vm7 = vmand %vm237_vm5, %vm298_vm3 }
   0xf   : > { %329 = vst [vmem:[#allocation2 + $0x80] sm:$0x1] %v328_v5  ;;  %v253_v10 = vld [vmem:[#allocation2 + $0x18] sm:$0x1]  ;;  %s4764_s25 = scalar_lea.vmem %s6298_s0, %s4225_s20  ;;  %276 = vst [vmem:[#allocation2 + $0x6c] sm:$0x1] %v275_v8  ;;  %s6059_s17 = scalar_lea.vmem %s6302_s4, %s4225_s20 }
  0x10   : > { %v325_v11 = vsel %vm4745_vm4, 0, %v324_v9  ;;  %v254_v12 = vsel %vm4735_vm2, 0, %v253_v10  ;;  %v303_v13 = vld [vmem:[#allocation2 + $0x20] sm:$0x1]  ;;  %v250_v14 = vld [vmem:[#allocation2 + $0xc] sm:$0x1] }
  0x11   : > { %v4363_v15 = vld [vmem:[%s4764_s25 + $0x48] sm:$0xff]   ;;  %326 = vst [vmem:[#allocation2 + $0x74] sm:$0x1] %v325_v11  ;;  %v4362_v16 = vld [vmem:[%s4764_s25 + $0x40] sm:$0xff]   ;;  %255 = vst [vmem:[#allocation2 + $0x18] sm:$0x1] %v254_v12 }
  0x12   : > { %v304_v17 = vsel %vm4745_vm4, 0, %v303_v13  ;;  %v4355_v18 = vld [vmem:[%s4764_s25 + $0x8] sm:$0xff]   ;;  %v251_v19 = vsel %vm4735_vm2, 0, %v250_v14  ;;  %v4329_v20 = vunpack.c.l.bf16 %v4363_v15  ;;  %v4330_v21 = vunpack.c.h.bf16 %v4363_v15  ;;  %v300_v24 = vld [vmem:[#allocation2 + $0x14] sm:$0x1]  ;;  %v4292_v25 = vld [vmem:[%s4764_s25] sm:$0xff]  }
  0x13   : > { %v4325_v22 = vunpack.c.l.bf16 %v4362_v16  ;;  %v4326_v23 = vunpack.c.h.bf16 %v4362_v16  ;;  %305 = vst [vmem:[#allocation2 + $0x20] sm:$0x1] %v304_v17  ;;  %252 = vst [vmem:[#allocation2 + $0xc] sm:$0x1] %v251_v19  ;;  %v4781_v26 = vld [vmem:[%s6300_s2] ss:$0 sm:$0xff]  ;;  %v4297_v27 = vunpack.c.l.bf16 %v4355_v18  ;;  %v4298_v28 = vunpack.c.h.bf16 %v4355_v18 }
  0x14   : > { %v301_v29 = vsel %vm4745_vm4, 0, %v300_v24  ;;  %v4293_v30 = vunpack.c.l.bf16 %v4292_v25  ;;  %v437_v31 = vmul.f32 %v4329_v20, %v4755_v7  ;;  %v438_v32 = vmul.f32 %v4330_v21, %v4755_v7  ;;  %v4797_v43 = vld [vmem:[%s4764_s25 + $0x18] sm:$0xff]   ;;  %s4692_s28 = smov 8   ;;  %s4693_s29 = smov 4  }
  0x15   : > { %vm618_vm6 = vsmask.f32 4368  ;;  %v435_v33 = vmul.f32 %v4325_v22, %v4755_v7  ;;  %v436_v34 = vmul.f32 %v4326_v23, %v4755_v7  ;;  %302 = vst [vmem:[#allocation2 + $0x14] sm:$0x1] %v301_v29  ;;  %v421_v35 = vmul.f32 %v4297_v27, %v4755_v7  ;;  %v1005_v14 = vld [vmem:[#allocation2 + $0x78] sm:$0xf] }
  0x16   : > { %v422_v36 = vmul.f32 %v4298_v28, %v4755_v7  ;;  %v4294_v37 = vunpack.c.h.bf16 %v4292_v25  ;;  %v419_v38 = vmul.f32 %v4293_v30, %v4755_v7  ;;  %v476_v39 = vadd.f32 %v4781_v26, %v437_v31  ;;  %vm4819_vm8 = vmor %vm248_vm1, %vm618_vm6  ;;  %v1009_v18 = vld [vmem:[#allocation2 + $0x80] sm:$0x1]  ;;  %v998_v28 = vld [vmem:[#allocation2 + $0x6c] sm:$0xf]  ;;  %s3957_s20 = sshll.u32 %s6346_s19, 1 }
  0x17   : > { %v477_v40 = vadd.f32 %v4781_v26, %v438_v32  ;;  %v474_v41 = vadd.f32 %v4781_v26, %v435_v33  ;;  %v475_v42 = vadd.f32 %v4781_v26, %v436_v34  ;;  %v460_v44 = vadd.f32 %v4781_v26, %v421_v35  ;;  %s235_s23 = scalar_lea.vmem %s6303_s5, %s3957_s20 }
  0x18   : > { %v461_v45 = vadd.f32 %v4781_v26, %v422_v36  ;;  %v420_v46 = vmul.f32 %v4294_v37, %v4755_v7  ;;  %v4803_v47 = vadd.f32 %v4781_v26, %v419_v38  ;;  %v508_v48 = vmax.f32 %v476_v39, 0.0  ;;  %v1002_v29 = vld [vmem:[#allocation2 + $0x74] sm:$0x1]  ;;  %v259_v38 = vld [vmem:[#allocation2 + $0x30] sm:$0x1] }
  0x19   : > { %v509_v49 = vmax.f32 %v477_v40, 0.0  ;;  %v506_v50 = vmax.f32 %v474_v41, 0.0  ;;  %v507_v51 = vmax.f32 %v475_v42, 0.0  ;;  %v492_v52 = vmax.f32 %v460_v44, 0.0  ;;  %v309_v39 = vld [vmem:[#allocation2 + $0x38] sm:$0x1] }
  0x1a   : > { %v493_v53 = vmax.f32 %v461_v45, 0.0  ;;  %v4806_v54 = vadd.f32 %v4781_v26, %v420_v46  ;;  %v4305_v55 = vunpack.c.l.bf16 %v4797_v43  ;;  %v4245_v56 = vpack.c.bf16 %v508_v48, %v508_v48  ;;  %v949_v45 = vld [vmem:[#allocation2 + $0x18] sm:$0xf]  ;;  %v953_v48 = vld [vmem:[#allocation2 + $0x20] sm:$0x1] }
  0x1b   : > { %v4246_v57 = vpack.c.bf16 %v509_v49, %v509_v49  ;;  %v4243_v58 = vpack.c.bf16 %v506_v50, %v506_v50  ;;  %v4244_v59 = vpack.c.bf16 %v507_v51, %v507_v51  ;;  %v4229_v60 = vpack.c.bf16 %v492_v52, %v492_v52  ;;  %v280_v51 = vld [vmem:[#allocation2 + $0x84] sm:$0x1] }
  0x1c   : > { %v4230_v61 = vpack.c.bf16 %v493_v53, %v493_v53  ;;  %v490_v62 = vmax.f32 %v4803_v47, 0.0  ;;  %v491_v63 = vmax.f32 %v4806_v54, 0.0  ;;  %v774_v1 = vshrl.u32 %v4245_v56, 16 }
  0x1d   : > { %v777_v2 = vshll.u32 %v4245_v56, 16  ;;  %v782_v3 = vshrl.u32 %v4246_v57, 16  ;;  %v785_v5 = vshll.u32 %v4246_v57, 16  ;;  %v757_v6 = vshrl.u32 %v4243_v58, 16  ;;  %v330_v57 = vld [vmem:[#allocation2 + $0x8c] sm:$0x1] }
  0x1e   : > { %v760_v8 = vshll.u32 %v4243_v58, 16  ;;  %v765_v9 = vshrl.u32 %v4244_v59, 16  ;;  %v768_v10 = vshll.u32 %v4244_v59, 16  ;;  %v776_v11 = vrot.slane %v774_v1, 7 }
  0x1f   : > { %v784_v12 = vrot.slane %v782_v3, 7  ;;  %v638_v15 = vshrl.u32 %v4229_v60, 16  ;;  %v641_v16 = vshll.u32 %v4229_v60, 16  ;;  %v759_v19 = vrot.slane %v757_v6, 7  ;;  %v942_v3 = vld [vmem:[#allocation2 + $0xc] sm:$0xf] }
  0x20   : > { %v767_v20 = vrot.slane %v765_v9, 7  ;;  %v646_v21 = vshrl.u32 %v4230_v61, 16  ;;  %v649_v22 = vshll.u32 %v4230_v61, 16  ;;  %v779_v23 = vor.u32 %v777_v2, %v776_v11  ;;  %v4365_v6 = vld [vmem:[%s4764_s25 + $0x58] sm:$0xff]  }
  0x21   : > { %v780_v24 = vrot.slane %v776_v11, 4  ;;  %v787_v25 = vor.u32 %v785_v5, %v784_v12  ;;  %v789_v27 = vrot.slane %v784_v12, 4  ;;  %v762_v30 = vor.u32 %v760_v8, %v759_v19 }
  0x22   : > { %v763_v31 = vrot.slane %v759_v19, 4  ;;  %v770_v32 = vor.u32 %v768_v10, %v767_v20  ;;  %v772_v33 = vrot.slane %v767_v20, 4  ;;  %v1006_v35 = vsel %vm4813_vm7, %v779_v23, %v1005_v14 }
  0x23   : > { %v788_v34 = vsel %vm4819_vm8, %v780_v24, %v787_v25  ;;  %v1010_v36 = vsel %vm4735_vm2, %v789_v27, %v1009_v18  ;;  %v640_v37 = vrot.slane %v638_v15, 7  ;;  %1007 = vst [vmem:[#allocation2 + $0x78] sm:$0xf] %v1006_v35  ;;  %v999_v41 = vsel %vm4813_vm7, %v762_v30, %v998_v28 }
  0x24   : > { %1008 = vst.msk [vmem:[#allocation2 + $0x7c] sm:$0xf] %vm237_vm5, %v788_v34  ;;  %1011 = vst [vmem:[#allocation2 + $0x80] sm:$0x1] %v1010_v36  ;;  %v771_v40 = vsel %vm4819_vm8, %v763_v31, %v770_v32  ;;  %v1003_v42 = vsel %vm4735_vm2, %v772_v33, %v1002_v29  ;;  %v648_v44 = vrot.slane %v646_v21, 7  ;;  %vm1519_vm9 = vcmask 1046528  }
  0x25   : > { %1000 = vst [vmem:[#allocation2 + $0x6c] sm:$0xf] %v999_v41  ;;  %1001 = vst.msk [vmem:[#allocation2 + $0x70] sm:$0xf] %vm237_vm5, %v771_v40  ;;  %v643_v46 = vor.u32 %v641_v16, %v640_v37  ;;  %v644_v47 = vrot.slane %v640_v37, 4  ;;  %v4227_v49 = vpack.c.bf16 %v490_v62, %v490_v62  ;;  %v4228_v50 = vpack.c.bf16 %v491_v63, %v491_v63  ;;  %v4364_v62 = vld [vmem:[%s4764_s25 + $0x50] sm:$0xff]  }
  0x26   : > { %1004 = vst [vmem:[#allocation2 + $0x74] sm:$0x1] %v1003_v42  ;;  %v651_v52 = vor.u32 %v649_v22, %v648_v44  ;;  %v653_v53 = vrot.slane %v648_v44, 4  ;;  %v260_v54 = vsel %vm4735_vm2, 0, %v259_v38  ;;  %v310_v56 = vsel %vm4745_vm4, 0, %v309_v39 }
  0x27   : > { %v950_v58 = vsel %vm4813_vm7, %v643_v46, %v949_v45  ;;  %v621_v59 = vshrl.u32 %v4227_v49, 16  ;;  %v624_v60 = vshll.u32 %v4227_v49, 16  ;;  %v629_v61 = vshrl.u32 %v4228_v50, 16  ;;  %261 = vst [vmem:[#allocation2 + $0x30] sm:$0x1] %v260_v54 }
  0x28   : > { %311 = vst [vmem:[#allocation2 + $0x38] sm:$0x1] %v310_v56  ;;  %v652_v63 = vsel %vm4819_vm8, %v644_v47, %v651_v52  ;;  %951 = vst [vmem:[#allocation2 + $0x18] sm:$0xf] %v950_v58  ;;  %v954_v1 = vsel %vm4735_vm2, %v653_v53, %v953_v48  ;;  %v632_v2 = vshll.u32 %v4228_v50, 16  ;;  %v4306_v5 = vunpack.c.h.bf16 %v4797_v43 }
  0x29   : > { %952 = vst.msk [vmem:[#allocation2 + $0x1c] sm:$0xf] %vm237_vm5, %v652_v63  ;;  %955 = vst [vmem:[#allocation2 + $0x20] sm:$0x1] %v954_v1  ;;  %v623_v8 = vrot.slane %v621_v59, 7  ;;  %v4851_v9 = vrot.slane %v629_v61, 7  ;;  %v425_v10 = vmul.f32 %v4305_v55, %v4755_v7  ;;  %v4333_v15 = vunpack.c.l.bf16 %v4364_v62 }
  0x2a   : > { %v281_v11 = vsel %vm4735_vm2, 0, %v280_v51  ;;  %v426_v12 = vmul.f32 %v4306_v5, %v4755_v7  ;;  %v331_v14 = vsel %vm4745_vm4, 0, %v330_v57  ;;  %v4334_v16 = vunpack.c.h.bf16 %v4364_v62  ;;  %v1725_v19 = vld [vmem:[#allocation2 + $0x78] sm:$0xe]  ;;  %v946_v40 = vld [vmem:[#allocation2 + $0x14] sm:$0x1] }
  0x2b   : > { %282 = vst [vmem:[#allocation2 + $0x84] sm:$0x1] %v281_v11  ;;  %v1687_v18 = vld [vmem:[#allocation2 + $0x7c] sm:$0xf]  ;;  %v626_v20 = vor.u32 %v624_v60, %v623_v8  ;;  %v634_v21 = vor.u32 %v632_v2, %v4851_v9  ;;  %v464_v22 = vadd.f32 %v4781_v26, %v425_v10  ;;  %332 = vst [vmem:[#allocation2 + $0x8c] sm:$0x1] %v331_v14  ;;  %v4337_v43 = vunpack.c.l.bf16 %v4365_v6 }
  0x2c   : > { %v4863_v55 = vld [vmem:[#allocation2 + $0x80] ss:$0 sps:$4 sm:$0x11]   ;;  %v4081_v23 = vcombine.low %v1725_v19, %v1687_v18  ;;  %v1686_v24 = vld [vmem:[#allocation2 + $0x78] sm:$0xf]  ;;  %v627_v25 = vrot.slane %v623_v8, 4  ;;  %v465_v27 = vadd.f32 %v4781_v26, %v426_v12  ;;  %v439_v28 = vmul.f32 %v4333_v15, %v4755_v7 }
  0x2d   : > { %v4867_v29 = vcombine.low %v1686_v24, %v1687_v18  ;;  %v1685_v30 = vld [vmem:[#allocation2 + $0x70] sm:$0xf]  ;;  %v1724_v31 = vld [vmem:[#allocation2 + $0x6c] sm:$0xe]  ;;  %v943_v32 = vsel %vm4813_vm7, %v626_v20, %v942_v3  ;;  %v440_v33 = vmul.f32 %v4334_v16, %v4755_v7  ;;  %v4338_v34 = vunpack.c.h.bf16 %v4365_v6  ;;  %v333_v12 = vld [vmem:[#allocation2 + $0x98] sm:$0x1] }
  0x2e   : > { %v2159_v35 = vrot.slane %v4081_v23, 1  ;;  %v2160_v36 = vrot.slane %v4863_v55, 1  ;;  %v4873_v37 = vld [vmem:[#allocation2 + $0x74] ss:$0 sps:$4 sm:$0x11]   ;;  %v4080_v38 = vcombine.low %v1724_v31, %v1685_v30  ;;  %v635_v39 = vsel %vm4819_vm8, %v627_v25, %v634_v21 }
  0x2f   : > { %944 = vst [vmem:[#allocation2 + $0xc] sm:$0xf] %v943_v32  ;;  %v1684_v41 = vld [vmem:[#allocation2 + $0x6c] sm:$0xf]  ;;  %v1717_v42 = vld [vmem:[#allocation2 + $0x18] sm:$0xe]  ;;  %v478_v45 = vadd.f32 %v4781_v26, %v439_v28  ;;  %v479_v46 = vadd.f32 %v4781_v26, %v440_v33  ;;  %v441_v48 = vmul.f32 %v4337_v43, %v4755_v7  ;;  %v442_v49 = vmul.f32 %v4338_v34, %v4755_v7 }
  0x30   : > { %v1670_v44 = vld [vmem:[#allocation2 + $0x18] sm:$0xf]  ;;  %945 = vst.msk [vmem:[#allocation2 + $0x10] sm:$0xf] %vm237_vm5, %v635_v39  ;;  %v283_v47 = vld [vmem:[#allocation2 + $0x90] sm:$0x1]  ;;  %v2161_v50 = vsel %vm1519_vm9, %v2159_v35, %v2160_v36  ;;  %v4884_v53 = vcombine.low %v1684_v41, %v1685_v30 }
  0x31   : > { %v2156_v51 = vrot.slane %v4080_v38, 1  ;;  %v2157_v52 = vrot.slane %v4873_v37, 1  ;;  %v1671_v54 = vld [vmem:[#allocation2 + $0x1c] sm:$0xf]  ;;  %2198 = vrot.lane.b32.xlu0 %v2161_v50, %s4692_s28  ;;  %v636_v59 = vrot.slane %v4851_v9, 4  ;;  %v496_v60 = vmax.f32 %v464_v22, 0.0 }
  0x32   : > { %v4887_v56 = vld [vmem:[#allocation2 + $0x20] ss:$0 sps:$4 sm:$0x11]   ;;  %v4073_v57 = vcombine.low %v1717_v42, %v1671_v54  ;;  %v4889_v58 = vcombine.low %v1670_v44, %v1671_v54  ;;  %v497_v62 = vmax.f32 %v465_v27, 0.0  ;;  %v510_v63 = vmax.f32 %v478_v45, 0.0  ;;  %v4905_v27 = vld [vmem:[%s4764_s25 + $0x10] sm:$0xff]  }
  0x33   : > { %v2158_v61 = vsel %vm1519_vm9, %v2156_v51, %v2157_v52  ;;  %v4894_v1 = vadd.f32 %v4781_v26, %v441_v48  ;;  %v2136_v3 = vrot.slane %v4887_v56, 1  ;;  %v947_v5 = vsel %vm4735_vm2, %v636_v59, %v946_v40  ;;  %v963_v23 = vld [vmem:[#allocation2 + $0x30] sm:$0xf]  ;;  %v967_v32 = vld [vmem:[#allocation2 + $0x38] sm:$0x1] }
  0x34   : > { %2196 = vrot.lane.b32.xlu1 %v2158_v61, %s4692_s28  ;;  %v2135_v2 = vrot.slane %v4073_v57, 1  ;;  %v4233_v6 = vpack.c.bf16 %v496_v60, %v496_v60  ;;  %948 = vst [vmem:[#allocation2 + $0x14] sm:$0x1] %v947_v5  ;;  %v4234_v8 = vpack.c.bf16 %v497_v62, %v497_v62  ;;  %v511_v9 = vmax.f32 %v479_v46, 0.0  ;;  %v1012_v34 = vld [vmem:[#allocation2 + $0x84] sm:$0xf] }
  0x35   : > { %v4247_v10 = vpack.c.bf16 %v510_v63, %v510_v63  ;;  %v284_v11 = vsel %vm4735_vm2, 0, %v283_v47  ;;  %v481_v20 = vadd.f32 %v4781_v26, %v442_v49  ;;  %v334_v44 = vsel %vm4745_vm4, 0, %v333_v12  ;;  %v1016_v61 = vld [vmem:[#allocation2 + $0x8c] sm:$0x1] }
  0x36   : > { %v2137_v14 = vsel %vm1519_vm9, %v2135_v2, %v2136_v3  ;;  %v1716_v15 = vld [vmem:[#allocation2 + $0xc] sm:$0xe]  ;;  %v672_v18 = vshrl.u32 %v4233_v6, 16  ;;  %v675_v19 = vshll.u32 %v4233_v6, 16  ;;  %285 = vst [vmem:[#allocation2 + $0x90] sm:$0x1] %v284_v11  ;;  %v4248_v24 = vpack.c.bf16 %v511_v9, %v511_v9 }
  0x37   : > { %v1668_v16 = vld [vmem:[#allocation2 + $0xc] sm:$0xf]  ;;  %v1669_v21 = vld [vmem:[#allocation2 + $0x10] sm:$0xf]  ;;  %v680_v22 = vshrl.u32 %v4234_v8, 16  ;;  %v683_v43 = vshll.u32 %v4234_v8, 16  ;;  %v4301_v52 = vunpack.c.l.bf16 %v4905_v27  ;;  %v4302_v54 = vunpack.c.h.bf16 %v4905_v27 }
  0x38   : > { %v791_v25 = vshrl.u32 %v4247_v10, 16  ;;  %2182 = vrot.lane.b32.xlu1 %v2137_v14, %s4692_s28  ;;  %v4072_v28 = vcombine.low %v1716_v15, %v1669_v21  ;;  %v4908_v30 = vcombine.low %v1668_v16, %v1669_v21  ;;  %v674_v31 = vrot.slane %v672_v18, 7  ;;  %335 = vst [vmem:[#allocation2 + $0x98] sm:$0x1] %v334_v44  ;;  %v256_v6 = vld [vmem:[#allocation2 + $0x24] sm:$0x1] }
  0x39   : > { %v794_v33 = vshll.u32 %v4247_v10, 16  ;;  %v682_v35 = vrot.slane %v680_v22, 7  ;;  %v799_v38 = vshrl.u32 %v4248_v24, 16  ;;  %v802_v39 = vshll.u32 %v4248_v24, 16  ;;  %v306_v11 = vld [vmem:[#allocation2 + $0x2c] sm:$0x1] }
  0x3a   : > { %v793_v36 = vrot.slane %v791_v25, 7  ;;  %v2132_v40 = vrot.slane %v4072_v28, 1  ;;  %v677_v41 = vor.u32 %v675_v19, %v674_v31  ;;  %v678_v42 = vrot.slane %v674_v31, 4  ;;  %v4934_v21 = vld [vmem:[%s4764_s25 + $0x60] sm:$0xff]  }
  0x3b   : > { %v685_v45 = vor.u32 %v683_v43, %v682_v35  ;;  %v687_v46 = vrot.slane %v682_v35, 4  ;;  %v4549_v49 = vld [vmem:[#allocation2 + $0x14] ss:$0 sps:$4 sm:$0x11]   ;;  %v801_v51 = vrot.slane %v799_v38, 7  ;;  %v512_v62 = vmax.f32 %v4894_v1, 0.0 }
  0x3c   : > { %v796_v47 = vor.u32 %v794_v33, %v793_v36  ;;  %v797_v48 = vrot.slane %v793_v36, 4  ;;  %v964_v50 = vsel %vm4813_vm7, %v677_v41, %v963_v23  ;;  %v2133_v63 = vrot.slane %v4549_v49, 1 }
  0x3d   : > { %v686_v57 = vsel %vm4819_vm8, %v678_v42, %v685_v45  ;;  %965 = vst [vmem:[#allocation2 + $0x30] sm:$0xf] %v964_v50  ;;  %v968_v59 = vsel %vm4735_vm2, %v687_v46, %v967_v32  ;;  %v804_v2 = vor.u32 %v802_v39, %v801_v51  ;;  %v806_v3 = vrot.slane %v801_v51, 4  ;;  %v1019_v27 = vld [vmem:[#allocation2 + $0x90] sm:$0xf] }
  0x3e   : > { %v1013_v60 = vsel %vm4813_vm7, %v796_v47, %v1012_v34  ;;  %966 = vst.msk [vmem:[#allocation2 + $0x34] sm:$0xf] %vm237_vm5, %v686_v57  ;;  %969 = vst [vmem:[#allocation2 + $0x38] sm:$0x1] %v968_v59  ;;  %v513_v5 = vmax.f32 %v481_v20, 0.0  ;;  %v4249_v8 = vpack.c.bf16 %v512_v62, %v512_v62  ;;  %v1861_v9 = vshrl.u32 %v4908_v30, 16 }
  0x3f   : > { %1014 = vst [vmem:[#allocation2 + $0x84] sm:$0xf] %v1013_v60  ;;  %vm1246_vm10 = vsmask.f32 7424  ;;  %v1863_v10 = vshll.u32 %v4908_v30, 16  ;;  %v2134_v12 = vsel %vm1519_vm9, %v2132_v40, %v2133_v63  ;;  %v805_v1 = vsel %vm4819_vm8, %v797_v48, %v804_v2 }
  0x40   : > { %v1017_v14 = vsel %vm4735_vm2, %v806_v3, %v1016_v61  ;;  %v4250_v15 = vpack.c.bf16 %v513_v5, %v513_v5  ;;  %2180 = vrot.lane.b32.xlu0 %v2134_v12, %s4692_s28  ;;  %1015 = vst.msk [vmem:[#allocation2 + $0x88] sm:$0xf] %vm237_vm5, %v805_v1  ;;  %v808_v16 = vshrl.u32 %v4249_v8, 16  ;;  %v811_v18 = vshll.u32 %v4249_v8, 16  ;;  %v1023_v36 = vld [vmem:[#allocation2 + $0x98] sm:$0x1] }
  0x41   : > { %1018 = vst [vmem:[#allocation2 + $0x8c] sm:$0x1] %v1017_v14  ;;  %v1865_v19 = vrot.slane %v1863_v10, 1  ;;  %v1868_v20 = vshll.u32 %v4549_v49, 16  ;;  %v257_v23 = vsel %vm4735_vm2, 0, %v256_v6  ;;  %v307_v24 = vsel %vm4745_vm4, 0, %v306_v11 }
  0x42   : > { %v816_v22 = vshrl.u32 %v4250_v15, 16  ;;  %v819_v43 = vshll.u32 %v4250_v15, 16  ;;  %v810_v25 = vrot.slane %v808_v16, 7  ;;  %258 = vst [vmem:[#allocation2 + $0x24] sm:$0x1] %v257_v23  ;;  %v423_v32 = vmul.f32 %v4301_v52, %v4755_v7  ;;  %v4367_v23 = vld [vmem:[%s4764_s25 + $0x68] sm:$0xff]  }
  0x43   : > { %v1866_v28 = vor.u32 %v1865_v19, %v1861_v9  ;;  %v1870_v31 = vrot.slane %v1868_v20, 1  ;;  %308 = vst [vmem:[#allocation2 + $0x2c] sm:$0x1] %v307_v24  ;;  %v424_v38 = vmul.f32 %v4302_v54, %v4755_v7  ;;  %v1873_v39 = vshrl.u32 %v4889_v58, 16  ;;  %v286_v62 = vld [vmem:[#allocation2 + $0x9c] sm:$0x1] }
  0x44   : > { %v1674_v33 = vld [vmem:[#allocation2 + $0x30] sm:$0xf]  ;;  %v818_v35 = vrot.slane %v816_v22, 7  ;;  %v4341_v40 = vunpack.c.l.bf16 %v4934_v21  ;;  %v813_v44 = vor.u32 %v811_v18, %v810_v25  ;;  %v462_v46 = vadd.f32 %v4781_v26, %v423_v32  ;;  %v336_v18 = vld [vmem:[#allocation2 + $0xa4] sm:$0x1] }
  0x45   : > { %v1719_v34 = vld [vmem:[#allocation2 + $0x30] sm:$0xe]  ;;  %v1675_v41 = vld [vmem:[#allocation2 + $0x34] sm:$0xf]  ;;  %v1871_v45 = vsel %vm1246_vm10, %v1866_v28, %v1870_v31  ;;  %v4342_v47 = vunpack.c.h.bf16 %v4934_v21  ;;  %v814_v52 = vrot.slane %v810_v25, 4  ;;  %v463_v60 = vadd.f32 %v4781_v26, %v424_v38 }
  0x46   : > { %v1688_v42 = vld [vmem:[#allocation2 + $0x84] sm:$0xf]  ;;  %v4947_v48 = vcombine.low %v1674_v33, %v1675_v41  ;;  %v4949_v49 = vld [vmem:[#allocation2 + $0x38] ss:$0 sps:$4 sm:$0x11]   ;;  %v4075_v50 = vcombine.low %v1719_v34, %v1675_v41  ;;  %v821_v54 = vor.u32 %v819_v43, %v818_v35  ;;  %v823_v57 = vrot.slane %v818_v35, 4 }
  0x47   : > { %v1726_v51 = vld [vmem:[#allocation2 + $0x84] sm:$0xe]  ;;  %v1020_v59 = vsel %vm4813_vm7, %v813_v44, %v1019_v27  ;;  %v494_v61 = vmax.f32 %v462_v46, 0.0  ;;  %v2142_v2 = vrot.slane %v4949_v49, 1  ;;  %v1689_v3 = vld [vmem:[#allocation2 + $0x88] sm:$0xf]  ;;  %v443_v6 = vmul.f32 %v4341_v40, %v4755_v7 }
  0x48   : > { %v2141_v63 = vrot.slane %v4075_v50, 1  ;;  %v822_v5 = vsel %vm4819_vm8, %v814_v52, %v821_v54  ;;  %1021 = vst [vmem:[#allocation2 + $0x90] sm:$0xf] %v1020_v59  ;;  %v4958_v8 = vcombine.low %v1688_v42, %v1689_v3  ;;  %v4960_v9 = vld [vmem:[#allocation2 + $0x8c] ss:$0 sps:$4 sm:$0x11]   ;;  %v4082_v10 = vcombine.low %v1726_v51, %v1689_v3 }
  0x49   : > { %1022 = vst.msk [vmem:[#allocation2 + $0x94] sm:$0xf] %vm237_vm5, %v822_v5  ;;  %v1024_v11 = vsel %vm4735_vm2, %v823_v57, %v1023_v36  ;;  %v495_v12 = vmax.f32 %v463_v60, 0.0  ;;  %v4231_v14 = vpack.c.bf16 %v494_v61, %v494_v61  ;;  %v1875_v15 = vshll.u32 %v4889_v58, 16  ;;  %v289_v43 = vld [vmem:[#allocation2 + $0xa8] sm:$0x1] }
  0x4a   : > { %v2143_v1 = vsel %vm1519_vm9, %v2141_v63, %v2142_v2  ;;  %1025 = vst [vmem:[#allocation2 + $0x98] sm:$0x1] %v1024_v11  ;;  %v1880_v16 = vshll.u32 %v4887_v56, 16  ;;  %v2162_v19 = vrot.slane %v4082_v10, 1  ;;  %v2163_v20 = vrot.slane %v4960_v9, 1 }
  0x4b   : > { %2186 = vrot.lane.b32.xlu1 %v2143_v1, %s4692_s28  ;;  %v4232_v21 = vpack.c.bf16 %v495_v12, %v495_v12  ;;  %v287_v22 = vsel %vm4735_vm2, 0, %v286_v62  ;;  %v655_v24 = vshrl.u32 %v4231_v14, 16  ;;  %v658_v25 = vshll.u32 %v4231_v14, 16  ;;  %v956_v35 = vld [vmem:[#allocation2 + $0x24] sm:$0xf] }
  0x4c   : > { %v1877_v27 = vrot.slane %v1875_v15, 1  ;;  %v1882_v28 = vrot.slane %v1880_v16, 1  ;;  %288 = vst [vmem:[#allocation2 + $0x9c] sm:$0x1] %v287_v22  ;;  %v2164_v31 = vsel %vm1519_vm9, %v2162_v19, %v2163_v20  ;;  %v337_v33 = vsel %vm4745_vm4, 0, %v336_v18 }
  0x4d   : > { %v663_v56 = vshrl.u32 %v4232_v21, 16  ;;  %v666_v32 = vshll.u32 %v4232_v21, 16  ;;  %2200 = vrot.lane.b32.xlu0 %v2164_v31, %s4692_s28  ;;  %v657_v34 = vrot.slane %v655_v24, 7  ;;  %338 = vst [vmem:[#allocation2 + $0xa4] sm:$0x1] %v337_v33  ;;  %v444_v38 = vmul.f32 %v4342_v47, %v4755_v7  ;;  %v5005_v33 = vld [vmem:[%s4764_s25 + $0x20] sm:$0xff]  }
  0x4e   : > { %v1878_v36 = vor.u32 %v1877_v27, %v1873_v39  ;;  %v482_v40 = vadd.f32 %v4781_v26, %v443_v6  ;;  %v339_v41 = vld [vmem:[#allocation2 + $0xb0] sm:$0x1]  ;;  %v290_v50 = vsel %vm4735_vm2, 0, %v289_v43  ;;  %v4345_v51 = vunpack.c.l.bf16 %v4367_v23  ;;  %v960_v59 = vld [vmem:[#allocation2 + $0x2c] sm:$0x1] }
  0x4f   : > { %v1690_v42 = vld [vmem:[#allocation2 + $0x90] sm:$0xf]  ;;  %2052 = vrot.lane.b32.xlu1 %v1871_v45, %s4693_s29  ;;  %v665_v46 = vrot.slane %v663_v56, 7  ;;  %v4346_v52 = vunpack.c.h.bf16 %v4367_v23  ;;  %v660_v57 = vor.u32 %v658_v25, %v657_v34  ;;  %v661_v39 = vrot.slane %v657_v34, 4  ;;  %291 = vst [vmem:[#allocation2 + $0xa8] sm:$0x1] %v290_v50 }
  0x50   : > { %v1727_v44 = vld [vmem:[#allocation2 + $0x90] sm:$0xe]  ;;  %v1691_v54 = vld [vmem:[#allocation2 + $0x94] sm:$0xf]  ;;  %v1883_v47 = vsel %vm1246_vm10, %v1878_v36, %v1882_v28  ;;  %v483_v60 = vadd.f32 %v4781_v26, %v444_v38  ;;  %v514_v5 = vmax.f32 %v482_v40, 0.0  ;;  %v340_v10 = vsel %vm4745_vm4, 0, %v339_v41 }
  0x51   : > { %v4984_v61 = vcombine.low %v1690_v42, %v1691_v54  ;;  %v4559_v62 = vld [vmem:[#allocation2 + $0x98] ss:$0 sps:$4 sm:$0x11]   ;;  %v4083_v63 = vcombine.low %v1727_v44, %v1691_v54  ;;  %v668_v45 = vor.u32 %v666_v32, %v665_v46  ;;  %v670_v2 = vrot.slane %v665_v46, 4  ;;  %341 = vst [vmem:[#allocation2 + $0xb0] sm:$0x1] %v340_v10 }
  0x52   : > { %v957_v3 = vsel %vm4813_vm7, %v660_v57, %v956_v35  ;;  %v515_v6 = vmax.f32 %v483_v60, 0.0  ;;  %v2166_v12 = vrot.slane %v4559_v62, 1  ;;  %v4251_v15 = vpack.c.bf16 %v514_v5, %v514_v5 }
  0x53   : > { %v2165_v11 = vrot.slane %v4083_v63, 1  ;;  %v669_v1 = vsel %vm4819_vm8, %v661_v39, %v668_v45  ;;  %958 = vst [vmem:[#allocation2 + $0x24] sm:$0xf] %v957_v3  ;;  %v961_v14 = vsel %vm4735_vm2, %v670_v2, %v960_v59  ;;  %2054 = vrot.lane.b32.xlu1 %v1883_v47, %s4693_s29  ;;  %v1993_v18 = vshrl.u32 %v4984_v61, 16  ;;  %v1026_v36 = vld [vmem:[#allocation2 + $0x9c] sm:$0xf] }
  0x54   : > { %959 = vst.msk [vmem:[#allocation2 + $0x28] sm:$0xf] %vm237_vm5, %v669_v1  ;;  %962 = vst [vmem:[#allocation2 + $0x2c] sm:$0x1] %v961_v14  ;;  %v4252_v16 = vpack.c.bf16 %v515_v6, %v515_v6  ;;  %v1995_v19 = vshll.u32 %v4984_v61, 16  ;;  %v2000_v21 = vshll.u32 %v4559_v62, 16  ;;  %v445_v22 = vmul.f32 %v4345_v51, %v4755_v7 }
  0x55   : > { %v2167_v20 = vsel %vm1519_vm9, %v2165_v11, %v2166_v12  ;;  %v446_v43 = vmul.f32 %v4346_v52, %v4755_v7  ;;  %v825_v23 = vshrl.u32 %v4251_v15, 16  ;;  %v828_v24 = vshll.u32 %v4251_v15, 16  ;;  %v1030_v41 = vld [vmem:[#allocation2 + $0xa4] sm:$0x1] }
  0x56   : > { %2202 = vrot.lane.b32.xlu0 %v2167_v20, %s4692_s28  ;;  %v833_v25 = vshrl.u32 %v4252_v16, 16  ;;  %v836_v27 = vshll.u32 %v4252_v16, 16  ;;  %v1997_v28 = vrot.slane %v1995_v19, 1  ;;  %v2002_v31 = vrot.slane %v2000_v21, 1  ;;  %v1033_v20 = vld [vmem:[#allocation2 + $0xa8] sm:$0xf] }
  0x57   : > { %v484_v56 = vadd.f32 %v4781_v26, %v445_v22  ;;  %v485_v32 = vadd.f32 %v4781_v26, %v446_v43  ;;  %v827_v34 = vrot.slane %v825_v23, 7  ;;  %v1957_v38 = vshrl.u32 %v4884_v53, 16 }
  0x58   : > { %v835_v35 = vrot.slane %v833_v25, 7  ;;  %v1959_v40 = vshll.u32 %v4884_v53, 16  ;;  %v1998_v42 = vor.u32 %v1997_v28, %v1993_v18  ;;  %v1964_v50 = vshll.u32 %v4873_v37, 16  ;;  %v1037_v23 = vld [vmem:[#allocation2 + $0xb0] sm:$0x1] }
  0x59   : > { %v516_v44 = vmax.f32 %v484_v56, 0.0  ;;  %v517_v46 = vmax.f32 %v485_v32, 0.0  ;;  %v830_v54 = vor.u32 %v828_v24, %v827_v34  ;;  %v831_v57 = vrot.slane %v827_v34, 4 }
  0x5a   : > { %v1672_v51 = vld [vmem:[#allocation2 + $0x24] sm:$0xf]  ;;  %v838_v26 = vor.u32 %v836_v27, %v835_v35  ;;  %v840_v39 = vrot.slane %v835_v35, 4  ;;  %v2003_v47 = vsel %vm1246_vm10, %v1998_v42, %v2002_v31  ;;  %v4309_v63 = vunpack.c.l.bf16 %v5005_v33  ;;  %v5029_v42 = vld [vmem:[%s4764_s25 + $0x28] sm:$0xff]  }
  0x5b   : > { %v1718_v52 = vld [vmem:[#allocation2 + $0x24] sm:$0xe]  ;;  %v1673_v59 = vld [vmem:[#allocation2 + $0x28] sm:$0xf]  ;;  %v4253_v60 = vpack.c.bf16 %v516_v44, %v516_v44  ;;  %v4254_v62 = vpack.c.bf16 %v517_v46, %v517_v46  ;;  %v1027_v5 = vsel %vm4813_vm7, %v830_v54, %v1026_v36  ;;  %2074 = vrot.lane.b32.xlu1 %v2003_v47, %s4693_s29  ;;  %v1961_v24 = vrot.slane %v1959_v40, 1 }
  0x5c   : > { %v5012_v45 = vcombine.low %v1672_v51, %v1673_v59  ;;  %v4562_v2 = vld [vmem:[#allocation2 + $0x2c] ss:$0 sps:$4 sm:$0x11]   ;;  %v4074_v3 = vcombine.low %v1718_v52, %v1673_v59  ;;  %v839_v37 = vsel %vm4819_vm8, %v831_v57, %v838_v26  ;;  %1028 = vst [vmem:[#allocation2 + $0x9c] sm:$0xf] %v1027_v5  ;;  %v1031_v6 = vsel %vm4735_vm2, %v840_v39, %v1030_v41 }
  0x5d   : > { %1029 = vst.msk [vmem:[#allocation2 + $0xa0] sm:$0xf] %vm237_vm5, %v839_v37  ;;  %v842_v10 = vshrl.u32 %v4253_v60, 16  ;;  %v845_v11 = vshll.u32 %v4253_v60, 16  ;;  %v850_v12 = vshrl.u32 %v4254_v62, 16  ;;  %v2139_v14 = vrot.slane %v4562_v2, 1 }
  0x5e   : > { %v2138_v1 = vrot.slane %v4074_v3, 1  ;;  %1032 = vst [vmem:[#allocation2 + $0xa4] sm:$0x1] %v1031_v6  ;;  %v853_v15 = vshll.u32 %v4254_v62, 16  ;;  %v1885_v16 = vshrl.u32 %v5012_v45, 16  ;;  %v1887_v21 = vshll.u32 %v5012_v45, 16 }
  0x5f   : > { %v844_v18 = vrot.slane %v842_v10, 7  ;;  %v852_v19 = vrot.slane %v850_v12, 7  ;;  %v1892_v22 = vshll.u32 %v4562_v2, 16  ;;  %v1966_v25 = vrot.slane %v1964_v50, 1  ;;  %v262_v26 = vld [vmem:[#allocation2 + $0x3c] sm:$0x1] }
  0x60   : > { %v2140_v43 = vsel %vm1519_vm9, %v2138_v1, %v2139_v14  ;;  %v1897_v27 = vshrl.u32 %v4947_v48, 16  ;;  %v1889_v34 = vrot.slane %v1887_v21, 1  ;;  %v1962_v36 = vor.u32 %v1961_v24, %v1957_v38  ;;  %v312_v10 = vld [vmem:[#allocation2 + $0x44] sm:$0x1] }
  0x61   : > { %2184 = vrot.lane.b32.xlu0 %v2140_v43, %s4692_s28  ;;  %v847_v28 = vor.u32 %v845_v11, %v844_v18  ;;  %v848_v31 = vrot.slane %v844_v18, 4  ;;  %v855_v56 = vor.u32 %v853_v15, %v852_v19  ;;  %v857_v32 = vrot.slane %v852_v19, 4 }
  0x62   : > { %v1894_v35 = vrot.slane %v1892_v22, 1  ;;  %v1899_v41 = vshll.u32 %v4947_v48, 16  ;;  %v1904_v50 = vshll.u32 %v4949_v49, 16  ;;  %v1890_v38 = vor.u32 %v1889_v34, %v1885_v16 }
  0x63   : > { %v856_v44 = vsel %vm4819_vm8, %v848_v31, %v855_v56  ;;  %v1034_v40 = vsel %vm4813_vm7, %v847_v28, %v1033_v20  ;;  %v1038_v46 = vsel %vm4735_vm2, %v857_v32, %v1037_v23  ;;  %v1692_v51 = vld [vmem:[#allocation2 + $0x9c] sm:$0xf]  ;;  %v5040_v57 = vsel %vm1246_vm10, %v1962_v36, %v1966_v25 }
  0x64   : > { %v1693_v52 = vld [vmem:[#allocation2 + $0xa0] sm:$0xf]  ;;  %v1728_v54 = vld [vmem:[#allocation2 + $0x9c] sm:$0xe]  ;;  %1035 = vst [vmem:[#allocation2 + $0xa8] sm:$0xf] %v1034_v40  ;;  %v4310_v39 = vunpack.c.h.bf16 %v5005_v33  ;;  %v427_v59 = vmul.f32 %v4309_v63, %v4755_v7  ;;  %v4313_v2 = vunpack.c.l.bf16 %v5029_v42  ;;  %v1895_v3 = vsel %vm1246_vm10, %v1890_v38, %v1894_v35 }
  0x65   : > { %1036 = vst.msk [vmem:[#allocation2 + $0xac] sm:$0xf] %vm237_vm5, %v856_v44  ;;  %1039 = vst [vmem:[#allocation2 + $0xb0] sm:$0x1] %v1038_v46  ;;  %v5044_v47 = vcombine.low %v1692_v51, %v1693_v52  ;;  %v4084_v49 = vcombine.low %v1728_v54, %v1693_v52  ;;  %v1901_v62 = vrot.slane %v1899_v41, 1  ;;  %v1906_v37 = vrot.slane %v1904_v50, 1  ;;  %2056 = vrot.lane.b32.xlu1 %v1895_v3, %s4693_s29 }
  0x66   : > { %v5046_v60 = vld [vmem:[#allocation2 + $0xa4] ss:$0 sps:$4 sm:$0x11]   ;;  %v1969_v5 = vshrl.u32 %v4867_v29, 16  ;;  %v1971_v6 = vshll.u32 %v4867_v29, 16  ;;  %v1976_v63 = vshll.u32 %v4863_v55, 16  ;;  %v4314_v31 = vunpack.c.h.bf16 %v5029_v42 }
  0x67   : > { %v2168_v11 = vrot.slane %v4084_v49, 1  ;;  %v2169_v33 = vrot.slane %v5046_v60, 1  ;;  %v1902_v7 = vor.u32 %v1901_v62, %v1897_v27  ;;  %v1981_v1 = vshrl.u32 %v4958_v8, 16  ;;  %v5075_v27 = vld [vmem:[%s6300_s2] ss:$0 sm:$0xff] }
  0x68   : > { %v1973_v12 = vrot.slane %v1971_v6, 1  ;;  %v1983_v14 = vshll.u32 %v4958_v8, 16  ;;  %v1988_v15 = vshll.u32 %v4960_v9, 16  ;;  %v1978_v19 = vrot.slane %v1976_v63, 1  ;;  %v5069_v9 = vld [vmem:[%s6299_s1] ss:$0 sm:$0xff] }
  0x69   : > { %v2170_v16 = vsel %vm1519_vm9, %v2168_v11, %v2169_v33  ;;  %v1907_v18 = vsel %vm1246_vm10, %v1902_v7, %v1906_v37  ;;  %v263_v20 = vsel %vm4735_vm2, 0, %v262_v26  ;;  %v313_v43 = vsel %vm4745_vm4, 0, %v312_v10  ;;  %v265_v62 = vld [vmem:[#allocation2 + $0x48] sm:$0x1]  ;;  %v315_v6 = vld [vmem:[#allocation2 + $0x50] sm:$0x1] }
  0x6a   : > { %2204 = vrot.lane.b32.xlu0 %v2170_v16, %s4692_s28  ;;  %v1974_v21 = vor.u32 %v1973_v12, %v1969_v5  ;;  %v1985_v22 = vrot.slane %v1983_v14, 1  ;;  %v1990_v55 = vrot.slane %v1988_v15, 1  ;;  %264 = vst [vmem:[#allocation2 + $0x3c] sm:$0x1] %v263_v20  ;;  %2058 = vrot.lane.b32.xlu1 %v1907_v18, %s4693_s29  ;;  %314 = vst [vmem:[#allocation2 + $0x44] sm:$0x1] %v313_v43 }
  0x6b   : > { %v1694_v23 = vld [vmem:[#allocation2 + $0xa8] sm:$0xf]  ;;  %v428_v25 = vmul.f32 %v5069_v9, %v4310_v39  ;;  %v466_v28 = vadd.f32 %v5075_v27, %v427_v59  ;;  %v429_v56 = vmul.f32 %v5069_v9, %v4313_v2  ;;  %v2005_v44 = vshrl.u32 %v5044_v47, 16  ;;  %v292_v15 = vld [vmem:[#allocation2 + $0xb4] sm:$0x1] }
  0x6c   : > { %v1695_v24 = vld [vmem:[#allocation2 + $0xac] sm:$0xf]  ;;  %v1729_v32 = vld [vmem:[#allocation2 + $0xa8] sm:$0xe]  ;;  %v5083_v36 = vsel %vm1246_vm10, %v1974_v21, %v1978_v19  ;;  %v1986_v41 = vor.u32 %v1985_v22, %v1981_v1  ;;  %v2007_v51 = vshll.u32 %v5044_v47, 16  ;;  %v2012_v5 = vshll.u32 %v5046_v60, 16 }
  0x6d   : > { %v5080_v34 = vcombine.low %v1694_v23, %v1695_v24  ;;  %v4568_v35 = vld [vmem:[#allocation2 + $0xb0] ss:$0 sps:$4 sm:$0x11]   ;;  %v4085_v40 = vcombine.low %v1729_v32, %v1695_v24  ;;  %v467_v46 = vadd.f32 %v5075_v27, %v428_v25  ;;  %v498_v50 = vmax.f32 %v466_v28, 0.0  ;;  %v342_v21 = vld [vmem:[#allocation2 + $0xbc] sm:$0x1] }
  0x6e   : > { %v2172_v52 = vrot.slane %v4568_v35, 1  ;;  %v2024_v38 = vshll.u32 %v4568_v35, 16  ;;  %v5091_v39 = vsel %vm1246_vm10, %v1986_v41, %v1990_v55  ;;  %v2009_v37 = vrot.slane %v2007_v51, 1  ;;  %v4368_v16 = vld [vmem:[%s4764_s25 + $0x70] sm:$0xff]   ;;  %v295_v41 = vld [vmem:[#allocation2 + $0xc0] sm:$0x1] }
  0x6f   : > { %v2017_v42 = vshrl.u32 %v5080_v34, 16  ;;  %v2019_v54 = vshll.u32 %v5080_v34, 16  ;;  %v2171_v26 = vrot.slane %v4085_v40, 1  ;;  %v499_v59 = vmax.f32 %v467_v46, 0.0 }
  0x70   : > { %v4235_v49 = vpack.c.bf16 %v498_v50, %v498_v50  ;;  %v2026_v3 = vrot.slane %v2024_v38, 1  ;;  %v2010_v12 = vor.u32 %v2009_v37, %v2005_v44  ;;  %v2014_v1 = vrot.slane %v2012_v5, 1  ;;  %v345_v50 = vld [vmem:[#allocation2 + $0xc8] sm:$0x1] }
  0x71   : > { %v2021_v2 = vrot.slane %v2019_v54, 1  ;;  %v2173_v10 = vsel %vm1519_vm9, %v2171_v26, %v2172_v52  ;;  %v4236_v11 = vpack.c.bf16 %v499_v59, %v499_v59  ;;  %v266_v14 = vsel %vm4735_vm2, 0, %v265_v62  ;;  %v970_v55 = vld [vmem:[#allocation2 + $0x3c] sm:$0xf]  ;;  %v974_v44 = vld [vmem:[#allocation2 + $0x44] sm:$0x1] }
  0x72   : > { %v689_v33 = vshrl.u32 %v4235_v49, 16  ;;  %v692_v7 = vshll.u32 %v4235_v49, 16  ;;  %2206 = vrot.lane.b32.xlu0 %v2173_v10, %s4692_s28  ;;  %267 = vst [vmem:[#allocation2 + $0x48] sm:$0x1] %v266_v14  ;;  %v316_v60 = vsel %vm4745_vm4, 0, %v315_v6  ;;  %v5103_v43 = vsel %vm1246_vm10, %v2010_v12, %v2014_v1  ;;  %v4369_v49 = vld [vmem:[%s4764_s25 + $0x78] sm:$0xff]  }
  0x73   : > { %v2022_v63 = vor.u32 %v2021_v2, %v2017_v42  ;;  %v697_v19 = vshrl.u32 %v4236_v11, 16  ;;  %v700_v20 = vshll.u32 %v4236_v11, 16  ;;  %317 = vst [vmem:[#allocation2 + $0x50] sm:$0x1] %v316_v60  ;;  %v430_v23 = vmul.f32 %v5069_v9, %v4314_v31  ;;  %v268_v62 = vld [vmem:[#allocation2 + $0x54] sm:$0x1] }
  0x74   : > { %v691_v18 = vrot.slane %v689_v33, 7  ;;  %v468_v24 = vadd.f32 %v5075_v27, %v429_v56  ;;  %v293_v35 = vsel %vm4735_vm2, 0, %v292_v15  ;;  %v343_v31 = vsel %vm4745_vm4, 0, %v342_v21 }
  0x75   : > { %v2027_v22 = vsel %vm1246_vm10, %v2022_v63, %v2026_v3  ;;  %v699_v32 = vrot.slane %v697_v19, 7  ;;  %v469_v40 = vadd.f32 %v5075_v27, %v430_v23  ;;  %294 = vst [vmem:[#allocation2 + $0xb4] sm:$0x1] %v293_v35  ;;  %v4349_v56 = vunpack.c.l.bf16 %v4368_v16  ;;  %344 = vst [vmem:[#allocation2 + $0xbc] sm:$0x1] %v343_v31  ;;  %v5136_v19 = vld [vmem:[%s4764_s25 + $0x30] sm:$0xff]  }
  0x76   : > { %2078 = vrot.lane.b32.xlu1 %v2027_v22, %s4693_s29  ;;  %v694_v25 = vor.u32 %v692_v7, %v691_v18  ;;  %v695_v28 = vrot.slane %v691_v18, 4  ;;  %2068 = vrot.lane.b32.xlu0 %v5040_v57, %s4693_s29  ;;  %v500_v46 = vmax.f32 %v468_v24, 0.0  ;;  %v4350_v54 = vunpack.c.h.bf16 %v4368_v16  ;;  %v318_v7 = vld [vmem:[#allocation2 + $0x5c] sm:$0x1] }
  0x77   : > { %v702_v51 = vor.u32 %v700_v20, %v699_v32  ;;  %v704_v52 = vrot.slane %v699_v32, 4  ;;  %v501_v57 = vmax.f32 %v469_v40, 0.0  ;;  %v447_v26 = vmul.f32 %v5069_v9, %v4349_v56 }
  0x78   : > { %v971_v42 = vsel %vm4813_vm7, %v694_v25, %v970_v55  ;;  %v4237_v38 = vpack.c.bf16 %v500_v46, %v500_v46  ;;  %v296_v59 = vsel %vm4735_vm2, 0, %v295_v41  ;;  %v448_v37 = vmul.f32 %v5069_v9, %v4350_v54 }
  0x79   : > { %972 = vst [vmem:[#allocation2 + $0x3c] sm:$0xf] %v971_v42  ;;  %v703_v2 = vsel %vm4819_vm8, %v695_v28, %v702_v51  ;;  %v975_v3 = vsel %vm4735_vm2, %v704_v52, %v974_v44  ;;  %297 = vst [vmem:[#allocation2 + $0xc0] sm:$0x1] %v296_v59  ;;  %v346_v5 = vsel %vm4745_vm4, 0, %v345_v50  ;;  %v4238_v6 = vpack.c.bf16 %v501_v57, %v501_v57 }
  0x7a   : > { %2070 = vrot.lane.b32.xlu0 %v5083_v36, %s4693_s29  ;;  %973 = vst.msk [vmem:[#allocation2 + $0x40] sm:$0xf] %vm237_vm5, %v703_v2  ;;  %976 = vst [vmem:[#allocation2 + $0x44] sm:$0x1] %v975_v3  ;;  %v706_v10 = vshrl.u32 %v4237_v38, 16  ;;  %v709_v11 = vshll.u32 %v4237_v38, 16  ;;  %v486_v33 = vadd.f32 %v5075_v27, %v447_v26  ;;  %v487_v63 = vadd.f32 %v5075_v27, %v448_v37 }
  0x7b   : > { %347 = vst [vmem:[#allocation2 + $0xc8] sm:$0x1] %v346_v5  ;;  %v4353_v12 = vunpack.c.l.bf16 %v4369_v49  ;;  %v4354_v1 = vunpack.c.h.bf16 %v4369_v49  ;;  %v269_v14 = vsel %vm4735_vm2, 0, %v268_v62  ;;  %v714_v36 = vshrl.u32 %v4238_v6, 16  ;;  %v977_v20 = vld [vmem:[#allocation2 + $0x48] sm:$0xf] }
  0x7c   : > { %v708_v15 = vrot.slane %v706_v10, 7  ;;  %v717_v16 = vshll.u32 %v4238_v6, 16  ;;  %v518_v18 = vmax.f32 %v486_v33, 0.0  ;;  %270 = vst [vmem:[#allocation2 + $0x54] sm:$0x1] %v269_v14  ;;  %v519_v60 = vmax.f32 %v487_v63, 0.0 }
  0x7d   : > { %v449_v21 = vmul.f32 %v5069_v9, %v4353_v12  ;;  %v450_v22 = vmul.f32 %v5069_v9, %v4354_v1  ;;  %v319_v55 = vsel %vm4745_vm4, 0, %v318_v7  ;;  %v716_v25 = vrot.slane %v714_v36, 7  ;;  %v981_v35 = vld [vmem:[#allocation2 + $0x50] sm:$0x1]  ;;  %v1040_v7 = vld [vmem:[#allocation2 + $0xb4] sm:$0xf] }
  0x7e   : > { %2072 = vrot.lane.b32.xlu0 %v5091_v39, %s4693_s29  ;;  %v711_v23 = vor.u32 %v709_v11, %v708_v15  ;;  %v712_v24 = vrot.slane %v708_v15, 4  ;;  %v4255_v28 = vpack.c.bf16 %v518_v18, %v518_v18  ;;  %320 = vst [vmem:[#allocation2 + $0x5c] sm:$0x1] %v319_v55  ;;  %v4256_v44 = vpack.c.bf16 %v519_v60, %v519_v60  ;;  %v1044_v15 = vld [vmem:[#allocation2 + $0xbc] sm:$0x1] }
  0x7f   : > { %v488_v40 = vadd.f32 %v5075_v27, %v449_v21  ;;  %v489_v46 = vadd.f32 %v5075_v27, %v450_v22  ;;  %v4317_v31 = vunpack.c.l.bf16 %v5136_v19  ;;  %v719_v56 = vor.u32 %v717_v16, %v716_v25 }
  0x80   : > { %v1676_v32 = vld [vmem:[#allocation2 + $0x3c] sm:$0xf]  ;;  %v721_v50 = vrot.slane %v716_v25, 4  ;;  %v978_v39 = vsel %vm4813_vm7, %v711_v23, %v977_v20  ;;  %v859_v51 = vshrl.u32 %v4255_v28, 16  ;;  %v862_v42 = vshll.u32 %v4255_v28, 16 }
  0x81   : > { %v1720_v41 = vld [vmem:[#allocation2 + $0x3c] sm:$0xe]  ;;  %v1677_v52 = vld [vmem:[#allocation2 + $0x40] sm:$0xf]  ;;  %979 = vst [vmem:[#allocation2 + $0x48] sm:$0xf] %v978_v39  ;;  %v4318_v57 = vunpack.c.h.bf16 %v5136_v19  ;;  %v431_v38 = vmul.f32 %v5069_v9, %v4317_v31  ;;  %v720_v49 = vsel %vm4819_vm8, %v712_v24, %v719_v56 }
  0x82   : > { %v867_v54 = vshrl.u32 %v4256_v44, 16  ;;  %v5151_v26 = vcombine.low %v1676_v32, %v1677_v52  ;;  %v4571_v59 = vld [vmem:[#allocation2 + $0x44] ss:$0 sps:$4 sm:$0x11]   ;;  %2076 = vrot.lane.b32.xlu0 %v5103_v43, %s4693_s29  ;;  %v982_v62 = vsel %vm4735_vm2, %v721_v50, %v981_v35  ;;  %v4076_v2 = vcombine.low %v1720_v41, %v1677_v52  ;;  %980 = vst.msk [vmem:[#allocation2 + $0x4c] sm:$0xf] %vm237_vm5, %v720_v49 }
  0x83   : > { %983 = vst [vmem:[#allocation2 + $0x50] sm:$0x1] %v982_v62  ;;  %v861_v3 = vrot.slane %v859_v51, 7  ;;  %v870_v5 = vshll.u32 %v4256_v44, 16  ;;  %v520_v6 = vmax.f32 %v488_v40, 0.0  ;;  %v1916_v33 = vshll.u32 %v4571_v59, 16 }
  0x84   : > { %v869_v37 = vrot.slane %v867_v54, 7  ;;  %v1909_v10 = vshrl.u32 %v5151_v26, 16  ;;  %v1911_v11 = vshll.u32 %v5151_v26, 16  ;;  %v2144_v43 = vrot.slane %v4076_v2, 1  ;;  %v271_v20 = vld [vmem:[#allocation2 + $0x60] sm:$0x1] }
  0x85   : > { %v2145_v63 = vrot.slane %v4571_v59, 1  ;;  %v864_v12 = vor.u32 %v862_v42, %v861_v3  ;;  %v865_v1 = vrot.slane %v861_v3, 4  ;;  %v1918_v16 = vrot.slane %v1916_v33, 1  ;;  %v321_v31 = vld [vmem:[#allocation2 + $0x68] sm:$0x1]  ;;  %v5176_v56 = vld [vmem:[%s4764_s25 + $0x38] sm:$0xff]  }
  0x86   : > { %v872_v14 = vor.u32 %v870_v5, %v869_v37  ;;  %v1913_v36 = vrot.slane %v1911_v11, 1  ;;  %v874_v18 = vrot.slane %v869_v37, 4  ;;  %v521_v19 = vmax.f32 %v489_v46, 0.0  ;;  %v1047_v33 = vld [vmem:[#allocation2 + $0xc0] sm:$0xf] }
  0x87   : > { %v2146_v60 = vsel %vm1519_vm9, %v2144_v43, %v2145_v63  ;;  %v1041_v22 = vsel %vm4813_vm7, %v864_v12, %v1040_v7  ;;  %v4257_v55 = vpack.c.bf16 %v520_v6, %v520_v6  ;;  %v432_v35 = vmul.f32 %v5069_v9, %v4318_v57 }
  0x88   : > { %v873_v21 = vsel %vm4819_vm8, %v865_v1, %v872_v14  ;;  %v1914_v23 = vor.u32 %v1913_v36, %v1909_v10  ;;  %v1678_v24 = vld [vmem:[#allocation2 + $0x48] sm:$0xf]  ;;  %2188 = vrot.lane.b32.xlu0 %v2146_v60, %s4692_s28  ;;  %1042 = vst [vmem:[#allocation2 + $0xb4] sm:$0xf] %v1041_v22  ;;  %v1045_v28 = vsel %vm4735_vm2, %v874_v18, %v1044_v15  ;;  %v272_v46 = vsel %vm4735_vm2, 0, %v271_v20 }
  0x89   : > { %v1721_v25 = vld [vmem:[#allocation2 + $0x48] sm:$0xe]  ;;  %1043 = vst.msk [vmem:[#allocation2 + $0xb8] sm:$0xf] %vm237_vm5, %v873_v21  ;;  %v4258_v32 = vpack.c.bf16 %v521_v19, %v521_v19  ;;  %1046 = vst [vmem:[#allocation2 + $0xbc] sm:$0x1] %v1045_v28  ;;  %v470_v40 = vadd.f32 %v5075_v27, %v431_v38  ;;  %v471_v42 = vadd.f32 %v5075_v27, %v432_v35  ;;  %v4321_v37 = vunpack.c.l.bf16 %v5176_v56 }
  0x8a   : > { %v876_v41 = vshrl.u32 %v4257_v55, 16  ;;  %v879_v44 = vshll.u32 %v4257_v55, 16  ;;  %v1919_v50 = vsel %vm1246_vm10, %v1914_v23, %v1918_v16  ;;  %v1679_v39 = vld [vmem:[#allocation2 + $0x4c] sm:$0xf]  ;;  %273 = vst [vmem:[#allocation2 + $0x60] sm:$0x1] %v272_v46 }
  0x8b   : > { %v884_v51 = vshrl.u32 %v4258_v32, 16  ;;  %v887_v52 = vshll.u32 %v4258_v32, 16  ;;  %2060 = vrot.lane.b32.xlu1 %v1919_v50, %s4693_s29  ;;  %v5181_v54 = vcombine.low %v1678_v24, %v1679_v39  ;;  %v4573_v57 = vld [vmem:[#allocation2 + $0x50] ss:$0 sps:$4 sm:$0x11]   ;;  %v4077_v38 = vcombine.low %v1721_v25, %v1679_v39 }
  0x8c   : > { %v878_v59 = vrot.slane %v876_v41, 7  ;;  %v502_v49 = vmax.f32 %v470_v40, 0.0  ;;  %v503_v2 = vmax.f32 %v471_v42, 0.0  ;;  %v322_v3 = vsel %vm4745_vm4, 0, %v321_v31  ;;  %v1051_v1 = vld [vmem:[#allocation2 + $0xc8] sm:$0x1] }
  0x8d   : > { %v886_v62 = vrot.slane %v884_v51, 7  ;;  %v1921_v5 = vshrl.u32 %v5181_v54, 16  ;;  %v1923_v6 = vshll.u32 %v5181_v54, 16  ;;  %v1928_v10 = vshll.u32 %v4573_v57, 16  ;;  %323 = vst [vmem:[#allocation2 + $0x68] sm:$0x1] %v322_v3 }
  0x8e   : > { %v2147_v11 = vrot.slane %v4077_v38, 1  ;;  %v2148_v43 = vrot.slane %v4573_v57, 1  ;;  %v881_v7 = vor.u32 %v879_v44, %v878_v59  ;;  %v882_v63 = vrot.slane %v878_v59, 4  ;;  %v984_v57 = vld [vmem:[#allocation2 + $0x54] sm:$0xf] }
  0x8f   : > { %v889_v12 = vor.u32 %v887_v52, %v886_v62  ;;  %v1925_v14 = vrot.slane %v1923_v6, 1  ;;  %v1930_v15 = vrot.slane %v1928_v10, 1  ;;  %v1696_v36 = vld [vmem:[#allocation2 + $0xb4] sm:$0xf]  ;;  %v4239_v16 = vpack.c.bf16 %v502_v49, %v502_v49  ;;  %v988_v10 = vld [vmem:[#allocation2 + $0x5c] sm:$0x1] }
  0x90   : > { %v1697_v4 = vld [vmem:[#allocation2 + $0xb8] sm:$0xf]  ;;  %v4240_v18 = vpack.c.bf16 %v503_v2, %v503_v2  ;;  %v2149_v19 = vsel %vm1519_vm9, %v2147_v11, %v2148_v43  ;;  %v4576_v60 = vld [vmem:[#allocation2 + $0xbc] ss:$0 sps:$4 sm:$0x11]   ;;  %v891_v22 = vrot.slane %v886_v62, 4  ;;  %v1048_v23 = vsel %vm4813_vm7, %v881_v7, %v1047_v33 }
  0x91   : > { %v5189_v20 = vcombine.low %v1696_v36, %v1697_v4  ;;  %v890_v21 = vsel %vm4819_vm8, %v882_v63, %v889_v12  ;;  %v1926_v55 = vor.u32 %v1925_v14, %v1921_v5  ;;  %v1730_v24 = vld [vmem:[#allocation2 + $0xb4] sm:$0xe]  ;;  %v723_v25 = vshrl.u32 %v4239_v16, 16  ;;  %1049 = vst [vmem:[#allocation2 + $0xc0] sm:$0xf] %v1048_v23 }
  0x92   : > { %1050 = vst.msk [vmem:[#allocation2 + $0xc4] sm:$0xf] %vm237_vm5, %v890_v21  ;;  %v726_v28 = vshll.u32 %v4239_v16, 16  ;;  %v2036_v41 = vshll.u32 %v4576_v60, 16  ;;  %v1052_v44 = vsel %vm4735_vm2, %v891_v22, %v1051_v1  ;;  %v4086_v46 = vcombine.low %v1730_v24, %v1697_v4 }
  0x93   : > { %v2029_v32 = vshrl.u32 %v5189_v20, 16  ;;  %v2031_v35 = vshll.u32 %v5189_v20, 16  ;;  %v1931_v40 = vsel %vm1246_vm10, %v1926_v55, %v1930_v15  ;;  %1053 = vst [vmem:[#allocation2 + $0xc8] sm:$0x1] %v1052_v44  ;;  %v2175_v31 = vrot.slane %v4576_v60, 1 }
  0x94   : > { %v725_v50 = vrot.slane %v723_v25, 7  ;;  %2062 = vrot.lane.b32.xlu1 %v1931_v40, %s4693_s29  ;;  %v2038_v51 = vrot.slane %v2036_v41, 1  ;;  %v731_v52 = vshrl.u32 %v4240_v18, 16  ;;  %v734_v42 = vshll.u32 %v4240_v18, 16 }
  0x95   : > { %v2033_v39 = vrot.slane %v2031_v35, 1  ;;  %v2174_v38 = vrot.slane %v4086_v46, 1  ;;  %v4322_v62 = vunpack.c.h.bf16 %v5176_v56  ;;  %v433_v5 = vmul.f32 %v5069_v9, %v4321_v37 }
  0x96   : > { %v728_v59 = vor.u32 %v726_v28, %v725_v50  ;;  %v729_v49 = vrot.slane %v725_v50, 4  ;;  %v733_v3 = vrot.slane %v731_v52, 7  ;;  %v4694_v33 = vmov 0   ;;  %v2684_v28 = vld [vmem:[#allocation2 + $0x18] sm:$0xf] }
  0x97   : > { %v2034_v2 = vor.u32 %v2033_v39, %v2029_v32  ;;  %v434_v11 = vmul.f32 %v5069_v9, %v4322_v62  ;;  %238 = vst.msk [vmem:[#allocation2] sm:$0xf] %vm237_vm5, %v4694_v33  ;;  %239 = vst.msk [vmem:[#allocation2 + $0x4] sm:$0xf] %vm237_vm5, %v4694_v33  ;;  %v472_v7 = vadd.f32 %v5075_v27, %v433_v5  ;;  %v5229_v32 = vld [vmem:[#allocation2 + $0x1c] sm:$0xf] }
  0x98   : > { %v985_v6 = vsel %vm4813_vm7, %v728_v59, %v984_v57  ;;  %241 = vst.msk [vmem:[#allocation2 + $0x8] sm:$0x1] %vm240_vm0, %v4694_v33  ;;  %245 = vst.msk [vmem:[#allocation2 + $0xd4] sm:$0x1] %vm240_vm0, %v4694_v33  ;;  %2190 = vrot.lane.b32.xlu1 %v2149_v19, %s4692_s28  ;;  %v736_v43 = vor.u32 %v734_v42, %v733_v3  ;;  %v738_v9 = vrot.slane %v733_v3, 4  ;;  %vm1600_vm11 = vcmask 31744  }
  0x99   : > { %243 = vst.msk [vmem:[#allocation2 + $0xcc] sm:$0xf] %vm237_vm5, %v4694_v33  ;;  %244 = vst.msk [vmem:[#allocation2 + $0xd0] sm:$0xf] %vm237_vm5, %v4694_v33  ;;  %v2039_v56 = vsel %vm1246_vm10, %v2034_v2, %v2038_v51  ;;  %v1699_v37 = vld [vmem:[#allocation2 + $0xc4] sm:$0xf]  ;;  %v2176_v12 = vsel %vm1519_vm9, %v2174_v38, %v2175_v31  ;;  %v473_v14 = vadd.f32 %v5075_v27, %v434_v11 }
  0x9a   : > { %986 = vst [vmem:[#allocation2 + $0x54] sm:$0xf] %v985_v6  ;;  %2080 = vrot.lane.b32.xlu0 %v2039_v56, %s4693_s29  ;;  %v1698_v63 = vld [vmem:[#allocation2 + $0xc0] sm:$0xf]  ;;  %v737_v4 = vsel %vm4819_vm8, %v729_v49, %v736_v43  ;;  %v989_v16 = vsel %vm4735_vm2, %v738_v9, %v988_v10  ;;  %v504_v19 = vmax.f32 %v472_v7, 0.0  ;;  %v5241_v11 = vcombine.low %v2684_v28, %v5229_v32 }
  0x9b   : > { %v1731_v1 = vld [vmem:[#allocation2 + $0xc0] sm:$0xe]  ;;  %v5219_v15 = vcombine.low %v1698_v63, %v1699_v37  ;;  %v4578_v36 = vld [vmem:[#allocation2 + $0xc8] ss:$0 sps:$4 sm:$0x11]   ;;  %v505_v60 = vmax.f32 %v473_v14, 0.0 }
  0x9c   : > { %v4087_v18 = vcombine.low %v1731_v1, %v1699_v37  ;;  %987 = vst.msk [vmem:[#allocation2 + $0x58] sm:$0xf] %vm237_vm5, %v737_v4  ;;  %990 = vst [vmem:[#allocation2 + $0x5c] sm:$0x1] %v989_v16  ;;  %v2048_v27 = vshll.u32 %v4578_v36, 16  ;;  %v2178_v23 = vrot.slane %v4578_v36, 1  ;;  %v4241_v24 = vpack.c.bf16 %v504_v19, %v504_v19 }
  0x9d   : > { %v2041_v21 = vshrl.u32 %v5219_v15, 16  ;;  %v2043_v22 = vshll.u32 %v5219_v15, 16  ;;  %v4242_v25 = vpack.c.bf16 %v505_v60, %v505_v60  ;;  %v991_v62 = vld [vmem:[#allocation2 + $0x60] sm:$0xf]  ;;  %v995_v7 = vld [vmem:[#allocation2 + $0x68] sm:$0x1] }
  0x9e   : > { %v2177_v55 = vrot.slane %v4087_v18, 1  ;;  %2208 = vrot.lane.b32.xlu0 %v2176_v12, %s4692_s28  ;;  %v2050_v41 = vrot.slane %v2048_v27, 1  ;;  %v1054_v44 = vld [vmem:[#allocation2] sm:$0xf]  ;;  %v1055_v40 = vld [vmem:[#allocation2 + $0x4] sm:$0xf] }
  0x9f   : > { %v2045_v35 = vrot.slane %v2043_v22, 1  ;;  %v740_v50 = vshrl.u32 %v4241_v24, 16  ;;  %v743_v39 = vshll.u32 %v4241_v24, 16  ;;  %v748_v51 = vshrl.u32 %v4242_v25, 16  ;;  %v1102_v60 = vld [vmem:[#allocation2] sm:$0xe] }
  0xa0   : > { %v2179_v31 = vsel %vm1519_vm9, %v2177_v55, %v2178_v23  ;;  %v751_v42 = vshll.u32 %v4242_v25, 16  ;;  %v5232_v38 = vcombine.low %v1054_v44, %v1055_v40  ;;  %v5235_v2 = vld [vmem:[#allocation2 + $0x8] ss:$0 sps:$4 sm:$0x11]   ;;  %v4024_v13 = vcombine.low %v1102_v60, %v1055_v40  ;;  %v5268_v40 = vld [vmem:[#allocation2 + $0x1c] sm:$0xf] }
  0xa1   : > { %v1680_v46 = vld [vmem:[#allocation2 + $0x54] sm:$0xf]  ;;  %v2046_v52 = vor.u32 %v2045_v35, %v2041_v21  ;;  %v742_v59 = vrot.slane %v740_v50, 7  ;;  %v750_v49 = vrot.slane %v748_v51, 7  ;;  %v1255_v14 = vshll.u32 %v5235_v2, 16 }
  0xa2   : > { %v1722_v57 = vld [vmem:[#allocation2 + $0x54] sm:$0xe]  ;;  %2210 = vrot.lane.b32.xlu0 %v2179_v31, %s4692_s28  ;;  %v1248_v6 = vshrl.u32 %v5232_v38, 16  ;;  %v1250_v10 = vshll.u32 %v5232_v38, 16  ;;  %v1056_v35 = vld [vmem:[#allocation2 + $0xc] sm:$0xf] }
  0xa3   : > { %v2051_v3 = vsel %vm1246_vm10, %v2046_v52, %v2050_v41  ;;  %v1681_v5 = vld [vmem:[#allocation2 + $0x58] sm:$0xf]  ;;  %v4580_v56 = vld [vmem:[#allocation2 + $0x5c] ss:$0 sps:$4 sm:$0x11]   ;;  %v745_v37 = vor.u32 %v743_v39, %v742_v59  ;;  %v746_v43 = vrot.slane %v742_v59, 4  ;;  %v753_v9 = vor.u32 %v751_v42, %v750_v49 }
  0xa4   : > { %2082 = vrot.lane.b32.xlu1 %v2051_v3, %s4693_s29  ;;  %v5244_v33 = vcombine.low %v1680_v46, %v1681_v5  ;;  %v755_v63 = vrot.slane %v750_v49, 4  ;;  %v4078_v12 = vcombine.low %v1722_v57, %v1681_v5  ;;  %v1252_v1 = vrot.slane %v1250_v10, 1  ;;  %v5247_v36 = vld [vmem:[#allocation2 + $0x20] ss:$0 sps:$4 sm:$0x11]  }
  0xa5   : > { %v1940_v18 = vshll.u32 %v4580_v56, 16  ;;  %v754_v19 = vsel %vm4819_vm8, %v746_v43, %v753_v9  ;;  %v992_v21 = vsel %vm4813_vm7, %v745_v37, %v991_v62  ;;  %v2151_v55 = vrot.slane %v4580_v56, 1  ;;  %v5259_v41 = vld [vmem:[#allocation2 + $0x10] sm:$0xf]  ;;  %v2732_v31 = vld [vmem:[#allocation2 + $0x18] sm:$0xe] }
  0xa6   : > { %v1933_v4 = vshrl.u32 %v5244_v33, 16  ;;  %v1935_v16 = vshll.u32 %v5244_v33, 16  ;;  %994 = vst.msk [vmem:[#allocation2 + $0x64] sm:$0xf] %vm237_vm5, %v754_v19  ;;  %v996_v22 = vsel %vm4735_vm2, %v755_v63, %v995_v7  ;;  %v2150_v27 = vrot.slane %v4078_v12, 1 }
  0xa7   : > { %v1942_v24 = vrot.slane %v1940_v18, 1  ;;  %993 = vst [vmem:[#allocation2 + $0x60] sm:$0xf] %v992_v21  ;;  %997 = vst [vmem:[#allocation2 + $0x68] sm:$0x1] %v996_v22  ;;  %v1253_v25 = vor.u32 %v1252_v1, %v1248_v6  ;;  %v1257_v28 = vrot.slane %v1255_v14, 1  ;;  %v5272_v49 = vcombine.low %v1056_v35, %v5259_v41 }
  0xa8   : > { %v1937_v23 = vrot.slane %v1935_v16, 1  ;;  %v2152_v17 = vsel %vm1519_vm9, %v2150_v27, %v2151_v55  ;;  %v1521_v0 = vrot.slane %v5235_v2, 1  ;;  %v2879_v46 = vshll.u32 %v5241_v11, 16  ;;  %v1058_v59 = vld [vmem:[#allocation2 + $0x18] sm:$0xf] }
  0xa9   : > { %2192 = vrot.lane.b32.xlu0 %v2152_v17, %s4692_s28  ;;  %v1258_v50 = vsel %vm1246_vm10, %v1253_v25, %v1257_v28  ;;  %v1520_v39 = vrot.slane %v4024_v13, 1  ;;  %v2877_v51 = vshrl.u32 %v5241_v11, 16  ;;  %v2884_v52 = vshll.u32 %v5247_v36, 16  ;;  %v5276_v5 = vld [vmem:[#allocation2 + $0x20] ss:$0 sps:$4 sm:$0x11]  }
  0xaa   : > { %v1938_v44 = vor.u32 %v1937_v23, %v1933_v4  ;;  %v2881_v57 = vrot.slane %v2879_v46, 1  ;;  %v4156_v62 = vcombine.low %v2732_v31, %v5229_v32  ;;  %v5278_v56 = vld [vmem:[#allocation2 + $0x14] ss:$0 sps:$4 sm:$0x11]   ;;  %v5282_v9 = vcombine.low %v1058_v59, %v5268_v40  ;;  %v2686_v32 = vld [vmem:[#allocation2 + $0x24] sm:$0xf] }
  0xab   : > { %v2886_v3 = vrot.slane %v2884_v52, 1  ;;  %v1522_v37 = vsel %vm1519_vm9, %v1520_v39, %v1521_v0  ;;  %v1262_v12 = vshll.u32 %v5272_v49, 16  ;;  %v1104_v4 = vld [vmem:[#allocation2 + $0x18] sm:$0xe]  ;;  %v5291_v21 = vld [vmem:[#allocation2 + $0x28] sm:$0xf] }
  0xac   : > { %v1943_v42 = vsel %vm1246_vm10, %v1938_v44, %v1942_v24  ;;  %v2882_v43 = vor.u32 %v2881_v57, %v2877_v51  ;;  %v3148_v1 = vrot.slane %v4156_v62, 1  ;;  %v1274_v14 = vshll.u32 %v5282_v9, 16  ;;  %v1103_v22 = vld [vmem:[#allocation2 + $0xc] sm:$0xe]  ;;  %v2688_v25 = vld [vmem:[#allocation2 + $0x30] sm:$0xf] }
  0xad   : > { %2064 = vrot.lane.b32.xlu1 %v1943_v42, %s4693_s29  ;;  %v1683_v2 = vld [vmem:[#allocation2 + $0x64] sm:$0xf]  ;;  %1439 = vrot.lane.b32.xlu0 %v1258_v50, %s4693_s29  ;;  %v3149_v55 = vrot.slane %v5247_v36, 1  ;;  %v1272_v23 = vshrl.u32 %v5282_v9, 16  ;;  %v1279_v35 = vshll.u32 %v5276_v5, 16  ;;  %v1260_v44 = vshrl.u32 %v5272_v49, 16 }
  0xae   : > { %v1682_v6 = vld [vmem:[#allocation2 + $0x60] sm:$0xf]  ;;  %v4582_v63 = vld [vmem:[#allocation2 + $0x68] ss:$0 sps:$4 sm:$0x11]   ;;  %v2887_v27 = vsel %vm1246_vm10, %v2882_v43, %v2886_v3  ;;  %v1276_v24 = vrot.slane %v1274_v14, 1  ;;  %v5302_v31 = vcombine.low %v2686_v32, %v5291_v21  ;;  %v4026_v51 = vcombine.low %v1104_v4, %v5268_v40  ;;  %v5319_v32 = vpop.permute.xlu1 %2196 }
  0xaf   : > { %v1723_v10 = vld [vmem:[#allocation2 + $0x60] sm:$0xe]  ;;  %v5284_v7 = vcombine.low %v1682_v6, %v1683_v2  ;;  %v1952_v19 = vshll.u32 %v4582_v63, 16  ;;  %v5297_v13 = vld [vmem:[#allocation2 + $0x34] sm:$0xf]  ;;  %v1264_v0 = vrot.slane %v1262_v12, 1  ;;  %v3150_v52 = vsel %vm1519_vm9, %v3148_v1, %v3149_v55 }
  0xb0   : > { %v4079_v60 = vcombine.low %v1723_v10, %v1683_v2  ;;  %v1267_v46 = vshll.u32 %v5278_v56, 16  ;;  %6323 = vst [vmem:[#allocation3_spill] sm:$0xff] %v5302_v31  ;;  %v2154_v39 = vrot.slane %v4582_v63, 1  ;;  %v1277_v42 = vor.u32 %v1276_v24, %v1272_v23  ;;  %v5307_v59 = vld [vmem:[#allocation2 + $0x38] ss:$0 sps:$4 sm:$0x11]  }
  0xb1   : > { %v1945_v16 = vshrl.u32 %v5284_v7, 16  ;;  %v1947_v18 = vshll.u32 %v5284_v7, 16  ;;  %1568 = vrot.lane.b32.xlu0 %v1522_v37, %s4692_s28  ;;  %v1954_v17 = vrot.slane %v1952_v19, 1  ;;  %v1281_v57 = vrot.slane %v1279_v35, 1  ;;  %v1062_v6 = vld [vmem:[#allocation2 + $0x30] sm:$0xf] }
  0xb2   : > { %v2153_v36 = vrot.slane %v4079_v60, 1  ;;  %v4025_v2 = vcombine.low %v1103_v22, %v5259_v41  ;;  %v5312_v3 = vcombine.low %v2688_v25, %v5297_v13  ;;  %v5314_v10 = vld [vmem:[#allocation2 + $0x34] sm:$0xf]  ;;  %v1265_v37 = vor.u32 %v1264_v0, %v1260_v44  ;;  %v5317_v43 = vld [vmem:[#allocation2 + $0x2c] ss:$0 sps:$4 sm:$0x11]  }
  0xb3   : > { %v1949_v28 = vrot.slane %v1947_v18, 1  ;;  %v1269_v40 = vrot.slane %v1267_v46, 1  ;;  %v1060_v63 = vld [vmem:[#allocation2 + $0x24] sm:$0xf]  ;;  %v2891_v1 = vshll.u32 %v5302_v31, 16  ;;  %v1526_v14 = vrot.slane %v4026_v51, 1  ;;  %v5348_v51 = vpop.permute.xlu1 %2182 }
  0xb4   : > { %v2155_v12 = vsel %vm1519_vm9, %v2153_v36, %v2154_v39  ;;  %v5324_v41 = vld [vmem:[#allocation2 + $0x28] sm:$0xf]  ;;  %v2903_v4 = vshll.u32 %v5312_v3, 16  ;;  %v1527_v18 = vrot.slane %v5276_v5, 1  ;;  %v2901_v19 = vshrl.u32 %v5312_v3, 16 }
  0xb5   : > { %v1950_v50 = vor.u32 %v1949_v28, %v1945_v16  ;;  %3068 = vrot.lane.b32.xlu0 %v2887_v27, %s4693_s29  ;;  %v1282_v16 = vsel %vm1246_vm10, %v1277_v42, %v1281_v57  ;;  %v2908_v60 = vshll.u32 %v5307_v59, 16  ;;  %v2734_v22 = vld [vmem:[#allocation2 + $0x30] sm:$0xe]  ;;  %v1523_v27 = vrot.slane %v4025_v2, 1  ;;  %v2733_v25 = vld [vmem:[#allocation2 + $0x24] sm:$0xe] }
  0xb6   : > { %v2905_v55 = vrot.slane %v2903_v4, 1  ;;  %v1270_v23 = vsel %vm1246_vm10, %v1265_v37, %v1269_v40  ;;  %v1524_v24 = vrot.slane %v5278_v56, 1  ;;  %v5335_v28 = vcombine.low %v1060_v63, %v5324_v41  ;;  %v5345_v36 = vld [vmem:[#allocation2 + $0x38] ss:$0 sps:$4 sm:$0x11]   ;;  %v5358_v37 = vpop.permute.xlu0 %2198 }
  0xb7   : > { %v1955_v62 = vsel %vm1246_vm10, %v1950_v50, %v1954_v17  ;;  %v5338_v17 = vcombine.low %v1062_v6, %v5314_v10  ;;  %v2889_v5 = vshrl.u32 %v5302_v31, 16  ;;  %v2893_v35 = vrot.slane %v2891_v1, 1  ;;  %v5351_v42 = vld [vmem:[#allocation2 + $0x2c] ss:$0 sps:$4 sm:$0x11]  }
  0xb8   : > { %2066 = vrot.lane.b32.xlu1 %v1955_v62, %s4693_s29  ;;  %6324 = vst [vmem:[#allocation4_spill] sm:$0xff] %v5335_v28  ;;  %v2896_v44 = vshll.u32 %v5317_v43, 16  ;;  %v4158_v0 = vcombine.low %v2734_v22, %v5297_v13  ;;  %v1528_v46 = vsel %vm1519_vm9, %v1526_v14, %v1527_v18  ;;  %v2906_v50 = vor.u32 %v2905_v55, %v2901_v19  ;;  %v1106_v62 = vld [vmem:[#allocation2 + $0x30] sm:$0xe]  ;;  %v2692_v2 = vld [vmem:[#allocation2 + $0x48] sm:$0xf] }
  0xb9   : > { %3196 = vrot.lane.b32.xlu0 %v3150_v52, %s4692_s28  ;;  %6325 = vst [vmem:[#allocation5_spill] sm:$0xff] %v5338_v17  ;;  %v2910_v56 = vrot.slane %v2908_v60, 1  ;;  %v1298_v39 = vshll.u32 %v5338_v17, 16  ;;  %v4157_v52 = vcombine.low %v2733_v25, %v5291_v21  ;;  %v1525_v57 = vsel %vm1519_vm9, %v1523_v27, %v1524_v24  ;;  %v5356_v6 = vld [vmem:[#allocation2 + $0x4c] sm:$0xf] }
  0xba   : > { %v1286_v13 = vshll.u32 %v5335_v28, 16  ;;  %v2894_v40 = vor.u32 %v2893_v35, %v2889_v5  ;;  %v2898_v63 = vrot.slane %v2896_v44, 1  ;;  %v3154_v21 = vrot.slane %v4158_v0, 1  ;;  %v5363_v4 = vld [vmem:[#allocation2 + $0x40] sm:$0xf] }
  0xbb   : > { %v3155_v1 = vrot.slane %v5307_v59, 1  ;;  %v2911_v14 = vsel %vm1246_vm10, %v2906_v50, %v2910_v56  ;;  %v1300_v18 = vrot.slane %v1298_v39, 1  ;;  %v1303_v19 = vshll.u32 %v5345_v36, 16  ;;  %v1105_v5 = vld [vmem:[#allocation2 + $0x24] sm:$0xe] }
  0xbc   : > { %2194 = vrot.lane.b32.xlu1 %v2155_v12, %s4692_s28  ;;  %v2690_v12 = vld [vmem:[#allocation2 + $0x3c] sm:$0xf]  ;;  %v3151_v60 = vrot.slane %v4157_v52, 1  ;;  %v5368_v22 = vcombine.low %v2692_v2, %v5356_v6  ;;  %v3152_v27 = vrot.slane %v5317_v43, 1  ;;  %v1284_v55 = vshrl.u32 %v5335_v28, 16 }
  0xbd   : > { %1443 = vrot.lane.b32.xlu0 %v1282_v16, %s4693_s29  ;;  %v1296_v16 = vshrl.u32 %v5338_v17, 16  ;;  %v1288_v59 = vrot.slane %v1286_v13, 1  ;;  %v5374_v24 = vpop.permute.xlu1 %2186  ;;  %v2899_v25 = vsel %vm1246_vm10, %v2894_v40, %v2898_v63  ;;  %v5379_v35 = vcombine.low %v2690_v12, %v5363_v4  ;;  %v5382_v0 = vld [vmem:[#allocation2 + $0x50] ss:$0 sps:$4 sm:$0x11]  }
  0xbe   : > { %6326 = vst [vmem:[#allocation6_spill] sm:$0xff] %v5368_v22  ;;  %v4028_v44 = vcombine.low %v1106_v62, %v5314_v10  ;;  %v3156_v43 = vsel %vm1519_vm9, %v3154_v21, %v3155_v1  ;;  %v1305_v50 = vrot.slane %v1303_v19, 1  ;;  %v2927_v56 = vshll.u32 %v5368_v22, 16  ;;  %v1066_v39 = vld [vmem:[#allocation2 + $0x48] sm:$0xf] }
  0xbf   : > { %6327 = vst [vmem:[#allocation7_spill] sm:$0xff] %v5379_v35  ;;  %v5386_v52 = vld [vmem:[#allocation2 + $0x4c] sm:$0xf]  ;;  %v1064_v13 = vld [vmem:[#allocation2 + $0x3c] sm:$0xf]  ;;  %v3153_v2 = vsel %vm1519_vm9, %v3151_v60, %v3152_v27  ;;  %v1289_v40 = vor.u32 %v1288_v59, %v1284_v55  ;;  %v4027_v62 = vcombine.low %v1105_v5, %v5324_v41  ;;  %v2915_v21 = vshll.u32 %v5379_v35, 16 }
  0xc0   : > { %1441 = vrot.lane.b32.xlu1 %v1270_v23, %s4693_s29  ;;  %v1291_v23 = vshll.u32 %v5351_v42, 16  ;;  %v5393_v63 = vld [vmem:[#allocation2 + $0x44] ss:$0 sps:$4 sm:$0x11]   ;;  %v5395_v12 = vld [vmem:[#allocation2 + $0x40] sm:$0xf] }
  0xc1   : > { %1572 = vrot.lane.b32.xlu0 %v1528_v46, %s4692_s28  ;;  %v1301_v46 = vor.u32 %v1300_v18, %v1296_v16  ;;  %v2735_v1 = vld [vmem:[#allocation2 + $0x3c] sm:$0xe]  ;;  %v1533_v16 = vrot.slane %v5345_v36, 1  ;;  %v5401_v18 = vcombine.low %v1066_v39, %v5386_v52  ;;  %v2925_v60 = vshrl.u32 %v5368_v22, 16  ;;  %v5406_v55 = vpop.permute.xlu1 %2052 }
  0xc2   : > { %v1293_v10 = vrot.slane %v1291_v23, 1  ;;  %v2929_v41 = vrot.slane %v2927_v56, 1  ;;  %v2932_v27 = vshll.u32 %v5382_v0, 16  ;;  %v5409_v59 = vcombine.low %v1064_v13, %v5395_v12  ;;  %v2736_v23 = vld [vmem:[#allocation2 + $0x48] sm:$0xe] }
  0xc3   : > { %6328 = vst [vmem:[#allocation8_spill] sm:$0xff] %v5401_v18  ;;  %v1306_v19 = vsel %vm1246_vm10, %v1301_v46, %v1305_v50  ;;  %v1530_v36 = vrot.slane %v5351_v42, 1  ;;  %v2920_v5 = vshll.u32 %v5393_v63, 16  ;;  %v2913_v50 = vshrl.u32 %v5379_v35, 16  ;;  %v2696_v35 = vld [vmem:[#allocation2 + $0x60] sm:$0xf] }
  0xc4   : > { %1570 = vrot.lane.b32.xlu1 %v1525_v57, %s4692_s28  ;;  %v5388_v57 = vpop.permute.xlu0 %2180  ;;  %6329 = vst [vmem:[#allocation9_spill] sm:$0xff] %v5409_v59  ;;  %v1294_v46 = vsel %vm1246_vm10, %v1289_v40, %v1293_v10  ;;  %v2917_v56 = vrot.slane %v2915_v21, 1  ;;  %v5420_v39 = vld [vmem:[#allocation2 + $0x50] ss:$0 sps:$4 sm:$0x11]   ;;  %v1322_v13 = vshll.u32 %v5401_v18, 16 }
  0xc5   : > { %3072 = vrot.lane.b32.xlu0 %v2911_v14, %s4693_s29  ;;  %v1532_v14 = vrot.slane %v4028_v44, 1  ;;  %v4159_v44 = vcombine.low %v2735_v1, %v5363_v4  ;;  %v2934_v22 = vrot.slane %v2932_v27, 1  ;;  %v4160_v4 = vcombine.low %v2736_v23, %v5356_v6  ;;  %v2694_v40 = vld [vmem:[#allocation2 + $0x54] sm:$0xf]  ;;  %v1108_v10 = vld [vmem:[#allocation2 + $0x48] sm:$0xe] }
  0xc6   : > { %v1310_v1 = vshll.u32 %v5409_v59, 16  ;;  %v5428_v21 = vld [vmem:[#allocation2 + $0x64] sm:$0xf]  ;;  %v2922_v28 = vrot.slane %v2920_v5, 1  ;;  %v3158_v31 = vrot.slane %v5393_v63, 1  ;;  %v1320_v6 = vshrl.u32 %v5401_v18, 16 }
  0xc7   : > { %v1534_v42 = vsel %vm1519_vm9, %v1532_v14, %v1533_v16  ;;  %v3157_v17 = vrot.slane %v4159_v44, 1  ;;  %v5433_v14 = vld [vmem:[#allocation2 + $0x58] sm:$0xf]  ;;  %v2055_v16 = vpop.permute.xlu1 %2054  ;;  %v1327_v27 = vshll.u32 %v5420_v39, 16  ;;  %v1308_v5 = vshrl.u32 %v5409_v59, 16 }
  0xc8   : > { %3070 = vrot.lane.b32.xlu1 %v2899_v25, %s4693_s29  ;;  %v1529_v25 = vrot.slane %v4027_v62, 1  ;;  %v2930_v62 = vor.u32 %v2929_v41, %v2925_v60  ;;  %v2918_v60 = vor.u32 %v2917_v56, %v2913_v50  ;;  %v1324_v41 = vrot.slane %v1322_v13, 1  ;;  %v1107_v56 = vld [vmem:[#allocation2 + $0x3c] sm:$0xe]  ;;  %v1070_v59 = vld [vmem:[#allocation2 + $0x60] sm:$0xf] }
  0xc9   : > { %3200 = vrot.lane.b32.xlu0 %v3156_v43, %s4692_s28  ;;  %v5415_v43 = vpop.permute.xlu0 %2200  ;;  %v1312_v44 = vrot.slane %v1310_v1, 1  ;;  %v5449_v13 = vcombine.low %v2694_v40, %v5433_v14  ;;  %v3159_v1 = vsel %vm1519_vm9, %v3157_v17, %v3158_v31  ;;  %v5474_v17 = vld [vmem:[#allocation2 + $0x58] sm:$0xf]  ;;  %vm2317_vm12 = vcmask 1045504  }
  0xca   : > { %v2935_v23 = vsel %vm1246_vm10, %v2930_v62, %v2934_v22  ;;  %v4030_v22 = vcombine.low %v1108_v10, %v5386_v52  ;;  %v1329_v62 = vrot.slane %v1327_v27, 1  ;;  %v1068_v52 = vld [vmem:[#allocation2 + $0x54] sm:$0xf]  ;;  %v5470_v27 = vld [vmem:[#allocation2 + $0x64] sm:$0xf]  ;;  %vm1633_vm13 = vcmask 64512  }
  0xcb   : > { %6331 = vst [vmem:[#allocation11_spill] sm:$0xff] %v5449_v13  ;;  %v2939_v31 = vshll.u32 %v5449_v13, 16  ;;  %vm2284_vm14 = vcmask 97280   ;;  %vm3858_vm15 = vcmask 1040384   ;;  %vm3860_vm0 = vcmask 25600  }
  0xcc   : > { %3198 = vrot.lane.b32.xlu1 %v3153_v2, %s4692_s28  ;;  %v5423_v2 = vld [vmem:[#allocation2 + $0x44] ss:$0 sps:$4 sm:$0x11]  }
  0xcd   : > { %1447 = vrot.lane.b32.xlu0 %v1306_v19, %s4693_s29  ;;  %v1531_v19 = vsel %vm1519_vm9, %v1529_v25, %v1530_v36  ;;  %v3161_v25 = vrot.slane %v5382_v0, 1  ;;  %v5441_v36 = vcombine.low %v2696_v35, %v5428_v21  ;;  %v5443_v63 = vpop.permute.xlu0 %2202  ;;  %v1315_v50 = vshll.u32 %v5423_v2, 16  ;;  %v4635_v35 = vld [vmem:[%s6301_s3 + $0x8] sm:$0x3f]   ;;  %v5464_v18 = vpop.permute.xlu1 %2074 }
  0xce   : > { %v2923_v0 = vsel %vm1246_vm10, %v2918_v60, %v2922_v28  ;;  %v1313_v28 = vor.u32 %v1312_v44, %v1308_v5  ;;  %4525 = vmatprep.subr.msk.bf16.mxu0 %vm2317_vm12, %v4635_v35  ;;  %4526 = vmatprep.subr.msk.bf16.mxu1 %vm2317_vm12, %v4635_v35 }
  0xcf   : > { %6330 = vst [vmem:[#allocation10_spill] sm:$0xff] %v5441_v36  ;;  %v2951_v10 = vshll.u32 %v5441_v36, 16  ;;  %v1317_v60 = vrot.slane %v1315_v50, 1  ;;  %v2949_v5 = vshrl.u32 %v5441_v36, 16  ;;  %v5485_v50 = vcombine.low %v1070_v59, %v5470_v27  ;;  %v2737_v36 = vld [vmem:[#allocation2 + $0x54] sm:$0xe] }
  0xd0   : > { %1445 = vrot.lane.b32.xlu1 %v1294_v46, %s4693_s29  ;;  %v3160_v46 = vrot.slane %v4160_v4, 1  ;;  %v5457_v4 = vld [vmem:[#allocation2 + $0x68] ss:$0 sps:$4 sm:$0x11]   ;;  %v2215_v59 = vsel %vm1600_vm11, %v4889_v58, %v2055_v16 }
  0xd1   : > { %1576 = vrot.lane.b32.xlu0 %v1534_v42, %s4692_s28  ;;  %v1325_v42 = vor.u32 %v1324_v41, %v1320_v6  ;;  %v4029_v6 = vcombine.low %v1107_v56, %v5395_v12  ;;  %v2213_v41 = vsel %vm1600_vm11, %v4908_v30, %v5406_v55  ;;  %v2956_v30 = vshll.u32 %v5457_v4, 16  ;;  %v2738_v55 = vld [vmem:[#allocation2 + $0x60] sm:$0xe]  ;;  %6332 = vst [vmem:[#allocation12_spill] sm:$0xff] %v5485_v50 }
  0xd2   : > { %v3162_v40 = vsel %vm1519_vm9, %v3160_v46, %v3161_v25  ;;  %v1539_v46 = vrot.slane %v5420_v39, 1  ;;  %v2953_v44 = vrot.slane %v2951_v10, 1  ;;  %v2245_v39 = vsel %vm1633_vm13, %v2213_v41, %v5388_v57  ;;  %v5493_v56 = vld [vmem:[%s6301_s3] sm:$0x3f]   ;;  %v2700_v10 = vld [vmem:[#allocation2 + $0x78] sm:$0xf] }
  0xd3   : > { %v5477_v25 = vpop.permute.xlu0 %2184  ;;  %v1330_v12 = vsel %vm1246_vm10, %v1325_v42, %v1329_v62  ;;  %4423 = vmatprep.mubr.msk.bf16.mxu0 %vm2284_vm14, %v2245_v39  ;;  %v1318_v57 = vsel %vm1246_vm10, %v1313_v28, %v1317_v60  ;;  %v1535_v42 = vrot.slane %v4029_v6, 1  ;;  %v1536_v62 = vrot.slane %v5423_v2, 1  ;;  %v5516_v2 = vld [vmem:[%s6301_s3 + $0x10] sm:$0x3f]  }
  0xd4   : > { %1574 = vrot.lane.b32.xlu1 %v1531_v19, %s4692_s28  ;;  %v5460_v19 = vld [vmem:[#allocation2 + $0x5c] ss:$0 sps:$4 sm:$0x11]   ;;  %v2937_v39 = vshrl.u32 %v5449_v13, 16  ;;  %v4162_v58 = vcombine.low %v2738_v55, %v5428_v21  ;;  %v2247_v16 = vsel %vm1633_vm13, %v2215_v59, %v5348_v51  ;;  %v2954_v28 = vor.u32 %v2953_v44, %v2949_v5  ;;  %v2698_v44 = vld [vmem:[#allocation2 + $0x6c] sm:$0xf] }
  0xd5   : > { %3076 = vrot.lane.b32.xlu0 %v2935_v23, %s4693_s29  ;;  %v1538_v23 = vrot.slane %v4030_v22, 1  ;;  %v5496_v22 = vcombine.low %v1068_v52, %v5474_v17  ;;  %v5506_v52 = vld [vmem:[#allocation2 + $0x7c] sm:$0xf]  ;;  %v2958_v60 = vrot.slane %v2956_v30, 1  ;;  %v4161_v30 = vcombine.low %v2737_v36, %v5433_v14 }
  0xd6   : > { %v5519_v6 = vld [vmem:[#allocation2 + $0x68] ss:$0 sps:$4 sm:$0x11]   ;;  %v5526_v51 = vld [vmem:[#allocation2 + $0x5c] ss:$0 sps:$4 sm:$0x11]   ;;  %v5542_v13 = vcombine.low %v2700_v10, %v5506_v52 }
  0xd7   : > { %6333 = vst [vmem:[#allocation13_spill] sm:$0xff] %v5496_v22  ;;  %v2057_v41 = vpop.permute.xlu1 %2056  ;;  %v1334_v21 = vshll.u32 %v5496_v22, 16  ;;  %v3166_v59 = vrot.slane %v4162_v58, 1  ;;  %v1351_v36 = vshll.u32 %v5519_v6, 16  ;;  %v3163_v10 = vrot.slane %v4161_v30, 1 }
  0xd8   : > { %3074 = vrot.lane.b32.xlu1 %v2923_v0, %s4693_s29  ;;  %v2319_v0 = vsel %vm2317_vm12, %v4635_v35, 0  ;;  %v2941_v35 = vrot.slane %v2939_v31, 1  ;;  %v1346_v31 = vshll.u32 %v5485_v50, 16  ;;  %v2217_v55 = vsel %vm1600_vm11, %v5012_v45, %v2057_v41  ;;  %v1109_v58 = vld [vmem:[#allocation2 + $0x54] sm:$0xe] }
  0xd9   : > { %3204 = vrot.lane.b32.xlu0 %v3162_v40, %s4692_s28  ;;  %v2944_v40 = vshll.u32 %v5460_v19, 16  ;;  %4422 = vmatpush3.bf16.msra.mxu0 %v2319_v0  ;;  %v1339_v41 = vshll.u32 %v5526_v51, 16 }
  0xda   : > { %4524 = vmatpush3.bf16.msra.mxu1 %v2319_v0  ;;  %4528 = vmatprep.subr.msk.bf16.mxu0 %vm2317_vm12, %v5516_v2  ;;  %v2942_v5 = vor.u32 %v2941_v35, %v2937_v39  ;;  %v5538_v0 = vld [vmem:[#allocation2 + $0x70] sm:$0xf]  ;;  %v1348_v14 = vrot.slane %v1346_v31, 1  ;;  %v1110_v39 = vld [vmem:[#allocation2 + $0x60] sm:$0xe]  ;;  %v3164_v35 = vrot.slane %v5460_v19, 1 }
  0xdb   : > { %4527 = vmatprep.subr.msk.bf16.mxu1 %vm2317_vm12, %v5493_v56  ;;  %v5561_v31 = vld [vmem:[#allocation2 + $0x80] ss:$0 sps:$4 sm:$0x11]   ;;  %v5566_v19 = vld [vmem:[#allocation2 + $0x74] ss:$0 sps:$4 sm:$0x11]  }
  0xdc   : > { %3202 = vrot.lane.b32.xlu1 %v3159_v1, %s4692_s28  ;;  %v1540_v1 = vsel %vm1519_vm9, %v1538_v23, %v1539_v46  ;;  %4424 = vmatmul.mubr.msk.bf16.vlgmr.msra.gmra.mxu0 %vm2284_vm14, %v2247_v16  ;;  %v1537_v23 = vsel %vm1519_vm9, %v1535_v42, %v1536_v62  ;;  %v2946_v46 = vrot.slane %v2944_v40, 1  ;;  %v3167_v16 = vrot.slane %v5457_v4, 1  ;;  %v2059_v45 = vpop.permute.xlu1 %2058 }
  0xdd   : > { %1451 = vrot.lane.b32.xlu0 %v1330_v12, %s4693_s29  ;;  %v5522_v12 = vpop.permute.xlu0 %2204  ;;  %v1344_v42 = vshrl.u32 %v5485_v50, 16  ;;  %v1332_v62 = vshrl.u32 %v5496_v22, 16  ;;  %v1336_v40 = vrot.slane %v1334_v21, 1  ;;  %v2249_v4 = vsel %vm1633_vm13, %v2217_v55, %v5477_v25 }
  0xde   : > { %4427 = vmatprep.mubr.msk.bf16.mxu0 %vm2284_vm14, %v2249_v4  ;;  %v2975_v25 = vshll.u32 %v5542_v13, 16  ;;  %v2219_v21 = vsel %vm1600_vm11, %v4947_v48, %v2059_v45  ;;  %v1353_v55 = vrot.slane %v1351_v36, 1  ;;  %v1341_v22 = vrot.slane %v1339_v41, 1  ;;  %v1072_v45 = vld [vmem:[#allocation2 + $0x6c] sm:$0xf] }
  0xdf   : > { %v1349_v30 = vor.u32 %v1348_v14, %v1344_v42  ;;  %v1337_v4 = vor.u32 %v1336_v40, %v1332_v62  ;;  %v3165_v50 = vsel %vm1519_vm9, %v3163_v10, %v3164_v35  ;;  %v5580_v42 = vld [vmem:[#allocation2 + $0x70] sm:$0xf]  ;;  %v2980_v36 = vshll.u32 %v5561_v31, 16  ;;  %v2740_v41 = vld [vmem:[#allocation2 + $0x78] sm:$0xe] }
  0xe0   : > { %1449 = vrot.lane.b32.xlu1 %v1318_v57, %s4693_s29  ;;  %v2959_v57 = vsel %vm1246_vm10, %v2954_v28, %v2958_v60  ;;  %v2947_v60 = vsel %vm1246_vm10, %v2942_v5, %v2946_v46  ;;  %v4031_v46 = vcombine.low %v1109_v58, %v5474_v17  ;;  %v1074_v5 = vld [vmem:[#allocation2 + $0x78] sm:$0xf]  ;;  %v2973_v17 = vshrl.u32 %v5542_v13, 16 }
  0xe1   : > { %1580 = vrot.lane.b32.xlu0 %v1540_v1, %s4692_s28  ;;  %v5554_v1 = vcombine.low %v2698_v44, %v5538_v0  ;;  %v4032_v44 = vcombine.low %v1110_v39, %v5470_v27  ;;  %v2251_v27 = vsel %vm1633_vm13, %v2219_v21, %v5374_v24  ;;  %v2977_v14 = vrot.slane %v2975_v25, 1  ;;  %v2739_v21 = vld [vmem:[#allocation2 + $0x6c] sm:$0xe] }
  0xe2   : > { %v1342_v10 = vsel %vm1246_vm10, %v1337_v4, %v1341_v22  ;;  %v1541_v35 = vrot.slane %v4031_v46, 1  ;;  %v1542_v58 = vrot.slane %v5526_v51, 1  ;;  %v2968_v25 = vshll.u32 %v5566_v19, 16 }
  0xe3   : > { %v2963_v48 = vshll.u32 %v5554_v1, 16  ;;  %v1544_v40 = vrot.slane %v4032_v44, 1  ;;  %v2982_v22 = vrot.slane %v2980_v36, 1  ;;  %v4164_v51 = vcombine.low %v2740_v41, %v5506_v52  ;;  %v5608_v44 = vld [vmem:[#allocation2 + $0x74] ss:$0 sps:$4 sm:$0x11]  }
  0xe4   : > { %1578 = vrot.lane.b32.xlu1 %v1537_v23, %s4692_s28  ;;  %v5556_v28 = vpop.permute.xlu0 %2206  ;;  %v3168_v23 = vsel %vm1519_vm9, %v3166_v59, %v3167_v16  ;;  %v1545_v59 = vrot.slane %v5519_v6, 1  ;;  %4428 = vmatmul.mubr.msk.bf16.gmra.mxu0 %vm2284_vm14, %v2251_v27  ;;  %v1354_v6 = vsel %vm1246_vm10, %v1349_v30, %v1353_v55  ;;  %v5604_v55 = vld [vmem:[#allocation2 + $0x80] ss:$0 sps:$4 sm:$0x11]   ;;  %v2704_v52 = vld [vmem:[#allocation2 + $0x90] sm:$0xf] }
  0xe5   : > { %3080 = vrot.lane.b32.xlu0 %v2959_v57, %s4693_s29  ;;  %v5571_v57 = vld [vmem:[#allocation2 + $0x7c] sm:$0xf]  ;;  %v2970_v27 = vrot.slane %v2968_v25, 1  ;;  %v2702_v36 = vld [vmem:[#allocation2 + $0x84] sm:$0xf]  ;;  %v2235_v25 = vsel %vm1600_vm11, %v4984_v61, %v5464_v18 }
  0xe6   : > { %v5589_v24 = vcombine.low %v1074_v5, %v5571_v57  ;;  %v1546_v4 = vsel %vm1519_vm9, %v1544_v40, %v1545_v59  ;;  %v5650_v18 = vld [vmem:[#allocation2 + $0x98] ss:$0 sps:$4 sm:$0x11]  }
  0xe8   : > { %3078 = vrot.lane.b32.xlu1 %v2947_v60, %s4693_s29  ;;  %v2069_v16 = vpop.permute.xlu0 %2068  ;;  %v2965_v60 = vrot.slane %v2963_v48, 1  ;;  %v1370_v46 = vshll.u32 %v5589_v24, 16  ;;  %v1543_v48 = vsel %vm1519_vm9, %v1541_v35, %v1542_v58  ;;  %v1368_v41 = vshrl.u32 %v5589_v24, 16 }
  0xe9   : > { %3208 = vrot.lane.b32.xlu0 %v3168_v23, %s4692_s28  ;;  %v2229_v62 = vsel %vm1600_vm11, %v4884_v53, %v2069_v16  ;;  %v2961_v53 = vshrl.u32 %v5554_v1, 16  ;;  %v5600_v23 = vcombine.low %v1072_v45, %v5580_v42  ;;  %v4163_v45 = vcombine.low %v2739_v21, %v5538_v0  ;;  %v5617_v16 = vld [vmem:[#allocation2 + $0x94] sm:$0xf]  ;;  %v5624_v0 = vld [vmem:[#allocation2 + $0x88] sm:$0xf] }
  0xea   : > { %v2261_v39 = vsel %vm1633_vm13, %v2229_v62, %v5319_v32  ;;  %v2978_v32 = vor.u32 %v2977_v14, %v2973_v17  ;;  %v3173_v17 = vrot.slane %v5561_v31, 1  ;;  %v3172_v62 = vrot.slane %v4164_v51, 1 }
  0xeb   : > { %4439 = vmatprep.mubr.msk.bf16.mxu1 %vm2284_vm14, %v2261_v39  ;;  %v1358_v59 = vshll.u32 %v5600_v23, 16  ;;  %v1372_v39 = vrot.slane %v1370_v46, 1  ;;  %v5631_v31 = vcombine.low %v2704_v52, %v5617_v16  ;;  %v3169_v58 = vrot.slane %v4163_v45, 1  ;;  %v1078_v45 = vld [vmem:[#allocation2 + $0x90] sm:$0xf] }
  0xec   : > { %3206 = vrot.lane.b32.xlu1 %v3165_v50, %s4692_s28  ;;  %v2071_v30 = vpop.permute.xlu0 %2070  ;;  %v1356_v21 = vshrl.u32 %v5600_v23, 16  ;;  %v5659_v52 = vld [vmem:[#allocation2 + $0x94] sm:$0xf] }
  0xed   : > { %1455 = vrot.lane.b32.xlu0 %v1354_v6, %s4693_s29  ;;  %v2231_v50 = vsel %vm1600_vm11, %v4867_v29, %v2071_v30  ;;  %v2966_v29 = vor.u32 %v2965_v60, %v2961_v53  ;;  %v1375_v6 = vshll.u32 %v5604_v55, 16  ;;  %v3170_v53 = vrot.slane %v5566_v19, 1 }
  0xee   : > { %v2263_v5 = vsel %vm1633_vm13, %v2231_v50, %v5358_v37  ;;  %v2983_v37 = vsel %vm1246_vm10, %v2978_v32, %v2982_v22  ;;  %v1363_v60 = vshll.u32 %v5608_v44, 16  ;;  %v1360_v30 = vrot.slane %v1358_v59, 1  ;;  %v1111_v32 = vld [vmem:[#allocation2 + $0x6c] sm:$0xe] }
  0xef   : > { %4440 = vmatmul.mubr.msk.bf16.vlgmr.msra.gmra.mxu1 %vm2284_vm14, %v2263_v5  ;;  %v3174_v22 = vsel %vm1519_vm9, %v3172_v62, %v3173_v17  ;;  %v1377_v51 = vrot.slane %v1375_v6, 1  ;;  %v2999_v46 = vshll.u32 %v5631_v31, 16  ;;  %v2267_v5 = vsel %vm1633_vm13, %v2235_v25, %v5443_v63  ;;  %v2741_v25 = vld [vmem:[#allocation2 + $0x84] sm:$0xe] }
  0xf0   : > { %1453 = vrot.lane.b32.xlu1 %v1342_v10, %s4693_s29  ;;  %v2073_v14 = vpop.permute.xlu0 %2072  ;;  %v1112_v10 = vld [vmem:[#allocation2 + $0x78] sm:$0xe]  ;;  %v1361_v59 = vor.u32 %v1360_v30, %v1356_v21  ;;  %v1365_v17 = vrot.slane %v1363_v60, 1  ;;  %v5675_v62 = vcombine.low %v1078_v45, %v5659_v52  ;;  %v2708_v45 = vld [vmem:[#allocation2 + $0xa8] sm:$0xf] }
  0xf1   : > { %1584 = vrot.lane.b32.xlu0 %v1546_v4, %s4692_s28  ;;  %v2233_v40 = vsel %vm1600_vm11, %v4958_v8, %v2073_v14  ;;  %v2971_v8 = vsel %vm1246_vm10, %v2966_v29, %v2970_v27  ;;  %v4034_v61 = vcombine.low %v1112_v10, %v5571_v57  ;;  %v1373_v4 = vor.u32 %v1372_v39, %v1368_v41  ;;  %v5662_v57 = vld [vmem:[#allocation2 + $0x8c] ss:$0 sps:$4 sm:$0x11]   ;;  %v2079_v27 = vpop.permute.xlu1 %2078  ;;  %v1076_v14 = vld [vmem:[#allocation2 + $0x84] sm:$0xf] }
  0xf2   : > { %v2265_v35 = vsel %vm1633_vm13, %v2233_v40, %v5415_v43  ;;  %v5645_v43 = vcombine.low %v2702_v36, %v5624_v0  ;;  %v4033_v29 = vcombine.low %v1111_v32, %v5580_v42  ;;  %v3004_v36 = vshll.u32 %v5650_v18, 16 }
  0xf3   : > { %4443 = vmatprep.mubr.msk.bf16.mxu1 %vm2284_vm14, %v2265_v35  ;;  %v1550_v42 = vrot.slane %v4034_v61, 1  ;;  %v1378_v6 = vsel %vm1246_vm10, %v1373_v4, %v1377_v51  ;;  %v2997_v40 = vshrl.u32 %v5631_v31, 16  ;;  %v3001_v41 = vrot.slane %v2999_v46, 1  ;;  %v5694_v51 = vld [vmem:[#allocation2 + $0x8c] ss:$0 sps:$4 sm:$0x11]  }
  0xf4   : > { %1582 = vrot.lane.b32.xlu1 %v1543_v48, %s4692_s28  ;;  %v2077_v19 = vpop.permute.xlu0 %2076  ;;  %v2987_v63 = vshll.u32 %v5645_v43, 16  ;;  %v1547_v39 = vrot.slane %v4033_v29, 1  ;;  %v1548_v10 = vrot.slane %v5608_v44, 1  ;;  %v2239_v35 = vsel %vm1600_vm11, %v5080_v34, %v2079_v27  ;;  %v5704_v29 = vld [vmem:[#allocation2 + $0xac] sm:$0xf] }
  0xf5   : > { %3084 = vrot.lane.b32.xlu0 %v2983_v37, %s4693_s29  ;;  %v2237_v50 = vsel %vm1600_vm11, %v5044_v47, %v2077_v19  ;;  %v3171_v47 = vsel %vm1519_vm9, %v3169_v58, %v3170_v53  ;;  %v1551_v37 = vrot.slane %v5604_v55, 1  ;;  %v2742_v58 = vld [vmem:[#allocation2 + $0x90] sm:$0xe]  ;;  %v2985_v55 = vshrl.u32 %v5645_v43, 16 }
  0xf6   : > { %v2269_v48 = vsel %vm1633_vm13, %v2237_v50, %v5522_v12  ;;  %v5670_v12 = vld [vmem:[#allocation2 + $0x88] sm:$0xf]  ;;  %v2989_v53 = vrot.slane %v2987_v63, 1  ;;  %v2992_v60 = vshll.u32 %v5662_v57, 16  ;;  %v1366_v30 = vsel %vm1246_vm10, %v1361_v59, %v1365_v17  ;;  %v2706_v59 = vld [vmem:[#allocation2 + $0x9c] sm:$0xf] }
  0xf7   : > { %4444 = vmatmul.mubr.msk.bf16.gmra.mxu1 %vm2284_vm14, %v2267_v5  ;;  %v1552_v44 = vsel %vm1519_vm9, %v1550_v42, %v1551_v37  ;;  %v3006_v32 = vrot.slane %v3004_v36, 1  ;;  %v5691_v19 = vld [vmem:[#allocation2 + $0x98] ss:$0 sps:$4 sm:$0x11]   ;;  %v3002_v50 = vor.u32 %v3001_v41, %v2997_v40  ;;  %v4166_v4 = vcombine.low %v2742_v58, %v5617_v16  ;;  %v5711_v16 = vld [vmem:[#allocation2 + $0xa0] sm:$0xf] }
  0xf8   : > { %3082 = vrot.lane.b32.xlu1 %v2971_v8, %s4693_s29  ;;  %4447 = vmatprep.mubr.msk.bf16.mxu1 %vm2284_vm14, %v2269_v48  ;;  %v5686_v8 = vcombine.low %v1076_v14, %v5670_v12  ;;  %v2271_v46 = vsel %vm1633_vm13, %v2239_v35, %v5556_v28  ;;  %v4165_v5 = vcombine.low %v2741_v25, %v5624_v0  ;;  %v1392_v0 = vshrl.u32 %v5675_v62, 16  ;;  %v1114_v36 = vld [vmem:[#allocation2 + $0x90] sm:$0xe] }
  0xf9   : > { %3212 = vrot.lane.b32.xlu0 %v3174_v22, %s4692_s28  ;;  %v1394_v22 = vshll.u32 %v5675_v62, 16  ;;  %v2990_v27 = vor.u32 %v2989_v53, %v2985_v55  ;;  %v1549_v28 = vsel %vm1519_vm9, %v1547_v39, %v1548_v10  ;;  %v1399_v63 = vshll.u32 %v5691_v19, 16  ;;  %v1113_v55 = vld [vmem:[#allocation2 + $0x84] sm:$0xe] }
  0xfa   : > { %v2189_v21 = vpop.permute.xlu0 %2188  ;;  %v3007_v14 = vsel %vm1246_vm10, %v3002_v50, %v3006_v32  ;;  %v3178_v42 = vrot.slane %v4166_v4, 1  ;;  %v3179_v37 = vrot.slane %v5650_v18, 1  ;;  %v3175_v40 = vrot.slane %v4165_v5, 1 }
  0xfb   : > { %v1396_v17 = vrot.slane %v1394_v22, 1  ;;  %v3176_v41 = vrot.slane %v5662_v57, 1  ;;  %v1387_v39 = vshll.u32 %v5694_v51, 16  ;;  %v1380_v35 = vshrl.u32 %v5686_v8, 16  ;;  %v1082_v22 = vld [vmem:[#allocation2 + $0xa8] sm:$0xf] }
  0xfc   : > { %3210 = vrot.lane.b32.xlu1 %v3171_v47, %s4692_s28  ;;  %v2994_v47 = vrot.slane %v2992_v60, 1  ;;  %v5726_v53 = vcombine.low %v2706_v59, %v5711_v16  ;;  %v1401_v60 = vrot.slane %v1399_v63, 1  ;;  %v4036_v25 = vcombine.low %v1114_v36, %v5659_v52  ;;  %v5730_v57 = vld [vmem:[#allocation2 + $0xb0] ss:$0 sps:$4 sm:$0x11]  }
  0xfd   : > { %1459 = vrot.lane.b32.xlu0 %v1378_v6, %s4693_s29  ;;  %v2061_v34 = vpop.permute.xlu1 %2060  ;;  %v5718_v6 = vcombine.low %v2708_v45, %v5704_v29  ;;  %v1397_v18 = vor.u32 %v1396_v17, %v1392_v0  ;;  %v4035_v32 = vcombine.low %v1113_v55, %v5670_v12  ;;  %v3177_v52 = vsel %vm1519_vm9, %v3175_v40, %v3176_v41  ;;  %v5750_v59 = vld [vmem:[#allocation2 + $0xa0] sm:$0xf]  ;;  %v2744_v17 = vld [vmem:[#allocation2 + $0xa8] sm:$0xe] }
  0xfe   : > { %v2221_v61 = vsel %vm1600_vm11, %v5151_v26, %v2061_v34  ;;  %v1382_v26 = vshll.u32 %v5686_v8, 16  ;;  %v2995_v10 = vsel %vm1246_vm10, %v2990_v27, %v2994_v47  ;;  %v1389_v4 = vrot.slane %v1387_v39, 1  ;;  %v2743_v39 = vld [vmem:[#allocation2 + $0x9c] sm:$0xe] }
  0xff   : > { %v2253_v48 = vsel %vm1633_vm13, %v2221_v61, %v2189_v21  ;;  %4448 = vmatmul.mubr.msk.bf16.gmra.mxu1 %vm2284_vm14, %v2271_v46  ;;  %v2520_v21 = vsel %vm2317_vm12, %v5493_v56, 0  ;;  %v3023_v34 = vshll.u32 %v5718_v6, 16  ;;  %v5737_v61 = vld [vmem:[#allocation2 + $0xac] sm:$0xf]  ;;  %v3011_v56 = vshll.u32 %v5726_v53, 16 }
 0x100   : > { %1457 = vrot.lane.b32.xlu1 %v1366_v30, %s4693_s29  ;;  %4431 = vmatprep.mubr.msk.bf16.mxu0 %vm2284_vm14, %v2253_v48  ;;  %v1384_v58 = vrot.slane %v1382_v26, 1  ;;  %v5741_v46 = vld [vmem:[#allocation2 + $0xa4] ss:$0 sps:$4 sm:$0x11]   ;;  %v1402_v5 = vsel %vm1246_vm10, %v1397_v18, %v1401_v60  ;;  %v1080_v48 = vld [vmem:[#allocation2 + $0x9c] sm:$0xf]  ;;  %v5754_v63 = vcombine.low %v1082_v22, %v5737_v61  ;;  %v4167_v22 = vcombine.low %v2743_v39, %v5711_v16 }
 0x101   : > { %1588 = vrot.lane.b32.xlu0 %v1552_v44, %s4692_s28  ;;  %v3180_v44 = vsel %vm1519_vm9, %v3178_v42, %v3179_v37  ;;  %4456 = vmatpush3.bf16.msra.mxu1 %v2520_v21  ;;  %v1556_v45 = vrot.slane %v4036_v25, 1  ;;  %v1557_v12 = vrot.slane %v5691_v19, 1  ;;  %v3028_v27 = vshll.u32 %v5730_v57, 16 }
 0x102   : > { %v1385_v50 = vor.u32 %v1384_v58, %v1380_v35  ;;  %v3025_v0 = vrot.slane %v3023_v34, 1  ;;  %v1554_v42 = vrot.slane %v5694_v51, 1  ;;  %v3013_v36 = vrot.slane %v3011_v56, 1  ;;  %v5768_v35 = vld [vmem:[#allocation2 + $0xb0] ss:$0 sps:$4 sm:$0x11]  }
 0x103   : > { %v3016_v40 = vshll.u32 %v5741_v46, 16  ;;  %v4168_v51 = vcombine.low %v2744_v17, %v5704_v29  ;;  %v3333_v58 = vsel %vm2317_vm12, %v5516_v2, 0  ;;  %v1558_v55 = vsel %vm1519_vm9, %v1556_v45, %v1557_v12  ;;  %v2712_v34 = vld [vmem:[#allocation2 + $0xc0] sm:$0xf]  ;;  %v5777_v29 = vld [vmem:[#allocation2 + $0xc4] sm:$0xf] }
 0x104   : > { %1586 = vrot.lane.b32.xlu1 %v1549_v28, %s4692_s28  ;;  %v3021_v28 = vshrl.u32 %v5718_v6, 16  ;;  %v1390_v41 = vsel %vm1246_vm10, %v1385_v50, %v1389_v4  ;;  %v3030_v60 = vrot.slane %v3028_v27, 1  ;;  %v1418_v25 = vshll.u32 %v5754_v63, 16  ;;  %4490 = vmatpush3.bf16.msra.mxu0 %v3333_v58  ;;  %v5790_v12 = vld [vmem:[#allocation2 + $0xb8] sm:$0xf] }
 0x105   : > { %3088 = vrot.lane.b32.xlu0 %v3007_v14, %s4693_s29  ;;  %v1553_v14 = vrot.slane %v4035_v32, 1  ;;  %v3018_v2 = vrot.slane %v3016_v40, 1  ;;  %v3184_v56 = vrot.slane %v4168_v51, 1  ;;  %v1416_v16 = vshrl.u32 %v5754_v63, 16 }
 0x106   : > { %v2063_v30 = vpop.permute.xlu1 %2062  ;;  %v3026_v18 = vor.u32 %v3025_v0, %v3021_v28  ;;  %v1420_v27 = vrot.slane %v1418_v25, 1  ;;  %v3182_v28 = vrot.slane %v5741_v46, 1  ;;  %v5809_v58 = vld [vmem:[#allocation2 + $0xc8] ss:$0 sps:$4 sm:$0x11]  }
 0x107   : > { %v2223_v47 = vsel %vm1600_vm11, %v5181_v54, %v2063_v30  ;;  %v3009_v54 = vshrl.u32 %v5726_v53, 16  ;;  %v1555_v21 = vsel %vm1519_vm9, %v1553_v14, %v1554_v42 }
 0x108   : > { %3086 = vrot.lane.b32.xlu1 %v2995_v10, %s4693_s29  ;;  %v5765_v10 = vcombine.low %v1080_v48, %v5750_v59  ;;  %v1423_v48 = vshll.u32 %v5768_v35, 16  ;;  %v3031_v45 = vsel %vm1246_vm10, %v3026_v18, %v3030_v60  ;;  %v1421_v39 = vor.u32 %v1420_v27, %v1416_v16 }
 0x109   : > { %3216 = vrot.lane.b32.xlu0 %v3180_v44, %s4692_s28  ;;  %v3014_v32 = vor.u32 %v3013_v36, %v3009_v54  ;;  %v1115_v54 = vld [vmem:[#allocation2 + $0x9c] sm:$0xe] }
 0x10a   : > { %v2191_v26 = vpop.permute.xlu1 %2190  ;;  %v1406_v4 = vshll.u32 %v5765_v10, 16  ;;  %v1404_v17 = vshrl.u32 %v5765_v10, 16  ;;  %v1425_v51 = vrot.slane %v1423_v48, 1 }
 0x10b   : > { %v2255_v19 = vsel %vm1633_vm13, %v2223_v47, %v2191_v26  ;;  %v1116_v47 = vld [vmem:[#allocation2 + $0xa8] sm:$0xe]  ;;  %v5794_v26 = vcombine.low %v2712_v34, %v5777_v29  ;;  %v3019_v0 = vsel %vm1246_vm10, %v3014_v32, %v3018_v2  ;;  %v5821_v34 = vld [vmem:[#allocation2 + $0xb8] sm:$0xf]  ;;  %v1563_v2 = vrot.slane %v5768_v35, 1 }
 0x10c   : > { %v2081_v37 = vpop.permute.xlu0 %2080  ;;  %3214 = vrot.lane.b32.xlu1 %v3177_v52, %s4692_s28  ;;  %4432 = vmatmul.mubr.msk.bf16.gmra.mxu0 %vm2284_vm14, %v2255_v19  ;;  %v5781_v52 = vld [vmem:[#allocation2 + $0xa4] ss:$0 sps:$4 sm:$0x11]   ;;  %v1408_v19 = vrot.slane %v1406_v4, 1  ;;  %v4038_v40 = vcombine.low %v1116_v47, %v5737_v61  ;;  %v3052_v4 = vshll.u32 %v5809_v58, 16 }
 0x10d   : > { %1463 = vrot.lane.b32.xlu0 %v1402_v5, %s4693_s29  ;;  %v2241_v30 = vsel %vm1600_vm11, %v5189_v20, %v2081_v37  ;;  %v2710_v20 = vld [vmem:[#allocation2 + $0xb4] sm:$0xf]  ;;  %v3185_v5 = vrot.slane %v5730_v57, 1  ;;  %v3181_v57 = vrot.slane %v4167_v22, 1  ;;  %v1411_v14 = vshll.u32 %v5781_v52, 16 }
 0x10e   : > { %v5803_v36 = vcombine.low %v2710_v20, %v5790_v12  ;;  %v1409_v61 = vor.u32 %v1408_v19, %v1404_v17  ;;  %v1562_v32 = vrot.slane %v4038_v40, 1  ;;  %v1426_v22 = vsel %vm1246_vm10, %v1421_v39, %v1425_v51 }
 0x10f   : > { %v3186_v46 = vsel %vm1519_vm9, %v3184_v56, %v3185_v5  ;;  %v3183_v60 = vsel %vm1519_vm9, %v3181_v57, %v3182_v28  ;;  %v1413_v25 = vrot.slane %v1411_v14, 1  ;;  %v2746_v56 = vld [vmem:[#allocation2 + $0xc0] sm:$0xe]  ;;  %v1560_v48 = vrot.slane %v5781_v52, 1 }
 0x110   : > { %v2209_v44 = vpop.permute.xlu0 %2208  ;;  %1461 = vrot.lane.b32.xlu1 %v1390_v41, %s4693_s29  ;;  %v3033_v35 = vshrl.u32 %v5803_v36, 16  ;;  %v1564_v57 = vsel %vm1519_vm9, %v1562_v32, %v1563_v2  ;;  %v3054_v14 = vrot.slane %v3052_v4, 1  ;;  %v4170_v52 = vcombine.low %v2746_v56, %v5777_v29  ;;  %v2714_v29 = vld [vmem:[#allocation2 + $0xcc] sm:$0xf] }
 0x111   : > { %v2273_v50 = vsel %vm1633_vm13, %v2241_v30, %v2209_v44  ;;  %1592 = vrot.lane.b32.xlu0 %v1558_v55, %s4692_s28  ;;  %v3047_v55 = vshll.u32 %v5794_v26, 16  ;;  %v5816_v30 = vld [vmem:[#allocation2 + $0xbc] ss:$0 sps:$4 sm:$0x11]   ;;  %v3035_v44 = vshll.u32 %v5803_v36, 16  ;;  %v1414_v16 = vsel %vm1246_vm10, %v1409_v61, %v1413_v25 }
 0x112   : > { %4451 = vmatprep.mubr.msk.bf16.mxu1 %vm2284_vm14, %v2273_v50  ;;  %v3045_v50 = vshrl.u32 %v5794_v26, 16  ;;  %v3040_v47 = vshll.u32 %v5816_v30, 16 }
 0x113   : > { %v3037_v27 = vrot.slane %v3035_v44, 1 }
 0x114   : > { %1590 = vrot.lane.b32.xlu1 %v1555_v21, %s4692_s28  ;;  %v2211_v42 = vpop.permute.xlu0 %2210  ;;  %v4037_v21 = vcombine.low %v1115_v54, %v5750_v59  ;;  %v3049_v59 = vrot.slane %v3047_v55, 1  ;;  %v4671_v54 = vld [vmem:[#allocation2 + $0xbc] ss:$0 sps:$4 sm:$0x11]   ;;  %v3042_v39 = vrot.slane %v3040_v47, 1 }
 0x115   : > { %3092 = vrot.lane.b32.xlu0 %v3031_v45, %s4693_s29  ;;  %v2715_v55 = vld [vmem:[#allocation2 + $0xd0] sm:$0xf]  ;;  %v1435_v61 = vshll.u32 %v4671_v54, 16 }
 0x116   : > { %v2083_v37 = vpop.permute.xlu1 %2082  ;;  %v1559_v5 = vrot.slane %v4037_v21, 1  ;;  %v3050_v17 = vor.u32 %v3049_v59, %v3045_v50  ;;  %v1117_v50 = vld [vmem:[#allocation2 + $0xb4] sm:$0xe] }
 0x117   : > { %v2243_v41 = vsel %vm1600_vm11, %v5219_v15, %v2083_v37  ;;  %v1084_v15 = vld [vmem:[#allocation2 + $0xb4] sm:$0xf]  ;;  %v4039_v56 = vcombine.low %v1117_v50, %v5821_v34 }
 0x118   : > { %v2275_v18 = vsel %vm1633_vm13, %v2243_v41, %v2211_v42  ;;  %3090 = vrot.lane.b32.xlu1 %v3019_v0, %s4693_s29  ;;  %v5830_v45 = vcombine.low %v1084_v15, %v5821_v34  ;;  %v2745_v0 = vld [vmem:[#allocation2 + $0xb4] sm:$0xe]  ;;  %v1561_v40 = vsel %vm1519_vm9, %v1559_v5, %v1560_v48  ;;  %v3038_v41 = vor.u32 %v3037_v27, %v3033_v35  ;;  %v4678_v48 = vld [vmem:[#allocation2 + $0xd4] ss:$0 sps:$4 sm:$0x11]  }
 0x119   : > { %4452 = vmatmul.mubr.msk.bf16.gmra.mxu1 %vm2284_vm14, %v2275_v18  ;;  %3220 = vrot.lane.b32.xlu0 %v3186_v46, %s4692_s28  ;;  %v4169_v51 = vcombine.low %v2745_v0, %v5790_v12  ;;  %v3190_v18 = vrot.slane %v4170_v52, 1  ;;  %v1565_v47 = vrot.slane %v4039_v56, 1 }
 0x11a   : > { %v1430_v46 = vshll.u32 %v5830_v45, 16  ;;  %v1428_v15 = vshrl.u32 %v5830_v45, 16  ;;  %v3043_v32 = vsel %vm1246_vm10, %v3038_v41, %v3042_v39 }
 0x11b   : > { %v2193_v20 = vpop.permute.xlu0 %2192  ;;  %v3187_v2 = vrot.slane %v4169_v51, 1 }
 0x11c   : > { %3218 = vrot.lane.b32.xlu1 %v3183_v60, %s4692_s28  ;;  %v3191_v60 = vrot.slane %v5809_v58, 1  ;;  %v1432_v12 = vrot.slane %v1430_v46, 1 }
 0x11d   : > { %1467 = vrot.lane.b32.xlu0 %v1426_v22, %s4693_s29  ;;  %v3188_v22 = vrot.slane %v5816_v30, 1 }
 0x11e   : > { %v3192_v58 = vsel %vm1519_vm9, %v3190_v18, %v3191_v60  ;;  %v1433_v4 = vor.u32 %v1432_v12, %v1428_v15 }
 0x11f   : > { %v2065_v28 = vpop.permute.xlu1 %2064  ;;  %v1440_v19 = vpop.permute.xlu0 %1439  ;;  %v3189_v5 = vsel %vm1519_vm9, %v3187_v2, %v3188_v22 }
 0x120   : > { %v2225_v42 = vsel %vm1600_vm11, %v5244_v33, %v2065_v28  ;;  %1465 = vrot.lane.b32.xlu1 %v1414_v16, %s4693_s29  ;;  %v3055_v33 = vsel %vm1246_vm10, %v3050_v17, %v3054_v14  ;;  %v1602_v25 = vsel %vm1600_vm11, %v5232_v38, %v1440_v19  ;;  %v5858_v38 = vcombine.low %v2714_v29, %v2715_v55 }
 0x121   : > { %v2257_v37 = vsel %vm1633_vm13, %v2225_v42, %v2193_v20  ;;  %1596 = vrot.lane.b32.xlu0 %v1564_v57, %s4692_s28  ;;  %v1437_v20 = vrot.slane %v1435_v61, 1  ;;  %v1566_v28 = vrot.slane %v4671_v54, 1  ;;  %v3064_v17 = vshll.u32 %v4678_v48, 16  ;;  %v2747_v42 = vld [vmem:[#allocation2 + $0xcc] sm:$0xe] }
 0x122   : > { %4435 = vmatprep.mubr.msk.bf16.mxu0 %vm2284_vm14, %v2257_v37  ;;  %v3059_v30 = vshll.u32 %v5858_v38, 16  ;;  %v3057_v0 = vshrl.u32 %v5858_v38, 16  ;;  %v4171_v39 = vcombine.low %v2747_v42, %v2715_v55  ;;  %v3194_v29 = vrot.slane %v4678_v48, 1 }
 0x123   : > { %v1569_v21 = vpop.permute.xlu0 %1568  ;;  %v1438_v27 = vsel %vm1246_vm10, %v1433_v4, %v1437_v20  ;;  %v1567_v54 = vsel %vm1519_vm9, %v1565_v47, %v1566_v28  ;;  %v3066_v41 = vrot.slane %v3064_v17, 1  ;;  %v6335_v20 = vld [vmem:[#allocation5_spill] sm:$0xff]  ;;  %v6337_v28 = vld [vmem:[#allocation6_spill] sm:$0xff] }
 0x124   : > { %1594 = vrot.lane.b32.xlu1 %v1561_v40, %s4692_s28  ;;  %v1635_v44 = vsel %vm1633_vm13, %v1602_v25, %v1569_v21  ;;  %v3061_v57 = vrot.slane %v3059_v30, 1 }
 0x125   : > { %3096 = vrot.lane.b32.xlu0 %v3055_v33, %s4693_s29  ;;  %4457 = vmatprep.mubr.msk.bf16.mxu1 %vm2284_vm14, %v1635_v44  ;;  %v3193_v33 = vrot.slane %v4171_v39, 1 }
 0x126   : > { %v3062_v40 = vor.u32 %v3061_v57, %v3057_v0  ;;  %v6338_v57 = vld [vmem:[#allocation7_spill] sm:$0xff] }
 0x127   : > { %v3069_v59 = vpop.permute.xlu0 %3068  ;;  %v3195_v12 = vsel %vm1519_vm9, %v3193_v33, %v3194_v29 }
 0x128   : > { %3094 = vrot.lane.b32.xlu1 %v3043_v32, %s4693_s29  ;;  %v3229_v34 = vsel %vm1600_vm11, %v5241_v11, %v3069_v59  ;;  %v3067_v51 = vsel %vm1246_vm10, %v3062_v40, %v3066_v41  ;;  %v6340_v40 = vld [vmem:[#allocation9_spill] sm:$0xff] }
 0x129   : > { %3224 = vrot.lane.b32.xlu0 %v3192_v58, %s4692_s28 }
 0x12a   : > { %v2067_v16 = vpop.permute.xlu1 %2066 }
 0x12b   : > { %v3197_v35 = vpop.permute.xlu0 %3196  ;;  %v2227_v14 = vsel %vm1600_vm11, %v5284_v7, %v2067_v16 }
 0x12c   : > { %3222 = vrot.lane.b32.xlu1 %v3189_v5, %s4692_s28  ;;  %v3261_v19 = vsel %vm1633_vm13, %v3229_v34, %v3197_v35  ;;  %v6336_v5 = vld [vmem:[#allocation4_spill] sm:$0xff] }
 0x12e   : > { %v2195_v52 = vpop.permute.xlu1 %2194 }
 0x12f   : > { %v2259_v37 = vsel %vm1633_vm13, %v2227_v14, %v2195_v52  ;;  %v1444_v46 = vpop.permute.xlu0 %1443 }
 0x130   : > { %1469 = vrot.lane.b32.xlu1 %v1438_v27, %s4693_s29  ;;  %4436 = vmatmul.mubr.msk.bf16.gmra.mxu0 %vm2284_vm14, %v2259_v37  ;;  %v1606_v18 = vsel %vm1600_vm11, %v5282_v9, %v1444_v46  ;;  %v6334_v9 = vld [vmem:[#allocation3_spill] sm:$0xff]  ;;  %v6339_v46 = vld [vmem:[#allocation8_spill] sm:$0xff] }
 0x131   : > { %4491 = vmatprep.mubr.msk.bf16.mxu0 %vm2284_vm14, %v3261_v19 }
 0x132   : > { %v1442_v11 = vpop.permute.xlu1 %1441 }
 0x133   : > { %v1573_v7 = vpop.permute.xlu0 %1572  ;;  %v1604_v60 = vsel %vm1600_vm11, %v5272_v49, %v1442_v11 }
 0x134   : > { %1598 = vrot.lane.b32.xlu1 %v1567_v54, %s4692_s28  ;;  %v1639_v21 = vsel %vm1633_vm13, %v1606_v18, %v1573_v7  ;;  %v6341_v18 = vld [vmem:[#allocation10_spill] sm:$0xff] }
 0x136   : > { %v1571_v25 = vpop.permute.xlu1 %1570 }
 0x137   : > { %v1637_v55 = vsel %vm1633_vm13, %v1604_v60, %v1571_v25  ;;  %v3073_v15 = vpop.permute.xlu0 %3072  ;;  %v6342_v25 = vld [vmem:[#allocation11_spill] sm:$0xff] }
 0x138   : > { %3098 = vrot.lane.b32.xlu1 %v3067_v51, %s4693_s29  ;;  %4458 = vmatmul.mubr.msk.bf16.vlgmr.msra.gmra.mxu1 %vm2284_vm14, %v1637_v55  ;;  %v3233_v49 = vsel %vm1600_vm11, %v5312_v3, %v3073_v15 }
 0x139   : > { %4461 = vmatprep.mubr.msk.bf16.mxu1 %vm2284_vm14, %v1639_v21 }
 0x13a   : > { %v3071_v61 = vpop.permute.xlu1 %3070 }
 0x13b   : > { %v3201_v44 = vpop.permute.xlu0 %3200  ;;  %v3231_v32 = vsel %vm1600_vm11, %v6334_v9, %v3071_v61  ;;  %v6343_v9 = vld [vmem:[#allocation12_spill] sm:$0xff] }
 0x13c   : > { %3226 = vrot.lane.b32.xlu1 %v3195_v12, %s4692_s28  ;;  %v3265_v22 = vsel %vm1633_vm13, %v3233_v49, %v3201_v44 }
 0x13e   : > { %v3199_v2 = vpop.permute.xlu1 %3198 }
 0x13f   : > { %v3263_v50 = vsel %vm1633_vm13, %v3231_v32, %v3199_v2  ;;  %v1448_v58 = vpop.permute.xlu0 %1447  ;;  %v6344_v2 = vld [vmem:[#allocation13_spill] sm:$0xff] }
 0x140   : > { %4492 = vmatmul.mubr.msk.bf16.vlgmr.msra.gmra.mxu0 %vm2284_vm14, %v3263_v50  ;;  %v1610_v56 = vsel %vm1600_vm11, %v6335_v20, %v1448_v58 }
 0x141   : > { %4495 = vmatprep.mubr.msk.bf16.mxu0 %vm2284_vm14, %v3265_v22 }
 0x142   : > { %v1446_v59 = vpop.permute.xlu1 %1445 }
 0x143   : > { %v1577_v4 = vpop.permute.xlu0 %1576  ;;  %v1608_v3 = vsel %vm1600_vm11, %v6336_v5, %v1446_v59 }
 0x144   : > { %v1643_v30 = vsel %vm1633_vm13, %v1610_v56, %v1577_v4 }
 0x146   : > { %v1575_v48 = vpop.permute.xlu1 %1574 }
 0x147   : > { %v1641_v16 = vsel %vm1633_vm13, %v1608_v3, %v1575_v48  ;;  %v3077_v35 = vpop.permute.xlu0 %3076 }
 0x148   : > { %4462 = vmatmul.mubr.msk.bf16.gmra.mxu1 %vm2284_vm14, %v1641_v16  ;;  %v3237_v0 = vsel %vm1600_vm11, %v6337_v28, %v3077_v35 }
 0x149   : > { %4465 = vmatprep.mubr.msk.bf16.mxu1 %vm2284_vm14, %v1643_v30 }
 0x14a   : > { %v3075_v27 = vpop.permute.xlu1 %3074 }
 0x14b   : > { %v3205_v47 = vpop.permute.xlu0 %3204  ;;  %v3235_v17 = vsel %vm1600_vm11, %v6338_v57, %v3075_v27 }
 0x14c   : > { %v3269_v14 = vsel %vm1633_vm13, %v3237_v0, %v3205_v47 }
 0x14e   : > { %v3203_v34 = vpop.permute.xlu1 %3202 }
 0x14f   : > { %v3267_v52 = vsel %vm1633_vm13, %v3235_v17, %v3203_v34  ;;  %v1452_v42 = vpop.permute.xlu0 %1451 }
 0x150   : > { %4496 = vmatmul.mubr.msk.bf16.gmra.mxu0 %vm2284_vm14, %v3267_v52  ;;  %v1614_v54 = vsel %vm1600_vm11, %v6339_v46, %v1452_v42 }
 0x151   : > { %4499 = vmatprep.mubr.msk.bf16.mxu0 %vm2284_vm14, %v3269_v14 }
 0x152   : > { %v1450_v19 = vpop.permute.xlu1 %1449 }
 0x153   : > { %v1581_v37 = vpop.permute.xlu0 %1580  ;;  %v1612_v41 = vsel %vm1600_vm11, %v6340_v40, %v1450_v19 }
 0x154   : > { %v1647_v11 = vsel %vm1633_vm13, %v1614_v54, %v1581_v37 }
 0x156   : > { %v1579_v39 = vpop.permute.xlu1 %1578 }
 0x157   : > { %v1645_v7 = vsel %vm1633_vm13, %v1612_v41, %v1579_v39  ;;  %v3081_v51 = vpop.permute.xlu0 %3080 }
 0x158   : > { %4466 = vmatmul.mubr.msk.bf16.gmra.mxu1 %vm2284_vm14, %v1645_v7  ;;  %v3241_v60 = vsel %vm1600_vm11, %v6341_v18, %v3081_v51 }
 0x159   : > { %4469 = vmatprep.mubr.msk.bf16.mxu1 %vm2284_vm14, %v1647_v11 }
 0x15a   : > { %v3079_v33 = vpop.permute.xlu1 %3078 }
 0x15b   : > { %v3209_v29 = vpop.permute.xlu0 %3208  ;;  %v3239_v21 = vsel %vm1600_vm11, %v6342_v25, %v3079_v33 }
 0x15c   : > { %v3273_v15 = vsel %vm1633_vm13, %v3241_v60, %v3209_v29 }
 0x15e   : > { %v3207_v55 = vpop.permute.xlu1 %3206 }
 0x15f   : > { %v3271_v12 = vsel %vm1633_vm13, %v3239_v21, %v3207_v55  ;;  %v1456_v61 = vpop.permute.xlu0 %1455 }
 0x160   : > { %4500 = vmatmul.mubr.msk.bf16.gmra.mxu0 %vm2284_vm14, %v3271_v12  ;;  %v1618_v32 = vsel %vm1600_vm11, %v6343_v9, %v1456_v61 }
 0x161   : > { %4503 = vmatprep.mubr.msk.bf16.mxu0 %vm2284_vm14, %v3273_v15 }
 0x162   : > { %v1454_v44 = vpop.permute.xlu1 %1453 }
 0x163   : > { %v1585_v49 = vpop.permute.xlu0 %1584  ;;  %v1616_v22 = vsel %vm1600_vm11, %v6344_v2, %v1454_v44 }
 0x164   : > { %v1651_v58 = vsel %vm1633_vm13, %v1618_v32, %v1585_v49 }
 0x166   : > { %v1583_v50 = vpop.permute.xlu1 %1582 }
 0x167   : > { %v1649_v59 = vsel %vm1633_vm13, %v1616_v22, %v1583_v50  ;;  %v3085_v4 = vpop.permute.xlu0 %3084 }
 0x168   : > { %4470 = vmatmul.mubr.msk.bf16.gmra.mxu1 %vm2284_vm14, %v1649_v59  ;;  %v3245_v5 = vsel %vm1600_vm11, %v5542_v13, %v3085_v4 }
 0x169   : > { %4473 = vmatprep.mubr.msk.bf16.mxu1 %vm2284_vm14, %v1651_v58 }
 0x16a   : > { %v3083_v20 = vpop.permute.xlu1 %3082 }
 0x16b   : > { %v3213_v56 = vpop.permute.xlu0 %3212  ;;  %v3243_v3 = vsel %vm1600_vm11, %v5554_v1, %v3083_v20 }
 0x16c   : > { %v3277_v30 = vsel %vm1633_vm13, %v3245_v5, %v3213_v56 }
 0x16e   : > { %v3211_v48 = vpop.permute.xlu1 %3210 }
 0x16f   : > { %v3275_v16 = vsel %vm1633_vm13, %v3243_v3, %v3211_v48  ;;  %v1460_v35 = vpop.permute.xlu0 %1459 }
 0x170   : > { %4504 = vmatmul.mubr.msk.bf16.gmra.mxu0 %vm2284_vm14, %v3275_v16  ;;  %v1622_v28 = vsel %vm1600_vm11, %v5589_v24, %v1460_v35 }
 0x171   : > { %4507 = vmatprep.mubr.msk.bf16.mxu0 %vm2284_vm14, %v3277_v30 }
 0x172   : > { %v1458_v27 = vpop.permute.xlu1 %1457 }
 0x173   : > { %v1589_v47 = vpop.permute.xlu0 %1588  ;;  %v1620_v13 = vsel %vm1600_vm11, %v5600_v23, %v1458_v27 }
 0x174   : > { %v1655_v1 = vsel %vm1633_vm13, %v1622_v28, %v1589_v47 }
 0x176   : > { %v1587_v0 = vpop.permute.xlu1 %1586 }
 0x177   : > { %v1653_v57 = vsel %vm1633_vm13, %v1620_v13, %v1587_v0  ;;  %v3089_v17 = vpop.permute.xlu0 %3088 }
 0x178   : > { %4474 = vmatmul.mubr.msk.bf16.gmra.mxu1 %vm2284_vm14, %v1653_v57  ;;  %v3249_v52 = vsel %vm1600_vm11, %v5631_v31, %v3089_v17 }
 0x179   : > { %4477 = vmatprep.mubr.msk.bf16.mxu1 %vm2284_vm14, %v1655_v1 }
 0x17a   : > { %v3087_v34 = vpop.permute.xlu1 %3086 }
 0x17b   : > { %v3217_v14 = vpop.permute.xlu0 %3216  ;;  %v3247_v24 = vsel %vm1600_vm11, %v5645_v43, %v3087_v34 }
 0x17c   : > { %v3281_v23 = vsel %vm1633_vm13, %v3249_v52, %v3217_v14 }
 0x17e   : > { %v3215_v42 = vpop.permute.xlu1 %3214 }
 0x17f   : > { %v3279_v19 = vsel %vm1633_vm13, %v3247_v24, %v3215_v42  ;;  %v1464_v37 = vpop.permute.xlu0 %1463 }
 0x180   : > { %4508 = vmatmul.mubr.msk.bf16.gmra.mxu0 %vm2284_vm14, %v3279_v19  ;;  %v1626_v40 = vsel %vm1600_vm11, %v5675_v62, %v1464_v37 }
 0x181   : > { %4511 = vmatprep.mubr.msk.bf16.mxu0 %vm2284_vm14, %v3281_v23 }
 0x182   : > { %v1462_v46 = vpop.permute.xlu1 %1461 }
 0x183   : > { %v1593_v54 = vpop.permute.xlu0 %1592  ;;  %v1624_v31 = vsel %vm1600_vm11, %v5686_v8, %v1462_v46 }
 0x184   : > { %v1659_v43 = vsel %vm1633_vm13, %v1626_v40, %v1593_v54 }
 0x186   : > { %v1591_v41 = vpop.permute.xlu1 %1590 }
 0x187   : > { %v1657_v39 = vsel %vm1633_vm13, %v1624_v31, %v1591_v41  ;;  %v3093_v11 = vpop.permute.xlu0 %3092 }
 0x188   : > { %4478 = vmatmul.mubr.msk.bf16.gmra.mxu1 %vm2284_vm14, %v1657_v39  ;;  %v3253_v33 = vsel %vm1600_vm11, %v5718_v6, %v3093_v11 }
 0x189   : > { %4481 = vmatprep.mubr.msk.bf16.mxu1 %vm2284_vm14, %v1659_v43 }
 0x18a   : > { %v3091_v7 = vpop.permute.xlu1 %3090 }
 0x18b   : > { %v3221_v51 = vpop.permute.xlu0 %3220  ;;  %v3251_v62 = vsel %vm1600_vm11, %v5726_v53, %v3091_v7 }
 0x18c   : > { %v3285_v8 = vsel %vm1633_vm13, %v3253_v33, %v3221_v51 }
 0x18e   : > { %v3219_v29 = vpop.permute.xlu1 %3218 }
 0x18f   : > { %v3283_v18 = vsel %vm1633_vm13, %v3251_v62, %v3219_v29  ;;  %v1468_v60 = vpop.permute.xlu0 %1467 }
 0x190   : > { %4512 = vmatmul.mubr.msk.bf16.gmra.mxu0 %vm2284_vm14, %v3283_v18  ;;  %v1630_v55 = vsel %vm1600_vm11, %v5754_v63, %v1468_v60 }
 0x191   : > { %4515 = vmatprep.mubr.msk.bf16.mxu0 %vm2284_vm14, %v3285_v8 }
 0x192   : > { %v1466_v25 = vpop.permute.xlu1 %1465 }
 0x193   : > { %v1597_v21 = vpop.permute.xlu0 %1596  ;;  %v1628_v6 = vsel %vm1600_vm11, %v5765_v10, %v1466_v25 }
 0x194   : > { %v1663_v53 = vsel %vm1633_vm13, %v1630_v55, %v1597_v21 }
 0x196   : > { %v1595_v15 = vpop.permute.xlu1 %1594 }
 0x197   : > { %v1661_v12 = vsel %vm1633_vm13, %v1628_v6, %v1595_v15  ;;  %v3097_v61 = vpop.permute.xlu0 %3096 }
 0x198   : > { %4482 = vmatmul.mubr.msk.bf16.gmra.mxu1 %vm2284_vm14, %v1661_v12  ;;  %v3257_v9 = vsel %vm1600_vm11, %v5794_v26, %v3097_v61 }
 0x199   : > { %4485 = vmatprep.mubr.msk.bf16.mxu1 %vm2284_vm14, %v1663_v53 }
 0x19a   : > { %v3095_v44 = vpop.permute.xlu1 %3094 }
 0x19b   : > { %v3225_v49 = vpop.permute.xlu0 %3224  ;;  %v3255_v63 = vsel %vm1600_vm11, %v5803_v36, %v3095_v44 }
 0x19c   : > { %v3289_v10 = vsel %vm1633_vm13, %v3257_v9, %v3225_v49  ;;  %v4425_v48 = vpop.f32.mrf.mxu0 }
 0x19e   : > { %v3223_v32 = vpop.permute.xlu1 %3222  ;;  %v2355_v16 = vpop.f32.mrf.mxu0 }
 0x19f   : > { %v3287_v2 = vsel %vm1633_vm13, %v3255_v63, %v3223_v32 }
 0x1a0   : > { %4516 = vmatmul.mubr.msk.bf16.gmra.mxu0 %vm2284_vm14, %v3287_v2 }
 0x1a1   : > { %4519 = vmatprep.mubr.msk.bf16.mxu0 %vm2284_vm14, %v3289_v10 }
 0x1a2   : > { %v1470_v22 = vpop.permute.xlu1 %1469 }
 0x1a3   : > { %v1632_v50 = vsel %vm1600_vm11, %v5830_v45, %v1470_v22 }
 0x1a6   : > { %v1599_v58 = vpop.permute.xlu1 %1598 }
 0x1a7   : > { %v1665_v59 = vsel %vm1633_vm13, %v1632_v50, %v1599_v58 }
 0x1a8   : > { %4486 = vmatmul.mubr.msk.bf16.gmra.mxu1 %vm2284_vm14, %v1665_v59 }
 0x1aa   : > { %v3099_v26 = vpop.permute.xlu1 %3098 }
 0x1ab   : > { %v3259_v36 = vsel %vm1600_vm11, %v5858_v38, %v3099_v26  ;;  %v4426_v38 = vpop.f32.mrf.mxu0 }
 0x1ad   : > { %v2358_v47 = vpop.f32.mrf.mxu0 }
 0x1ae   : > { %v3227_v4 = vpop.permute.xlu1 %3226 }
 0x1af   : > { %v3291_v20 = vsel %vm1633_vm13, %v3259_v36, %v3227_v4  ;;  %v6004_v56 = vpop.f32.mrf.mxu1  ;;  %v4429_v28 = vpop.f32.mrf.mxu0 }
 0x1b0   : > { %4520 = vmatmul.mubr.msk.bf16.gmra.mxu0 %vm2284_vm14, %v3291_v20 }
 0x1b1   : > { %v6006_v5 = vpop.f32.mrf.mxu1  ;;  %v2371_v0 = vpop.f32.mrf.mxu0 }
 0x1b3   : > { %v6008_v3 = vpop.f32.mrf.mxu1  ;;  %v4430_v57 = vpop.f32.mrf.mxu0 }
 0x1b5   : > { %v6010_v45 = vpop.f32.mrf.mxu1  ;;  %v2374_v34 = vpop.f32.mrf.mxu0 }
 0x1b7   : > { %v6012_v30 = vpop.f32.mrf.mxu1 }
 0x1b9   : > { %v6014_v35 = vpop.f32.mrf.mxu1 }
 0x1bb   : > { %v6016_v27 = vpop.f32.mrf.mxu1 }
 0x1bd   : > { %v6018_v13 = vpop.f32.mrf.mxu1 }
 0x1bf   : > { %v6020_v1 = vpop.f32.mrf.mxu1 }
 0x1c1   : > { %v6022_v17 = vpop.f32.mrf.mxu1 }
 0x1c3   : > { %v6024_v14 = vpop.f32.mrf.mxu1 }
 0x1c5   : > { %v6028_v24 = vpop.f32.mrf.mxu1 }
 0x1cc   : > { %v6026_v52 = vpop.f32.mrf.mxu0 }
 0x1ce   : > { %v6030_v42 = vpop.f32.mrf.mxu0 }
 0x1d0   : > { %v6034_v19 = vpop.f32.mrf.mxu0 }
 0x1d2   : > { %v6038_v46 = vpop.f32.mrf.mxu0 }
 0x1d9   : > { %v6032_v23 = vpop.f32.mrf.mxu1 }
 0x1db   : > { %v6036_v37 = vpop.f32.mrf.mxu1 }
 0x1dd   : > { %v6042_v40 = vpop.f32.mrf.mxu1 }
 0x1df   : > { %v6046_v41 = vpop.f32.mrf.mxu1 }
 0x1f0   : > { %v6040_v54 = vpop.f32.mrf.mxu0 }
 0x1f2   : > { %v6044_v31 = vpop.f32.mrf.mxu0 }
 0x1f4   : > { %v6048_v39 = vpop.f32.mrf.mxu0 }
 0x1f6   : > { %v6050_v7 = vpop.f32.mrf.mxu0 }
 0x1f8   : > { %v4459_v43 = vpop.f32.mrf.mxu1 }
 0x1f9   : > { %v2565_v33 = vadd.f32 %v4459_v43, %v4425_v48 }
 0x1fa   : > { %v2556_v11 = vpop.f32.mrf.mxu1 }
 0x1fb   : > { %v2557_v29 = vadd.f32 %v2556_v11, %v2355_v16 }
 0x1fc   : > { %v4460_v51 = vpop.f32.mrf.mxu1 }
 0x1fd   : > { %v2568_v55 = vadd.f32 %v4460_v51, %v4426_v38 }
 0x1fe   : > { %v2559_v18 = vpop.f32.mrf.mxu1 }
 0x1ff   : > { %v2560_v15 = vadd.f32 %v2559_v18, %v2358_v47 }
 0x200   : > { %v4493_v62 = vpop.f32.mrf.mxu0 }
 0x201   : > { %v6052_v8 = vadd.f32 %v4493_v62, %v2565_v33 }
 0x202   : > { %v3369_v60 = vpop.f32.mrf.mxu0 }
 0x203   : > { %v4261_v25 = vpack.c.bf16 %v6052_v8, %v6052_v8  ;;  %v3496_v21 = vadd.f32 %v3369_v60, %v2557_v29  ;;  %v3691_v50 = vsel %vm1600_vm11, %v6052_v8, 0.0 }
 0x204   : > { %v4494_v6 = vpop.f32.mrf.mxu0 }
 0x205   : > { %3658 = vst.msk [vmem:[%s6059_s17 + $0x8] sm:$0xf] %vm237_vm5, %v4261_v25  ;;  %v4259_v53 = vpack.c.bf16 %v3496_v21, %v3496_v21  ;;  %v6065_v12 = vadd.f32 %v4494_v6, %v2568_v55  ;;  %v3688_v63 = vsel %vm1600_vm11, %v3496_v21, 0.0 }
 0x206   : > { %v3372_v61 = vpop.f32.mrf.mxu0 }
 0x207   : > { %3656 = vst.msk [vmem:[%s6059_s17] sm:$0xf] %vm237_vm5, %v4259_v53  ;;  %v3497_v44 = vadd.f32 %v3372_v61, %v2560_v15  ;;  %v4262_v49 = vpack.c.bf16 %v6065_v12, %v6065_v12  ;;  %v3693_v59 = vsel %vm1600_vm11, %v6065_v12, 0.0 }
 0x208   : > { %v4463_v9 = vpop.f32.mrf.mxu1 }
 0x209   : > { %v4260_v32 = vpack.c.bf16 %v3497_v44, %v3497_v44  ;;  %v3689_v10 = vsel %vm1600_vm11, %v3497_v44, 0.0  ;;  %3659 = vst.msk [vmem:[%s6059_s17 + $0xc] sm:$0xf] %vm237_vm5, %v4262_v49  ;;  %v2581_v4 = vadd.f32 %v4463_v9, %v4429_v28  ;;  %v3758_v53 = vmul.f32 %v3497_v44, %v3497_v44 }
 0x20a   : > { %v3690_v2 = vadd.f32 %v3689_v10, %v3688_v63  ;;  %v2572_v22 = vpop.f32.mrf.mxu1 }
 0x20b   : > { %3657 = vst.msk [vmem:[%s6059_s17 + $0x4] sm:$0xf] %vm237_vm5, %v4260_v32  ;;  %v2573_v48 = vadd.f32 %v2572_v22, %v2371_v0  ;;  %v3757_v32 = vmul.f32 %v3496_v21, %v3496_v21 }
 0x20c   : > { %v3692_v58 = vadd.f32 %v3691_v50, %v3690_v2  ;;  %v4464_v26 = vpop.f32.mrf.mxu1 }
 0x20d   : > { %v2584_v51 = vadd.f32 %v4464_v26, %v4430_v57 }
 0x20e   : > { %v6081_v36 = vadd.f32 %v3693_v59, %v3692_v58  ;;  %v2575_v38 = vpop.f32.mrf.mxu1  ;;  %v3759_v59 = vmul.f32 %v6052_v8, %v6052_v8 }
 0x20f   : > { %v2576_v62 = vadd.f32 %v2575_v38, %v2374_v34 }
 0x210   : > { %v4497_v20 = vpop.f32.mrf.mxu0 }
 0x211   : > { %v6083_v16 = vadd.f32 %v4497_v20, %v2581_v4 }
 0x212   : > { %v3385_v47 = vpop.f32.mrf.mxu0 }
 0x213   : > { %v4265_v43 = vpack.c.bf16 %v6083_v16, %v6083_v16  ;;  %v3500_v11 = vadd.f32 %v3385_v47, %v2573_v48  ;;  %v3792_v47 = vsel %vm1600_vm11, %v3759_v59, 0.0 }
 0x214   : > { %v4498_v33 = vpop.f32.mrf.mxu0 }
 0x215   : > { %3662 = vst.msk [vmem:[%s6059_s17 + $0x18] sm:$0xf] %vm237_vm5, %v4265_v43  ;;  %v4263_v29 = vpack.c.bf16 %v3500_v11, %v3500_v11  ;;  %v6089_v18 = vadd.f32 %v4498_v33, %v2584_v51  ;;  %v3760_v43 = vmul.f32 %v6065_v12, %v6065_v12  ;;  %v3761_v8 = vmul.f32 %v3500_v11, %v3500_v11 }
 0x216   : > { %v3388_v28 = vpop.f32.mrf.mxu0  ;;  %v3695_v33 = vsel %vm1600_vm11, %v3500_v11, 0.0 }
 0x217   : > { %3660 = vst.msk [vmem:[%s6059_s17 + $0x10] sm:$0xf] %vm237_vm5, %v4263_v29  ;;  %v3501_v0 = vadd.f32 %v3388_v28, %v2576_v62  ;;  %v4266_v60 = vpack.c.bf16 %v6089_v18, %v6089_v18  ;;  %v3794_v28 = vsel %vm1600_vm11, %v3760_v43, 0.0 }
 0x218   : > { %v4467_v25 = vpop.f32.mrf.mxu1 }
 0x219   : > { %v4264_v55 = vpack.c.bf16 %v3501_v0, %v3501_v0  ;;  %3663 = vst.msk [vmem:[%s6059_s17 + $0x1c] sm:$0xf] %vm237_vm5, %v4266_v60  ;;  %v2597_v34 = vadd.f32 %v4467_v25, %v6026_v52  ;;  %v3790_v52 = vsel %vm1600_vm11, %v3758_v53, 0.0  ;;  %v3762_v62 = vmul.f32 %v3501_v0, %v3501_v0 }
 0x21a   : > { %v2588_v6 = vpop.f32.mrf.mxu1  ;;  %v3796_v60 = vsel %vm1600_vm11, %v3761_v8, 0.0  ;;  %v3697_v25 = vsel %vm1600_vm11, %v3501_v0, 0.0  ;;  %v3763_v0 = vmul.f32 %v6083_v16, %v6083_v16 }
 0x21b   : > { %3661 = vst.msk [vmem:[%s6059_s17 + $0x14] sm:$0xf] %vm237_vm5, %v4264_v55  ;;  %v2589_v61 = vadd.f32 %v2588_v6, %v6030_v42  ;;  %v3696_v6 = vadd.f32 %v3695_v33, %v6081_v36 }
 0x21c   : > { %v4468_v57 = vpop.f32.mrf.mxu1  ;;  %v3800_v59 = vsel %vm1600_vm11, %v3763_v0, 0.0 }
 0x21d   : > { %v2600_v22 = vadd.f32 %v4468_v57, %v6034_v19  ;;  %v3789_v19 = vsel %vm1600_vm11, %v3757_v32, 0.0 }
 0x21e   : > { %v2591_v9 = vpop.f32.mrf.mxu1  ;;  %v3791_v4 = vadd.f32 %v3790_v52, %v3789_v19  ;;  %v3764_v19 = vmul.f32 %v6089_v18, %v6089_v18 }
 0x21f   : > { %v2592_v44 = vadd.f32 %v2591_v9, %v6038_v46 }
 0x220   : > { %v4501_v15 = vpop.f32.mrf.mxu0  ;;  %v3793_v51 = vadd.f32 %v3792_v47, %v3791_v4 }
 0x221   : > { %v6101_v49 = vadd.f32 %v4501_v15, %v2597_v34  ;;  %v3798_v34 = vsel %vm1600_vm11, %v3762_v62, 0.0 }
 0x222   : > { %v3401_v63 = vpop.f32.mrf.mxu0  ;;  %v3795_v57 = vadd.f32 %v3794_v28, %v3793_v51  ;;  %v3802_v51 = vsel %vm1600_vm11, %v3764_v19, 0.0 }
 0x223   : > { %v4269_v10 = vpack.c.bf16 %v6101_v49, %v6101_v49  ;;  %v6105_v2 = vadd.f32 %v3401_v63, %v2589_v61  ;;  %v3698_v61 = vadd.f32 %v3697_v25, %v3696_v6 }
 0x224   : > { %v4502_v50 = vpop.f32.mrf.mxu0  ;;  %v3797_v53 = vadd.f32 %v3796_v60, %v3795_v57 }
 0x225   : > { %3666 = vst.msk [vmem:[%s6059_s17 + $0x28] sm:$0xf] %vm237_vm5, %v4269_v10  ;;  %v4267_v42 = vpack.c.bf16 %v6105_v2, %v6105_v2  ;;  %v6114_v21 = vadd.f32 %v4502_v50, %v2600_v22 }
 0x226   : > { %v3404_v58 = vpop.f32.mrf.mxu0  ;;  %v3799_v32 = vadd.f32 %v3798_v34, %v3797_v53  ;;  %v3707_v34 = vsel %vm1600_vm11, %v6101_v49, 0.0 }
 0x227   : > { %3664 = vst.msk [vmem:[%s6059_s17 + $0x20] sm:$0xf] %vm237_vm5, %v4267_v42  ;;  %v3505_v26 = vadd.f32 %v3404_v58, %v2592_v44  ;;  %v4270_v46 = vpack.c.bf16 %v6114_v21, %v6114_v21  ;;  %v3768_v0 = vmul.f32 %v6114_v21, %v6114_v21 }
 0x228   : > { %v4471_v20 = vpop.f32.mrf.mxu1 }
 0x229   : > { %v4268_v48 = vpack.c.bf16 %v3505_v26, %v3505_v26  ;;  %3667 = vst.msk [vmem:[%s6059_s17 + $0x2c] sm:$0xf] %vm237_vm5, %v4270_v46  ;;  %v2613_v55 = vadd.f32 %v4471_v20, %v6040_v54  ;;  %v3701_v20 = vsel %vm1600_vm11, %v6089_v18, 0.0  ;;  %v3705_v62 = vsel %vm1600_vm11, %v3505_v26, 0.0 }
 0x22a   : > { %v2604_v38 = vpop.f32.mrf.mxu1 }
 0x22b   : > { %3665 = vst.msk [vmem:[%s6059_s17 + $0x24] sm:$0xf] %vm237_vm5, %v4268_v48  ;;  %v2605_v15 = vadd.f32 %v2604_v38, %v6044_v31  ;;  %v3699_v31 = vsel %vm1600_vm11, %v6083_v16, 0.0  ;;  %v3801_v16 = vadd.f32 %v3800_v59, %v3799_v32  ;;  %v3703_v48 = vsel %vm1600_vm11, %v6105_v2, 0.0 }
 0x22c   : > { %v4472_v29 = vpop.f32.mrf.mxu1  ;;  %v3700_v44 = vadd.f32 %v3699_v31, %v3698_v61  ;;  %v3766_v38 = vmul.f32 %v3505_v26, %v3505_v26 }
 0x22d   : > { %v2616_v10 = vadd.f32 %v4472_v29, %v6048_v39  ;;  %v3765_v39 = vmul.f32 %v6105_v2, %v6105_v2  ;;  %v3803_v28 = vadd.f32 %v3802_v51, %v3801_v16  ;;  %v3767_v2 = vmul.f32 %v6101_v49, %v6101_v49 }
 0x22e   : > { %v2607_v9 = vpop.f32.mrf.mxu1  ;;  %v3702_v43 = vadd.f32 %v3701_v20, %v3700_v44  ;;  %v3806_v18 = vsel %vm1600_vm11, %v3766_v38, 0.0 }
 0x22f   : > { %v2608_v50 = vadd.f32 %v2607_v9, %v6050_v7  ;;  %v3804_v33 = vsel %vm1600_vm11, %v3765_v39, 0.0  ;;  %v3808_v53 = vsel %vm1600_vm11, %v3767_v2, 0.0  ;;  %v3810_v39 = vsel %vm1600_vm11, %v3768_v0, 0.0 }
 0x230   : > { %v4505_v12 = vpop.f32.mrf.mxu0  ;;  %v3704_v29 = vadd.f32 %v3703_v48, %v3702_v43  ;;  %v3805_v60 = vadd.f32 %v3804_v33, %v3803_v28 }
 0x231   : > { %v6138_v11 = vadd.f32 %v4505_v12, %v2613_v55 }
 0x232   : > { %v3417_v63 = vpop.f32.mrf.mxu0  ;;  %v3706_v25 = vadd.f32 %v3705_v62, %v3704_v29  ;;  %v3807_v57 = vadd.f32 %v3806_v18, %v3805_v60 }
 0x233   : > { %v4273_v54 = vpack.c.bf16 %v6138_v11, %v6138_v11  ;;  %v3508_v36 = vadd.f32 %v3417_v63, %v2605_v15  ;;  %v3715_v51 = vsel %vm1600_vm11, %v6138_v11, 0.0 }
 0x234   : > { %v4506_v22 = vpop.f32.mrf.mxu0  ;;  %v3708_v61 = vadd.f32 %v3707_v34, %v3706_v25  ;;  %v3809_v49 = vadd.f32 %v3808_v53, %v3807_v57 }
 0x235   : > { %3670 = vst.msk [vmem:[%s6059_s17 + $0x38] sm:$0xf] %vm237_vm5, %v4273_v54  ;;  %v4271_v52 = vpack.c.bf16 %v3508_v36, %v3508_v36  ;;  %v6150_v42 = vadd.f32 %v4506_v22, %v2616_v10  ;;  %v3769_v54 = vmul.f32 %v3508_v36, %v3508_v36  ;;  %v3711_v31 = vsel %vm1600_vm11, %v3508_v36, 0.0 }
 0x236   : > { %v3420_v58 = vpop.f32.mrf.mxu0 }
 0x237   : > { %3668 = vst.msk [vmem:[%s6059_s17 + $0x30] sm:$0xf] %vm237_vm5, %v4271_v52  ;;  %v3509_v7 = vadd.f32 %v3420_v58, %v2608_v50  ;;  %v4274_v4 = vpack.c.bf16 %v6150_v42, %v6150_v42  ;;  %v3772_v33 = vmul.f32 %v6150_v42, %v6150_v42  ;;  %v3717_v60 = vsel %vm1600_vm11, %v6150_v42, 0.0 }
 0x238   : > { %v4475_v46 = vpop.f32.mrf.mxu1 }
 0x239   : > { %v4272_v47 = vpack.c.bf16 %v3509_v7, %v3509_v7  ;;  %3671 = vst.msk [vmem:[%s6059_s17 + $0x3c] sm:$0xf] %vm237_vm5, %v4274_v4  ;;  %v2629_v6 = vadd.f32 %v4475_v46, %v6004_v56  ;;  %v3770_v50 = vmul.f32 %v3509_v7, %v3509_v7  ;;  %v3818_v34 = vsel %vm1600_vm11, %v3772_v33, 0.0 }
 0x23a   : > { %v2620_v8 = vpop.f32.mrf.mxu1 }
 0x23b   : > { %3669 = vst.msk [vmem:[%s6059_s17 + $0x34] sm:$0xf] %vm237_vm5, %v4272_v47  ;;  %v2621_v26 = vadd.f32 %v2620_v8, %v6006_v5  ;;  %v3709_v5 = vsel %vm1600_vm11, %v6114_v21, 0.0  ;;  %v3812_v21 = vsel %vm1600_vm11, %v3769_v54, 0.0  ;;  %v3814_v20 = vsel %vm1600_vm11, %v3770_v50, 0.0 }
 0x23c   : > { %v4476_v55 = vpop.f32.mrf.mxu1  ;;  %v3710_v58 = vadd.f32 %v3709_v5, %v3708_v61 }
 0x23d   : > { %v2632_v10 = vadd.f32 %v4476_v55, %v6008_v3  ;;  %v3713_v3 = vsel %vm1600_vm11, %v3509_v7, 0.0  ;;  %v3771_v7 = vmul.f32 %v6138_v11, %v6138_v11 }
 0x23e   : > { %v2623_v9 = vpop.f32.mrf.mxu1  ;;  %v3712_v16 = vadd.f32 %v3711_v31, %v3710_v58 }
 0x23f   : > { %v2624_v52 = vadd.f32 %v2623_v9, %v6010_v45  ;;  %v3811_v45 = vadd.f32 %v3810_v39, %v3809_v49  ;;  %v3816_v28 = vsel %vm1600_vm11, %v3771_v7, 0.0 }
 0x240   : > { %v4509_v12 = vpop.f32.mrf.mxu0  ;;  %v3714_v47 = vadd.f32 %v3713_v3, %v3712_v16 }
 0x241   : > { %v6179_v15 = vadd.f32 %v4509_v12, %v2629_v6  ;;  %v3813_v38 = vadd.f32 %v3812_v21, %v3811_v45 }
 0x242   : > { %v3433_v63 = vpop.f32.mrf.mxu0  ;;  %v3716_v62 = vadd.f32 %v3715_v51, %v3714_v47 }
 0x243   : > { %v4277_v56 = vpack.c.bf16 %v6179_v15, %v6179_v15  ;;  %v3512_v32 = vadd.f32 %v3433_v63, %v2621_v26  ;;  %v3815_v8 = vadd.f32 %v3814_v20, %v3813_v38 }
 0x244   : > { %v4510_v22 = vpop.f32.mrf.mxu0  ;;  %v3718_v26 = vadd.f32 %v3717_v60, %v3716_v62 }
 0x245   : > { %3674 = vst.msk [vmem:[%s6059_s17 + $0x48] sm:$0xf] %vm237_vm5, %v4277_v56  ;;  %v4275_v44 = vpack.c.bf16 %v3512_v32, %v3512_v32  ;;  %v6193_v59 = vadd.f32 %v4510_v22, %v2632_v10  ;;  %v3773_v18 = vmul.f32 %v3512_v32, %v3512_v32  ;;  %v3817_v25 = vadd.f32 %v3816_v28, %v3815_v8 }
 0x246   : > { %v3436_v19 = vpop.f32.mrf.mxu0  ;;  %v3719_v6 = vsel %vm1600_vm11, %v3512_v32, 0.0 }
 0x247   : > { %3672 = vst.msk [vmem:[%s6059_s17 + $0x40] sm:$0xf] %vm237_vm5, %v4275_v44  ;;  %v3513_v36 = vadd.f32 %v3436_v19, %v2624_v52  ;;  %v4278_v4 = vpack.c.bf16 %v6193_v59, %v6193_v59  ;;  %v3820_v9 = vsel %vm1600_vm11, %v3773_v18, 0.0  ;;  %v3720_v0 = vadd.f32 %v3719_v6, %v3718_v26 }
 0x248   : > { %v4479_v46 = vpop.f32.mrf.mxu1  ;;  %v3819_v54 = vadd.f32 %v3818_v34, %v3817_v25  ;;  %v3775_v52 = vmul.f32 %v6179_v15, %v6179_v15  ;;  %v3776_v16 = vmul.f32 %v6193_v59, %v6193_v59 }
 0x249   : > { %v4276_v48 = vpack.c.bf16 %v3513_v36, %v3513_v36  ;;  %3675 = vst.msk [vmem:[%s6059_s17 + $0x4c] sm:$0xf] %vm237_vm5, %v4278_v4  ;;  %v2645_v2 = vadd.f32 %v4479_v46, %v6012_v30  ;;  %v3774_v57 = vmul.f32 %v3513_v36, %v3513_v36  ;;  %v3721_v30 = vsel %vm1600_vm11, %v3513_v36, 0.0 }
 0x24a   : > { %v2636_v43 = vpop.f32.mrf.mxu1  ;;  %v3821_v10 = vadd.f32 %v3820_v9, %v3819_v54  ;;  %v3722_v22 = vadd.f32 %v3721_v30, %v3720_v0  ;;  %v3824_v36 = vsel %vm1600_vm11, %v3775_v52, 0.0  ;;  %v3725_v46 = vsel %vm1600_vm11, %v6193_v59, 0.0 }
 0x24b   : > { %3673 = vst.msk [vmem:[%s6059_s17 + $0x44] sm:$0xf] %vm237_vm5, %v4276_v48  ;;  %v2637_v11 = vadd.f32 %v2636_v43, %v6014_v35  ;;  %v3822_v35 = vsel %vm1600_vm11, %v3774_v57, 0.0  ;;  %v3826_v47 = vsel %vm1600_vm11, %v3776_v16, 0.0 }
 0x24c   : > { %v4480_v29 = vpop.f32.mrf.mxu1  ;;  %v3823_v44 = vadd.f32 %v3822_v35, %v3821_v10 }
 0x24d   : > { %v2648_v56 = vadd.f32 %v4480_v29, %v6016_v27 }
 0x24e   : > { %v2639_v53 = vpop.f32.mrf.mxu1  ;;  %v3825_v4 = vadd.f32 %v3824_v36, %v3823_v44 }
 0x24f   : > { %v2640_v5 = vadd.f32 %v2639_v53, %v6018_v13  ;;  %v3723_v13 = vsel %vm1600_vm11, %v6179_v15, 0.0 }
 0x250   : > { %v4513_v55 = vpop.f32.mrf.mxu0  ;;  %v3724_v21 = vadd.f32 %v3723_v13, %v3722_v22  ;;  %v3827_v33 = vadd.f32 %v3826_v47, %v3825_v4 }
 0x251   : > { %v3518_v12 = vadd.f32 %v4513_v55, %v2645_v2 }
 0x252   : > { %v3449_v61 = vpop.f32.mrf.mxu0  ;;  %v3726_v48 = vadd.f32 %v3725_v46, %v3724_v21 }
 0x253   : > { %v4281_v42 = vpack.c.bf16 %v3518_v12, %v3518_v12  ;;  %v3516_v63 = vadd.f32 %v3449_v61, %v2637_v11  ;;  %v3779_v55 = vmul.f32 %v3518_v12, %v3518_v12  ;;  %v3731_v26 = vsel %vm1600_vm11, %v3518_v12, 0.0 }
 0x254   : > { %v4514_v32 = vpop.f32.mrf.mxu0 }
 0x255   : > { %3678 = vst.msk [vmem:[%s6059_s17 + $0x58] sm:$0xf] %vm237_vm5, %v4281_v42  ;;  %v4279_v49 = vpack.c.bf16 %v3516_v63, %v3516_v63  ;;  %v3519_v31 = vadd.f32 %v4514_v32, %v2648_v56  ;;  %v3777_v45 = vmul.f32 %v3516_v63, %v3516_v63  ;;  %v3727_v20 = vsel %vm1600_vm11, %v3516_v63, 0.0 }
 0x256   : > { %v3452_v50 = vpop.f32.mrf.mxu0  ;;  %v3728_v51 = vadd.f32 %v3727_v20, %v3726_v48  ;;  %v3832_v42 = vsel %vm1600_vm11, %v3779_v55, 0.0 }
 0x257   : > { %3676 = vst.msk [vmem:[%s6059_s17 + $0x50] sm:$0xf] %vm237_vm5, %v4279_v49  ;;  %v3517_v27 = vadd.f32 %v3452_v50, %v2640_v5  ;;  %v4282_v58 = vpack.c.bf16 %v3519_v31, %v3519_v31  ;;  %v3828_v43 = vsel %vm1600_vm11, %v3777_v45, 0.0  ;;  %v3780_v63 = vmul.f32 %v3519_v31, %v3519_v31 }
 0x258   : > { %v4483_v19 = vpop.f32.mrf.mxu1  ;;  %v3829_v18 = vadd.f32 %v3828_v43, %v3827_v33 }
 0x259   : > { %v4280_v39 = vpack.c.bf16 %v3517_v27, %v3517_v27  ;;  %3679 = vst.msk [vmem:[%s6059_s17 + $0x5c] sm:$0xf] %vm237_vm5, %v4282_v58  ;;  %v3778_v15 = vmul.f32 %v3517_v27, %v3517_v27  ;;  %v3729_v7 = vsel %vm1600_vm11, %v3517_v27, 0.0  ;;  %v2661_v8 = vadd.f32 %v4483_v19, %v6020_v1 }
 0x25a   : > { %v2652_v3 = vpop.f32.mrf.mxu1  ;;  %v3730_v2 = vadd.f32 %v3729_v7, %v3728_v51  ;;  %v3834_v22 = vsel %vm1600_vm11, %v3780_v63, 0.0 }
 0x25b   : > { %3677 = vst.msk [vmem:[%s6059_s17 + $0x54] sm:$0xf] %vm237_vm5, %v4280_v39  ;;  %v3830_v29 = vsel %vm1600_vm11, %v3778_v15, 0.0  ;;  %v2653_v59 = vadd.f32 %v2652_v3, %v6022_v17 }
 0x25c   : > { %v4484_v38 = vpop.f32.mrf.mxu1  ;;  %v3831_v11 = vadd.f32 %v3830_v29, %v3829_v18  ;;  %v3732_v61 = vadd.f32 %v3731_v26, %v3730_v2 }
 0x25d   : > { %v2664_v1 = vadd.f32 %v4484_v38, %v6024_v14 }
 0x25e   : > { %v2655_v60 = vpop.f32.mrf.mxu1  ;;  %v3833_v54 = vadd.f32 %v3832_v42, %v3831_v11 }
 0x25f   : > { %v2656_v53 = vadd.f32 %v2655_v60, %v6028_v24  ;;  %v3733_v24 = vsel %vm1600_vm11, %v3519_v31, 0.0 }
 0x260   : > { %v4517_v62 = vpop.f32.mrf.mxu0  ;;  %v3734_v49 = vadd.f32 %v3733_v24, %v3732_v61  ;;  %v3835_v44 = vadd.f32 %v3834_v22, %v3833_v54 }
 0x261   : > { %v3522_v28 = vadd.f32 %v4517_v62, %v2661_v8 }
 0x262   : > { %v3465_v25 = vpop.f32.mrf.mxu0 }
 0x263   : > { %v4285_v6 = vpack.c.bf16 %v3522_v28, %v3522_v28  ;;  %v3520_v57 = vadd.f32 %v3465_v25, %v2653_v59  ;;  %v3783_v39 = vmul.f32 %v3522_v28, %v3522_v28  ;;  %v3739_v16 = vsel %vm1600_vm11, %v3522_v28, 0.0 }
 0x264   : > { %v4518_v34 = vpop.f32.mrf.mxu0 }
 0x265   : > { %3682 = vst.msk [vmem:[%s6059_s17 + $0x68] sm:$0xf] %vm237_vm5, %v4285_v6  ;;  %v4283_v17 = vpack.c.bf16 %v3520_v57, %v3520_v57  ;;  %v3523_v9 = vadd.f32 %v4518_v34, %v2664_v1  ;;  %v3781_v0 = vmul.f32 %v3520_v57, %v3520_v57  ;;  %v3735_v32 = vsel %vm1600_vm11, %v3520_v57, 0.0 }
 0x266   : > { %v3468_v30 = vpop.f32.mrf.mxu0  ;;  %v3736_v27 = vadd.f32 %v3735_v32, %v3734_v49  ;;  %v3840_v48 = vsel %vm1600_vm11, %v3783_v39, 0.0 }
 0x267   : > { %3680 = vst.msk [vmem:[%s6059_s17 + $0x60] sm:$0xf] %vm237_vm5, %v4283_v17  ;;  %v3521_v14 = vadd.f32 %v3468_v30, %v2656_v53  ;;  %v4286_v56 = vpack.c.bf16 %v3523_v9, %v3523_v9  ;;  %v3836_v50 = vsel %vm1600_vm11, %v3781_v0, 0.0  ;;  %v3784_v38 = vmul.f32 %v3523_v9, %v3523_v9 }
 0x268   : > { %v4487_v12 = vpop.f32.mrf.mxu1  ;;  %v3837_v58 = vadd.f32 %v3836_v50, %v3835_v44  ;;  %v3741_v7 = vsel %vm1600_vm11, %v3523_v9, 0.0 }
 0x269   : > { %v4284_v35 = vpack.c.bf16 %v3521_v14, %v3521_v14  ;;  %v3782_v5 = vmul.f32 %v3521_v14, %v3521_v14  ;;  %3683 = vst.msk [vmem:[%s6059_s17 + $0x6c] sm:$0xf] %vm237_vm5, %v4286_v56  ;;  %v3737_v52 = vsel %vm1600_vm11, %v3521_v14, 0.0  ;;  %v2677_v21 = vadd.f32 %v4487_v12, %v6032_v23 }
 0x26a   : > { %v2668_v10 = vpop.f32.mrf.mxu1  ;;  %v3738_v19 = vadd.f32 %v3737_v52, %v3736_v27  ;;  %v3842_v2 = vsel %vm1600_vm11, %v3784_v38, 0.0 }
 0x26b   : > { %3681 = vst.msk [vmem:[%s6059_s17 + $0x64] sm:$0xf] %vm237_vm5, %v4284_v35  ;;  %v3838_v31 = vsel %vm1600_vm11, %v3782_v5, 0.0  ;;  %v2669_v45 = vadd.f32 %v2668_v10, %v6036_v37 }
 0x26c   : > { %v4488_v13 = vpop.f32.mrf.mxu1  ;;  %v3839_v3 = vadd.f32 %v3838_v31, %v3837_v58  ;;  %v3740_v46 = vadd.f32 %v3739_v16, %v3738_v19 }
 0x26d   : > { %v2680_v8 = vadd.f32 %v4488_v13, %v6042_v40 }
 0x26e   : > { %v2671_v20 = vpop.f32.mrf.mxu1  ;;  %v3841_v23 = vadd.f32 %v3840_v48, %v3839_v3  ;;  %v3742_v59 = vadd.f32 %v3741_v7, %v3740_v46 }
 0x26f   : > { %v2672_v33 = vadd.f32 %v2671_v20, %v6046_v41 }
 0x270   : > { %v4521_v36 = vpop.f32.mrf.mxu0  ;;  %v3843_v41 = vadd.f32 %v3842_v2, %v3841_v23 }
 0x271   : > { %v3526_v4 = vadd.f32 %v4521_v36, %v2677_v21 }
 0x272   : > { %v3481_v15 = vpop.f32.mrf.mxu0 }
 0x273   : > { %v4289_v47 = vpack.c.bf16 %v3526_v4, %v3526_v4  ;;  %v3524_v43 = vadd.f32 %v3481_v15, %v2669_v45  ;;  %v3787_v6 = vmul.f32 %v3526_v4, %v3526_v4  ;;  %v3747_v53 = vsel %vm1600_vm11, %v3526_v4, 0.0 }
 0x274   : > { %v4522_v51 = vpop.f32.mrf.mxu0 }
 0x275   : > { %3686 = vst.msk [vmem:[%s6059_s17 + $0x78] sm:$0xf] %vm237_vm5, %v4289_v47  ;;  %v4287_v37 = vpack.c.bf16 %v3524_v43, %v3524_v43  ;;  %v3743_v62 = vsel %vm1600_vm11, %v3524_v43, 0.0  ;;  %v3785_v29 = vmul.f32 %v3524_v43, %v3524_v43  ;;  %v3527_v28 = vadd.f32 %v4522_v51, %v2680_v8 }
 0x276   : > { %v3484_v18 = vpop.f32.mrf.mxu0  ;;  %v3744_v25 = vadd.f32 %v3743_v62, %v3742_v59  ;;  %v3848_v42 = vsel %vm1600_vm11, %v3787_v6, 0.0 }
 0x277   : > { %3684 = vst.msk [vmem:[%s6059_s17 + $0x70] sm:$0xf] %vm237_vm5, %v4287_v37  ;;  %v3844_v40 = vsel %vm1600_vm11, %v3785_v29, 0.0  ;;  %v3525_v60 = vadd.f32 %v3484_v18, %v2672_v33  ;;  %v4290_v55 = vpack.c.bf16 %v3527_v28, %v3527_v28  ;;  %v3788_v17 = vmul.f32 %v3527_v28, %v3527_v28 }
 0x278   : > { %v3845_v34 = vadd.f32 %v3844_v40, %v3843_v41  ;;  %v3749_v63 = vsel %vm1600_vm11, %v3527_v28, 0.0 }
 0x279   : > { %v4288_v57 = vpack.c.bf16 %v3525_v60, %v3525_v60  ;;  %v3745_v11 = vsel %vm1600_vm11, %v3525_v60, 0.0  ;;  %v3786_v1 = vmul.f32 %v3525_v60, %v3525_v60  ;;  %3687 = vst.msk [vmem:[%s6059_s17 + $0x7c] sm:$0xf] %vm237_vm5, %v4290_v55  ;;  %v3850_v54 = vsel %vm1600_vm11, %v3788_v17, 0.0 }
 0x27a   : > { %v3746_v26 = vadd.f32 %v3745_v11, %v3744_v25 }
 0x27b   : > { %3685 = vst.msk [vmem:[%s6059_s17 + $0x74] sm:$0xf] %vm237_vm5, %v4288_v57  ;;  %v3846_v61 = vsel %vm1600_vm11, %v3786_v1, 0.0 }
 0x27c   : > { %v3748_v9 = vadd.f32 %v3747_v53, %v3746_v26  ;;  %v3847_v30 = vadd.f32 %v3846_v61, %v3845_v34 }
 0x27e   : > { %v3750_v0 = vadd.f32 %v3749_v63, %v3748_v9  ;;  %v3849_v14 = vadd.f32 %v3848_v42, %v3847_v30 }
 0x280   : > { %v3751_v56 = vrot.slane %v3750_v0, 4  ;;  %v3851_v12 = vadd.f32 %v3850_v54, %v3849_v14 }
 0x282   : > { %v3752_v24 = vadd.f32 %v3751_v56, %v3750_v0  ;;  %v3852_v32 = vrot.slane %v3851_v12, 4 }
 0x284   : > { %v3753_v35 = vrot.slane %v3752_v24, 2  ;;  %v3853_v5 = vadd.f32 %v3852_v32, %v3851_v12 }
 0x286   : > { %v3754_v49 = vadd.f32 %v3753_v35, %v3752_v24  ;;  %v3854_v10 = vrot.slane %v3853_v5, 2 }
 0x288   : > { %v3755_v22 = vrot.slane %v3754_v49, 1  ;;  %v3855_v50 = vadd.f32 %v3854_v10, %v3853_v5 }
 0x28a   : > { %v3856_v52 = vrot.slane %v3855_v50, 1  ;;  %v3756_v27 = vadd.f32 %v3755_v22, %v3754_v49 }
 0x28c   : > { %v3857_v44 = vadd.f32 %v3856_v52, %v3855_v50 }
 0x28e   : > { %v3859_v31 = vsel %vm3858_vm15, %v3756_v27, %v3857_v44 }
 0x28f   : > { %3861 = vst.msk [vmem:[%s235_s23] sm:$0x3] %vm3860_vm0, %v3859_v31 }
 0x290 PF: > { %s16_s18 = sadd.s32 1, %s4690_s18  }
 0x291   : > { %p13_p4 = scmp.ge.s32.totalorder %s16_s18, 4  }
 0x293   :  { %15 = sbr.rel (!%p13_p4) target bundleno = 1 (0x1), region = 83 }

</bundles_post_ra>
